<compile_context>
chip_gen: v5e
topology: v5e:2x2
jax: 0.10.0
libtpu: 0.0.40
codegen_flags: <defaults>
</compile_context>

<pallas_src>
import functools

import jax
import jax.numpy as jnp
import numpy as np
from jax.experimental import pallas as pl
from jax.experimental.pallas import tpu as pltpu

EPS = 1e-5
LANES = 128


def _conv_layer_kernel(scale_ref, shift_ref, a_ref, prev_ref, next_ref, w_ref,
                       y_ref, s_ref, xt_ref,
                       *, th, wd, cp_in, cp_out, nj, pre_relu):
    """One zero-padded 3x3 conv over a (th x wd) row tile of one image.

    scale_ref/shift_ref : (1, cp_in) f32   per-channel affine applied to the
                                           input before the conv (folded BN of
                                           the previous layer; identity+no-relu
                                           for the very first conv).
    a_ref    : (1, th, wd, cp_in) f32      the row tile of the input activation
    prev_ref : (1, 8,  wd, cp_in) f32      8-row block holding the row above
    next_ref : (1, 8,  wd, cp_in) f32      8-row block holding the row below
    w_ref    : (3, 3, cp_in, cp_out) bf16  HWIO conv weights (resident)
    y_ref    : (1, th, wd, cp_out) f32     conv output tile
    s_ref    : (1, 1, 2, cp_out) f32       per-tile [sum, sum(x^2)] for BN
    xt_ref   : (th+2, wd+2, cp_in) bf16    scratch: pre-activated, zero-padded
                                           input window
    """
    j = pl.program_id(1)

    scale = scale_ref[...].reshape(1, 1, cp_in)
    shift = shift_ref[...].reshape(1, 1, cp_in)

    def preact(v):                                   # v: (rows, wd, cp_in) f32
        u = v * scale + shift
        if pre_relu:
            u = jnp.maximum(u, 0.0)
        return u.astype(jnp.bfloat16)                # bf16 only at MXU boundary

    # Zero the scratch: the untouched border ring is exactly the conv's zero
    # padding (applied *after* BN/ReLU, as in the PyTorch module).
    xt_ref[...] = jnp.zeros((th + 2, wd + 2, cp_in), jnp.bfloat16)

    # Interior rows of the tile.
    xt_ref[1:th + 1, 1:wd + 1, :] = preact(a_ref[0])

    # Halo row above the tile (last row of the previous 8-row block).
    @pl.when(j > 0)
    def _():
        xt_ref[0:1, 1:wd + 1, :] = preact(prev_ref[0][7:8])

    # Halo row below the tile (first row of the next 8-row block).
    @pl.when(j < nj - 1)
    def _():
        xt_ref[th + 1:th + 2, 1:wd + 1, :] = preact(next_ref[0][0:1])

    # 3x3 conv = 9 shifted (th*wd, cp_in) x (cp_in, cp_out) MXU matmuls,
    # bf16 operands, f32 accumulation.
    acc = jnp.zeros((th * wd, cp_out), jnp.float32)
    for kh in range(3):
        for kw in range(3):
            patch = xt_ref[kh:kh + th, kw:kw + wd, :].reshape(th * wd, cp_in)
            acc += jnp.dot(patch, w_ref[kh, kw],
                           preferred_element_type=jnp.float32)

    y_ref[...] = acc.reshape(1, th, wd, cp_out)

    # Fused partial sums for the training-mode BatchNorm batch statistics.
    stats = jnp.concatenate(
        [jnp.sum(acc, axis=0, keepdims=True),
         jnp.sum(acc * acc, axis=0, keepdims=True)], axis=0)      # (2, cp_out)
    s_ref[...] = stats.reshape(1, 1, 2, cp_out)


def _conv3x3(a, w_bf16, scale, shift, *, pre_relu, row_tile):
    """One conv layer: y = conv3x3(preact(a)), plus per-tile BN stat sums."""
    n, h, wd, cp_in = a.shape
    cp_out = w_bf16.shape[-1]
    assert h % 8 == 0 and row_tile % 8 == 0 and h % row_tile == 0
    nj = h // row_tile
    tpb = row_tile // 8          # 8-row halo blocks per row tile
    hb = h // 8                  # number of 8-row halo blocks

    kern = functools.partial(
        _conv_layer_kernel, th=row_tile, wd=wd, cp_in=cp_in, cp_out=cp_out,
        nj=nj, pre_relu=pre_relu)

    y, stats = pl.pallas_call(
        kern,
        grid=(n, nj),
        in_specs=[
            pl.BlockSpec((1, cp_in), lambda i, j: (0, 0)),            # scale
            pl.BlockSpec((1, cp_in), lambda i, j: (0, 0)),            # shift
            pl.BlockSpec((1, row_tile, wd, cp_in),
                         lambda i, j: (i, j, 0, 0)),                  # tile
            pl.BlockSpec((1, 8, wd, cp_in),                           # halo up
                         lambda i, j: (i, jnp.maximum(j * tpb - 1, 0), 0, 0)),
            pl.BlockSpec((1, 8, wd, cp_in),                           # halo dn
                         lambda i, j: (i, jnp.minimum((j + 1) * tpb, hb - 1),
                                       0, 0)),
            pl.BlockSpec((3, 3, cp_in, cp_out),
                         lambda i, j: (0, 0, 0, 0)),                  # weights
        ],
        out_specs=[
            pl.BlockSpec((1, row_tile, wd, cp_out), lambda i, j: (i, j, 0, 0)),
            pl.BlockSpec((1, 1, 2, cp_out), lambda i, j: (i, j, 0, 0)),
        ],
        out_shape=[
            jax.ShapeDtypeStruct((n, h, wd, cp_out), jnp.float32),
            jax.ShapeDtypeStruct((n, nj, 2, cp_out), jnp.float32),
        ],
        scratch_shapes=[
            pltpu.VMEM((row_tile + 2, wd + 2, cp_in), jnp.bfloat16)],
        compiler_params=pltpu.CompilerParams(
            dimension_semantics=("parallel", "parallel")),
    )(scale, shift, a, a, a, w_bf16)
    return y, stats


def _pad_channels(x, cp):
    pad = cp - x.shape[-1]
    if pad:
        x = jnp.pad(x, [(0, 0)] * (x.ndim - 1) + [(0, pad)])
    return x


def _prep_weight(w_oihw, cp):
    # OIHW -> HWIO, zero-pad both channel dims to cp, cast to bf16 for the MXU.
    w = jnp.transpose(w_oihw, (2, 3, 1, 0)).astype(jnp.float32)
    kh, kw, ci, co = w.shape
    wp = jnp.zeros((kh, kw, cp, cp), jnp.float32)
    wp = wp.at[:, :, :ci, :co].set(w)
    return wp.astype(jnp.bfloat16)


def _bn_affine(stats, gamma_p, beta_p, count):
    """Finalize per-tile [sum, sumsq] into the BN scale/shift affine."""
    s = jnp.sum(stats, axis=(0, 1))                          # (2, cp)
    mean = s[0] / count
    var = jnp.maximum(s[1] / count - mean * mean, 0.0)       # biased, train mode
    scale = gamma_p * jax.lax.rsqrt(var + EPS)
    shift = beta_p - mean * scale
    return scale.reshape(1, -1), shift.reshape(1, -1)


def dncnn_forward(x_nchw, params, *, row_tile=8):
    """Pallas DNCNN.forward.  x_nchw: (N, Cin, H, W) -> (N, Cout, H, W)."""
    n, cin, h, w = x_nchw.shape
    feats = params["conv1_w"].shape[0]
    cout = params["conv_final_w"].shape[0]
    cp = LANES * max(1, -(-max(cin, feats, cout) // LANES))  # lane-dense pad

    x = jnp.transpose(x_nchw, (0, 2, 3, 1)).astype(jnp.float32)   # NHWC
    x = _pad_channels(x, cp)

    ones = jnp.ones((1, cp), jnp.float32)
    zeros = jnp.zeros((1, cp), jnp.float32)
    count = float(n * h * w)

    # conv1 (no pre-activation; the ReLU after conv1 is folded into the next
    # conv's pre-activation).
    a, _ = _conv3x3(x, _prep_weight(params["conv1_w"], cp), ones, zeros,
                    pre_relu=False, row_tile=row_tile)

    # Mid Conv-BN-ReLU blocks: each conv consumes relu(affine(prev)) applied on
    # the fly; its own BN statistics come out of the same kernel call.
    scale, shift = ones, zeros
    for blk in params["mid"]:
        a, stats = _conv3x3(a, _prep_weight(blk["conv_w"], cp), scale, shift,
                            pre_relu=True, row_tile=row_tile)
        gamma_p = _pad_channels(blk["gamma"].astype(jnp.float32), cp)
        beta_p = _pad_channels(blk["beta"].astype(jnp.float32), cp)
        scale, shift = _bn_affine(stats, gamma_p, beta_p, count)

    # conv_final consumes relu(bn(last mid block)) (or relu(conv1) if L == 2).
    out, _ = _conv3x3(a, _prep_weight(params["conv_final_w"], cp), scale, shift,
                      pre_relu=True, row_tile=row_tile)

    out = out[..., :cout]
    return jnp.transpose(out, (0, 3, 1, 2))


def dncnn_reference(x_nchw, params):
    """Pure-JAX reference of DNCNN.forward (train-mode BN; bf16 conv inputs to
    mirror the kernel's MXU precision)."""
    x = jnp.transpose(x_nchw, (0, 2, 3, 1)).astype(jnp.float32)

    def conv(h_, w_oihw):
        w_hwio = jnp.transpose(w_oihw, (2, 3, 1, 0))
        return jax.lax.conv_general_dilated(
            h_.astype(jnp.bfloat16), w_hwio.astype(jnp.bfloat16),
            window_strides=(1, 1), padding=((1, 1), (1, 1)),
            dimension_numbers=("NHWC", "HWIO", "NHWC"),
            preferred_element_type=jnp.float32)

    def bn(y, g, b):
        mean = jnp.mean(y, axis=(0, 1, 2), keepdims=True)
        var = jnp.mean((y - mean) ** 2, axis=(0, 1, 2), keepdims=True)
        return ((y - mean) * jax.lax.rsqrt(var + EPS)
                * g.reshape(1, 1, 1, -1) + b.reshape(1, 1, 1, -1))

    h_ = jax.nn.relu(conv(x, params["conv1_w"]))
    for blk in params["mid"]:
        h_ = jax.nn.relu(bn(conv(h_, blk["conv_w"]), blk["gamma"], blk["beta"]))
    out = conv(h_, params["conv_final_w"])
    return jnp.transpose(out, (0, 3, 1, 2))


def make_params(key, num_features, num_layers, in_channels=3, out_channels=3):
    """Deterministic synthetic parameters in PyTorch (OIHW, gamma/beta) form."""
    n_mid = num_layers - 2
    keys = jax.random.split(key, 2 + 3 * max(n_mid, 1))
    params = {
        "conv1_w": 0.05 * jax.random.normal(
            keys[0], (num_features, in_channels, 3, 3), jnp.float32),
        "conv_final_w": 0.05 * jax.random.normal(
            keys[1], (out_channels, num_features, 3, 3), jnp.float32),
        "mid": [],
    }
    for i in range(n_mid):
        k = keys[2 + 3 * i: 5 + 3 * i]
        params["mid"].append({
            "conv_w": 0.05 * jax.random.normal(
                k[0], (num_features, num_features, 3, 3), jnp.float32),
            "gamma": 1.0 + 0.1 * jax.random.normal(
                k[1], (num_features,), jnp.float32),
            "beta": 0.1 * jax.random.normal(k[2], (num_features,), jnp.float32),
        })
    return params


if __name__ == "__main__":
    key = jax.random.PRNGKey(0)
    k_x, k_p = jax.random.split(key)

    N, IN_C, OUT_C, H, W = 2, 3, 3, 16, 16
    NUM_FEATURES, NUM_LAYERS = 64, 4          # -> 2 mid Conv-BN-ReLU blocks

    x = jax.random.normal(k_x, (N, IN_C, H, W), jnp.float32)
    params = make_params(k_p, NUM_FEATURES, NUM_LAYERS, IN_C, OUT_C)

    fwd = jax.jit(functools.partial(dncnn_forward, row_tile=8))
    out = jax.block_until_ready(fwd(x, params))

    ref = jax.block_until_ready(dncnn_reference(x, params))
    np.testing.assert_allclose(np.asarray(out), np.asarray(ref),
                               atol=2e-2, rtol=2e-2)
    assert out.shape == (N, OUT_C, H, W)
    print("KERNEL_OK")
</pallas_src>

<mosaic_0001>
module attributes {stable_mosaic.version = 11 : i64} {
  func.func @_conv_layer_kernel(%arg0: i32, %arg1: i32, %arg2: memref<1x128xf32, #tpu.memory_space<vmem>>, %arg3: memref<1x128xf32, #tpu.memory_space<vmem>>, %arg4: memref<1x8x16x128xf32, #tpu.memory_space<vmem>>, %arg5: memref<1x8x16x128xf32, #tpu.memory_space<vmem>>, %arg6: memref<1x8x16x128xf32, #tpu.memory_space<vmem>>, %arg7: memref<3x3x128x128xbf16, #tpu.memory_space<vmem>>, %arg8: memref<1x8x16x128xf32, #tpu.memory_space<vmem>>, %arg9: memref<1x1x2x128xf32, #tpu.memory_space<vmem>>, %arg10: memref<10x18x128xbf16, #tpu.memory_space<vmem>>) attributes {dimension_semantics = [#tpu.dimension_semantics<parallel>, #tpu.dimension_semantics<parallel>], iteration_bounds = array<i64: 2, 2>, scalar_prefetch = 0 : i64, scratch_operands = 1 : i64, tpu.core_type = #tpu.core_type<tc>, window_params = [{pipeline_mode = #tpu.pipeline_mode<synchronous>, transform_indices = @transform_0, window_bounds = array<i64: 1, 128>}, {pipeline_mode = #tpu.pipeline_mode<synchronous>, transform_indices = @transform_1, window_bounds = array<i64: 1, 128>}, {transform_indices = @transform_2, window_bounds = array<i64: 1, 8, 16, 128>}, {transform_indices = @transform_3, window_bounds = array<i64: 1, 8, 16, 128>}, {transform_indices = @transform_4, window_bounds = array<i64: 1, 8, 16, 128>}, {pipeline_mode = #tpu.pipeline_mode<synchronous>, transform_indices = @transform_5, window_bounds = array<i64: 3, 3, 128, 128>}, {transform_indices = @transform_6, window_bounds = array<i64: 1, 8, 16, 128>}, {transform_indices = @transform_7, window_bounds = array<i64: 1, 1, 2, 128>}]} {
    %c0 = arith.constant 0 : index
    %c0_0 = arith.constant 0 : index
    %0 = vector.load %arg2[%c0, %c0_0] : memref<1x128xf32, #tpu.memory_space<vmem>>, vector<1x128xf32>
    %1 = vector.shape_cast %0 : vector<1x128xf32> to vector<1x1x128xf32>
    %c0_1 = arith.constant 0 : index
    %c0_2 = arith.constant 0 : index
    %2 = vector.load %arg3[%c0_1, %c0_2] : memref<1x128xf32, #tpu.memory_space<vmem>>, vector<1x128xf32>
    %3 = vector.shape_cast %2 : vector<1x128xf32> to vector<1x1x128xf32>
    %cst = arith.constant 0.000000e+00 : bf16
    %4 = vector.broadcast %cst : bf16 to vector<10x18x128xbf16>
    %c0_3 = arith.constant 0 : index
    %c0_4 = arith.constant 0 : index
    %c0_5 = arith.constant 0 : index
    %5 = vector.load %arg10[%c0_3, %c0_4, %c0_5] : memref<10x18x128xbf16, #tpu.memory_space<vmem>>, vector<10x18x128xbf16>
    tpu.vector_store %arg10[%c0_3, %c0_4, %c0_5], %4 {strides = array<i32>} : memref<10x18x128xbf16, #tpu.memory_space<vmem>>, vector<10x18x128xbf16>,
    %c0_6 = arith.constant 0 : index
    %c0_7 = arith.constant 0 : index
    %c0_8 = arith.constant 0 : index
    %c0_9 = arith.constant 0 : index
    %6 = vector.load %arg4[%c0_6, %c0_7, %c0_8, %c0_9] : memref<1x8x16x128xf32, #tpu.memory_space<vmem>>, vector<1x8x16x128xf32>
    %7 = vector.shape_cast %6 : vector<1x8x16x128xf32> to vector<8x16x128xf32>
    %8 = vector.broadcast %1 : vector<1x1x128xf32> to vector<8x16x128xf32>
    %9 = arith.mulf %7, %8 : vector<8x16x128xf32>
    %10 = vector.broadcast %3 : vector<1x1x128xf32> to vector<8x16x128xf32>
    %11 = arith.addf %9, %10 : vector<8x16x128xf32>
    %12 = arith.truncf %11 : vector<8x16x128xf32> to vector<8x16x128xbf16>
    %c1 = arith.constant 1 : index
    %c1_10 = arith.constant 1 : index
    %c0_11 = arith.constant 0 : index
    %13 = vector.load %arg10[%c1, %c1_10, %c0_11] : memref<10x18x128xbf16, #tpu.memory_space<vmem>>, vector<8x16x128xbf16>
    tpu.vector_store %arg10[%c1, %c1_10, %c0_11], %12 {strides = array<i32>} : memref<10x18x128xbf16, #tpu.memory_space<vmem>>, vector<8x16x128xbf16>,
    %c0_i32 = arith.constant 0 : i32
    %14 = arith.cmpi sgt, %arg1, %c0_i32 : i32
    %15 = arith.extui %14 : i1 to i32
    %c0_i32_12 = arith.constant 0 : i32
    %16 = arith.cmpi ne, %15, %c0_i32_12 : i32
    scf.if %16 {
      %c0_96 = arith.constant 0 : index
      %c0_97 = arith.constant 0 : index
      %c0_98 = arith.constant 0 : index
      %c0_99 = arith.constant 0 : index
      %85 = vector.load %arg5[%c0_96, %c0_97, %c0_98, %c0_99] : memref<1x8x16x128xf32, #tpu.memory_space<vmem>>, vector<1x8x16x128xf32>
      %86 = vector.shape_cast %85 : vector<1x8x16x128xf32> to vector<8x16x128xf32>
      %87 = vector.extract_strided_slice %86 {offsets = [7, 0, 0], sizes = [1, 16, 128], strides = [1, 1, 1]} : vector<8x16x128xf32> to vector<1x16x128xf32>
      %88 = vector.broadcast %1 : vector<1x1x128xf32> to vector<1x16x128xf32>
      %89 = arith.mulf %87, %88 : vector<1x16x128xf32>
      %90 = vector.broadcast %3 : vector<1x1x128xf32> to vector<1x16x128xf32>
      %91 = arith.addf %89, %90 : vector<1x16x128xf32>
      %92 = arith.truncf %91 : vector<1x16x128xf32> to vector<1x16x128xbf16>
      %c0_100 = arith.constant 0 : index
      %c1_101 = arith.constant 1 : index
      %c0_102 = arith.constant 0 : index
      %93 = vector.load %arg10[%c0_100, %c1_101, %c0_102] : memref<10x18x128xbf16, #tpu.memory_space<vmem>>, vector<1x16x128xbf16>
      tpu.vector_store %arg10[%c0_100, %c1_101, %c0_102], %92 {strides = array<i32>} : memref<10x18x128xbf16, #tpu.memory_space<vmem>>, vector<1x16x128xbf16>,
    } else {
    }
    %c1_i32 = arith.constant 1 : i32
    %17 = arith.cmpi slt, %arg1, %c1_i32 : i32
    %18 = arith.extui %17 : i1 to i32
    %c0_i32_13 = arith.constant 0 : i32
    %19 = arith.cmpi ne, %18, %c0_i32_13 : i32
    scf.if %19 {
      %c0_96 = arith.constant 0 : index
      %c0_97 = arith.constant 0 : index
      %c0_98 = arith.constant 0 : index
      %c0_99 = arith.constant 0 : index
      %85 = vector.load %arg6[%c0_96, %c0_97, %c0_98, %c0_99] : memref<1x8x16x128xf32, #tpu.memory_space<vmem>>, vector<1x8x16x128xf32>
      %86 = vector.shape_cast %85 : vector<1x8x16x128xf32> to vector<8x16x128xf32>
      %87 = vector.extract_strided_slice %86 {offsets = [0, 0, 0], sizes = [1, 16, 128], strides = [1, 1, 1]} : vector<8x16x128xf32> to vector<1x16x128xf32>
      %88 = vector.broadcast %1 : vector<1x1x128xf32> to vector<1x16x128xf32>
      %89 = arith.mulf %87, %88 : vector<1x16x128xf32>
      %90 = vector.broadcast %3 : vector<1x1x128xf32> to vector<1x16x128xf32>
      %91 = arith.addf %89, %90 : vector<1x16x128xf32>
      %92 = arith.truncf %91 : vector<1x16x128xf32> to vector<1x16x128xbf16>
      %c9 = arith.constant 9 : index
      %c1_100 = arith.constant 1 : index
      %c0_101 = arith.constant 0 : index
      %93 = vector.load %arg10[%c9, %c1_100, %c0_101] : memref<10x18x128xbf16, #tpu.memory_space<vmem>>, vector<1x16x128xbf16>
      tpu.vector_store %arg10[%c9, %c1_100, %c0_101], %92 {strides = array<i32>} : memref<10x18x128xbf16, #tpu.memory_space<vmem>>, vector<1x16x128xbf16>,
    } else {
    }
    %cst_14 = arith.constant 0.000000e+00 : f32
    %20 = vector.broadcast %cst_14 : f32 to vector<128x128xf32>
    %c0_15 = arith.constant 0 : index
    %c0_16 = arith.constant 0 : index
    %c0_17 = arith.constant 0 : index
    %21 = vector.load %arg10[%c0_15, %c0_16, %c0_17] : memref<10x18x128xbf16, #tpu.memory_space<vmem>>, vector<8x16x128xbf16>
    %22 = vector.shape_cast %21 : vector<8x16x128xbf16> to vector<128x128xbf16>
    %c0_18 = arith.constant 0 : index
    %c0_19 = arith.constant 0 : index
    %c0_20 = arith.constant 0 : index
    %c0_21 = arith.constant 0 : index
    %23 = vector.load %arg7[%c0_18, %c0_19, %c0_20, %c0_21] : memref<3x3x128x128xbf16, #tpu.memory_space<vmem>>, vector<1x1x128x128xbf16>
    %24 = vector.shape_cast %23 : vector<1x1x128x128xbf16> to vector<128x128xbf16>
    %cst_22 = arith.constant dense<0.000000e+00> : vector<128x128xf32>
    %25 = tpu.matmul %22, %24, %cst_22 {dimension_numbers = #tpu.dot_dimension_numbers<[1], [0], [0], [1], [0, 0, 1, 1], [], []>} : vector<128x128xbf16>, vector<128x128xbf16>, vector<128x128xf32> -> vector<128x128xf32>
    %26 = arith.addf %20, %25 : vector<128x128xf32>
    %c0_23 = arith.constant 0 : index
    %c1_24 = arith.constant 1 : index
    %c0_25 = arith.constant 0 : index
    %27 = vector.load %arg10[%c0_23, %c1_24, %c0_25] : memref<10x18x128xbf16, #tpu.memory_space<vmem>>, vector<8x16x128xbf16>
    %28 = vector.shape_cast %27 : vector<8x16x128xbf16> to vector<128x128xbf16>
    %c0_26 = arith.constant 0 : index
    %c1_27 = arith.constant 1 : index
    %c0_28 = arith.constant 0 : index
    %c0_29 = arith.constant 0 : index
    %29 = vector.load %arg7[%c0_26, %c1_27, %c0_28, %c0_29] : memref<3x3x128x128xbf16, #tpu.memory_space<vmem>>, vector<1x1x128x128xbf16>
    %30 = vector.shape_cast %29 : vector<1x1x128x128xbf16> to vector<128x128xbf16>
    %cst_30 = arith.constant dense<0.000000e+00> : vector<128x128xf32>
    %31 = tpu.matmul %28, %30, %cst_30 {dimension_numbers = #tpu.dot_dimension_numbers<[1], [0], [0], [1], [0, 0, 1, 1], [], []>} : vector<128x128xbf16>, vector<128x128xbf16>, vector<128x128xf32> -> vector<128x128xf32>
    %32 = arith.addf %26, %31 : vector<128x128xf32>
    %c0_31 = arith.constant 0 : index
    %c2 = arith.constant 2 : index
    %c0_32 = arith.constant 0 : index
    %33 = vector.load %arg10[%c0_31, %c2, %c0_32] : memref<10x18x128xbf16, #tpu.memory_space<vmem>>, vector<8x16x128xbf16>
    %34 = vector.shape_cast %33 : vector<8x16x128xbf16> to vector<128x128xbf16>
    %c0_33 = arith.constant 0 : index
    %c2_34 = arith.constant 2 : index
    %c0_35 = arith.constant 0 : index
    %c0_36 = arith.constant 0 : index
    %35 = vector.load %arg7[%c0_33, %c2_34, %c0_35, %c0_36] : memref<3x3x128x128xbf16, #tpu.memory_space<vmem>>, vector<1x1x128x128xbf16>
    %36 = vector.shape_cast %35 : vector<1x1x128x128xbf16> to vector<128x128xbf16>
    %cst_37 = arith.constant dense<0.000000e+00> : vector<128x128xf32>
    %37 = tpu.matmul %34, %36, %cst_37 {dimension_numbers = #tpu.dot_dimension_numbers<[1], [0], [0], [1], [0, 0, 1, 1], [], []>} : vector<128x128xbf16>, vector<128x128xbf16>, vector<128x128xf32> -> vector<128x128xf32>
    %38 = arith.addf %32, %37 : vector<128x128xf32>
    %c1_38 = arith.constant 1 : index
    %c0_39 = arith.constant 0 : index
    %c0_40 = arith.constant 0 : index
    %39 = vector.load %arg10[%c1_38, %c0_39, %c0_40] : memref<10x18x128xbf16, #tpu.memory_space<vmem>>, vector<8x16x128xbf16>
    %40 = vector.shape_cast %39 : vector<8x16x128xbf16> to vector<128x128xbf16>
    %c1_41 = arith.constant 1 : index
    %c0_42 = arith.constant 0 : index
    %c0_43 = arith.constant 0 : index
    %c0_44 = arith.constant 0 : index
    %41 = vector.load %arg7[%c1_41, %c0_42, %c0_43, %c0_44] : memref<3x3x128x128xbf16, #tpu.memory_space<vmem>>, vector<1x1x128x128xbf16>
    %42 = vector.shape_cast %41 : vector<1x1x128x128xbf16> to vector<128x128xbf16>
    %cst_45 = arith.constant dense<0.000000e+00> : vector<128x128xf32>
    %43 = tpu.matmul %40, %42, %cst_45 {dimension_numbers = #tpu.dot_dimension_numbers<[1], [0], [0], [1], [0, 0, 1, 1], [], []>} : vector<128x128xbf16>, vector<128x128xbf16>, vector<128x128xf32> -> vector<128x128xf32>
    %44 = arith.addf %38, %43 : vector<128x128xf32>
    %c1_46 = arith.constant 1 : index
    %c1_47 = arith.constant 1 : index
    %c0_48 = arith.constant 0 : index
    %45 = vector.load %arg10[%c1_46, %c1_47, %c0_48] : memref<10x18x128xbf16, #tpu.memory_space<vmem>>, vector<8x16x128xbf16>
    %46 = vector.shape_cast %45 : vector<8x16x128xbf16> to vector<128x128xbf16>
    %c1_49 = arith.constant 1 : index
    %c1_50 = arith.constant 1 : index
    %c0_51 = arith.constant 0 : index
    %c0_52 = arith.constant 0 : index
    %47 = vector.load %arg7[%c1_49, %c1_50, %c0_51, %c0_52] : memref<3x3x128x128xbf16, #tpu.memory_space<vmem>>, vector<1x1x128x128xbf16>
    %48 = vector.shape_cast %47 : vector<1x1x128x128xbf16> to vector<128x128xbf16>
    %cst_53 = arith.constant dense<0.000000e+00> : vector<128x128xf32>
    %49 = tpu.matmul %46, %48, %cst_53 {dimension_numbers = #tpu.dot_dimension_numbers<[1], [0], [0], [1], [0, 0, 1, 1], [], []>} : vector<128x128xbf16>, vector<128x128xbf16>, vector<128x128xf32> -> vector<128x128xf32>
    %50 = arith.addf %44, %49 : vector<128x128xf32>
    %c1_54 = arith.constant 1 : index
    %c2_55 = arith.constant 2 : index
    %c0_56 = arith.constant 0 : index
    %51 = vector.load %arg10[%c1_54, %c2_55, %c0_56] : memref<10x18x128xbf16, #tpu.memory_space<vmem>>, vector<8x16x128xbf16>
    %52 = vector.shape_cast %51 : vector<8x16x128xbf16> to vector<128x128xbf16>
    %c1_57 = arith.constant 1 : index
    %c2_58 = arith.constant 2 : index
    %c0_59 = arith.constant 0 : index
    %c0_60 = arith.constant 0 : index
    %53 = vector.load %arg7[%c1_57, %c2_58, %c0_59, %c0_60] : memref<3x3x128x128xbf16, #tpu.memory_space<vmem>>, vector<1x1x128x128xbf16>
    %54 = vector.shape_cast %53 : vector<1x1x128x128xbf16> to vector<128x128xbf16>
    %cst_61 = arith.constant dense<0.000000e+00> : vector<128x128xf32>
    %55 = tpu.matmul %52, %54, %cst_61 {dimension_numbers = #tpu.dot_dimension_numbers<[1], [0], [0], [1], [0, 0, 1, 1], [], []>} : vector<128x128xbf16>, vector<128x128xbf16>, vector<128x128xf32> -> vector<128x128xf32>
    %56 = arith.addf %50, %55 : vector<128x128xf32>
    %c2_62 = arith.constant 2 : index
    %c0_63 = arith.constant 0 : index
    %c0_64 = arith.constant 0 : index
    %57 = vector.load %arg10[%c2_62, %c0_63, %c0_64] : memref<10x18x128xbf16, #tpu.memory_space<vmem>>, vector<8x16x128xbf16>
    %58 = vector.shape_cast %57 : vector<8x16x128xbf16> to vector<128x128xbf16>
    %c2_65 = arith.constant 2 : index
    %c0_66 = arith.constant 0 : index
    %c0_67 = arith.constant 0 : index
    %c0_68 = arith.constant 0 : index
    %59 = vector.load %arg7[%c2_65, %c0_66, %c0_67, %c0_68] : memref<3x3x128x128xbf16, #tpu.memory_space<vmem>>, vector<1x1x128x128xbf16>
    %60 = vector.shape_cast %59 : vector<1x1x128x128xbf16> to vector<128x128xbf16>
    %cst_69 = arith.constant dense<0.000000e+00> : vector<128x128xf32>
    %61 = tpu.matmul %58, %60, %cst_69 {dimension_numbers = #tpu.dot_dimension_numbers<[1], [0], [0], [1], [0, 0, 1, 1], [], []>} : vector<128x128xbf16>, vector<128x128xbf16>, vector<128x128xf32> -> vector<128x128xf32>
    %62 = arith.addf %56, %61 : vector<128x128xf32>
    %c2_70 = arith.constant 2 : index
    %c1_71 = arith.constant 1 : index
    %c0_72 = arith.constant 0 : index
    %63 = vector.load %arg10[%c2_70, %c1_71, %c0_72] : memref<10x18x128xbf16, #tpu.memory_space<vmem>>, vector<8x16x128xbf16>
    %64 = vector.shape_cast %63 : vector<8x16x128xbf16> to vector<128x128xbf16>
    %c2_73 = arith.constant 2 : index
    %c1_74 = arith.constant 1 : index
    %c0_75 = arith.constant 0 : index
    %c0_76 = arith.constant 0 : index
    %65 = vector.load %arg7[%c2_73, %c1_74, %c0_75, %c0_76] : memref<3x3x128x128xbf16, #tpu.memory_space<vmem>>, vector<1x1x128x128xbf16>
    %66 = vector.shape_cast %65 : vector<1x1x128x128xbf16> to vector<128x128xbf16>
    %cst_77 = arith.constant dense<0.000000e+00> : vector<128x128xf32>
    %67 = tpu.matmul %64, %66, %cst_77 {dimension_numbers = #tpu.dot_dimension_numbers<[1], [0], [0], [1], [0, 0, 1, 1], [], []>} : vector<128x128xbf16>, vector<128x128xbf16>, vector<128x128xf32> -> vector<128x128xf32>
    %68 = arith.addf %62, %67 : vector<128x128xf32>
    %c2_78 = arith.constant 2 : index
    %c2_79 = arith.constant 2 : index
    %c0_80 = arith.constant 0 : index
    %69 = vector.load %arg10[%c2_78, %c2_79, %c0_80] : memref<10x18x128xbf16, #tpu.memory_space<vmem>>, vector<8x16x128xbf16>
    %70 = vector.shape_cast %69 : vector<8x16x128xbf16> to vector<128x128xbf16>
    %c2_81 = arith.constant 2 : index
    %c2_82 = arith.constant 2 : index
    %c0_83 = arith.constant 0 : index
    %c0_84 = arith.constant 0 : index
    %71 = vector.load %arg7[%c2_81, %c2_82, %c0_83, %c0_84] : memref<3x3x128x128xbf16, #tpu.memory_space<vmem>>, vector<1x1x128x128xbf16>
    %72 = vector.shape_cast %71 : vector<1x1x128x128xbf16> to vector<128x128xbf16>
    %cst_85 = arith.constant dense<0.000000e+00> : vector<128x128xf32>
    %73 = tpu.matmul %70, %72, %cst_85 {dimension_numbers = #tpu.dot_dimension_numbers<[1], [0], [0], [1], [0, 0, 1, 1], [], []>} : vector<128x128xbf16>, vector<128x128xbf16>, vector<128x128xf32> -> vector<128x128xf32>
    %74 = arith.addf %68, %73 : vector<128x128xf32>
    %75 = vector.shape_cast %74 : vector<128x128xf32> to vector<1x8x16x128xf32>
    %c0_86 = arith.constant 0 : index
    %c0_87 = arith.constant 0 : index
    %c0_88 = arith.constant 0 : index
    %c0_89 = arith.constant 0 : index
    %76 = vector.load %arg8[%c0_86, %c0_87, %c0_88, %c0_89] : memref<1x8x16x128xf32, #tpu.memory_space<vmem>>, vector<1x8x16x128xf32>
    tpu.vector_store %arg8[%c0_86, %c0_87, %c0_88, %c0_89], %75 {strides = array<i32>} : memref<1x8x16x128xf32, #tpu.memory_space<vmem>>, vector<1x8x16x128xf32>,
    %cst_90 = arith.constant dense<0.000000e+00> : vector<128xf32>
    %77 = vector.multi_reduction <add>, %74, %cst_90 [0] : vector<128x128xf32> to vector<128xf32>
    %78 = vector.shape_cast %77 : vector<128xf32> to vector<1x128xf32>
    %79 = arith.mulf %74, %74 : vector<128x128xf32>
    %cst_91 = arith.constant dense<0.000000e+00> : vector<128xf32>
    %80 = vector.multi_reduction <add>, %79, %cst_91 [0] : vector<128x128xf32> to vector<128xf32>
    %81 = vector.shape_cast %80 : vector<128xf32> to vector<1x128xf32>
    %82 = tpu.concatenate %78, %81 in 0 : vector<1x128xf32>, vector<1x128xf32> -> vector<2x128xf32>
    %83 = vector.shape_cast %82 : vector<2x128xf32> to vector<1x1x2x128xf32>
    %c0_92 = arith.constant 0 : index
    %c0_93 = arith.constant 0 : index
    %c0_94 = arith.constant 0 : index
    %c0_95 = arith.constant 0 : index
    %84 = vector.load %arg9[%c0_92, %c0_93, %c0_94, %c0_95] : memref<1x1x2x128xf32, #tpu.memory_space<vmem>>, vector<1x1x2x128xf32>
    tpu.vector_store %arg9[%c0_92, %c0_93, %c0_94, %c0_95], %83 {strides = array<i32>} : memref<1x1x2x128xf32, #tpu.memory_space<vmem>>, vector<1x1x2x128xf32>,
    return
  }
  func.func @transform_0(%arg0: i32, %arg1: i32) -> (i32, i32) {
    %c0_i32 = arith.constant 0 : i32
    %c0_i32_0 = arith.constant 0 : i32
    %c0_i32_1 = arith.constant 0 : i32
    return %c0_i32, %c0_i32_0 : i32, i32
  }
  func.func @transform_1(%arg0: i32, %arg1: i32) -> (i32, i32) {
    %c0_i32 = arith.constant 0 : i32
    %c0_i32_0 = arith.constant 0 : i32
    %c0_i32_1 = arith.constant 0 : i32
    return %c0_i32, %c0_i32_0 : i32, i32
  }
  func.func @transform_2(%arg0: i32, %arg1: i32) -> (i32, i32, i32, i32) {
    %c0_i32 = arith.constant 0 : i32
    %c0_i32_0 = arith.constant 0 : i32
    %c0_i32_1 = arith.constant 0 : i32
    return %arg0, %arg1, %c0_i32, %c0_i32_0 : i32, i32, i32, i32
  }
  func.func @transform_3(%arg0: i32, %arg1: i32) -> (i32, i32, i32, i32) {
    %c1_i32 = arith.constant 1 : i32
    %0 = arith.muli %arg1, %c1_i32 : i32
    %c1_i32_0 = arith.constant 1 : i32
    %1 = arith.subi %0, %c1_i32_0 : i32
    %c0_i32 = arith.constant 0 : i32
    %2 = arith.maxsi %1, %c0_i32 : i32
    %c0_i32_1 = arith.constant 0 : i32
    %c0_i32_2 = arith.constant 0 : i32
    %c0_i32_3 = arith.constant 0 : i32
    return %arg0, %2, %c0_i32_1, %c0_i32_2 : i32, i32, i32, i32
  }
  func.func @transform_4(%arg0: i32, %arg1: i32) -> (i32, i32, i32, i32) {
    %c1_i32 = arith.constant 1 : i32
    %0 = arith.addi %arg1, %c1_i32 : i32
    %c1_i32_0 = arith.constant 1 : i32
    %1 = arith.muli %0, %c1_i32_0 : i32
    %c1_i32_1 = arith.constant 1 : i32
    %2 = arith.minsi %1, %c1_i32_1 : i32
    %c0_i32 = arith.constant 0 : i32
    %c0_i32_2 = arith.constant 0 : i32
    %c0_i32_3 = arith.constant 0 : i32
    return %arg0, %2, %c0_i32, %c0_i32_2 : i32, i32, i32, i32
  }
  func.func @transform_5(%arg0: i32, %arg1: i32) -> (i32, i32, i32, i32) {
    %c0_i32 = arith.constant 0 : i32
    %c0_i32_0 = arith.constant 0 : i32
    %c0_i32_1 = arith.constant 0 : i32
    %c0_i32_2 = arith.constant 0 : i32
    %c0_i32_3 = arith.constant 0 : i32
    return %c0_i32, %c0_i32_0, %c0_i32_1, %c0_i32_2 : i32, i32, i32, i32
  }
  func.func @transform_6(%arg0: i32, %arg1: i32) -> (i32, i32, i32, i32) {
    %c0_i32 = arith.constant 0 : i32
    %c0_i32_0 = arith.constant 0 : i32
    %c0_i32_1 = arith.constant 0 : i32
    return %arg0, %arg1, %c0_i32, %c0_i32_0 : i32, i32, i32, i32
  }
  func.func @transform_7(%arg0: i32, %arg1: i32) -> (i32, i32, i32, i32) {
    %c0_i32 = arith.constant 0 : i32
    %c0_i32_0 = arith.constant 0 : i32
    %c0_i32_1 = arith.constant 0 : i32
    return %arg0, %arg1, %c0_i32, %c0_i32_0 : i32, i32, i32, i32
  }
}

module attributes {stable_mosaic.version = 11 : i64} {
  func.func @_conv_layer_kernel(%arg0: i32, %arg1: i32, %arg2: memref<1x128xf32, #tpu.memory_space<vmem>>, %arg3: memref<1x128xf32, #tpu.memory_space<vmem>>, %arg4: memref<1x8x16x128xf32, #tpu.memory_space<vmem>>, %arg5: memref<1x8x16x128xf32, #tpu.memory_space<vmem>>, %arg6: memref<1x8x16x128xf32, #tpu.memory_space<vmem>>, %arg7: memref<3x3x128x128xbf16, #tpu.memory_space<vmem>>, %arg8: memref<1x8x16x128xf32, #tpu.memory_space<vmem>>, %arg9: memref<1x1x2x128xf32, #tpu.memory_space<vmem>>, %arg10: memref<10x18x128xbf16, #tpu.memory_space<vmem>>) attributes {dimension_semantics = [#tpu.dimension_semantics<parallel>, #tpu.dimension_semantics<parallel>], iteration_bounds = array<i64: 2, 2>, scalar_prefetch = 0 : i64, scratch_operands = 1 : i64, tpu.core_type = #tpu.core_type<tc>, window_params = [{pipeline_mode = #tpu.pipeline_mode<synchronous>, transform_indices = @transform_0, window_bounds = array<i64: 1, 128>}, {pipeline_mode = #tpu.pipeline_mode<synchronous>, transform_indices = @transform_1, window_bounds = array<i64: 1, 128>}, {transform_indices = @transform_2, window_bounds = array<i64: 1, 8, 16, 128>}, {transform_indices = @transform_3, window_bounds = array<i64: 1, 8, 16, 128>}, {transform_indices = @transform_4, window_bounds = array<i64: 1, 8, 16, 128>}, {pipeline_mode = #tpu.pipeline_mode<synchronous>, transform_indices = @transform_5, window_bounds = array<i64: 3, 3, 128, 128>}, {transform_indices = @transform_6, window_bounds = array<i64: 1, 8, 16, 128>}, {transform_indices = @transform_7, window_bounds = array<i64: 1, 1, 2, 128>}]} {
    %c0 = arith.constant 0 : index
    %c0_0 = arith.constant 0 : index
    %0 = vector.load %arg2[%c0, %c0_0] : memref<1x128xf32, #tpu.memory_space<vmem>>, vector<1x128xf32>
    %1 = vector.shape_cast %0 : vector<1x128xf32> to vector<1x1x128xf32>
    %c0_1 = arith.constant 0 : index
    %c0_2 = arith.constant 0 : index
    %2 = vector.load %arg3[%c0_1, %c0_2] : memref<1x128xf32, #tpu.memory_space<vmem>>, vector<1x128xf32>
    %3 = vector.shape_cast %2 : vector<1x128xf32> to vector<1x1x128xf32>
    %cst = arith.constant 0.000000e+00 : bf16
    %4 = vector.broadcast %cst : bf16 to vector<10x18x128xbf16>
    %c0_3 = arith.constant 0 : index
    %c0_4 = arith.constant 0 : index
    %c0_5 = arith.constant 0 : index
    %5 = vector.load %arg10[%c0_3, %c0_4, %c0_5] : memref<10x18x128xbf16, #tpu.memory_space<vmem>>, vector<10x18x128xbf16>
    tpu.vector_store %arg10[%c0_3, %c0_4, %c0_5], %4 {strides = array<i32>} : memref<10x18x128xbf16, #tpu.memory_space<vmem>>, vector<10x18x128xbf16>,
    %c0_6 = arith.constant 0 : index
    %c0_7 = arith.constant 0 : index
    %c0_8 = arith.constant 0 : index
    %c0_9 = arith.constant 0 : index
    %6 = vector.load %arg4[%c0_6, %c0_7, %c0_8, %c0_9] : memref<1x8x16x128xf32, #tpu.memory_space<vmem>>, vector<1x8x16x128xf32>
    %7 = vector.shape_cast %6 : vector<1x8x16x128xf32> to vector<8x16x128xf32>
    %8 = vector.broadcast %1 : vector<1x1x128xf32> to vector<8x16x128xf32>
    %9 = arith.mulf %7, %8 : vector<8x16x128xf32>
    %10 = vector.broadcast %3 : vector<1x1x128xf32> to vector<8x16x128xf32>
    %11 = arith.addf %9, %10 : vector<8x16x128xf32>
    %cst_10 = arith.constant 0.000000e+00 : f32
    %12 = vector.broadcast %cst_10 : f32 to vector<8x16x128xf32>
    %13 = arith.maximumf %11, %12 : vector<8x16x128xf32>
    %14 = arith.truncf %13 : vector<8x16x128xf32> to vector<8x16x128xbf16>
    %c1 = arith.constant 1 : index
    %c1_11 = arith.constant 1 : index
    %c0_12 = arith.constant 0 : index
    %15 = vector.load %arg10[%c1, %c1_11, %c0_12] : memref<10x18x128xbf16, #tpu.memory_space<vmem>>, vector<8x16x128xbf16>
    tpu.vector_store %arg10[%c1, %c1_11, %c0_12], %14 {strides = array<i32>} : memref<10x18x128xbf16, #tpu.memory_space<vmem>>, vector<8x16x128xbf16>,
    %c0_i32 = arith.constant 0 : i32
    %16 = arith.cmpi sgt, %arg1, %c0_i32 : i32
    %17 = arith.extui %16 : i1 to i32
    %c0_i32_13 = arith.constant 0 : i32
    %18 = arith.cmpi ne, %17, %c0_i32_13 : i32
    scf.if %18 {
      %c0_97 = arith.constant 0 : index
      %c0_98 = arith.constant 0 : index
      %c0_99 = arith.constant 0 : index
      %c0_100 = arith.constant 0 : index
      %87 = vector.load %arg5[%c0_97, %c0_98, %c0_99, %c0_100] : memref<1x8x16x128xf32, #tpu.memory_space<vmem>>, vector<1x8x16x128xf32>
      %88 = vector.shape_cast %87 : vector<1x8x16x128xf32> to vector<8x16x128xf32>
      %89 = vector.extract_strided_slice %88 {offsets = [7, 0, 0], sizes = [1, 16, 128], strides = [1, 1, 1]} : vector<8x16x128xf32> to vector<1x16x128xf32>
      %90 = vector.broadcast %1 : vector<1x1x128xf32> to vector<1x16x128xf32>
      %91 = arith.mulf %89, %90 : vector<1x16x128xf32>
      %92 = vector.broadcast %3 : vector<1x1x128xf32> to vector<1x16x128xf32>
      %93 = arith.addf %91, %92 : vector<1x16x128xf32>
      %cst_101 = arith.constant 0.000000e+00 : f32
      %94 = vector.broadcast %cst_101 : f32 to vector<1x16x128xf32>
      %95 = arith.maximumf %93, %94 : vector<1x16x128xf32>
      %96 = arith.truncf %95 : vector<1x16x128xf32> to vector<1x16x128xbf16>
      %c0_102 = arith.constant 0 : index
      %c1_103 = arith.constant 1 : index
      %c0_104 = arith.constant 0 : index
      %97 = vector.load %arg10[%c0_102, %c1_103, %c0_104] : memref<10x18x128xbf16, #tpu.memory_space<vmem>>, vector<1x16x128xbf16>
      tpu.vector_store %arg10[%c0_102, %c1_103, %c0_104], %96 {strides = array<i32>} : memref<10x18x128xbf16, #tpu.memory_space<vmem>>, vector<1x16x128xbf16>,
    } else {
    }
    %c1_i32 = arith.constant 1 : i32
    %19 = arith.cmpi slt, %arg1, %c1_i32 : i32
    %20 = arith.extui %19 : i1 to i32
    %c0_i32_14 = arith.constant 0 : i32
    %21 = arith.cmpi ne, %20, %c0_i32_14 : i32
    scf.if %21 {
      %c0_97 = arith.constant 0 : index
      %c0_98 = arith.constant 0 : index
      %c0_99 = arith.constant 0 : index
      %c0_100 = arith.constant 0 : index
      %87 = vector.load %arg6[%c0_97, %c0_98, %c0_99, %c0_100] : memref<1x8x16x128xf32, #tpu.memory_space<vmem>>, vector<1x8x16x128xf32>
      %88 = vector.shape_cast %87 : vector<1x8x16x128xf32> to vector<8x16x128xf32>
      %89 = vector.extract_strided_slice %88 {offsets = [0, 0, 0], sizes = [1, 16, 128], strides = [1, 1, 1]} : vector<8x16x128xf32> to vector<1x16x128xf32>
      %90 = vector.broadcast %1 : vector<1x1x128xf32> to vector<1x16x128xf32>
      %91 = arith.mulf %89, %90 : vector<1x16x128xf32>
      %92 = vector.broadcast %3 : vector<1x1x128xf32> to vector<1x16x128xf32>
      %93 = arith.addf %91, %92 : vector<1x16x128xf32>
      %cst_101 = arith.constant 0.000000e+00 : f32
      %94 = vector.broadcast %cst_101 : f32 to vector<1x16x128xf32>
      %95 = arith.maximumf %93, %94 : vector<1x16x128xf32>
      %96 = arith.truncf %95 : vector<1x16x128xf32> to vector<1x16x128xbf16>
      %c9 = arith.constant 9 : index
      %c1_102 = arith.constant 1 : index
      %c0_103 = arith.constant 0 : index
      %97 = vector.load %arg10[%c9, %c1_102, %c0_103] : memref<10x18x128xbf16, #tpu.memory_space<vmem>>, vector<1x16x128xbf16>
      tpu.vector_store %arg10[%c9, %c1_102, %c0_103], %96 {strides = array<i32>} : memref<10x18x128xbf16, #tpu.memory_space<vmem>>, vector<1x16x128xbf16>,
    } else {
    }
    %cst_15 = arith.constant 0.000000e+00 : f32
    %22 = vector.broadcast %cst_15 : f32 to vector<128x128xf32>
    %c0_16 = arith.constant 0 : index
    %c0_17 = arith.constant 0 : index
    %c0_18 = arith.constant 0 : index
    %23 = vector.load %arg10[%c0_16, %c0_17, %c0_18] : memref<10x18x128xbf16, #tpu.memory_space<vmem>>, vector<8x16x128xbf16>
    %24 = vector.shape_cast %23 : vector<8x16x128xbf16> to vector<128x128xbf16>
    %c0_19 = arith.constant 0 : index
    %c0_20 = arith.constant 0 : index
    %c0_21 = arith.constant 0 : index
    %c0_22 = arith.constant 0 : index
    %25 = vector.load %arg7[%c0_19, %c0_20, %c0_21, %c0_22] : memref<3x3x128x128xbf16, #tpu.memory_space<vmem>>, vector<1x1x128x128xbf16>
    %26 = vector.shape_cast %25 : vector<1x1x128x128xbf16> to vector<128x128xbf16>
    %cst_23 = arith.constant dense<0.000000e+00> : vector<128x128xf32>
    %27 = tpu.matmul %24, %26, %cst_23 {dimension_numbers = #tpu.dot_dimension_numbers<[1], [0], [0], [1], [0, 0, 1, 1], [], []>} : vector<128x128xbf16>, vector<128x128xbf16>, vector<128x128xf32> -> vector<128x128xf32>
    %28 = arith.addf %22, %27 : vector<128x128xf32>
    %c0_24 = arith.constant 0 : index
    %c1_25 = arith.constant 1 : index
    %c0_26 = arith.constant 0 : index
    %29 = vector.load %arg10[%c0_24, %c1_25, %c0_26] : memref<10x18x128xbf16, #tpu.memory_space<vmem>>, vector<8x16x128xbf16>
    %30 = vector.shape_cast %29 : vector<8x16x128xbf16> to vector<128x128xbf16>
    %c0_27 = arith.constant 0 : index
    %c1_28 = arith.constant 1 : index
    %c0_29 = arith.constant 0 : index
    %c0_30 = arith.constant 0 : index
    %31 = vector.load %arg7[%c0_27, %c1_28, %c0_29, %c0_30] : memref<3x3x128x128xbf16, #tpu.memory_space<vmem>>, vector<1x1x128x128xbf16>
    %32 = vector.shape_cast %31 : vector<1x1x128x128xbf16> to vector<128x128xbf16>
    %cst_31 = arith.constant dense<0.000000e+00> : vector<128x128xf32>
    %33 = tpu.matmul %30, %32, %cst_31 {dimension_numbers = #tpu.dot_dimension_numbers<[1], [0], [0], [1], [0, 0, 1, 1], [], []>} : vector<128x128xbf16>, vector<128x128xbf16>, vector<128x128xf32> -> vector<128x128xf32>
    %34 = arith.addf %28, %33 : vector<128x128xf32>
    %c0_32 = arith.constant 0 : index
    %c2 = arith.constant 2 : index
    %c0_33 = arith.constant 0 : index
    %35 = vector.load %arg10[%c0_32, %c2, %c0_33] : memref<10x18x128xbf16, #tpu.memory_space<vmem>>, vector<8x16x128xbf16>
    %36 = vector.shape_cast %35 : vector<8x16x128xbf16> to vector<128x128xbf16>
    %c0_34 = arith.constant 0 : index
    %c2_35 = arith.constant 2 : index
    %c0_36 = arith.constant 0 : index
    %c0_37 = arith.constant 0 : index
    %37 = vector.load %arg7[%c0_34, %c2_35, %c0_36, %c0_37] : memref<3x3x128x128xbf16, #tpu.memory_space<vmem>>, vector<1x1x128x128xbf16>
    %38 = vector.shape_cast %37 : vector<1x1x128x128xbf16> to vector<128x128xbf16>
    %cst_38 = arith.constant dense<0.000000e+00> : vector<128x128xf32>
    %39 = tpu.matmul %36, %38, %cst_38 {dimension_numbers = #tpu.dot_dimension_numbers<[1], [0], [0], [1], [0, 0, 1, 1], [], []>} : vector<128x128xbf16>, vector<128x128xbf16>, vector<128x128xf32> -> vector<128x128xf32>
    %40 = arith.addf %34, %39 : vector<128x128xf32>
    %c1_39 = arith.constant 1 : index
    %c0_40 = arith.constant 0 : index
    %c0_41 = arith.constant 0 : index
    %41 = vector.load %arg10[%c1_39, %c0_40, %c0_41] : memref<10x18x128xbf16, #tpu.memory_space<vmem>>, vector<8x16x128xbf16>
    %42 = vector.shape_cast %41 : vector<8x16x128xbf16> to vector<128x128xbf16>
    %c1_42 = arith.constant 1 : index
    %c0_43 = arith.constant 0 : index
    %c0_44 = arith.constant 0 : index
    %c0_45 = arith.constant 0 : index
    %43 = vector.load %arg7[%c1_42, %c0_43, %c0_44, %c0_45] : memref<3x3x128x128xbf16, #tpu.memory_space<vmem>>, vector<1x1x128x128xbf16>
    %44 = vector.shape_cast %43 : vector<1x1x128x128xbf16> to vector<128x128xbf16>
    %cst_46 = arith.constant dense<0.000000e+00> : vector<128x128xf32>
    %45 = tpu.matmul %42, %44, %cst_46 {dimension_numbers = #tpu.dot_dimension_numbers<[1], [0], [0], [1], [0, 0, 1, 1], [], []>} : vector<128x128xbf16>, vector<128x128xbf16>, vector<128x128xf32> -> vector<128x128xf32>
    %46 = arith.addf %40, %45 : vector<128x128xf32>
    %c1_47 = arith.constant 1 : index
    %c1_48 = arith.constant 1 : index
    %c0_49 = arith.constant 0 : index
    %47 = vector.load %arg10[%c1_47, %c1_48, %c0_49] : memref<10x18x128xbf16, #tpu.memory_space<vmem>>, vector<8x16x128xbf16>
    %48 = vector.shape_cast %47 : vector<8x16x128xbf16> to vector<128x128xbf16>
    %c1_50 = arith.constant 1 : index
    %c1_51 = arith.constant 1 : index
    %c0_52 = arith.constant 0 : index
    %c0_53 = arith.constant 0 : index
    %49 = vector.load %arg7[%c1_50, %c1_51, %c0_52, %c0_53] : memref<3x3x128x128xbf16, #tpu.memory_space<vmem>>, vector<1x1x128x128xbf16>
    %50 = vector.shape_cast %49 : vector<1x1x128x128xbf16> to vector<128x128xbf16>
    %cst_54 = arith.constant dense<0.000000e+00> : vector<128x128xf32>
    %51 = tpu.matmul %48, %50, %cst_54 {dimension_numbers = #tpu.dot_dimension_numbers<[1], [0], [0], [1], [0, 0, 1, 1], [], []>} : vector<128x128xbf16>, vector<128x128xbf16>, vector<128x128xf32> -> vector<128x128xf32>
    %52 = arith.addf %46, %51 : vector<128x128xf32>
    %c1_55 = arith.constant 1 : index
    %c2_56 = arith.constant 2 : index
    %c0_57 = arith.constant 0 : index
    %53 = vector.load %arg10[%c1_55, %c2_56, %c0_57] : memref<10x18x128xbf16, #tpu.memory_space<vmem>>, vector<8x16x128xbf16>
    %54 = vector.shape_cast %53 : vector<8x16x128xbf16> to vector<128x128xbf16>
    %c1_58 = arith.constant 1 : index
    %c2_59 = arith.constant 2 : index
    %c0_60 = arith.constant 0 : index
    %c0_61 = arith.constant 0 : index
    %55 = vector.load %arg7[%c1_58, %c2_59, %c0_60, %c0_61] : memref<3x3x128x128xbf16, #tpu.memory_space<vmem>>, vector<1x1x128x128xbf16>
    %56 = vector.shape_cast %55 : vector<1x1x128x128xbf16> to vector<128x128xbf16>
    %cst_62 = arith.constant dense<0.000000e+00> : vector<128x128xf32>
    %57 = tpu.matmul %54, %56, %cst_62 {dimension_numbers = #tpu.dot_dimension_numbers<[1], [0], [0], [1], [0, 0, 1, 1], [], []>} : vector<128x128xbf16>, vector<128x128xbf16>, vector<128x128xf32> -> vector<128x128xf32>
    %58 = arith.addf %52, %57 : vector<128x128xf32>
    %c2_63 = arith.constant 2 : index
    %c0_64 = arith.constant 0 : index
    %c0_65 = arith.constant 0 : index
    %59 = vector.load %arg10[%c2_63, %c0_64, %c0_65] : memref<10x18x128xbf16, #tpu.memory_space<vmem>>, vector<8x16x128xbf16>
    %60 = vector.shape_cast %59 : vector<8x16x128xbf16> to vector<128x128xbf16>
    %c2_66 = arith.constant 2 : index
    %c0_67 = arith.constant 0 : index
    %c0_68 = arith.constant 0 : index
    %c0_69 = arith.constant 0 : index
    %61 = vector.load %arg7[%c2_66, %c0_67, %c0_68, %c0_69] : memref<3x3x128x128xbf16, #tpu.memory_space<vmem>>, vector<1x1x128x128xbf16>
    %62 = vector.shape_cast %61 : vector<1x1x128x128xbf16> to vector<128x128xbf16>
    %cst_70 = arith.constant dense<0.000000e+00> : vector<128x128xf32>
    %63 = tpu.matmul %60, %62, %cst_70 {dimension_numbers = #tpu.dot_dimension_numbers<[1], [0], [0], [1], [0, 0, 1, 1], [], []>} : vector<128x128xbf16>, vector<128x128xbf16>, vector<128x128xf32> -> vector<128x128xf32>
    %64 = arith.addf %58, %63 : vector<128x128xf32>
    %c2_71 = arith.constant 2 : index
    %c1_72 = arith.constant 1 : index
    %c0_73 = arith.constant 0 : index
    %65 = vector.load %arg10[%c2_71, %c1_72, %c0_73] : memref<10x18x128xbf16, #tpu.memory_space<vmem>>, vector<8x16x128xbf16>
    %66 = vector.shape_cast %65 : vector<8x16x128xbf16> to vector<128x128xbf16>
    %c2_74 = arith.constant 2 : index
    %c1_75 = arith.constant 1 : index
    %c0_76 = arith.constant 0 : index
    %c0_77 = arith.constant 0 : index
    %67 = vector.load %arg7[%c2_74, %c1_75, %c0_76, %c0_77] : memref<3x3x128x128xbf16, #tpu.memory_space<vmem>>, vector<1x1x128x128xbf16>
    %68 = vector.shape_cast %67 : vector<1x1x128x128xbf16> to vector<128x128xbf16>
    %cst_78 = arith.constant dense<0.000000e+00> : vector<128x128xf32>
    %69 = tpu.matmul %66, %68, %cst_78 {dimension_numbers = #tpu.dot_dimension_numbers<[1], [0], [0], [1], [0, 0, 1, 1], [], []>} : vector<128x128xbf16>, vector<128x128xbf16>, vector<128x128xf32> -> vector<128x128xf32>
    %70 = arith.addf %64, %69 : vector<128x128xf32>
    %c2_79 = arith.constant 2 : index
    %c2_80 = arith.constant 2 : index
    %c0_81 = arith.constant 0 : index
    %71 = vector.load %arg10[%c2_79, %c2_80, %c0_81] : memref<10x18x128xbf16, #tpu.memory_space<vmem>>, vector<8x16x128xbf16>
    %72 = vector.shape_cast %71 : vector<8x16x128xbf16> to vector<128x128xbf16>
    %c2_82 = arith.constant 2 : index
    %c2_83 = arith.constant 2 : index
    %c0_84 = arith.constant 0 : index
    %c0_85 = arith.constant 0 : index
    %73 = vector.load %arg7[%c2_82, %c2_83, %c0_84, %c0_85] : memref<3x3x128x128xbf16, #tpu.memory_space<vmem>>, vector<1x1x128x128xbf16>
    %74 = vector.shape_cast %73 : vector<1x1x128x128xbf16> to vector<128x128xbf16>
    %cst_86 = arith.constant dense<0.000000e+00> : vector<128x128xf32>
    %75 = tpu.matmul %72, %74, %cst_86 {dimension_numbers = #tpu.dot_dimension_numbers<[1], [0], [0], [1], [0, 0, 1, 1], [], []>} : vector<128x128xbf16>, vector<128x128xbf16>, vector<128x128xf32> -> vector<128x128xf32>
    %76 = arith.addf %70, %75 : vector<128x128xf32>
    %77 = vector.shape_cast %76 : vector<128x128xf32> to vector<1x8x16x128xf32>
    %c0_87 = arith.constant 0 : index
    %c0_88 = arith.constant 0 : index
    %c0_89 = arith.constant 0 : index
    %c0_90 = arith.constant 0 : index
    %78 = vector.load %arg8[%c0_87, %c0_88, %c0_89, %c0_90] : memref<1x8x16x128xf32, #tpu.memory_space<vmem>>, vector<1x8x16x128xf32>
    tpu.vector_store %arg8[%c0_87, %c0_88, %c0_89, %c0_90], %77 {strides = array<i32>} : memref<1x8x16x128xf32, #tpu.memory_space<vmem>>, vector<1x8x16x128xf32>,
    %cst_91 = arith.constant dense<0.000000e+00> : vector<128xf32>
    %79 = vector.multi_reduction <add>, %76, %cst_91 [0] : vector<128x128xf32> to vector<128xf32>
    %80 = vector.shape_cast %79 : vector<128xf32> to vector<1x128xf32>
    %81 = arith.mulf %76, %76 : vector<128x128xf32>
    %cst_92 = arith.constant dense<0.000000e+00> : vector<128xf32>
    %82 = vector.multi_reduction <add>, %81, %cst_92 [0] : vector<128x128xf32> to vector<128xf32>
    %83 = vector.shape_cast %82 : vector<128xf32> to vector<1x128xf32>
    %84 = tpu.concatenate %80, %83 in 0 : vector<1x128xf32>, vector<1x128xf32> -> vector<2x128xf32>
    %85 = vector.shape_cast %84 : vector<2x128xf32> to vector<1x1x2x128xf32>
    %c0_93 = arith.constant 0 : index
    %c0_94 = arith.constant 0 : index
    %c0_95 = arith.constant 0 : index
    %c0_96 = arith.constant 0 : index
    %86 = vector.load %arg9[%c0_93, %c0_94, %c0_95, %c0_96] : memref<1x1x2x128xf32, #tpu.memory_space<vmem>>, vector<1x1x2x128xf32>
    tpu.vector_store %arg9[%c0_93, %c0_94, %c0_95, %c0_96], %85 {strides = array<i32>} : memref<1x1x2x128xf32, #tpu.memory_space<vmem>>, vector<1x1x2x128xf32>,
    return
  }
  func.func @transform_0(%arg0: i32, %arg1: i32) -> (i32, i32) {
    %c0_i32 = arith.constant 0 : i32
    %c0_i32_0 = arith.constant 0 : i32
    %c0_i32_1 = arith.constant 0 : i32
    return %c0_i32, %c0_i32_0 : i32, i32
  }
  func.func @transform_1(%arg0: i32, %arg1: i32) -> (i32, i32) {
    %c0_i32 = arith.constant 0 : i32
    %c0_i32_0 = arith.constant 0 : i32
    %c0_i32_1 = arith.constant 0 : i32
    return %c0_i32, %c0_i32_0 : i32, i32
  }
  func.func @transform_2(%arg0: i32, %arg1: i32) -> (i32, i32, i32, i32) {
    %c0_i32 = arith.constant 0 : i32
    %c0_i32_0 = arith.constant 0 : i32
    %c0_i32_1 = arith.constant 0 : i32
    return %arg0, %arg1, %c0_i32, %c0_i32_0 : i32, i32, i32, i32
  }
  func.func @transform_3(%arg0: i32, %arg1: i32) -> (i32, i32, i32, i32) {
    %c1_i32 = arith.constant 1 : i32
    %0 = arith.muli %arg1, %c1_i32 : i32
    %c1_i32_0 = arith.constant 1 : i32
    %1 = arith.subi %0, %c1_i32_0 : i32
    %c0_i32 = arith.constant 0 : i32
    %2 = arith.maxsi %1, %c0_i32 : i32
    %c0_i32_1 = arith.constant 0 : i32
    %c0_i32_2 = arith.constant 0 : i32
    %c0_i32_3 = arith.constant 0 : i32
    return %arg0, %2, %c0_i32_1, %c0_i32_2 : i32, i32, i32, i32
  }
  func.func @transform_4(%arg0: i32, %arg1: i32) -> (i32, i32, i32, i32) {
    %c1_i32 = arith.constant 1 : i32
    %0 = arith.addi %arg1, %c1_i32 : i32
    %c1_i32_0 = arith.constant 1 : i32
    %1 = arith.muli %0, %c1_i32_0 : i32
    %c1_i32_1 = arith.constant 1 : i32
    %2 = arith.minsi %1, %c1_i32_1 : i32
    %c0_i32 = arith.constant 0 : i32
    %c0_i32_2 = arith.constant 0 : i32
    %c0_i32_3 = arith.constant 0 : i32
    return %arg0, %2, %c0_i32, %c0_i32_2 : i32, i32, i32, i32
  }
  func.func @transform_5(%arg0: i32, %arg1: i32) -> (i32, i32, i32, i32) {
    %c0_i32 = arith.constant 0 : i32
    %c0_i32_0 = arith.constant 0 : i32
    %c0_i32_1 = arith.constant 0 : i32
    %c0_i32_2 = arith.constant 0 : i32
    %c0_i32_3 = arith.constant 0 : i32
    return %c0_i32, %c0_i32_0, %c0_i32_1, %c0_i32_2 : i32, i32, i32, i32
  }
  func.func @transform_6(%arg0: i32, %arg1: i32) -> (i32, i32, i32, i32) {
    %c0_i32 = arith.constant 0 : i32
    %c0_i32_0 = arith.constant 0 : i32
    %c0_i32_1 = arith.constant 0 : i32
    return %arg0, %arg1, %c0_i32, %c0_i32_0 : i32, i32, i32, i32
  }
  func.func @transform_7(%arg0: i32, %arg1: i32) -> (i32, i32, i32, i32) {
    %c0_i32 = arith.constant 0 : i32
    %c0_i32_0 = arith.constant 0 : i32
    %c0_i32_1 = arith.constant 0 : i32
    return %arg0, %arg1, %c0_i32, %c0_i32_0 : i32, i32, i32, i32
  }
}

module attributes {stable_mosaic.version = 11 : i64} {
  func.func @_conv_layer_kernel(%arg0: i32, %arg1: i32, %arg2: memref<1x128xf32, #tpu.memory_space<vmem>>, %arg3: memref<1x128xf32, #tpu.memory_space<vmem>>, %arg4: memref<1x8x16x128xf32, #tpu.memory_space<vmem>>, %arg5: memref<1x8x16x128xf32, #tpu.memory_space<vmem>>, %arg6: memref<1x8x16x128xf32, #tpu.memory_space<vmem>>, %arg7: memref<3x3x128x128xbf16, #tpu.memory_space<vmem>>, %arg8: memref<1x8x16x128xf32, #tpu.memory_space<vmem>>, %arg9: memref<1x1x2x128xf32, #tpu.memory_space<vmem>>, %arg10: memref<10x18x128xbf16, #tpu.memory_space<vmem>>) attributes {dimension_semantics = [#tpu.dimension_semantics<parallel>, #tpu.dimension_semantics<parallel>], iteration_bounds = array<i64: 2, 2>, scalar_prefetch = 0 : i64, scratch_operands = 1 : i64, tpu.core_type = #tpu.core_type<tc>, window_params = [{pipeline_mode = #tpu.pipeline_mode<synchronous>, transform_indices = @transform_0, window_bounds = array<i64: 1, 128>}, {pipeline_mode = #tpu.pipeline_mode<synchronous>, transform_indices = @transform_1, window_bounds = array<i64: 1, 128>}, {transform_indices = @transform_2, window_bounds = array<i64: 1, 8, 16, 128>}, {transform_indices = @transform_3, window_bounds = array<i64: 1, 8, 16, 128>}, {transform_indices = @transform_4, window_bounds = array<i64: 1, 8, 16, 128>}, {pipeline_mode = #tpu.pipeline_mode<synchronous>, transform_indices = @transform_5, window_bounds = array<i64: 3, 3, 128, 128>}, {transform_indices = @transform_6, window_bounds = array<i64: 1, 8, 16, 128>}, {transform_indices = @transform_7, window_bounds = array<i64: 1, 1, 2, 128>}]} {
    %c0 = arith.constant 0 : index
    %c0_0 = arith.constant 0 : index
    %0 = vector.load %arg2[%c0, %c0_0] : memref<1x128xf32, #tpu.memory_space<vmem>>, vector<1x128xf32>
    %1 = vector.shape_cast %0 : vector<1x128xf32> to vector<1x1x128xf32>
    %c0_1 = arith.constant 0 : index
    %c0_2 = arith.constant 0 : index
    %2 = vector.load %arg3[%c0_1, %c0_2] : memref<1x128xf32, #tpu.memory_space<vmem>>, vector<1x128xf32>
    %3 = vector.shape_cast %2 : vector<1x128xf32> to vector<1x1x128xf32>
    %cst = arith.constant 0.000000e+00 : bf16
    %4 = vector.broadcast %cst : bf16 to vector<10x18x128xbf16>
    %c0_3 = arith.constant 0 : index
    %c0_4 = arith.constant 0 : index
    %c0_5 = arith.constant 0 : index
    %5 = vector.load %arg10[%c0_3, %c0_4, %c0_5] : memref<10x18x128xbf16, #tpu.memory_space<vmem>>, vector<10x18x128xbf16>
    tpu.vector_store %arg10[%c0_3, %c0_4, %c0_5], %4 {strides = array<i32>} : memref<10x18x128xbf16, #tpu.memory_space<vmem>>, vector<10x18x128xbf16>,
    %c0_6 = arith.constant 0 : index
    %c0_7 = arith.constant 0 : index
    %c0_8 = arith.constant 0 : index
    %c0_9 = arith.constant 0 : index
    %6 = vector.load %arg4[%c0_6, %c0_7, %c0_8, %c0_9] : memref<1x8x16x128xf32, #tpu.memory_space<vmem>>, vector<1x8x16x128xf32>
    %7 = vector.shape_cast %6 : vector<1x8x16x128xf32> to vector<8x16x128xf32>
    %8 = vector.broadcast %1 : vector<1x1x128xf32> to vector<8x16x128xf32>
    %9 = arith.mulf %7, %8 : vector<8x16x128xf32>
    %10 = vector.broadcast %3 : vector<1x1x128xf32> to vector<8x16x128xf32>
    %11 = arith.addf %9, %10 : vector<8x16x128xf32>
    %cst_10 = arith.constant 0.000000e+00 : f32
    %12 = vector.broadcast %cst_10 : f32 to vector<8x16x128xf32>
    %13 = arith.maximumf %11, %12 : vector<8x16x128xf32>
    %14 = arith.truncf %13 : vector<8x16x128xf32> to vector<8x16x128xbf16>
    %c1 = arith.constant 1 : index
    %c1_11 = arith.constant 1 : index
    %c0_12 = arith.constant 0 : index
    %15 = vector.load %arg10[%c1, %c1_11, %c0_12] : memref<10x18x128xbf16, #tpu.memory_space<vmem>>, vector<8x16x128xbf16>
    tpu.vector_store %arg10[%c1, %c1_11, %c0_12], %14 {strides = array<i32>} : memref<10x18x128xbf16, #tpu.memory_space<vmem>>, vector<8x16x128xbf16>,
    %c0_i32 = arith.constant 0 : i32
    %16 = arith.cmpi sgt, %arg1, %c0_i32 : i32
    %17 = arith.extui %16 : i1 to i32
    %c0_i32_13 = arith.constant 0 : i32
    %18 = arith.cmpi ne, %17, %c0_i32_13 : i32
    scf.if %18 {
      %c0_97 = arith.constant 0 : index
      %c0_98 = arith.constant 0 : index
      %c0_99 = arith.constant 0 : index
      %c0_100 = arith.constant 0 : index
      %87 = vector.load %arg5[%c0_97, %c0_98, %c0_99, %c0_100] : memref<1x8x16x128xf32, #tpu.memory_space<vmem>>, vector<1x8x16x128xf32>
      %88 = vector.shape_cast %87 : vector<1x8x16x128xf32> to vector<8x16x128xf32>
      %89 = vector.extract_strided_slice %88 {offsets = [7, 0, 0], sizes = [1, 16, 128], strides = [1, 1, 1]} : vector<8x16x128xf32> to vector<1x16x128xf32>
      %90 = vector.broadcast %1 : vector<1x1x128xf32> to vector<1x16x128xf32>
      %91 = arith.mulf %89, %90 : vector<1x16x128xf32>
      %92 = vector.broadcast %3 : vector<1x1x128xf32> to vector<1x16x128xf32>
      %93 = arith.addf %91, %92 : vector<1x16x128xf32>
      %cst_101 = arith.constant 0.000000e+00 : f32
      %94 = vector.broadcast %cst_101 : f32 to vector<1x16x128xf32>
      %95 = arith.maximumf %93, %94 : vector<1x16x128xf32>
      %96 = arith.truncf %95 : vector<1x16x128xf32> to vector<1x16x128xbf16>
      %c0_102 = arith.constant 0 : index
      %c1_103 = arith.constant 1 : index
      %c0_104 = arith.constant 0 : index
      %97 = vector.load %arg10[%c0_102, %c1_103, %c0_104] : memref<10x18x128xbf16, #tpu.memory_space<vmem>>, vector<1x16x128xbf16>
      tpu.vector_store %arg10[%c0_102, %c1_103, %c0_104], %96 {strides = array<i32>} : memref<10x18x128xbf16, #tpu.memory_space<vmem>>, vector<1x16x128xbf16>,
    } else {
    }
    %c1_i32 = arith.constant 1 : i32
    %19 = arith.cmpi slt, %arg1, %c1_i32 : i32
    %20 = arith.extui %19 : i1 to i32
    %c0_i32_14 = arith.constant 0 : i32
    %21 = arith.cmpi ne, %20, %c0_i32_14 : i32
    scf.if %21 {
      %c0_97 = arith.constant 0 : index
      %c0_98 = arith.constant 0 : index
      %c0_99 = arith.constant 0 : index
      %c0_100 = arith.constant 0 : index
      %87 = vector.load %arg6[%c0_97, %c0_98, %c0_99, %c0_100] : memref<1x8x16x128xf32, #tpu.memory_space<vmem>>, vector<1x8x16x128xf32>
      %88 = vector.shape_cast %87 : vector<1x8x16x128xf32> to vector<8x16x128xf32>
      %89 = vector.extract_strided_slice %88 {offsets = [0, 0, 0], sizes = [1, 16, 128], strides = [1, 1, 1]} : vector<8x16x128xf32> to vector<1x16x128xf32>
      %90 = vector.broadcast %1 : vector<1x1x128xf32> to vector<1x16x128xf32>
      %91 = arith.mulf %89, %90 : vector<1x16x128xf32>
      %92 = vector.broadcast %3 : vector<1x1x128xf32> to vector<1x16x128xf32>
      %93 = arith.addf %91, %92 : vector<1x16x128xf32>
      %cst_101 = arith.constant 0.000000e+00 : f32
      %94 = vector.broadcast %cst_101 : f32 to vector<1x16x128xf32>
      %95 = arith.maximumf %93, %94 : vector<1x16x128xf32>
      %96 = arith.truncf %95 : vector<1x16x128xf32> to vector<1x16x128xbf16>
      %c9 = arith.constant 9 : index
      %c1_102 = arith.constant 1 : index
      %c0_103 = arith.constant 0 : index
      %97 = vector.load %arg10[%c9, %c1_102, %c0_103] : memref<10x18x128xbf16, #tpu.memory_space<vmem>>, vector<1x16x128xbf16>
      tpu.vector_store %arg10[%c9, %c1_102, %c0_103], %96 {strides = array<i32>} : memref<10x18x128xbf16, #tpu.memory_space<vmem>>, vector<1x16x128xbf16>,
    } else {
    }
    %cst_15 = arith.constant 0.000000e+00 : f32
    %22 = vector.broadcast %cst_15 : f32 to vector<128x128xf32>
    %c0_16 = arith.constant 0 : index
    %c0_17 = arith.constant 0 : index
    %c0_18 = arith.constant 0 : index
    %23 = vector.load %arg10[%c0_16, %c0_17, %c0_18] : memref<10x18x128xbf16, #tpu.memory_space<vmem>>, vector<8x16x128xbf16>
    %24 = vector.shape_cast %23 : vector<8x16x128xbf16> to vector<128x128xbf16>
    %c0_19 = arith.constant 0 : index
    %c0_20 = arith.constant 0 : index
    %c0_21 = arith.constant 0 : index
    %c0_22 = arith.constant 0 : index
    %25 = vector.load %arg7[%c0_19, %c0_20, %c0_21, %c0_22] : memref<3x3x128x128xbf16, #tpu.memory_space<vmem>>, vector<1x1x128x128xbf16>
    %26 = vector.shape_cast %25 : vector<1x1x128x128xbf16> to vector<128x128xbf16>
    %cst_23 = arith.constant dense<0.000000e+00> : vector<128x128xf32>
    %27 = tpu.matmul %24, %26, %cst_23 {dimension_numbers = #tpu.dot_dimension_numbers<[1], [0], [0], [1], [0, 0, 1, 1], [], []>} : vector<128x128xbf16>, vector<128x128xbf16>, vector<128x128xf32> -> vector<128x128xf32>
    %28 = arith.addf %22, %27 : vector<128x128xf32>
    %c0_24 = arith.constant 0 : index
    %c1_25 = arith.constant 1 : index
    %c0_26 = arith.constant 0 : index
    %29 = vector.load %arg10[%c0_24, %c1_25, %c0_26] : memref<10x18x128xbf16, #tpu.memory_space<vmem>>, vector<8x16x128xbf16>
    %30 = vector.shape_cast %29 : vector<8x16x128xbf16> to vector<128x128xbf16>
    %c0_27 = arith.constant 0 : index
    %c1_28 = arith.constant 1 : index
    %c0_29 = arith.constant 0 : index
    %c0_30 = arith.constant 0 : index
    %31 = vector.load %arg7[%c0_27, %c1_28, %c0_29, %c0_30] : memref<3x3x128x128xbf16, #tpu.memory_space<vmem>>, vector<1x1x128x128xbf16>
    %32 = vector.shape_cast %31 : vector<1x1x128x128xbf16> to vector<128x128xbf16>
    %cst_31 = arith.constant dense<0.000000e+00> : vector<128x128xf32>
    %33 = tpu.matmul %30, %32, %cst_31 {dimension_numbers = #tpu.dot_dimension_numbers<[1], [0], [0], [1], [0, 0, 1, 1], [], []>} : vector<128x128xbf16>, vector<128x128xbf16>, vector<128x128xf32> -> vector<128x128xf32>
    %34 = arith.addf %28, %33 : vector<128x128xf32>
    %c0_32 = arith.constant 0 : index
    %c2 = arith.constant 2 : index
    %c0_33 = arith.constant 0 : index
    %35 = vector.load %arg10[%c0_32, %c2, %c0_33] : memref<10x18x128xbf16, #tpu.memory_space<vmem>>, vector<8x16x128xbf16>
    %36 = vector.shape_cast %35 : vector<8x16x128xbf16> to vector<128x128xbf16>
    %c0_34 = arith.constant 0 : index
    %c2_35 = arith.constant 2 : index
    %c0_36 = arith.constant 0 : index
    %c0_37 = arith.constant 0 : index
    %37 = vector.load %arg7[%c0_34, %c2_35, %c0_36, %c0_37] : memref<3x3x128x128xbf16, #tpu.memory_space<vmem>>, vector<1x1x128x128xbf16>
    %38 = vector.shape_cast %37 : vector<1x1x128x128xbf16> to vector<128x128xbf16>
    %cst_38 = arith.constant dense<0.000000e+00> : vector<128x128xf32>
    %39 = tpu.matmul %36, %38, %cst_38 {dimension_numbers = #tpu.dot_dimension_numbers<[1], [0], [0], [1], [0, 0, 1, 1], [], []>} : vector<128x128xbf16>, vector<128x128xbf16>, vector<128x128xf32> -> vector<128x128xf32>
    %40 = arith.addf %34, %39 : vector<128x128xf32>
    %c1_39 = arith.constant 1 : index
    %c0_40 = arith.constant 0 : index
    %c0_41 = arith.constant 0 : index
    %41 = vector.load %arg10[%c1_39, %c0_40, %c0_41] : memref<10x18x128xbf16, #tpu.memory_space<vmem>>, vector<8x16x128xbf16>
    %42 = vector.shape_cast %41 : vector<8x16x128xbf16> to vector<128x128xbf16>
    %c1_42 = arith.constant 1 : index
    %c0_43 = arith.constant 0 : index
    %c0_44 = arith.constant 0 : index
    %c0_45 = arith.constant 0 : index
    %43 = vector.load %arg7[%c1_42, %c0_43, %c0_44, %c0_45] : memref<3x3x128x128xbf16, #tpu.memory_space<vmem>>, vector<1x1x128x128xbf16>
    %44 = vector.shape_cast %43 : vector<1x1x128x128xbf16> to vector<128x128xbf16>
    %cst_46 = arith.constant dense<0.000000e+00> : vector<128x128xf32>
    %45 = tpu.matmul %42, %44, %cst_46 {dimension_numbers = #tpu.dot_dimension_numbers<[1], [0], [0], [1], [0, 0, 1, 1], [], []>} : vector<128x128xbf16>, vector<128x128xbf16>, vector<128x128xf32> -> vector<128x128xf32>
    %46 = arith.addf %40, %45 : vector<128x128xf32>
    %c1_47 = arith.constant 1 : index
    %c1_48 = arith.constant 1 : index
    %c0_49 = arith.constant 0 : index
    %47 = vector.load %arg10[%c1_47, %c1_48, %c0_49] : memref<10x18x128xbf16, #tpu.memory_space<vmem>>, vector<8x16x128xbf16>
    %48 = vector.shape_cast %47 : vector<8x16x128xbf16> to vector<128x128xbf16>
    %c1_50 = arith.constant 1 : index
    %c1_51 = arith.constant 1 : index
    %c0_52 = arith.constant 0 : index
    %c0_53 = arith.constant 0 : index
    %49 = vector.load %arg7[%c1_50, %c1_51, %c0_52, %c0_53] : memref<3x3x128x128xbf16, #tpu.memory_space<vmem>>, vector<1x1x128x128xbf16>
    %50 = vector.shape_cast %49 : vector<1x1x128x128xbf16> to vector<128x128xbf16>
    %cst_54 = arith.constant dense<0.000000e+00> : vector<128x128xf32>
    %51 = tpu.matmul %48, %50, %cst_54 {dimension_numbers = #tpu.dot_dimension_numbers<[1], [0], [0], [1], [0, 0, 1, 1], [], []>} : vector<128x128xbf16>, vector<128x128xbf16>, vector<128x128xf32> -> vector<128x128xf32>
    %52 = arith.addf %46, %51 : vector<128x128xf32>
    %c1_55 = arith.constant 1 : index
    %c2_56 = arith.constant 2 : index
    %c0_57 = arith.constant 0 : index
    %53 = vector.load %arg10[%c1_55, %c2_56, %c0_57] : memref<10x18x128xbf16, #tpu.memory_space<vmem>>, vector<8x16x128xbf16>
    %54 = vector.shape_cast %53 : vector<8x16x128xbf16> to vector<128x128xbf16>
    %c1_58 = arith.constant 1 : index
    %c2_59 = arith.constant 2 : index
    %c0_60 = arith.constant 0 : index
    %c0_61 = arith.constant 0 : index
    %55 = vector.load %arg7[%c1_58, %c2_59, %c0_60, %c0_61] : memref<3x3x128x128xbf16, #tpu.memory_space<vmem>>, vector<1x1x128x128xbf16>
    %56 = vector.shape_cast %55 : vector<1x1x128x128xbf16> to vector<128x128xbf16>
    %cst_62 = arith.constant dense<0.000000e+00> : vector<128x128xf32>
    %57 = tpu.matmul %54, %56, %cst_62 {dimension_numbers = #tpu.dot_dimension_numbers<[1], [0], [0], [1], [0, 0, 1, 1], [], []>} : vector<128x128xbf16>, vector<128x128xbf16>, vector<128x128xf32> -> vector<128x128xf32>
    %58 = arith.addf %52, %57 : vector<128x128xf32>
    %c2_63 = arith.constant 2 : index
    %c0_64 = arith.constant 0 : index
    %c0_65 = arith.constant 0 : index
    %59 = vector.load %arg10[%c2_63, %c0_64, %c0_65] : memref<10x18x128xbf16, #tpu.memory_space<vmem>>, vector<8x16x128xbf16>
    %60 = vector.shape_cast %59 : vector<8x16x128xbf16> to vector<128x128xbf16>
    %c2_66 = arith.constant 2 : index
    %c0_67 = arith.constant 0 : index
    %c0_68 = arith.constant 0 : index
    %c0_69 = arith.constant 0 : index
    %61 = vector.load %arg7[%c2_66, %c0_67, %c0_68, %c0_69] : memref<3x3x128x128xbf16, #tpu.memory_space<vmem>>, vector<1x1x128x128xbf16>
    %62 = vector.shape_cast %61 : vector<1x1x128x128xbf16> to vector<128x128xbf16>
    %cst_70 = arith.constant dense<0.000000e+00> : vector<128x128xf32>
    %63 = tpu.matmul %60, %62, %cst_70 {dimension_numbers = #tpu.dot_dimension_numbers<[1], [0], [0], [1], [0, 0, 1, 1], [], []>} : vector<128x128xbf16>, vector<128x128xbf16>, vector<128x128xf32> -> vector<128x128xf32>
    %64 = arith.addf %58, %63 : vector<128x128xf32>
    %c2_71 = arith.constant 2 : index
    %c1_72 = arith.constant 1 : index
    %c0_73 = arith.constant 0 : index
    %65 = vector.load %arg10[%c2_71, %c1_72, %c0_73] : memref<10x18x128xbf16, #tpu.memory_space<vmem>>, vector<8x16x128xbf16>
    %66 = vector.shape_cast %65 : vector<8x16x128xbf16> to vector<128x128xbf16>
    %c2_74 = arith.constant 2 : index
    %c1_75 = arith.constant 1 : index
    %c0_76 = arith.constant 0 : index
    %c0_77 = arith.constant 0 : index
    %67 = vector.load %arg7[%c2_74, %c1_75, %c0_76, %c0_77] : memref<3x3x128x128xbf16, #tpu.memory_space<vmem>>, vector<1x1x128x128xbf16>
    %68 = vector.shape_cast %67 : vector<1x1x128x128xbf16> to vector<128x128xbf16>
    %cst_78 = arith.constant dense<0.000000e+00> : vector<128x128xf32>
    %69 = tpu.matmul %66, %68, %cst_78 {dimension_numbers = #tpu.dot_dimension_numbers<[1], [0], [0], [1], [0, 0, 1, 1], [], []>} : vector<128x128xbf16>, vector<128x128xbf16>, vector<128x128xf32> -> vector<128x128xf32>
    %70 = arith.addf %64, %69 : vector<128x128xf32>
    %c2_79 = arith.constant 2 : index
    %c2_80 = arith.constant 2 : index
    %c0_81 = arith.constant 0 : index
    %71 = vector.load %arg10[%c2_79, %c2_80, %c0_81] : memref<10x18x128xbf16, #tpu.memory_space<vmem>>, vector<8x16x128xbf16>
    %72 = vector.shape_cast %71 : vector<8x16x128xbf16> to vector<128x128xbf16>
    %c2_82 = arith.constant 2 : index
    %c2_83 = arith.constant 2 : index
    %c0_84 = arith.constant 0 : index
    %c0_85 = arith.constant 0 : index
    %73 = vector.load %arg7[%c2_82, %c2_83, %c0_84, %c0_85] : memref<3x3x128x128xbf16, #tpu.memory_space<vmem>>, vector<1x1x128x128xbf16>
    %74 = vector.shape_cast %73 : vector<1x1x128x128xbf16> to vector<128x128xbf16>
    %cst_86 = arith.constant dense<0.000000e+00> : vector<128x128xf32>
    %75 = tpu.matmul %72, %74, %cst_86 {dimension_numbers = #tpu.dot_dimension_numbers<[1], [0], [0], [1], [0, 0, 1, 1], [], []>} : vector<128x128xbf16>, vector<128x128xbf16>, vector<128x128xf32> -> vector<128x128xf32>
    %76 = arith.addf %70, %75 : vector<128x128xf32>
    %77 = vector.shape_cast %76 : vector<128x128xf32> to vector<1x8x16x128xf32>
    %c0_87 = arith.constant 0 : index
    %c0_88 = arith.constant 0 : index
    %c0_89 = arith.constant 0 : index
    %c0_90 = arith.constant 0 : index
    %78 = vector.load %arg8[%c0_87, %c0_88, %c0_89, %c0_90] : memref<1x8x16x128xf32, #tpu.memory_space<vmem>>, vector<1x8x16x128xf32>
    tpu.vector_store %arg8[%c0_87, %c0_88, %c0_89, %c0_90], %77 {strides = array<i32>} : memref<1x8x16x128xf32, #tpu.memory_space<vmem>>, vector<1x8x16x128xf32>,
    %cst_91 = arith.constant dense<0.000000e+00> : vector<128xf32>
    %79 = vector.multi_reduction <add>, %76, %cst_91 [0] : vector<128x128xf32> to vector<128xf32>
    %80 = vector.shape_cast %79 : vector<128xf32> to vector<1x128xf32>
    %81 = arith.mulf %76, %76 : vector<128x128xf32>
    %cst_92 = arith.constant dense<0.000000e+00> : vector<128xf32>
    %82 = vector.multi_reduction <add>, %81, %cst_92 [0] : vector<128x128xf32> to vector<128xf32>
    %83 = vector.shape_cast %82 : vector<128xf32> to vector<1x128xf32>
    %84 = tpu.concatenate %80, %83 in 0 : vector<1x128xf32>, vector<1x128xf32> -> vector<2x128xf32>
    %85 = vector.shape_cast %84 : vector<2x128xf32> to vector<1x1x2x128xf32>
    %c0_93 = arith.constant 0 : index
    %c0_94 = arith.constant 0 : index
    %c0_95 = arith.constant 0 : index
    %c0_96 = arith.constant 0 : index
    %86 = vector.load %arg9[%c0_93, %c0_94, %c0_95, %c0_96] : memref<1x1x2x128xf32, #tpu.memory_space<vmem>>, vector<1x1x2x128xf32>
    tpu.vector_store %arg9[%c0_93, %c0_94, %c0_95, %c0_96], %85 {strides = array<i32>} : memref<1x1x2x128xf32, #tpu.memory_space<vmem>>, vector<1x1x2x128xf32>,
    return
  }
  func.func @transform_0(%arg0: i32, %arg1: i32) -> (i32, i32) {
    %c0_i32 = arith.constant 0 : i32
    %c0_i32_0 = arith.constant 0 : i32
    %c0_i32_1 = arith.constant 0 : i32
    return %c0_i32, %c0_i32_0 : i32, i32
  }
  func.func @transform_1(%arg0: i32, %arg1: i32) -> (i32, i32) {
    %c0_i32 = arith.constant 0 : i32
    %c0_i32_0 = arith.constant 0 : i32
    %c0_i32_1 = arith.constant 0 : i32
    return %c0_i32, %c0_i32_0 : i32, i32
  }
  func.func @transform_2(%arg0: i32, %arg1: i32) -> (i32, i32, i32, i32) {
    %c0_i32 = arith.constant 0 : i32
    %c0_i32_0 = arith.constant 0 : i32
    %c0_i32_1 = arith.constant 0 : i32
    return %arg0, %arg1, %c0_i32, %c0_i32_0 : i32, i32, i32, i32
  }
  func.func @transform_3(%arg0: i32, %arg1: i32) -> (i32, i32, i32, i32) {
    %c1_i32 = arith.constant 1 : i32
    %0 = arith.muli %arg1, %c1_i32 : i32
    %c1_i32_0 = arith.constant 1 : i32
    %1 = arith.subi %0, %c1_i32_0 : i32
    %c0_i32 = arith.constant 0 : i32
    %2 = arith.maxsi %1, %c0_i32 : i32
    %c0_i32_1 = arith.constant 0 : i32
    %c0_i32_2 = arith.constant 0 : i32
    %c0_i32_3 = arith.constant 0 : i32
    return %arg0, %2, %c0_i32_1, %c0_i32_2 : i32, i32, i32, i32
  }
  func.func @transform_4(%arg0: i32, %arg1: i32) -> (i32, i32, i32, i32) {
    %c1_i32 = arith.constant 1 : i32
    %0 = arith.addi %arg1, %c1_i32 : i32
    %c1_i32_0 = arith.constant 1 : i32
    %1 = arith.muli %0, %c1_i32_0 : i32
    %c1_i32_1 = arith.constant 1 : i32
    %2 = arith.minsi %1, %c1_i32_1 : i32
    %c0_i32 = arith.constant 0 : i32
    %c0_i32_2 = arith.constant 0 : i32
    %c0_i32_3 = arith.constant 0 : i32
    return %arg0, %2, %c0_i32, %c0_i32_2 : i32, i32, i32, i32
  }
  func.func @transform_5(%arg0: i32, %arg1: i32) -> (i32, i32, i32, i32) {
    %c0_i32 = arith.constant 0 : i32
    %c0_i32_0 = arith.constant 0 : i32
    %c0_i32_1 = arith.constant 0 : i32
    %c0_i32_2 = arith.constant 0 : i32
    %c0_i32_3 = arith.constant 0 : i32
    return %c0_i32, %c0_i32_0, %c0_i32_1, %c0_i32_2 : i32, i32, i32, i32
  }
  func.func @transform_6(%arg0: i32, %arg1: i32) -> (i32, i32, i32, i32) {
    %c0_i32 = arith.constant 0 : i32
    %c0_i32_0 = arith.constant 0 : i32
    %c0_i32_1 = arith.constant 0 : i32
    return %arg0, %arg1, %c0_i32, %c0_i32_0 : i32, i32, i32, i32
  }
  func.func @transform_7(%arg0: i32, %arg1: i32) -> (i32, i32, i32, i32) {
    %c0_i32 = arith.constant 0 : i32
    %c0_i32_0 = arith.constant 0 : i32
    %c0_i32_1 = arith.constant 0 : i32
    return %arg0, %arg1, %c0_i32, %c0_i32_0 : i32, i32, i32, i32
  }
}

</mosaic_0001>

<bundles_post_ra>
// kernel: dncnn_forward.4
= control target key start
LH: loop header
LB: loop body
LE: loop exit
PB: predicated region body
PF: predicated region fallthrough
CT: control target
= control target key end

     0   :  { %s5593_s0 = inlined_call_operand.vmem [shape: f32[1,128], index: 0, kind: input, shape index: {}]   ;;  %s5594_s1 = inlined_call_operand.vmem [shape: f32[1,128], index: 1, kind: input, shape index: {}]   ;;  %s5595_s2 = inlined_call_operand.vmem [shape: f32[2,16,16,128], index: 2, kind: input, shape index: {}, may-alias: {2,3,4}]   ;;  %s5596_s3 = inlined_call_operand.vmem [shape: f32[2,16,16,128], index: 3, kind: input, shape index: {}, may-alias: {2,3,4}]   ;;  %s5597_s4 = inlined_call_operand.vmem [shape: f32[2,16,16,128], index: 4, kind: input, shape index: {}, may-alias: {2,3,4}]   ;;  %s5598_s5 = inlined_call_operand.vmem [shape: bf16[3,3,128,128], index: 5, kind: input, shape index: {}]   ;;  %s5599_s6 = inlined_call_operand.vmem [shape: f32[2,16,16,128], index: 6, kind: output, shape index: {0}]   ;;  %s5600_s7 = inlined_call_operand.hbm [shape: f32[2,2,2,128], index: 7, kind: output, shape index: {1}]  }
   0x1   :  { %5605 = sst [smem:[#allocation9_spill]] %s5593_s0 }
   0x2   :  { %13 = vsyncpa [#allocation4], 0 }
   0x3   :  { %15 = vsyncpa [#allocation4 + $0x1], 0  ;;  %s4454_s24 = smov 0   ;;  %s4456_s25 = smov 0  }
   0x4   :  { %s4458_s26 = smov 0   ;;  %s4460_s27 = smov 0  }
   0x5   :  { %s4462_s28 = smov 0   ;;  %s4464_s29 = smov 0  }
   0x6   :  { %s4466_s30 = smov 0   ;;  %s4468_s8 = smov 0  }
   0x7 LB: > { %5606 = sst [smem:[#allocation6_spill]] %s4407_s30  ;;  %s3553_s9 = sadd.s32 4294967295, %s4411_s8   ;;  %s4411_s8 = sphi %s4468_s8, %s21_s8   ;;  %s4407_s30 = sphi %s4466_s30, %s5627_s30   ;;  %s4403_s29 = sphi %s4464_s29, %s5632_s29   ;;  %s4399_s28 = sphi %s4462_s28, %s5625_s28   ;;  %s4395_s27 = sphi %s4460_s27, %s5631_s27   ;;  %s4391_s26 = sphi %s4458_s26, %s5630_s26   ;;  %s4387_s25 = sphi %s4456_s25, %s5629_s25   ;;  %s4383_s24 = sphi %s4454_s24, %s5628_s24  }
   0x8   : > { %s3554_s10 = sadd.s32 4294967294, %s4411_s8   ;;  %s30_s11 = sadd.s32 1, %s4403_s29 }
   0x9   : > { %p31_p0 = scmp.ge.s32.totalorder %s30_s11, 2  ;;  %s33_s12 = sadd.s32 1, %s4407_s30 }
   0xa   : > { %p239_p1 = scmp.ne.s32.totalorder %s4391_s26, %s4387_s25  ;;  %p240_p2 = scmp.eq.s32.totalorder %s3553_s9, 3 }
   0xb   : > { %s5634_s11 = smov (%p31_p0, %s30_s11), 0  ;;  %s5636_s12 = smov (!%p31_p0, %s33_s12), %s4407_s30 }
   0xc   : > { %5607 = sst [smem:[#allocation7_spill]] %s5634_s11  ;;  %s225_s13 = ssub.s32 %s4403_s29, %s5634_s11 }
   0xd   : > { %p4505_p3 = por %p240_p2, %p239_p1  ;;  %p35_p4 = scmp.ge.s32.totalorder %s5636_s12, 2 }
   0xe   : > { %p245_p5 = scmp.ne.s32.totalorder %s4387_s25, %s4383_s24  ;;  %p246_p6 = scmp.eq.s32.totalorder %s3554_s10, 3 }
   0xf   : > { %p3559_p7 = scmp.ge.s32.totalorder %s4411_s8, 1  ;;  %s5638_s12 = smov (%p35_p4, %s5636_s12), 0 }
  0x10   : > { %5609 = sst [smem:[#allocation8_spill]] %s5638_s12  ;;  %p4514_p8 = por %p246_p6, %p245_p5 }
  0x11   : > { %p327_p9 = scmp.lt.s32.totalorder %s4411_s8, 5  ;;  %s224_s16 = ssub.s32 %s4407_s30, %s5638_s12 }
  0x12   : > { %s229_s17 = sadd.s32 1, %s4391_s26  ;;  %s226_s18 = sor.u32 %s225_s13, %s224_s16 }
  0x13   : > { %p328_p10 = pnand %p3559_p7, %p327_p9  ;;  %p227_p11 = scmp.eq.s32.totalorder %s226_s18, 0 }
  0x14   : > { %s5601_s20 = sand.u32 (!%p328_p10), 1, %s4387_s25   ;;  %s3561_s21 = sshll.u32 (!%p328_p10), %s4395_s27, 3 }
  0x15   : > { %s4523_s19 = scalar_select %p227_p11, %s4391_s26, %s229_s17  }
  0x16   : > { %331 = sbr.rel (%p328_p10) target bundleno = 593 (0x251), region = 44  ;;  %s4530_s22 = sshll.u32 (!%p328_p10), %s5601_s20, 1 }
  0x17   : > { %p401_p12 = scmp.lt.s32.totalorder (!%p328_p10), %s4399_s28, 1  ;;  %p403_p13 = scmp.lt.s32.totalorder (!%p328_p10), %s3561_s21, 15 }
  0x18   : > { %s3565_s10 = sadd.s32 (!%p328_p10), 4294967295, %s4395_s27  ;;  %s428_s18 = sadd.s32 (!%p328_p10), 1, %s4395_s27 }
  0x19   : > { %p4542_p0 = scmp.gt.s32.totalorder (!%p328_p10), %s3565_s10, 0  ;;  %s5612_s0 = sld [smem:[#allocation9_spill]] (!%p328_p10) }
  0x1a   : > { %p4555_p1 = scmp.lt.s32.totalorder (!%p328_p10), %s428_s18, 1  ;;  %p3578_p5 = scmp.le.s32.totalorder (!%p328_p10), %s4395_s27, 0 }
  0x1b   : > { %v4413_v0 = vmov 0   ;;  %s402_s23 = scalar_select %p401_p12, %s4399_s28, 1  ;;  %v4562_v2 = vld [vmem:[%s5594_s1] ss:$0 sm:$0xff]  ;;  %vm723_vm0 = vcmask 1043456   ;;  %vm730_vm3 = vcmask 1040384  }
  0x1c   : > { %462 = vst [vmem:[#allocation2 + $0xc] sm:$0xf] %v4413_v0  ;;  %s5640_s21 = smov (!%p403_p13, %s3561_s21), 15  ;;  %vm724_vm1 = vsmask.f32 7938  ;;  %s5642_s10 = smov (!%p4542_p0, %s3565_s10), 0 }
  0x1d   : > { %459 = vst [vmem:[#allocation2] sm:$0xf] %v4413_v0  ;;  %s4538_s9 = sshll.u32 %s402_s23, 5  ;;  %s3562_s13 = sshll.u32 %s5640_s21, 1  ;;  %vm559_vm2 = vsmask.f32 256  ;;  %vm4631_vm5 = vmand %vm723_vm0, %vm724_vm1 }
  0x1e   : > { %460 = vst [vmem:[#allocation2 + $0x4] sm:$0xf] %v4413_v0  ;;  %s407_s17 = sadd.s32 %s4538_s9, %s3562_s13  ;;  %s5644_s18 = smov (!%p4555_p1, %s428_s18), 1  ;;  %vm560_vm4 = vsmask.f32 4368  ;;  %vm4643_vm6 = vmand %vm730_vm3, %vm559_vm2 }
  0x1f   : > { %461 = vst [vmem:[#allocation2 + $0x8] sm:$0x1] %v4413_v0  ;;  %v4552_v1 = vld [vmem:[%s5612_s0] ss:$0 sm:$0xff]  ;;  %s3564_s23 = sshll.u32 %s407_s17, 3  ;;  %s3566_s0 = sshll.u32 %s5642_s10, 3  ;;  %vm4658_vm7 = vmor %vm559_vm2, %vm560_vm4 }
  0x20   : > { %463 = vst [vmem:[#allocation2 + $0x10] sm:$0xf] %v4413_v0  ;;  %s4568_s20 = scalar_lea.vmem %s5595_s2, %s3564_s23  ;;  %s4573_s30 = scalar_lea.vmem %s5599_s6, %s3564_s23 }
  0x21   : > { %464 = vst [vmem:[#allocation2 + $0x14] sm:$0x1] %v4413_v0  ;;  %v489_v3 = vld [vmem:[%s4568_s20] sm:$0xff]  ;;  %v490_v4 = vld [vmem:[%s4568_s20 + $0x8] sm:$0xff]  ;;  %v491_v5 = vld [vmem:[%s4568_s20 + $0x10] sm:$0xff]  ;;  %p417_p2 = scmp.lt.s32.totalorder %s3566_s0, 15 }
  0x22   : > { %465 = vst [vmem:[#allocation2 + $0x18] sm:$0xf] %v4413_v0  ;;  %v508_v6 = vmul.f32 %v4552_v1, %v489_v3  ;;  %v509_v7 = vmul.f32 %v4552_v1, %v490_v4  ;;  %v510_v8 = vmul.f32 %v4552_v1, %v491_v5  ;;  %v492_v9 = vld [vmem:[%s4568_s20 + $0x18] sm:$0xff]  ;;  %v493_v10 = vld [vmem:[%s4568_s20 + $0x20] sm:$0xff]  ;;  %v494_v11 = vld [vmem:[%s4568_s20 + $0x28] sm:$0xff]  ;;  %s3570_s11 = sshll.u32 %s5644_s18, 3 }
  0x23   : > { %466 = vst [vmem:[#allocation2 + $0x1c] sm:$0xf] %v4413_v0  ;;  %v511_v12 = vmul.f32 %v4552_v1, %v492_v9  ;;  %v512_v13 = vmul.f32 %v4552_v1, %v493_v10  ;;  %v513_v14 = vmul.f32 %v4552_v1, %v494_v11  ;;  %v495_v15 = vld [vmem:[%s4568_s20 + $0x30] sm:$0xff]  ;;  %v496_v16 = vld [vmem:[%s4568_s20 + $0x38] sm:$0xff]  ;;  %p434_p4 = scmp.lt.s32.totalorder %s3570_s11, 15  ;;  %s5646_s0 = smov (!%p417_p2, %s3566_s0), 15 }
  0x24   : > { %467 = vst [vmem:[#allocation2 + $0x20] sm:$0x1] %v4413_v0  ;;  %v527_v17 = vadd.f32 %v4562_v2, %v508_v6  ;;  %v528_v18 = vadd.f32 %v4562_v2, %v509_v7  ;;  %v529_v19 = vadd.f32 %v4562_v2, %v510_v8  ;;  %v514_v20 = vmul.f32 %v4552_v1, %v495_v15  ;;  %s3567_s10 = sshll.u32 %s5646_s0, 1  ;;  %v497_v35 = vld [vmem:[%s4568_s20 + $0x40] sm:$0xff]  ;;  %v4622_v36 = vld [vmem:[#allocation2 + $0xc] sm:$0xf] }
  0x25   : > { %468 = vst [vmem:[#allocation2 + $0x24] sm:$0xf] %v4413_v0  ;;  %v530_v21 = vadd.f32 %v4562_v2, %v511_v12  ;;  %v531_v22 = vadd.f32 %v4562_v2, %v512_v13  ;;  %v532_v23 = vadd.f32 %v4562_v2, %v513_v14  ;;  %v515_v24 = vmul.f32 %v4552_v1, %v496_v16  ;;  %s5648_s11 = smov (!%p434_p4, %s3570_s11), 15  ;;  %s421_s16 = sadd.s32 %s3567_s10, %s4538_s9  ;;  %v498_v41 = vld [vmem:[%s4568_s20 + $0x48] sm:$0xff]  ;;  %v499_v11 = vld [vmem:[%s4568_s20 + $0x50] sm:$0xff] }
  0x26   : > { %469 = vst [vmem:[#allocation2 + $0x28] sm:$0xf] %v4413_v0  ;;  %v543_v25 = vpack.c.bf16 %v527_v17, %v527_v17  ;;  %v544_v26 = vpack.c.bf16 %v528_v18, %v528_v18  ;;  %v545_v27 = vpack.c.bf16 %v529_v19, %v529_v19  ;;  %v533_v28 = vadd.f32 %v4562_v2, %v514_v20  ;;  %s3571_s18 = sshll.u32 %s5648_s11, 1  ;;  %s3569_s23 = sshll.u32 %s421_s16, 3 }
  0x27   : > { %470 = vst [vmem:[#allocation2 + $0x2c] sm:$0x1] %v4413_v0  ;;  %v546_v29 = vpack.c.bf16 %v530_v21, %v530_v21  ;;  %v4615_v30 = vpack.c.bf16 %v531_v22, %v531_v22  ;;  %v534_v31 = vadd.f32 %v4562_v2, %v515_v24  ;;  %v4624_v40 = vpack.c.bf16 %v532_v23, %v532_v23  ;;  %s438_s21 = sadd.s32 %s3571_s18, %s4538_s9  ;;  %s4639_s17 = scalar_lea.vmem %s5596_s3, %s3569_s23 }
  0x28   : > { %471 = vst [vmem:[#allocation2 + $0x30] sm:$0xf] %v4413_v0  ;;  %v563_v32 = vshrl.u32 %v543_v25, 16  ;;  %v566_v33 = vshll.u32 %v543_v25, 16  ;;  %v571_v34 = vshrl.u32 %v544_v26, 16  ;;  %v574_v37 = vshll.u32 %v544_v26, 16 }
  0x29   : > { %472 = vst [vmem:[#allocation2 + $0x34] sm:$0xf] %v4413_v0  ;;  %v580_v38 = vshrl.u32 %v545_v27, 16  ;;  %v583_v39 = vshll.u32 %v545_v27, 16  ;;  %v732_v45 = vld [vmem:[#allocation2 + $0x14] sm:$0x1]  ;;  %v549_v47 = vpack.c.bf16 %v533_v28, %v533_v28  ;;  %v4648_v52 = vpack.c.bf16 %v534_v31, %v534_v31 }
  0x2a   : > { %473 = vst [vmem:[#allocation2 + $0x38] sm:$0x1] %v4413_v0  ;;  %v565_v42 = vrot.slane %v563_v32, 7  ;;  %v573_v44 = vrot.slane %v571_v34, 7  ;;  %v588_v46 = vshrl.u32 %v546_v29, 16  ;;  %s3573_s0 = sshll.u32 %s438_s21, 3  ;;  %v516_v62 = vmul.f32 %v4552_v1, %v497_v35 }
  0x2b   : > { %474 = vst [vmem:[#allocation2 + $0x3c] sm:$0xf] %v4413_v0  ;;  %v582_v49 = vrot.slane %v580_v38, 7  ;;  %v591_v50 = vshll.u32 %v546_v29, 16  ;;  %v597_v51 = vshrl.u32 %v4615_v30, 16  ;;  %s4654_s10 = scalar_lea.vmem %s5597_s4, %s3573_s0  ;;  %v600_v4 = vshll.u32 %v4615_v30, 16 }
  0x2c   : > { %475 = vst [vmem:[#allocation2 + $0x40] sm:$0xf] %v4413_v0  ;;  %v568_v53 = vor.u32 %v566_v33, %v565_v42  ;;  %v569_v55 = vrot.slane %v565_v42, 4  ;;  %v576_v56 = vor.u32 %v574_v37, %v573_v44  ;;  %v578_v57 = vrot.slane %v573_v44, 4  ;;  %v4662_v58 = vld [vmem:[#allocation2 + $0x18] sm:$0xf] }
  0x2d   : > { %476 = vst [vmem:[#allocation2 + $0x44] sm:$0x1] %v4413_v0  ;;  %v4665_v59 = vor.u32 %v583_v39, %v582_v49  ;;  %v590_v60 = vrot.slane %v588_v46, 7  ;;  %v599_v61 = vrot.slane %v597_v51, 7  ;;  %v586_v3 = vrot.slane %v582_v49, 4  ;;  %v500_v39 = vld [vmem:[%s4568_s20 + $0x58] sm:$0xff] }
  0x2e   : > { %477 = vst [vmem:[#allocation2 + $0x48] sm:$0xf] %v4413_v0  ;;  %v727_v63 = vsel %vm4631_vm5, %v568_v53, %v4622_v36  ;;  %v517_v5 = vmul.f32 %v4552_v1, %v498_v41  ;;  %v577_v6 = vsel %vm4658_vm7, %v569_v55, %v576_v56  ;;  %v733_v7 = vsel %vm4643_vm6, %v578_v57, %v732_v45  ;;  %v739_v10 = vld [vmem:[#allocation2 + $0x20] sm:$0x1]  ;;  %v4685_v13 = vld [vmem:[#allocation2 + $0x24] sm:$0xf] }
  0x2f   : > { %478 = vst [vmem:[#allocation2 + $0x4c] sm:$0xf] %v4413_v0  ;;  %v736_v8 = vsel %vm4631_vm5, %v4665_v59, %v4662_v58  ;;  %v593_v9 = vor.u32 %v591_v50, %v590_v60  ;;  %v595_v12 = vrot.slane %v590_v60, 4  ;;  %v605_v14 = vshrl.u32 %v4624_v40, 16  ;;  %v746_v25 = vld [vmem:[#allocation2 + $0x2c] sm:$0x1] }
  0x30   : > { %479 = vst [vmem:[#allocation2 + $0x50] sm:$0x1] %v4413_v0  ;;  %v608_v15 = vshll.u32 %v4624_v40, 16  ;;  %v614_v16 = vshrl.u32 %v549_v47, 16  ;;  %v602_v17 = vor.u32 %v600_v4, %v599_v61  ;;  %v603_v18 = vrot.slane %v599_v61, 4  ;;  %v502_v45 = vld [vmem:[%s4568_s20 + $0x68] sm:$0xff] }
  0x31   : > { %480 = vst [vmem:[#allocation2 + $0x54] sm:$0xf] %v4413_v0  ;;  %v617_v19 = vshll.u32 %v549_v47, 16  ;;  %v622_v20 = vshrl.u32 %v4648_v52, 16  ;;  %v594_v21 = vsel %vm4658_vm7, %v586_v3, %v593_v9  ;;  %v607_v22 = vrot.slane %v605_v14, 7  ;;  %v503_v46 = vld [vmem:[%s4568_s20 + $0x70] sm:$0xff] }
  0x32   : > { %481 = vst [vmem:[#allocation2 + $0x58] sm:$0xf] %v4413_v0  ;;  %v4694_v23 = vrot.slane %v614_v16, 7  ;;  %v625_v24 = vshll.u32 %v4648_v52, 16  ;;  %v535_v27 = vadd.f32 %v4562_v2, %v516_v62  ;;  %v536_v28 = vadd.f32 %v4562_v2, %v517_v5  ;;  %v749_v34 = vld [vmem:[#allocation2 + $0x30] sm:$0xf] }
  0x33   : > { %482 = vst [vmem:[#allocation2 + $0x5c] sm:$0x1] %v4413_v0  ;;  %v4698_v26 = vrot.slane %v622_v20, 7  ;;  %v518_v29 = vmul.f32 %v4552_v1, %v499_v11  ;;  %v740_v30 = vsel %vm4643_vm6, %v595_v12, %v739_v10  ;;  %v610_v31 = vor.u32 %v608_v15, %v607_v22  ;;  %v753_v57 = vld [vmem:[#allocation2 + $0x38] sm:$0x1] }
  0x34   : > { %483 = vst [vmem:[#allocation2 + $0x60] sm:$0xf] %v4413_v0  ;;  %v612_v32 = vrot.slane %v607_v22, 4  ;;  %v619_v33 = vor.u32 %v617_v19, %v4694_v23  ;;  %v743_v35 = vsel %vm4631_vm5, %v602_v17, %v4685_v13  ;;  %v620_v36 = vrot.slane %v4694_v23, 4  ;;  %v760_v15 = vld [vmem:[#allocation2 + $0x44] sm:$0x1] }
  0x35   : > { %484 = vst [vmem:[#allocation2 + $0x64] sm:$0xf] %v4413_v0  ;;  %v551_v37 = vpack.c.bf16 %v535_v27, %v535_v27  ;;  %v552_v38 = vpack.c.bf16 %v536_v28, %v536_v28  ;;  %v611_v40 = vsel %vm4658_vm7, %v603_v18, %v610_v31  ;;  %v627_v41 = vor.u32 %v625_v24, %v4698_v26  ;;  %v763_v23 = vld [vmem:[#allocation2 + $0x48] sm:$0xf]  ;;  %v504_v24 = vld [vmem:[%s4568_s20 + $0x78] sm:$0xff] }
  0x36   : > { %485 = vst [vmem:[#allocation2 + $0x68] sm:$0x1] %v4413_v0  ;;  %v629_v42 = vrot.slane %v4698_v26, 4  ;;  %v537_v44 = vadd.f32 %v4562_v2, %v518_v29  ;;  %v747_v47 = vsel %vm4643_vm6, %v612_v32, %v746_v25  ;;  %v750_v49 = vsel %vm4631_vm5, %v619_v33, %v749_v34 }
  0x37   : > { %486 = vst [vmem:[#allocation2 + $0x6c] sm:$0xf] %v4413_v0  ;;  %v631_v50 = vshrl.u32 %v551_v37, 16  ;;  %v634_v51 = vshll.u32 %v551_v37, 16  ;;  %v639_v52 = vshrl.u32 %v552_v38, 16  ;;  %v642_v53 = vshll.u32 %v552_v38, 16 }
  0x38   : > { %487 = vst [vmem:[#allocation2 + $0x70] sm:$0xf] %v4413_v0  ;;  %v553_v55 = vpack.c.bf16 %v537_v44, %v537_v44  ;;  %v519_v56 = vmul.f32 %v4552_v1, %v500_v39  ;;  %v521_v60 = vmul.f32 %v4552_v1, %v502_v45  ;;  %v522_v61 = vmul.f32 %v4552_v1, %v503_v46  ;;  %v770_v31 = vld [vmem:[#allocation2 + $0x54] sm:$0xf] }
  0x39   : > { %488 = vst [vmem:[#allocation2 + $0x74] sm:$0x1] %v4413_v0  ;;  %v501_v0 = vld [vmem:[%s4568_s20 + $0x60] sm:$0xff]  ;;  %v633_v58 = vrot.slane %v631_v50, 7  ;;  %v641_v62 = vrot.slane %v639_v52, 7  ;;  %v628_v14 = vsel %vm4658_vm7, %v620_v36, %v627_v41  ;;  %v754_v19 = vsel %vm4643_vm6, %v629_v42, %v753_v57  ;;  %s399_s20 = scalar_lea.vmem [#allocation3], %s4530_s22 }
  0x3a   : > { %728 = vst [vmem:[#allocation2 + $0xc] sm:$0xf] %v727_v63  ;;  %v520_v59 = vmul.f32 %v4552_v1, %v501_v0  ;;  %v648_v63 = vshrl.u32 %v553_v55, 16  ;;  %v651_v3 = vshll.u32 %v553_v55, 16  ;;  %v538_v4 = vadd.f32 %v4562_v2, %v519_v56  ;;  %v774_v50 = vld [vmem:[#allocation2 + $0x5c] sm:$0x1] }
  0x3b   : > { %729 = vst [vmem:[#allocation2 + $0x10] sm:$0xf] %v577_v6  ;;  %v636_v5 = vor.u32 %v634_v51, %v633_v58  ;;  %v756_v6 = vld [vmem:[#allocation2 + $0x3c] sm:$0xf]  ;;  %v540_v9 = vadd.f32 %v4562_v2, %v521_v60  ;;  %v644_v10 = vor.u32 %v642_v53, %v641_v62  ;;  %v646_v11 = vrot.slane %v641_v62, 4 }
  0x3c   : > { %734 = vst [vmem:[#allocation2 + $0x14] sm:$0x1] %v733_v7  ;;  %v637_v7 = vrot.slane %v633_v58, 4  ;;  %v650_v12 = vrot.slane %v648_v63, 7  ;;  %v554_v13 = vpack.c.bf16 %v538_v4, %v538_v4  ;;  %v541_v18 = vadd.f32 %v4562_v2, %v522_v61  ;;  %v777_v57 = vld [vmem:[#allocation2 + $0x60] sm:$0xf] }
  0x3d   : > { %737 = vst [vmem:[#allocation2 + $0x18] sm:$0xf] %v736_v8  ;;  %v539_v8 = vadd.f32 %v4562_v2, %v520_v59  ;;  %v556_v17 = vpack.c.bf16 %v540_v9, %v540_v9  ;;  %v757_v20 = vsel %vm4631_vm5, %v636_v5, %v756_v6  ;;  %v761_v29 = vsel %vm4643_vm6, %v646_v11, %v760_v15  ;;  %v781_v6 = vld [vmem:[#allocation2 + $0x68] sm:$0x1] }
  0x3e   : > { %738 = vst [vmem:[#allocation2 + $0x1c] sm:$0xf] %v594_v21  ;;  %v645_v21 = vsel %vm4658_vm7, %v637_v7, %v644_v10  ;;  %v653_v22 = vor.u32 %v651_v3, %v650_v12  ;;  %v656_v25 = vshrl.u32 %v554_v13, 16  ;;  %v659_v26 = vshll.u32 %v554_v13, 16 }
  0x3f   : > { %741 = vst [vmem:[#allocation2 + $0x20] sm:$0x1] %v740_v30  ;;  %v555_v16 = vpack.c.bf16 %v539_v8, %v539_v8  ;;  %v767_v30 = vld [vmem:[#allocation2 + $0x50] sm:$0x1]  ;;  %v673_v32 = vshrl.u32 %v556_v17, 16  ;;  %v676_v33 = vshll.u32 %v556_v17, 16  ;;  %v557_v34 = vpack.c.bf16 %v541_v18, %v541_v18 }
  0x40   : > { %744 = vst [vmem:[#allocation2 + $0x24] sm:$0xf] %v743_v35  ;;  %v654_v35 = vrot.slane %v650_v12, 4  ;;  %v658_v36 = vrot.slane %v656_v25, 7  ;;  %v523_v38 = vmul.f32 %v4552_v1, %v504_v24  ;;  %v764_v39 = vsel %vm4631_vm5, %v653_v22, %v763_v23 }
  0x41   : > { %745 = vst [vmem:[#allocation2 + $0x28] sm:$0xf] %v611_v40  ;;  %v665_v27 = vshrl.u32 %v555_v16, 16  ;;  %v668_v28 = vshll.u32 %v555_v16, 16  ;;  %v675_v40 = vrot.slane %v673_v32, 7  ;;  %v682_v41 = vshrl.u32 %v557_v34, 16 }
  0x42   : > { %748 = vst [vmem:[#allocation2 + $0x2c] sm:$0x1] %v747_v47  ;;  %v685_v42 = vshll.u32 %v557_v34, 16  ;;  %v661_v44 = vor.u32 %v659_v26, %v658_v36  ;;  %v663_v0 = vrot.slane %v658_v36, 4  ;;  %v542_v52 = vadd.f32 %v4562_v2, %v523_v38 }
  0x43   : > { %751 = vst [vmem:[#allocation2 + $0x30] sm:$0xf] %v750_v49  ;;  %v667_v37 = vrot.slane %v665_v27, 7  ;;  %v678_v47 = vor.u32 %v676_v33, %v675_v40  ;;  %v680_v49 = vrot.slane %v675_v40, 4  ;;  %v684_v51 = vrot.slane %v682_v41, 7 }
  0x44   : > { %752 = vst [vmem:[#allocation2 + $0x34] sm:$0xf] %v628_v14  ;;  %v662_v53 = vsel %vm4658_vm7, %v654_v35, %v661_v44  ;;  %v768_v55 = vsel %vm4643_vm6, %v663_v0, %v767_v30  ;;  %v558_v60 = vpack.c.bf16 %v542_v52, %v542_v52 }
  0x45   : > { %755 = vst [vmem:[#allocation2 + $0x38] sm:$0x1] %v754_v19  ;;  %v670_v45 = vor.u32 %v668_v28, %v667_v37  ;;  %v671_v46 = vrot.slane %v667_v37, 4  ;;  %v687_v59 = vor.u32 %v685_v42, %v684_v51  ;;  %v775_v61 = vsel %vm4643_vm6, %v680_v49, %v774_v50 }
  0x46   : > { %758 = vst [vmem:[#allocation2 + $0x3c] sm:$0xf] %v757_v20  ;;  %v690_v63 = vshrl.u32 %v558_v60, 16  ;;  %v693_v3 = vshll.u32 %v558_v60, 16  ;;  %v688_v4 = vrot.slane %v684_v51, 4 }
  0x47   : > { %759 = vst [vmem:[#allocation2 + $0x40] sm:$0xf] %v645_v21  ;;  %v771_v56 = vsel %vm4631_vm5, %v670_v45, %v770_v31  ;;  %v679_v58 = vsel %vm4658_vm7, %v671_v46, %v678_v47  ;;  %v778_v62 = vsel %vm4631_vm5, %v687_v59, %v777_v57 }
  0x48   : > { %762 = vst [vmem:[#allocation2 + $0x44] sm:$0x1] %v761_v29  ;;  %v692_v5 = vrot.slane %v690_v63, 7 }
  0x49   : > { %765 = vst [vmem:[#allocation2 + $0x48] sm:$0xf] %v764_v39 }
  0x4a   : > { %766 = vst [vmem:[#allocation2 + $0x4c] sm:$0xf] %v662_v53  ;;  %v695_v7 = vor.u32 %v693_v3, %v692_v5  ;;  %v697_v8 = vrot.slane %v692_v5, 4 }
  0x4b   : > { %769 = vst [vmem:[#allocation2 + $0x50] sm:$0x1] %v768_v55 }
  0x4c   : > { %772 = vst [vmem:[#allocation2 + $0x54] sm:$0xf] %v771_v56  ;;  %v696_v9 = vsel %vm4658_vm7, %v688_v4, %v695_v7  ;;  %v782_v10 = vsel %vm4643_vm6, %v697_v8, %v781_v6 }
  0x4d   : > { %773 = vst [vmem:[#allocation2 + $0x58] sm:$0xf] %v679_v58  ;;  %787 = sbr.rel (%p3578_p5) target bundleno = 99 (0x63), region = 48 }
  0x4e   : > { %776 = vst [vmem:[#allocation2 + $0x5c] sm:$0x1] %v775_v61 }
  0x4f   : > { %779 = vst [vmem:[#allocation2 + $0x60] sm:$0xf] %v778_v62 }
  0x50   : > { %780 = vst [vmem:[#allocation2 + $0x64] sm:$0xf] %v696_v9 }
  0x51   : > { %783 = vst [vmem:[#allocation2 + $0x68] sm:$0x1] %v782_v10 }
  0x52   : > { %v788_v11 = vld [vmem:[%s4639_s17 + $0x70] sm:$0xff]  ;;  %v789_v12 = vld [vmem:[%s4639_s17 + $0x78] sm:$0xff]  ;;  %v816_v25 = vld [vmem:[#allocation2] sm:$0xf] }
  0x53   : > { %v790_v13 = vmul.f32 %v4552_v1, %v788_v11  ;;  %v791_v14 = vmul.f32 %v4552_v1, %v789_v12  ;;  %v820_v26 = vld [vmem:[#allocation2 + $0x8] sm:$0x1] }
  0x55   : > { %v792_v15 = vadd.f32 %v4562_v2, %v790_v13  ;;  %v793_v16 = vadd.f32 %v4562_v2, %v791_v14 }
  0x57   : > { %v794_v17 = vpack.c.bf16 %v792_v15, %v792_v15  ;;  %v795_v18 = vpack.c.bf16 %v793_v16, %v793_v16 }
  0x59   : > { %v797_v19 = vshrl.u32 %v794_v17, 16  ;;  %v800_v20 = vshll.u32 %v794_v17, 16  ;;  %v805_v21 = vshrl.u32 %v795_v18, 16  ;;  %v808_v22 = vshll.u32 %v795_v18, 16 }
  0x5b   : > { %v799_v23 = vrot.slane %v797_v19, 7  ;;  %v807_v24 = vrot.slane %v805_v21, 7 }
  0x5d   : > { %v802_v27 = vor.u32 %v800_v20, %v799_v23  ;;  %v803_v28 = vrot.slane %v799_v23, 4  ;;  %v810_v29 = vor.u32 %v808_v22, %v807_v24  ;;  %v812_v30 = vrot.slane %v807_v24, 4 }
  0x5f   : > { %v817_v31 = vsel %vm4631_vm5, %v802_v27, %v816_v25  ;;  %v811_v32 = vsel %vm4658_vm7, %v803_v28, %v810_v29  ;;  %v821_v33 = vsel %vm4643_vm6, %v812_v30, %v820_v26 }
  0x60   : > { %818 = vst [vmem:[#allocation2] sm:$0xf] %v817_v31 }
  0x61   : > { %819 = vst [vmem:[#allocation2 + $0x4] sm:$0xf] %v811_v32 }
  0x62   : > { %822 = vst [vmem:[#allocation2 + $0x8] sm:$0x1] %v821_v33 }
  0x63 PF: > { %p3579_p6 = scmp.ge.s32.totalorder %s4395_s27, 1 }
  0x65   : > { %826 = sbr.rel (%p3579_p6) target bundleno = 123 (0x7b), region = 52 }
  0x6a   : > { %v827_v34 = vld [vmem:[%s4654_s10] sm:$0xff]  ;;  %v828_v35 = vld [vmem:[%s4654_s10 + $0x8] sm:$0xff]  ;;  %v860_v50 = vld [vmem:[#allocation2 + $0x74] sm:$0x1] }
  0x6b   : > { %v829_v36 = vmul.f32 %v4552_v1, %v827_v34  ;;  %v830_v37 = vmul.f32 %v4552_v1, %v828_v35  ;;  %v856_v49 = vld [vmem:[#allocation2 + $0x6c] sm:$0xf] }
  0x6d   : > { %v831_v38 = vadd.f32 %v4562_v2, %v829_v36  ;;  %v832_v39 = vadd.f32 %v4562_v2, %v830_v37 }
  0x6f   : > { %v833_v40 = vpack.c.bf16 %v831_v38, %v831_v38  ;;  %v834_v41 = vpack.c.bf16 %v832_v39, %v832_v39 }
  0x71   : > { %v836_v42 = vshrl.u32 %v833_v40, 16  ;;  %v839_v44 = vshll.u32 %v833_v40, 16  ;;  %v844_v0 = vshrl.u32 %v834_v41, 16  ;;  %v847_v45 = vshll.u32 %v834_v41, 16 }
  0x73   : > { %v838_v46 = vrot.slane %v836_v42, 7  ;;  %v846_v47 = vrot.slane %v844_v0, 7 }
  0x75   : > { %v841_v51 = vor.u32 %v839_v44, %v838_v46  ;;  %v842_v52 = vrot.slane %v838_v46, 4  ;;  %v849_v53 = vor.u32 %v847_v45, %v846_v47  ;;  %v851_v55 = vrot.slane %v846_v47, 4 }
  0x77   : > { %v857_v1 = vsel %vm4631_vm5, %v841_v51, %v856_v49  ;;  %v850_v2 = vsel %vm4658_vm7, %v842_v52, %v849_v53  ;;  %v861_v56 = vsel %vm4643_vm6, %v851_v55, %v860_v50 }
  0x78   : > { %858 = vst [vmem:[#allocation2 + $0x6c] sm:$0xf] %v857_v1 }
  0x79   : > { %859 = vst [vmem:[#allocation2 + $0x70] sm:$0xf] %v850_v2 }
  0x7a   : > { %862 = vst [vmem:[#allocation2 + $0x74] sm:$0x1] %v861_v56 }
  0x7b PF: > { %v4144_v57 = vld [vmem:[%s5598_s5 + $0x78] sm:$0xff]  ;;  %v4143_v43 = vld [vmem:[%s5598_s5 + $0x70] sm:$0xff]  ;;  %vm903_vm8 = vsmask.f32 3328  ;;  %v4801_v63 = vld [vmem:[#allocation2 + $0x20] sm:$0x1] }
  0x7c   : > { %4217 = vmatpush.bf16.msra.mxu1 %v4144_v57  ;;  %4218 = vmatpush.bf16.msra.mxu2 %v4144_v57  ;;  %v867_v58 = vld [vmem:[#allocation2 + $0x18] sm:$0xf]  ;;  %v4797_v54 = vld [vmem:[#allocation2 + $0x1c] sm:$0xf]  ;;  %v871_v62 = vld [vmem:[#allocation2 + $0x30] sm:$0xf] }
  0x7d   : > { %4219 = vmatpush.bf16.msra.mxu3 %v4144_v57  ;;  %1195 = vmatpush.bf16.msra.mxu0 %v4144_v57  ;;  %v955_v48 = vshrl.u32 %v867_v58, 16  ;;  %v958_v59 = vshll.u32 %v867_v58, 16  ;;  %v964_v60 = vshll.u32 %v4797_v54, 16  ;;  %v968_v61 = vshrl.u32 %v4797_v54, 16  ;;  %v4803_v5 = vld [vmem:[#allocation2 + $0x34] sm:$0xf] }
  0x7e   : > { %v4142_v6 = vld [vmem:[%s5598_s5 + $0x68] sm:$0xff]  ;;  %v1003_v9 = vshrl.u32 %v871_v62, 16  ;;  %v4810_v12 = vld [vmem:[#allocation2 + $0x38] sm:$0x1]  ;;  %v1006_v13 = vshll.u32 %v871_v62, 16  ;;  %v1012_v14 = vshll.u32 %v4803_v5, 16 }
  0x7f   : > { %v957_v3 = vrot.slane %v955_v48, 4  ;;  %v960_v4 = vrot.slane %v958_v59, 5  ;;  %v4808_v7 = vrot.slane %v964_v60, 5  ;;  %v970_v8 = vrot.slane %v968_v61, 4  ;;  %v875_v10 = vld [vmem:[#allocation2 + $0x48] sm:$0xf] }
  0x80   : > { %4220 = vmatpush.bf16.msra.mxu1 %v4143_v43  ;;  %4221 = vmatpush.bf16.msra.mxu2 %v4143_v43  ;;  %v1016_v15 = vshrl.u32 %v4803_v5, 16  ;;  %v974_v17 = vshll.u32 %v4801_v63, 16  ;;  %v1005_v18 = vrot.slane %v1003_v9, 4  ;;  %v876_v19 = vld [vmem:[#allocation2 + $0x4c] sm:$0xf]  ;;  %v1051_v20 = vshrl.u32 %v875_v10, 16 }
  0x81   : > { %4222 = vmatpush.bf16.msra.mxu3 %v4143_v43  ;;  %1196 = vmatpush.bf16.msra.mxu0 %v4143_v43  ;;  %v961_v11 = vor.u32 %v960_v4, %v957_v3  ;;  %v971_v16 = vor.u32 %v970_v8, %v4808_v7  ;;  %vm904_vm9 = vsmask.f32 7440  ;;  %v1008_v21 = vrot.slane %v1006_v13, 5  ;;  %v4141_v24 = vld [vmem:[%s5598_s5 + $0x60] sm:$0xff]  ;;  %v901_v31 = vld [vmem:[#allocation2 + $0x50] sm:$0x1] }
  0x82   : > { %v4816_v22 = vrot.slane %v1012_v14, 5  ;;  %v1018_v23 = vrot.slane %v1016_v15, 4  ;;  %v1022_v25 = vshll.u32 %v4810_v12, 16  ;;  %v1053_v26 = vrot.slane %v1051_v20, 4  ;;  %v863_v33 = vld [vmem:[#allocation2] sm:$0xf]  ;;  %vm4825_vm10 = vmor %vm903_vm8, %vm904_vm9 }
  0x83   : > { %v1054_v27 = vshll.u32 %v875_v10, 16  ;;  %v962_v28 = vrot.slane %v961_v11, 4  ;;  %v1009_v29 = vor.u32 %v1008_v21, %v1005_v18  ;;  %v1060_v32 = vshll.u32 %v876_v19, 16  ;;  %v4140_v41 = vld [vmem:[%s5598_s5 + $0x58] sm:$0xff]  ;;  %v4832_v45 = vld [vmem:[#allocation2 + $0x4] sm:$0xf] }
  0x84   : > { %4223 = vmatpush.bf16.msra.mxu1 %v4142_v6  ;;  %4224 = vmatpush.bf16.msra.mxu2 %v4142_v6  ;;  %v1019_v30 = vor.u32 %v1018_v23, %v4816_v22  ;;  %v972_v35 = vrot.slane %v971_v16, 4  ;;  %v976_v36 = vrot.slane %v974_v17, 5  ;;  %v1064_v38 = vshrl.u32 %v876_v19, 16  ;;  %v4839_v1 = vld [vmem:[#allocation2 + $0x8] sm:$0x1]  ;;  %v4139_v48 = vld [vmem:[%s5598_s5 + $0x50] sm:$0xff] }
  0x85   : > { %4225 = vmatpush.bf16.msra.mxu3 %v4142_v6  ;;  %1197 = vmatpush.bf16.msra.mxu0 %v4142_v6  ;;  %v1056_v37 = vrot.slane %v1054_v27, 5  ;;  %v1010_v39 = vrot.slane %v1009_v29, 4  ;;  %v1062_v40 = vrot.slane %v1060_v32, 5  ;;  %v1070_v0 = vshll.u32 %v901_v31, 16  ;;  %v869_v58 = vld [vmem:[#allocation2 + $0x24] sm:$0xf] }
  0x86   : > { %v1066_v44 = vrot.slane %v1064_v38, 4  ;;  %v907_v46 = vshrl.u32 %v863_v33, 16  ;;  %v967_v47 = vsel %vm4825_vm10, %v962_v28, %v4808_v7  ;;  %v1020_v49 = vrot.slane %v1019_v30, 4  ;;  %v4851_v3 = vld [vmem:[#allocation2 + $0x28] sm:$0xf]  ;;  %s4117_s18 = sshll.u32 %s4399_s28, 1 }
  0x87   : > { %v1057_v42 = vor.u32 %v1056_v37, %v1053_v26  ;;  %v1024_v50 = vrot.slane %v1022_v25, 5  ;;  %v910_v51 = vshll.u32 %v863_v33, 16  ;;  %v977_v52 = vsel %vm4825_vm10, %v972_v35, %v976_v36  ;;  %v873_v18 = vld [vmem:[#allocation2 + $0x3c] sm:$0xf]  ;;  %v4138_v19 = vld [vmem:[%s5598_s5 + $0x48] sm:$0xff]  ;;  %s3381_s23 = sadd.s32 %s4395_s27, %s4117_s18  ;;  %s3385_s28 = sshll.u32 %s399_s20, 4  ;;  %s3386_s28 = int_to_ptr.vmem [resolvable:$true] %s3385_s28 }
  0x88   : > { %4226 = vmatpush.bf16.msra.mxu1 %v4141_v24  ;;  %4227 = vmatpush.bf16.msra.mxu2 %v4141_v24  ;;  %v1067_v55 = vor.u32 %v1066_v44, %v1062_v40  ;;  %v1072_v2 = vrot.slane %v1070_v0, 5  ;;  %v909_v56 = vrot.slane %v907_v46, 4  ;;  %v916_v43 = vshll.u32 %v4832_v45, 16  ;;  %v4875_v33 = vld [vmem:[#allocation2 + $0x2c] sm:$0x1]  ;;  %s4118_s21 = sshll.u32 %s3381_s23, 1 }
  0x89   : > { %4228 = vmatpush.bf16.msra.mxu3 %v4141_v24  ;;  %1198 = vmatpush.bf16.msra.mxu0 %v4141_v24  ;;  %v1058_v53 = vrot.slane %v1057_v42, 4  ;;  %v912_v57 = vrot.slane %v910_v51, 5  ;;  %v4845_v59 = vunpack.c.l.b16 %v967_v47  ;;  %v1015_v60 = vsel %vm4825_vm10, %v1010_v39, %v4816_v22  ;;  %v4865_v24 = vld [vmem:[#allocation2 + $0x40] sm:$0xf]  ;;  %v877_v0 = vld [vmem:[#allocation2 + $0x54] sm:$0xf] }
  0x8a   : > { %v1068_v61 = vrot.slane %v1067_v55, 4  ;;  %v920_v62 = vshrl.u32 %v4832_v45, 16  ;;  %v1025_v4 = vsel %vm4825_vm10, %v1020_v49, %v1024_v50  ;;  %v918_v7 = vrot.slane %v916_v43, 5  ;;  %v4137_v39 = vld [vmem:[%s5598_s5 + $0x40] sm:$0xff]  ;;  %v4152_v55 = vld [vmem:[%s5598_s5 + $0xb8] sm:$0xff]  ;;  %s5624_s17 = sand.u32 1, %s4387_s25  }
  0x8b   : > { %v913_v6 = vor.u32 %v912_v57, %v909_v56  ;;  %v926_v8 = vshll.u32 %v4839_v1, 16  ;;  %v1063_v9 = vsel %vm4825_vm10, %v1058_v53, %v1062_v40  ;;  %v979_v11 = vshrl.u32 %v869_v58, 16  ;;  %v4884_v47 = vld [vmem:[#allocation2 + $0x44] sm:$0x1]  ;;  %v4896_v43 = vld [vmem:[#allocation2 + $0x58] sm:$0xf] }
  0x8c   : > { %4229 = vmatpush.bf16.msra.mxu1 %v4140_v41  ;;  %4230 = vmatpush.bf16.msra.mxu2 %v4140_v41  ;;  %v922_v10 = vrot.slane %v920_v62, 4  ;;  %v982_v13 = vshll.u32 %v869_v58, 16  ;;  %v1073_v14 = vsel %vm4825_vm10, %v1068_v61, %v1072_v2  ;;  %v988_v17 = vshll.u32 %v4851_v3, 16  ;;  %v4136_v2 = vld [vmem:[%s5598_s5 + $0x38] sm:$0xff]  ;;  %s3367_s0 = scalar_lea.sflag [#allocation4], %s5624_s17  ;;  %s4337_s18 = scalar_lea.hbm %s5600_s7, 8 }
  0x8d   : > { %4231 = vmatpush.bf16.msra.mxu3 %v4140_v41  ;;  %1199 = vmatpush.bf16.msra.mxu0 %v4140_v41  ;;  %v914_v15 = vrot.slane %v913_v6, 4  ;;  %v928_v16 = vrot.slane %v926_v8, 5  ;;  %v981_v21 = vrot.slane %v979_v11, 4  ;;  %v992_v23 = vshrl.u32 %v4851_v3, 16  ;;  %v865_v8 = vld [vmem:[#allocation2 + $0xc] sm:$0xf] }
  0x8e   : > { %v923_v20 = vor.u32 %v922_v10, %v918_v7  ;;  %v984_v22 = vrot.slane %v982_v13, 5  ;;  %v1120_v25 = vunpack.c.l.b16 %v977_v52  ;;  %v1123_v26 = vunpack.c.l.b16 %v1015_v60  ;;  %v4901_v60 = vld [vmem:[#allocation2 + $0x5c] sm:$0x1] }
  0x8f   : > { %v1124_v27 = vunpack.c.l.b16 %v1025_v4  ;;  %v919_v28 = vsel %vm4825_vm10, %v914_v15, %v918_v7  ;;  %v4869_v29 = vunpack.c.l.b16 %v1063_v9  ;;  %v4871_v30 = vunpack.c.l.b16 %v1073_v14  ;;  %v4168_v9 = vld [vmem:[%s5598_s5 + $0xf8] sm:$0xff]  ;;  %v4151_v15 = vld [vmem:[%s5598_s5 + $0xb0] sm:$0xff] }
  0x90   : > { %4232 = vmatpush.bf16.msra.mxu1 %v4139_v48  ;;  %4233 = vmatpush.bf16.msra.mxu2 %v4139_v48  ;;  %v924_v31 = vrot.slane %v923_v20, 4  ;;  %v4873_v32 = vrot.slane %v988_v17, 5  ;;  %v994_v35 = vrot.slane %v992_v23, 4  ;;  %v1027_v36 = vshrl.u32 %v873_v18, 16  ;;  %v4176_v10 = vld [vmem:[%s5598_s5 + $0x138] sm:$0xff] }
  0x91   : > { %4234 = vmatpush.bf16.msra.mxu3 %v4139_v48  ;;  %1200 = vmatpush.bf16.msra.mxu0 %v4139_v48  ;;  %v1030_v37 = vshll.u32 %v873_v18, 16  ;;  %v1036_v38 = vshll.u32 %v4865_v24, 16  ;;  %v1115_v41 = vunpack.c.l.b16 %v919_v28  ;;  %v985_v42 = vor.u32 %v984_v22, %v981_v21 }
  0x92   : > { %v929_v40 = vsel %vm4825_vm10, %v924_v31, %v928_v16  ;;  %v1040_v44 = vshrl.u32 %v4865_v24, 16  ;;  %v1029_v49 = vrot.slane %v1027_v36, 4  ;;  %v1133_v52 = vpack.c.b16 %v1120_v25, %v4845_v59  ;;  %v4135_v16 = vld [vmem:[%s5598_s5 + $0x30] sm:$0xff] }
  0x93   : > { %v1116_v46 = vunpack.c.l.b16 %v929_v40  ;;  %v1032_v50 = vrot.slane %v1030_v37, 5  ;;  %v4886_v51 = vrot.slane %v1036_v38, 5  ;;  %v1135_v53 = vpack.c.b16 %v1124_v27, %v1123_v26  ;;  %v4920_v25 = vld [vmem:[#allocation2 + $0x10] sm:$0xf]  ;;  %v4922_v31 = vld [vmem:[#allocation2 + $0x14] sm:$0x1] }
  0x94   : > { %4235 = vmatpush.bf16.msra.mxu1 %v4138_v19  ;;  %4236 = vmatpush.bf16.msra.mxu2 %v4138_v19  ;;  %v998_v56 = vshll.u32 %v4875_v33, 16  ;;  %v1042_v57 = vrot.slane %v1040_v44, 4  ;;  %v1137_v58 = vpack.c.b16 %v4871_v30, %v4869_v29  ;;  %v995_v48 = vor.u32 %v994_v35, %v4873_v32  ;;  %v4167_v35 = vld [vmem:[%s5598_s5 + $0xf0] sm:$0xff] }
  0x95   : > { %4237 = vmatpush.bf16.msra.mxu3 %v4138_v19  ;;  %1201 = vmatpush.bf16.msra.mxu0 %v4138_v19  ;;  %v1033_v59 = vor.u32 %v1032_v50, %v1029_v49  ;;  %v1075_v61 = vshrl.u32 %v877_v0, 16  ;;  %v1131_v62 = vpack.c.b16 %v1116_v46, %v1115_v41  ;;  %v1046_v6 = vshll.u32 %v4884_v47, 16  ;;  %v4175_v36 = vld [vmem:[%s5598_s5 + $0x130] sm:$0xff]  ;;  %v4150_v41 = vld [vmem:[%s5598_s5 + $0xa8] sm:$0xff] }
  0x96   : > { %v1043_v4 = vor.u32 %v1042_v57, %v4886_v51  ;;  %v1078_v7 = vshll.u32 %v877_v0, 16  ;;  %v986_v11 = vrot.slane %v985_v42, 4  ;;  %v1084_v14 = vshll.u32 %v4896_v43, 16  ;;  %v4134_v42 = vld [vmem:[%s5598_s5 + $0x28] sm:$0xff] }
  0x97   : > { %v1077_v13 = vrot.slane %v1075_v61, 4  ;;  %v1000_v17 = vrot.slane %v998_v56, 5  ;;  %v1088_v19 = vshrl.u32 %v4896_v43, 16  ;;  %v1094_v20 = vshll.u32 %v4901_v60, 16 }
  0x98   : > { %4238 = vmatpush.bf16.msra.mxu1 %v4137_v39  ;;  %4239 = vmatpush.bf16.msra.mxu2 %v4137_v39  ;;  %v1080_v18 = vrot.slane %v1078_v7, 5  ;;  %v996_v21 = vrot.slane %v995_v48, 4  ;;  %v1034_v22 = vrot.slane %v1033_v59, 4  ;;  %v1086_v23 = vrot.slane %v1084_v14, 5  ;;  %v4166_v48 = vld [vmem:[%s5598_s5 + $0xe8] sm:$0xff] }
  0x99   : > { %4240 = vmatpush.bf16.msra.mxu3 %v4137_v39  ;;  %1202 = vmatpush.bf16.msra.mxu0 %v4137_v39  ;;  %v931_v26 = vshrl.u32 %v865_v8, 16  ;;  %v1044_v27 = vrot.slane %v1043_v4, 4  ;;  %v1048_v28 = vrot.slane %v1046_v6, 5  ;;  %v1090_v30 = vrot.slane %v1088_v19, 4  ;;  %v4149_v4 = vld [vmem:[%s5598_s5 + $0xa0] sm:$0xff] }
  0x9a   : > { %v1081_v29 = vor.u32 %v1080_v18, %v1077_v13  ;;  %v991_v37 = vsel %vm4825_vm10, %v986_v11, %v4873_v32  ;;  %v1096_v38 = vrot.slane %v1094_v20, 5  ;;  %v934_v40 = vshll.u32 %v865_v8, 16  ;;  %v4133_v6 = vld [vmem:[%s5598_s5 + $0x20] sm:$0xff]  ;;  %v4965_v19 = vld [vmem:[#allocation2 + $0x10] sm:$0xf] }
  0x9b   : > { %1213 = vmatmul.bf16.vlgmr.msra.gmra.mxu1 %v1133_v52  ;;  %1223 = vmatmul.bf16.vlgmr.msra.gmra.mxu2 %v1135_v53  ;;  %v933_v39 = vrot.slane %v931_v26, 4  ;;  %v1091_v0 = vor.u32 %v1090_v30, %v1086_v23  ;;  %v940_v46 = vshll.u32 %v4920_v25, 16  ;;  %v944_v49 = vshrl.u32 %v4920_v25, 16 }
  0x9c   : > { %1569 = vmatpush.bf16.msrb.mxu2 %v4152_v55  ;;  %1340 = vmatpush.bf16.msrb.mxu1 %v4136_v2  ;;  %v1082_v44 = vrot.slane %v1081_v29, 4  ;;  %v1001_v32 = vsel %vm4825_vm10, %v996_v21, %v1000_v17  ;;  %v1039_v50 = vsel %vm4825_vm10, %v1034_v22, %v4886_v51  ;;  %v936_v52 = vrot.slane %v934_v40, 5  ;;  %v4174_v51 = vld [vmem:[%s5598_s5 + $0x128] sm:$0xff]  ;;  %v4165_v21 = vld [vmem:[%s5598_s5 + $0xe0] sm:$0xff]  ;;  %v4132_v29 = vld [vmem:[%s5598_s5 + $0x18] sm:$0xff] }
  0x9d   : > { %1233 = vmatmul.bf16.vlgmr.msra.gmra.mxu3 %v1137_v58  ;;  %1203 = vmatmul.bf16.vlgmr.msra.gmra.mxu0 %v1131_v62  ;;  %v950_v53 = vshll.u32 %v4922_v31, 16  ;;  %v1049_v55 = vsel %vm4825_vm10, %v1044_v27, %v1048_v28  ;;  %v1092_v2 = vrot.slane %v1091_v0, 4  ;;  %v942_v56 = vrot.slane %v940_v46, 5  ;;  %v1828_v58 = vld [vmem:[#allocation2 + $0xc] sm:$0xf]  ;;  %v4173_v22 = vld [vmem:[%s5598_s5 + $0x120] sm:$0xff] }
  0x9e   : > { %1763 = vmatpush.bf16.msrb.mxu3 %v4168_v9  ;;  %2141 = vmatpush.bf16.msrb.mxu0 %v4176_v10  ;;  %v946_v57 = vrot.slane %v944_v49, 4  ;;  %v1121_v59 = vunpack.c.l.b16 %v991_v37  ;;  %v1087_v61 = vsel %vm4825_vm10, %v1082_v44, %v1086_v23  ;;  %v937_v62 = vor.u32 %v936_v52, %v933_v39  ;;  %v4148_v28 = vld [vmem:[%s5598_s5 + $0x98] sm:$0xff] }
  0x9f   : > { %v1122_v7 = vunpack.c.l.b16 %v1001_v32  ;;  %v1097_v8 = vsel %vm4825_vm10, %v1092_v2, %v1096_v38  ;;  %v952_v10 = vrot.slane %v950_v53, 5  ;;  %v1125_v11 = vunpack.c.l.b16 %v1039_v50  ;;  %v4164_v44 = vld [vmem:[%s5598_s5 + $0xd8] sm:$0xff]  ;;  %v1389_v50 = vld [vmem:[#allocation2] sm:$0xe]  ;;  %v4147_v2 = vld [vmem:[%s5598_s5 + $0x90] sm:$0xff] }
  0xa0   : > { %1570 = vmatpush.bf16.msrb.mxu2 %v4151_v15  ;;  %1341 = vmatpush.bf16.msrb.mxu1 %v4135_v16  ;;  %v947_v9 = vor.u32 %v946_v57, %v942_v56  ;;  %v1126_v13 = vunpack.c.l.b16 %v1049_v55  ;;  %v938_v14 = vrot.slane %v937_v62, 4  ;;  %v1853_v15 = vshrl.u32 %v1828_v58, 16  ;;  %v4172_v32 = vld [vmem:[%s5598_s5 + $0x118] sm:$0xff]  ;;  %v4163_v57 = vld [vmem:[%s5598_s5 + $0xd0] sm:$0xff] }
  0xa1   : > { %v1129_v16 = vunpack.c.l.b16 %v1087_v61  ;;  %v1130_v17 = vunpack.c.l.b16 %v1097_v8  ;;  %v1856_v20 = vshll.u32 %v1828_v58, 16  ;;  %v1134_v27 = vpack.c.b16 %v1122_v7, %v1121_v59  ;;  %v4171_v59 = vld [vmem:[%s5598_s5 + $0x110] sm:$0xff]  ;;  %v1831_v7 = vld [vmem:[#allocation2 + $0x18] sm:$0xf]  ;;  %v4130_v8 = vld [vmem:[%s5598_s5 + $0x8] sm:$0xff] }
  0xa2   : > { %1764 = vmatpush.bf16.msrb.mxu3 %v4167_v35  ;;  %2142 = vmatpush.bf16.msrb.mxu0 %v4175_v36  ;;  %v948_v18 = vrot.slane %v947_v9, 4  ;;  %v943_v23 = vsel %vm4825_vm10, %v938_v14, %v942_v56  ;;  %v1855_v26 = vrot.slane %v1853_v15, 4  ;;  %v4983_v36 = vld [vmem:[#allocation2 + $0x14] sm:$0x1]  ;;  %v1136_v38 = vpack.c.b16 %v1126_v13, %v1125_v11  ;;  %v5018_v9 = vld [vmem:[#allocation2 + $0x1c] sm:$0xf] }
  0xa3   : > { %v1117_v35 = vunpack.c.l.b16 %v943_v23  ;;  %v1858_v37 = vrot.slane %v1856_v20, 5  ;;  %v1862_v40 = vshll.u32 %v4965_v19, 16  ;;  %v1418_v0 = vrot.slane %v4832_v45, 5  ;;  %v4131_v45 = vld [vmem:[%s5598_s5 + $0x10] sm:$0xff]  ;;  %v4162_v15 = vld [vmem:[%s5598_s5 + $0xc8] sm:$0xff]  ;;  %v4129_v23 = vld [vmem:[%s5598_s5] sm:$0xff] }
  0xa4   : > { %1571 = vmatpush.bf16.msrb.mxu2 %v4150_v41  ;;  %1342 = vmatpush.bf16.msrb.mxu1 %v4134_v42  ;;  %v953_v30 = vsel %vm4825_vm10, %v948_v18, %v952_v10  ;;  %v1866_v41 = vshrl.u32 %v4965_v19, 16  ;;  %v1138_v42 = vpack.c.b16 %v1130_v17, %v1129_v16  ;;  %v1872_v55 = vshll.u32 %v4983_v36, 16  ;;  %v4170_v16 = vld [vmem:[%s5598_s5 + $0x108] sm:$0xff] }
  0xa5   : > { %v1118_v39 = vunpack.c.l.b16 %v953_v30  ;;  %v1859_v46 = vor.u32 %v1858_v37, %v1855_v26  ;;  %v1864_v52 = vrot.slane %v1862_v40, 5  ;;  %vm1413_vm11 = vcmask 1042432   ;;  %v1391_v40 = vld [vmem:[#allocation2 + $0x18] sm:$0xe] }
  0xa6   : > { %1765 = vmatpush.bf16.msrb.mxu3 %v4166_v48  ;;  %2143 = vmatpush.bf16.msrb.mxu0 %v4174_v51  ;;  %v1868_v53 = vrot.slane %v1866_v41, 4  ;;  %vm1414_vm12 = vcmask 1046532   ;;  %v3692_v58 = vrot.slane %v1389_v50, 9  ;;  %v1420_v48 = vrot.slane %v1418_v0, 4  ;;  %v4161_v41 = vld [vmem:[%s5598_s5 + $0xc0] sm:$0xff] }
  0xa7   : > { %v1132_v49 = vpack.c.b16 %v1118_v39, %v1117_v35  ;;  %v1421_v51 = vrot.slane %v4839_v1, 5  ;;  %vm5008_vm13 = vmor %vm1413_vm11, %vm1414_vm12  ;;  %v1860_v62 = vrot.slane %v1859_v46, 4  ;;  %v4146_v1 = vld [vmem:[%s5598_s5 + $0x88] sm:$0xff]  ;;  %v1877_v13 = vshrl.u32 %v1831_v7, 16  ;;  %v5063_v50 = vld [vmem:[#allocation2 + $0x20] sm:$0x1] }
  0xa8   : > { %1572 = vmatpush.bf16.msrb.mxu2 %v4149_v4  ;;  %1343 = vmatpush.bf16.msrb.mxu1 %v4133_v6  ;;  %v1869_v56 = vor.u32 %v1868_v53, %v1864_v52  ;;  %v1874_v6 = vrot.slane %v1872_v55, 5  ;;  %v1419_v10 = vsel %vm5008_vm13, %v3692_v58, %v1418_v0  ;;  %v1880_v14 = vshll.u32 %v1831_v7, 16  ;;  %v4121_v53 = vld [vmem:[#allocation2] sm:$0xff]  ;;  %v1390_v58 = vld [vmem:[#allocation2 + $0xc] sm:$0xe]  ;;  %v4207_v7 = vld [vmem:[%s5598_s5 + $0x1f0] sm:$0xff] }
  0xa9   : > { %v1422_v11 = vsel %vm5008_vm13, %v1420_v48, %v1421_v51  ;;  %v1865_v17 = vsel %vm4825_vm10, %v1860_v62, %v1864_v52  ;;  %v1886_v20 = vshll.u32 %v5018_v9, 16  ;;  %v1489_v26 = vunpack.c.l.b16 %v1419_v10 }
  0xaa   : > { %1766 = vmatpush.bf16.msrb.mxu3 %v4165_v21  ;;  %2144 = vmatpush.bf16.msrb.mxu0 %v4173_v22  ;;  %v1870_v4 = vrot.slane %v1869_v56, 4  ;;  %v1890_v21 = vshrl.u32 %v5018_v9, 16  ;;  %v4145_v22 = vld [vmem:[%s5598_s5 + $0x80] sm:$0xff]  ;;  %v1432_v30 = vrot.slane %v4797_v54, 5  ;;  %v2061_v35 = vunpack.c.l.b16 %v1865_v17  ;;  %v4153_v56 = vld [vmem:[#allocation2 + $0xc] sm:$0xff] }
  0xab   : > { %1218 = vmatmul.bf16.gmra.mxu1 %v1134_v27  ;;  %1228 = vmatmul.bf16.gmra.mxu2 %v1136_v38  ;;  %v1490_v27 = vunpack.c.l.b16 %v1422_v11  ;;  %v1879_v38 = vrot.slane %v1877_v13, 4  ;;  %v1882_v39 = vrot.slane %v1880_v14, 5  ;;  %v3694_v46 = vrot.slane %v1391_v40, 9  ;;  %v1834_v14 = vld [vmem:[#allocation2 + $0x24] sm:$0xf] }
  0xac   : > { %1573 = vmatpush.bf16.msrb.mxu2 %v4148_v28  ;;  %1344 = vmatpush.bf16.msrb.mxu1 %v4132_v29  ;;  %v1875_v18 = vsel %vm4825_vm10, %v1870_v4, %v1874_v6  ;;  %v4200_v28 = vld [vmem:[%s5598_s5 + $0x1b8] sm:$0xff]  ;;  %v1892_v0 = vrot.slane %v1890_v21, 4  ;;  %v1434_v54 = vrot.slane %v1432_v30, 4  ;;  %v1435_v52 = vrot.slane %v4801_v63, 5  ;;  %v4199_v63 = vld [vmem:[%s5598_s5 + $0x1b0] sm:$0xff] }
  0xad   : > { %1238 = vmatmul.bf16.gmra.mxu3 %v1138_v42  ;;  %1208 = vmatmul.bf16.gmra.mxu0 %v1132_v49  ;;  %v4184_v29 = vld [vmem:[%s5598_s5 + $0x178] sm:$0xff]  ;;  %v2062_v37 = vunpack.c.l.b16 %v1875_v18  ;;  %v4169_v42 = vld [vmem:[%s5598_s5 + $0x100] sm:$0xff]  ;;  %v1505_v55 = vpack.c.b16 %v1490_v27, %v1489_v26  ;;  %v4183_v4 = vld [vmem:[%s5598_s5 + $0x170] sm:$0xff]  ;;  %v1428_v11 = vrot.slane %v4922_v31, 5  ;;  %v1901_v21 = vshrl.u32 %v1834_v14, 16 }
  0xae   : > { %1767 = vmatpush.bf16.msrb.mxu3 %v4164_v44  ;;  %2145 = vmatpush.bf16.msrb.mxu0 %v4172_v32  ;;  %v5055_v44 = vrot.slane %v1886_v20, 5  ;;  %v4208_v49 = vld [vmem:[%s5598_s5 + $0x1f8] sm:$0xff]  ;;  %v1436_v48 = vsel %vm5008_vm13, %v1434_v54, %v1435_v52  ;;  %v4198_v20 = vld [vmem:[%s5598_s5 + $0x1a8] sm:$0xff] }
  0xaf   : > { %v4216_v32 = vld [vmem:[%s5598_s5 + $0x238] sm:$0xff]  ;;  %v1494_v6 = vunpack.c.l.b16 %v1436_v48  ;;  %v4182_v31 = vld [vmem:[%s5598_s5 + $0x168] sm:$0xff]  ;;  %v1903_v40 = vrot.slane %v1901_v21, 4 }
  0xb0   : > { %1574 = vmatpush.bf16.msrb.mxu2 %v4147_v2  ;;  %1345 = vmatpush.bf16.msrb.mxu1 %v4131_v45  ;;  %v1425_v2 = vrot.slane %v4920_v25, 5  ;;  %v1433_v45 = vsel %vm5008_vm13, %v3694_v46, %v1432_v30  ;;  %v1893_v62 = vor.u32 %v1892_v0, %v5055_v44  ;;  %v1896_v25 = vshll.u32 %v5063_v50, 16  ;;  %v4214_v26 = vld [vmem:[%s5598_s5 + $0x228] sm:$0xff] }
  0xb1   : > { %v1493_v51 = vunpack.c.l.b16 %v1433_v45  ;;  %v1439_v46 = vrot.slane %v4851_v3, 5 }
  0xb2   : > { %1768 = vmatpush.bf16.msrb.mxu3 %v4163_v57  ;;  %2146 = vmatpush.bf16.msrb.mxu0 %v4171_v59  ;;  %v2077_v57 = vpack.c.b16 %v2062_v37, %v2061_v35  ;;  %v1883_v59 = vor.u32 %v1882_v39, %v1879_v38  ;;  %v1427_v10 = vrot.slane %v1425_v2, 4  ;;  %v1894_v17 = vrot.slane %v1893_v62, 4 }
  0xb3   : > { %v5086_v13 = vpack.c.b16 %v1494_v6, %v1493_v51  ;;  %v1898_v18 = vrot.slane %v1896_v25, 5  ;;  %v4154_v51 = vld [vmem:[#allocation2 + $0x18] sm:$0xff] }
  0xb4   : > { %1575 = vmatpush.bf16.msrb.mxu2 %v4146_v1  ;;  %1346 = vmatpush.bf16.msrb.mxu1 %v4130_v8  ;;  %v4215_v1 = vld [vmem:[%s5598_s5 + $0x230] sm:$0xff]  ;;  %v3693_v8 = vrot.slane %v1390_v58, 9 }
  0xb5   : > { %v1899_v37 = vsel %vm4825_vm10, %v1894_v17, %v1898_v18 }
  0xb6   : > { %1769 = vmatpush.bf16.msrb.mxu3 %v4162_v15  ;;  %2147 = vmatpush.bf16.msrb.mxu0 %v4170_v16  ;;  %v5088_v15 = vld [vmem:[#allocation2 + $0x28] sm:$0xf]  ;;  %v1884_v16 = vrot.slane %v1883_v59, 4  ;;  %v1426_v27 = vsel %vm5008_vm13, %v3693_v8, %v1425_v2  ;;  %v4181_v8 = vld [vmem:[%s5598_s5 + $0x160] sm:$0xff] }
  0xb7   : > { %v1914_v30 = vshrl.u32 %v5088_v15, 16  ;;  %v1491_v38 = vunpack.c.l.b16 %v1426_v27 }
  0xb8   : > { %1576 = vmatpush.bf16.msrb.mxu2 %v4145_v22  ;;  %1347 = vmatpush.bf16.msrb.mxu1 %v4129_v23  ;;  %v1904_v22 = vshll.u32 %v1834_v14, 16  ;;  %v4206_v23 = vld [vmem:[%s5598_s5 + $0x1e8] sm:$0xff]  ;;  %v1889_v35 = vsel %vm4825_vm10, %v1884_v16, %v5055_v44  ;;  %v1392_v44 = vld [vmem:[#allocation2 + $0x24] sm:$0xe] }
  0xb9   : > { %v1916_v0 = vrot.slane %v1914_v30, 4  ;;  %v2063_v54 = vunpack.c.l.b16 %v1889_v35  ;;  %v3695_v52 = vrot.slane %v1392_v44, 9  ;;  %v4213_v14 = vld [vmem:[%s5598_s5 + $0x220] sm:$0xff]  ;;  %v5144_v30 = vld [vmem:[#allocation2 + $0x38] sm:$0x1] }
  0xba   : > { %1770 = vmatpush.bf16.msrb.mxu3 %v4161_v41  ;;  %2148 = vmatpush.bf16.msrb.mxu0 %v4169_v42  ;;  %v1906_v41 = vrot.slane %v1904_v22, 5  ;;  %v4123_v35 = vld [vmem:[#allocation2 + $0x18] sm:$0xff] }
  0xbb   : > { %1348 = vmatmul.bf16.vlgmr.msrb.gmra.mxu1 %v4121_v53  ;;  %1577 = vmatmul.bf16.vlgmr.msrb.gmra.mxu2 %v1505_v55  ;;  %v1441_v53 = vrot.slane %v1439_v46, 4  ;;  %v1442_v55 = vrot.slane %v4875_v33, 5  ;;  %v1440_v48 = vsel %vm5008_vm13, %v3695_v52, %v1439_v46  ;;  %v4180_v44 = vld [vmem:[%s5598_s5 + $0x158] sm:$0xff] }
  0xbc   : > { %2586 = vmatpush.bf16.msra.mxu2 %v4200_v28  ;;  %2391 = vmatpush.bf16.msra.mxu1 %v4184_v29  ;;  %v1429_v28 = vsel %vm5008_vm13, %v1427_v10, %v1428_v11  ;;  %v1910_v29 = vshll.u32 %v5088_v15, 16  ;;  %v1907_v45 = vor.u32 %v1906_v41, %v1903_v40  ;;  %v1495_v59 = vunpack.c.l.b16 %v1440_v48  ;;  %v1837_v10 = vld [vmem:[#allocation2 + $0x30] sm:$0xf]  ;;  %v5133_v11 = vld [vmem:[#allocation2 + $0x34] sm:$0xf] }
  0xbd   : > { %1771 = vmatmul.bf16.vlgmr.msrb.gmra.mxu3 %v4153_v56  ;;  %2149 = vmatmul.bf16.vlgmr.msrb.gmra.mxu0 %v2077_v57  ;;  %v1492_v39 = vunpack.c.l.b16 %v1429_v28  ;;  %v4122_v56 = vld [vmem:[#allocation2 + $0xc] sm:$0xff]  ;;  %v1443_v3 = vsel %vm5008_vm13, %v1441_v53, %v1442_v55  ;;  %v1925_v18 = vshrl.u32 %v1837_v10, 16  ;;  %v1938_v21 = vshrl.u32 %v5133_v11, 16  ;;  %v1840_v52 = vld [vmem:[#allocation2 + $0x3c] sm:$0xf] }
  0xbe   : > { %2964 = vmatpush.bf16.msra.mxu3 %v4208_v49  ;;  %3214 = vmatpush.bf16.msra.mxu0 %v4216_v32  ;;  %v1912_v42 = vrot.slane %v1910_v29, 5  ;;  %v2064_v49 = vunpack.c.l.b16 %v1899_v37  ;;  %v5114_v32 = vld [vmem:[#allocation2 + $0x2c] sm:$0x1]  ;;  %v1496_v62 = vunpack.c.l.b16 %v1443_v3  ;;  %v1908_v33 = vrot.slane %v1907_v45, 4  ;;  %v4155_v37 = vld [vmem:[#allocation2 + $0x24] sm:$0xff] }
  0xbf   : > { %v1506_v2 = vpack.c.b16 %v1492_v39, %v1491_v38  ;;  %v1920_v58 = vshll.u32 %v5114_v32, 16  ;;  %v1940_v29 = vrot.slane %v1938_v21, 4  ;;  %v1944_v41 = vshll.u32 %v5144_v30, 16  ;;  %v5160_v53 = vld [vmem:[#allocation2 + $0x40] sm:$0xf] }
  0xc0   : > { %2587 = vmatpush.bf16.msra.mxu2 %v4199_v63  ;;  %2392 = vmatpush.bf16.msra.mxu1 %v4183_v4  ;;  %v1917_v57 = vor.u32 %v1916_v0, %v1912_v42  ;;  %v2078_v63 = vpack.c.b16 %v2064_v49, %v2063_v54  ;;  %v5122_v25 = vpack.c.b16 %v1496_v62, %v1495_v59  ;;  %v4196_v54 = vld [vmem:[%s5598_s5 + $0x198] sm:$0xff]  ;;  %v1949_v45 = vshrl.u32 %v1840_v52, 16  ;;  %v5174_v21 = vld [vmem:[#allocation2 + $0x4c] sm:$0xf] }
  0xc1   : > { %v1922_v6 = vrot.slane %v1920_v58, 5  ;;  %v1913_v16 = vsel %vm4825_vm10, %v1908_v33, %v1912_v42  ;;  %v1946_v46 = vrot.slane %v1944_v41, 5  ;;  %v4204_v49 = vld [vmem:[%s5598_s5 + $0x1d8] sm:$0xff]  ;;  %v1962_v58 = vshrl.u32 %v5160_v53, 16 }
  0xc2   : > { %2965 = vmatpush.bf16.msra.mxu3 %v4207_v7  ;;  %3215 = vmatpush.bf16.msra.mxu0 %v4215_v1  ;;  %v1918_v4 = vrot.slane %v1917_v57, 4  ;;  %v4197_v7 = vld [vmem:[%s5598_s5 + $0x1a0] sm:$0xff]  ;;  %v2065_v22 = vunpack.c.l.b16 %v1913_v16  ;;  %v1958_v57 = vshll.u32 %v5160_v53, 16  ;;  %v1446_v33 = vrot.slane %v4803_v5, 5  ;;  %v4195_v5 = vld [vmem:[%s5598_s5 + $0x190] sm:$0xff] }
  0xc3   : > { %v4205_v1 = vld [vmem:[%s5598_s5 + $0x1e0] sm:$0xff]  ;;  %v1964_v62 = vrot.slane %v1962_v58, 4 }
  0xc4   : > { %2588 = vmatpush.bf16.msra.mxu2 %v4198_v20  ;;  %2393 = vmatpush.bf16.msra.mxu1 %v4182_v31  ;;  %v1923_v17 = vsel %vm4825_vm10, %v1918_v4, %v1922_v6  ;;  %v1928_v20 = vshll.u32 %v1837_v10, 16  ;;  %v1934_v31 = vshll.u32 %v5133_v11, 16  ;;  %v1960_v59 = vrot.slane %v1958_v57, 5  ;;  %v5169_v4 = vld [vmem:[#allocation2 + $0x44] sm:$0x1] }
  0xc5   : > { %v4124_v6 = vld [vmem:[#allocation2 + $0x24] sm:$0xff]  ;;  %v1968_v16 = vshll.u32 %v5169_v4, 16  ;;  %v1394_v57 = vld [vmem:[#allocation2 + $0x3c] sm:$0xe] }
  0xc6   : > { %2966 = vmatpush.bf16.msra.mxu3 %v4206_v23  ;;  %3216 = vmatpush.bf16.msra.mxu0 %v4214_v26  ;;  %v2066_v23 = vunpack.c.l.b16 %v1923_v17  ;;  %v1927_v26 = vrot.slane %v1925_v18, 4  ;;  %v1930_v27 = vrot.slane %v1928_v20, 5  ;;  %v1936_v28 = vrot.slane %v1934_v31, 5  ;;  %v1843_v31 = vld [vmem:[#allocation2 + $0x48] sm:$0xf] }
  0xc7   : > { %v1448_v18 = vrot.slane %v1446_v33, 4  ;;  %v1449_v20 = vrot.slane %v4810_v12, 5  ;;  %v4179_v12 = vld [vmem:[%s5598_s5 + $0x150] sm:$0xff] }
  0xc8   : > { %2589 = vmatpush.bf16.msra.mxu2 %v4197_v7  ;;  %2394 = vmatpush.bf16.msra.mxu1 %v4181_v8  ;;  %v2079_v38 = vpack.c.b16 %v2066_v23, %v2065_v22  ;;  %v1931_v39 = vor.u32 %v1930_v27, %v1927_v26  ;;  %v1941_v40 = vor.u32 %v1940_v29, %v1936_v28  ;;  %v1393_v7 = vld [vmem:[#allocation2 + $0x30] sm:$0xe] }
  0xc9   : > { %v3696_v17 = vrot.slane %v1393_v7, 9  ;;  %v4203_v22 = vld [vmem:[%s5598_s5 + $0x1d0] sm:$0xff]  ;;  %v1450_v29 = vsel %vm5008_vm13, %v1448_v18, %v1449_v20  ;;  %v4178_v20 = vld [vmem:[%s5598_s5 + $0x148] sm:$0xff] }
  0xca   : > { %2967 = vmatpush.bf16.msra.mxu3 %v4205_v1  ;;  %3217 = vmatpush.bf16.msra.mxu0 %v4213_v14  ;;  %v1932_v42 = vrot.slane %v1931_v39, 4  ;;  %v1942_v0 = vrot.slane %v1941_v40, 4  ;;  %v4156_v1 = vld [vmem:[#allocation2 + $0x30] sm:$0xff]  ;;  %v1965_v14 = vor.u32 %v1964_v62, %v1960_v59  ;;  %v1986_v39 = vshrl.u32 %v5174_v21, 16 }
  0xcb   : > { %1353 = vmatmul.bf16.gmra.mxu1 %v4122_v56  ;;  %1582 = vmatmul.bf16.gmra.mxu2 %v1506_v2  ;;  %v1952_v56 = vshll.u32 %v1840_v52, 16  ;;  %v4211_v27 = vld [vmem:[%s5598_s5 + $0x210] sm:$0xff] }
  0xcc   : > { %2590 = vmatpush.bf16.msra.mxu2 %v4196_v54  ;;  %2395 = vmatpush.bf16.msra.mxu1 %v4180_v44  ;;  %v1937_v55 = vsel %vm4825_vm10, %v1932_v42, %v1936_v28  ;;  %v1947_v2 = vsel %vm4825_vm10, %v1942_v0, %v1946_v46  ;;  %v1966_v26 = vrot.slane %v1965_v14, 4  ;;  %v1447_v28 = vsel %vm5008_vm13, %v3696_v17, %v1446_v33  ;;  %v5209_v14 = vld [vmem:[#allocation2 + $0x58] sm:$0xf] }
  0xcd   : > { %1776 = vmatmul.bf16.gmra.mxu3 %v4154_v51  ;;  %2154 = vmatmul.bf16.gmra.mxu0 %v2078_v63  ;;  %v2067_v48 = vunpack.c.l.b16 %v1937_v55  ;;  %v2068_v3 = vunpack.c.l.b16 %v1947_v2  ;;  %v1951_v51 = vrot.slane %v1949_v45, 4  ;;  %v1954_v63 = vrot.slane %v1952_v56, 5  ;;  %v5198_v55 = vld [vmem:[#allocation2 + $0x50] sm:$0x1] }
  0xce   : > { %2968 = vmatpush.bf16.msra.mxu3 %v4204_v49  ;;  %v1497_v42 = vunpack.c.l.b16 %v1447_v28  ;;  %v1498_v0 = vunpack.c.l.b16 %v1450_v29  ;;  %v1988_v44 = vrot.slane %v1986_v39, 4  ;;  %v1453_v2 = vrot.slane %v4865_v24, 5  ;;  %v4125_v45 = vld [vmem:[#allocation2 + $0x30] sm:$0xff]  ;;  %v4194_v24 = vld [vmem:[%s5598_s5 + $0x188] sm:$0xff]  ;;  %v5227_v39 = vld [vmem:[#allocation2 + $0x5c] sm:$0x1] }
  0xcf   : > { %v2080_v8 = vpack.c.b16 %v2068_v3, %v2067_v48  ;;  %v1955_v10 = vor.u32 %v1954_v63, %v1951_v51  ;;  %v1992_v3 = vshll.u32 %v5198_v55, 16  ;;  %v4157_v51 = vld [vmem:[#allocation2 + $0x3c] sm:$0xff]  ;;  %v1456_v33 = vrot.slane %v4884_v47, 5 }
  0xd0   : > { %2591 = vmatpush.bf16.msra.mxu2 %v4195_v5  ;;  %2396 = vmatpush.bf16.msra.mxu1 %v4179_v12  ;;  %v1509_v56 = vpack.c.b16 %v1498_v0, %v1497_v42  ;;  %v1455_v62 = vrot.slane %v1453_v2, 4  ;;  %v2010_v12 = vshrl.u32 %v5209_v14, 16  ;;  %v4315_v42 = vld [vmem:[#allocation2 + $0x4c] sm:$0xf] }
  0xd1   : > { %v1956_v23 = vrot.slane %v1955_v10, 4  ;;  %v1846_v10 = vld [vmem:[#allocation2 + $0x54] sm:$0xf]  ;;  %v1460_v0 = vrot.slane %v4315_v42, 5 }
  0xd2   : > { %2969 = vmatpush.bf16.msra.mxu3 %v4203_v22  ;;  %v2000_v5 = vshll.u32 %v1846_v10, 16  ;;  %v2006_v22 = vshll.u32 %v5209_v14, 16 }
  0xd3   : > { %v1961_v40 = vsel %vm4825_vm10, %v1956_v23, %v1960_v59  ;;  %v3697_v59 = vrot.slane %v1394_v57, 9  ;;  %v4210_v23 = vld [vmem:[%s5598_s5 + $0x208] sm:$0xff] }
  0xd4   : > { %2592 = vmatpush.bf16.msra.mxu2 %v4194_v24  ;;  %2397 = vmatpush.bf16.msra.mxu1 %v4178_v20 }
  0xd5   : > { %v1454_v47 = vsel %vm5008_vm13, %v3697_v59, %v1453_v2  ;;  %v1849_v59 = vld [vmem:[#allocation2 + $0x60] sm:$0xf] }
  0xdb   : > { %1358 = vmatmul.bf16.gmra.mxu1 %v4123_v35  ;;  %1587 = vmatmul.bf16.gmra.mxu2 %v5086_v13  ;;  %v4212_v13 = vld [vmem:[%s5598_s5 + $0x218] sm:$0xff]  ;;  %v1973_v35 = vshrl.u32 %v1843_v31, 16 }
  0xdc   : > { %3218 = vmatpush.bf16.msra.mxu0 %v4212_v13  ;;  %v2069_v13 = vunpack.c.l.b16 %v1961_v40  ;;  %v4126_v40 = vld [vmem:[#allocation2 + $0x3c] sm:$0xff] }
  0xdd   : > { %1781 = vmatmul.bf16.gmra.mxu3 %v4155_v37  ;;  %2159 = vmatmul.bf16.gmra.mxu0 %v2079_v38  ;;  %v1976_v37 = vshll.u32 %v1843_v31, 16  ;;  %v1982_v38 = vshll.u32 %v5174_v21, 16  ;;  %v1975_v46 = vrot.slane %v1973_v35, 4  ;;  %v1997_v31 = vshrl.u32 %v1846_v10, 16 }
  0xde   : > { %v2002_v35 = vrot.slane %v2000_v5, 5  ;;  %v2024_v10 = vshll.u32 %v1849_v59, 16 }
  0xdf   : > { %v1978_v54 = vrot.slane %v1976_v37, 5  ;;  %v1984_v49 = vrot.slane %v1982_v38, 5  ;;  %v1999_v29 = vrot.slane %v1997_v31, 4  ;;  %v2008_v37 = vrot.slane %v2006_v22, 5 }
  0xe0   : > { %3219 = vmatpush.bf16.msra.mxu0 %v4211_v27  ;;  %v2012_v38 = vrot.slane %v2010_v12, 4  ;;  %v2026_v12 = vrot.slane %v2024_v10, 5 }
  0xe1   : > { %v1979_v58 = vor.u32 %v1978_v54, %v1975_v46  ;;  %v1989_v48 = vor.u32 %v1988_v44, %v1984_v49  ;;  %v4158_v46 = vld [vmem:[#allocation2 + $0x48] sm:$0xff]  ;;  %v2003_v44 = vor.u32 %v2002_v35, %v1999_v29  ;;  %v4159_v35 = vld [vmem:[#allocation2 + $0x54] sm:$0xff] }
  0xe3   : > { %v1990_v7 = vrot.slane %v1989_v48, 4 }
  0xe4   : > { %3220 = vmatpush.bf16.msra.mxu0 %v4210_v23 }
  0xeb   : > { %1363 = vmatmul.bf16.gmra.mxu1 %v4124_v6  ;;  %1592 = vmatmul.bf16.gmra.mxu2 %v5122_v25  ;;  %v1970_v25 = vrot.slane %v1968_v16, 5  ;;  %v1980_v6 = vrot.slane %v1979_v58, 4  ;;  %v1457_v16 = vsel %vm5008_vm13, %v1455_v62, %v1456_v33  ;;  %v2004_v58 = vrot.slane %v2003_v44, 4  ;;  %v5236_v62 = vld [vmem:[#allocation2 + $0x64] sm:$0xf] }
  0xec   : > { %v4177_v33 = vld [vmem:[%s5598_s5 + $0x140] sm:$0xff] }
  0xed   : > { %1786 = vmatmul.bf16.gmra.mxu3 %v4156_v1  ;;  %2164 = vmatmul.bf16.gmra.mxu0 %v2080_v8  ;;  %v1971_v41 = vsel %vm4825_vm10, %v1966_v26, %v1970_v25  ;;  %v1994_v1 = vrot.slane %v1992_v3, 5  ;;  %v4202_v8 = vld [vmem:[%s5598_s5 + $0x1c8] sm:$0xff]  ;;  %v1985_v17 = vsel %vm4825_vm10, %v1980_v6, %v1984_v49  ;;  %v1499_v26 = vunpack.c.l.b16 %v1454_v47 }
  0xee   : > { %v2070_v52 = vunpack.c.l.b16 %v1971_v41  ;;  %2970 = vmatpush.bf16.msra.mxu3 %v4202_v8  ;;  %v1500_v25 = vunpack.c.l.b16 %v1457_v16  ;;  %v2071_v27 = vunpack.c.l.b16 %v1985_v17  ;;  %v1395_v49 = vld [vmem:[#allocation2 + $0x48] sm:$0xe]  ;;  %v2021_v8 = vshrl.u32 %v1849_v59, 16  ;;  %2398 = vmatpush.bf16.msra.mxu1 %v4177_v33  ;;  %v4209_v17 = vld [vmem:[%s5598_s5 + $0x200] sm:$0xff] }
  0xef   : > { %v1995_v18 = vsel %vm4825_vm10, %v1990_v7, %v1994_v1  ;;  %v3698_v2 = vrot.slane %v1395_v49, 9  ;;  %v2009_v1 = vsel %vm4825_vm10, %v2004_v58, %v2008_v37  ;;  %v2030_v47 = vshll.u32 %v5236_v62, 16  ;;  %3221 = vmatpush.bf16.msra.mxu0 %v4209_v17  ;;  %v5262_v49 = vld [vmem:[#allocation2 + $0x1c] sm:$0xf] }
  0xf0   : > { %v2081_v63 = vpack.c.b16 %v2070_v52, %v2069_v13  ;;  %v2072_v28 = vunpack.c.l.b16 %v1995_v18  ;;  %v1510_v41 = vpack.c.b16 %v1500_v25, %v1499_v26  ;;  %v2013_v13 = vor.u32 %v2012_v38, %v2008_v37  ;;  %v5254_v25 = vld [vmem:[#allocation2 + $0x68] sm:$0x1] }
  0xf1   : > { %v2016_v52 = vshll.u32 %v5227_v39, 16  ;;  %v1461_v6 = vsel %vm5008_vm13, %v3698_v2, %v1460_v0  ;;  %v2034_v16 = vshrl.u32 %v5236_v62, 16  ;;  %v2073_v31 = vunpack.c.l.b16 %v2009_v1 }
  0xf2   : > { %v2082_v54 = vpack.c.b16 %v2072_v28, %v2071_v27  ;;  %v2014_v48 = vrot.slane %v2013_v13, 4  ;;  %v1501_v18 = vunpack.c.l.b16 %v1461_v6  ;;  %v2023_v22 = vrot.slane %v2021_v8, 4  ;;  %v4127_v27 = vld [vmem:[#allocation2 + $0x48] sm:$0xff] }
  0xf3   : > { %v2018_v3 = vrot.slane %v2016_v52, 5  ;;  %v2032_v23 = vrot.slane %v2030_v47, 5  ;;  %v2036_v26 = vrot.slane %v2034_v16, 4  ;;  %v1467_v38 = vrot.slane %v4896_v43, 5 }
  0xf4   : > { %v2027_v42 = vor.u32 %v2026_v12, %v2023_v22  ;;  %v1470_v52 = vrot.slane %v4901_v60, 5 }
  0xf5   : > { %v2019_v24 = vsel %vm4825_vm10, %v2014_v48, %v2018_v3  ;;  %v1469_v13 = vrot.slane %v1467_v38, 4  ;;  %v2685_v48 = vshll.u32 %v5262_v49, 16  ;;  %v2689_v3 = vshrl.u32 %v5262_v49, 16 }
  0xf6   : > { %v2074_v5 = vunpack.c.l.b16 %v2019_v24  ;;  %v2028_v2 = vrot.slane %v2027_v42, 4 }
  0xf7   : > { %v1471_v60 = vsel %vm5008_vm13, %v1469_v13, %v1470_v52  ;;  %v2687_v8 = vrot.slane %v2685_v48, 5  ;;  %v2691_v10 = vrot.slane %v2689_v3, 4 }
  0xf8   : > { %v2083_v37 = vpack.c.b16 %v2074_v5, %v2073_v31  ;;  %v2033_v6 = vsel %vm4825_vm10, %v2028_v2, %v2032_v23  ;;  %v1504_v16 = vunpack.c.l.b16 %v1471_v60  ;;  %v2240_v5 = vrot.slane %v4965_v19, 5 }
  0xf9   : > { %v2075_v17 = vunpack.c.l.b16 %v2033_v6  ;;  %v2692_v12 = vor.u32 %v2691_v10, %v2687_v8 }
  0xfb   : > { %1368 = vmatmul.bf16.gmra.mxu1 %v4125_v45  ;;  %1597 = vmatmul.bf16.gmra.mxu2 %v1509_v56  ;;  %v1462_v45 = vrot.slane %v1460_v0, 4  ;;  %v4316_v56 = vld [vmem:[#allocation2 + $0x50] sm:$0x1]  ;;  %v2037_v0 = vor.u32 %v2036_v26, %v2032_v23  ;;  %v4128_v23 = vld [vmem:[#allocation2 + $0x54] sm:$0xff]  ;;  %v2693_v52 = vrot.slane %v2692_v12, 4 }
  0xfc   : > { %v1463_v57 = vrot.slane %v4316_v56, 5 }
  0xfd   : > { %1791 = vmatmul.bf16.gmra.mxu3 %v4157_v51  ;;  %2169 = vmatmul.bf16.gmra.mxu0 %v2081_v63  ;;  %v4193_v51 = vld [vmem:[%s5598_s5 + $0x180] sm:$0xff]  ;;  %v2038_v43 = vrot.slane %v2037_v0, 4  ;;  %v3029_v0 = vld [vmem:[#allocation2 + $0x18] sm:$0xe] }
  0xfe   : > { %v4201_v63 = vld [vmem:[%s5598_s5 + $0x1c0] sm:$0xff]  ;;  %2593 = vmatpush.bf16.msra.mxu2 %v4193_v51  ;;  %v1464_v7 = vsel %vm5008_vm13, %v1462_v45, %v1463_v57 }
  0xff   : > { %2971 = vmatpush.bf16.msra.mxu3 %v4201_v63  ;;  %v1502_v20 = vunpack.c.l.b16 %v1464_v7 }
 0x101   : > { %v1511_v28 = vpack.c.b16 %v1502_v20, %v1501_v18  ;;  %v2653_v20 = vld [vmem:[#allocation2 + $0x20] sm:$0x1] }
 0x10b   : > { %1373 = vmatmul.bf16.gmra.mxu1 %v4126_v40  ;;  %1602 = vmatmul.bf16.gmra.mxu2 %v1510_v41  ;;  %v1396_v41 = vld [vmem:[#allocation2 + $0x54] sm:$0xe] }
 0x10c   : > { %v3699_v44 = vrot.slane %v1396_v41, 9  ;;  %v4160_v41 = vld [vmem:[#allocation2 + $0x60] sm:$0xff] }
 0x10d   : > { %1796 = vmatmul.bf16.gmra.mxu3 %v4158_v46  ;;  %2174 = vmatmul.bf16.gmra.mxu0 %v2082_v54  ;;  %v2040_v46 = vshll.u32 %v5254_v25, 16  ;;  %v2651_v54 = vld [vmem:[#allocation2 + $0x18] sm:$0xf] }
 0x10e   : > { %v2676_v57 = vshrl.u32 %v2651_v54, 16  ;;  %v2679_v58 = vshll.u32 %v2651_v54, 16  ;;  %v1468_v59 = vsel %vm5008_vm13, %v3699_v44, %v1467_v38  ;;  %v2242_v44 = vrot.slane %v2240_v5, 4 }
 0x10f   : > { %v2042_v45 = vrot.slane %v2040_v46, 5  ;;  %v1503_v47 = vunpack.c.l.b16 %v1468_v59  ;;  %v2243_v46 = vrot.slane %v4983_v36, 5 }
 0x110   : > { %v2678_v1 = vrot.slane %v2676_v57, 4  ;;  %v2681_v24 = vrot.slane %v2679_v58, 5  ;;  %v3066_v57 = vrot.slane %v2653_v20, 5  ;;  %v5294_v58 = vld [vmem:[#allocation2 + $0x28] sm:$0xf] }
 0x111   : > { %v2043_v7 = vsel %vm4825_vm10, %v2038_v43, %v2042_v45  ;;  %v4060_v43 = vrot.slane %v3029_v0, 9  ;;  %v2244_v3 = vsel %vm5008_vm13, %v2242_v44, %v2243_v46 }
 0x112   : > { %v2076_v18 = vunpack.c.l.b16 %v2043_v7  ;;  %v2682_v22 = vor.u32 %v2681_v24, %v2678_v1 }
 0x114   : > { %v2084_v42 = vpack.c.b16 %v2076_v18, %v2075_v17  ;;  %v2683_v13 = vrot.slane %v2682_v22, 4  ;;  %v2713_v17 = vshrl.u32 %v5294_v58, 16 }
 0x116   : > { %v2688_v60 = vsel %vm4825_vm10, %v2683_v13, %v2687_v8  ;;  %v2247_v13 = vrot.slane %v5018_v9, 5  ;;  %v2250_v9 = vrot.slane %v5063_v50, 5 }
 0x118   : > { %v5256_v29 = vpop.f32.mrf.mxu1 }
 0x11a   : > { %v5259_v40 = vpop.f32.mrf.mxu0 }
 0x11b   : > { %1378 = vmatmul.bf16.gmra.mxu1 %v4127_v27  ;;  %1607 = vmatmul.bf16.gmra.mxu2 %v1511_v28  ;;  %v1512_v27 = vpack.c.b16 %v1504_v16, %v1503_v47  ;;  %v2206_v28 = vld [vmem:[#allocation2 + $0xc] sm:$0xe]  ;;  %v2709_v16 = vshll.u32 %v5294_v58, 16 }
 0x11c   : > { %v3876_v19 = vrot.slane %v2206_v28, 9 }
 0x11d   : > { %1801 = vmatmul.bf16.gmra.mxu3 %v4159_v35  ;;  %2179 = vmatmul.bf16.gmra.mxu0 %v2083_v37  ;;  %v2695_v35 = vshll.u32 %v2653_v20, 16  ;;  %v3063_v37 = vrot.slane %v5262_v49, 5  ;;  %v2654_v49 = vld [vmem:[#allocation2 + $0x24] sm:$0xf]  ;;  %v2312_v20 = vunpack.c.l.b16 %v2244_v3 }
 0x11e   : > { %v5265_v56 = vpop.f32.mrf.mxu2  ;;  %v2241_v36 = vsel %vm5008_vm13, %v3876_v19, %v2240_v5  ;;  %v2700_v10 = vshrl.u32 %v2654_v49, 16  ;;  %v2703_v47 = vshll.u32 %v2654_v49, 16  ;;  %v2884_v5 = vunpack.c.l.b16 %v2688_v60  ;;  %v4185_v19 = vld [vmem:[#allocation2 + $0x18] sm:$0xff] }
 0x11f   : > { %v2697_v2 = vrot.slane %v2695_v35, 5  ;;  %v3065_v45 = vrot.slane %v3063_v37, 4  ;;  %v3064_v7 = vsel %vm5008_vm13, %v4060_v43, %v3063_v37  ;;  %v2311_v8 = vunpack.c.l.b16 %v2241_v36  ;;  %v2207_v43 = vld [vmem:[#allocation2 + $0x18] sm:$0xe] }
 0x120   : > { %v5269_v51 = vpop.f32.mrf.mxu3  ;;  %v5271_v63 = vpop.f32.mrf.mxu1  ;;  %v3134_v12 = vunpack.c.l.b16 %v3064_v7  ;;  %v2705_v28 = vrot.slane %v2703_v47, 5  ;;  %v2711_v35 = vrot.slane %v2709_v16, 5  ;;  %v2715_v37 = vrot.slane %v2713_v17, 4  ;;  %v5325_v47 = vld [vmem:[#allocation2 + $0x34] sm:$0xf] }
 0x121   : > { %v2698_v6 = vsel %vm4825_vm10, %v2693_v52, %v2697_v2  ;;  %v3067_v1 = vsel %vm5008_vm13, %v3065_v45, %v3066_v57  ;;  %v2327_v46 = vpack.c.b16 %v2312_v20, %v2311_v8  ;;  %v3070_v60 = vrot.slane %v5294_v58, 5 }
 0x122   : > { %v5277_v33 = vpop.f32.mrf.mxu0  ;;  %v2885_v22 = vunpack.c.l.b16 %v2698_v6  ;;  %v2716_v57 = vor.u32 %v2715_v37, %v2711_v35  ;;  %v3030_v6 = vld [vmem:[#allocation2 + $0x24] sm:$0xe]  ;;  %v3877_v7 = vrot.slane %v2207_v43, 9 }
 0x123   : > { %v4061_v20 = vrot.slane %v3030_v6, 9 }
 0x124   : > { %v2900_v44 = vpack.c.b16 %v2885_v22, %v2884_v5  ;;  %v2717_v17 = vrot.slane %v2716_v57, 4 }
 0x126   : > { %v5283_v31 = vpop.f32.mrf.mxu2 }
 0x128   : > { %v5286_v26 = vpop.f32.mrf.mxu3  ;;  %v5289_v38 = vpop.f32.mrf.mxu1 }
 0x12a   : > { %v5292_v54 = vpop.f32.mrf.mxu0 }
 0x12b   : > { %1383 = vmatmul.bf16.gmra.mxu1 %v4128_v23  ;;  %1612 = vmatmul.bf16.gmra.mxu2 %v1512_v27  ;;  %v3135_v23 = vunpack.c.l.b16 %v3067_v1  ;;  %v2702_v27 = vrot.slane %v2700_v10, 4  ;;  %v2249_v1 = vrot.slane %v2247_v13, 4  ;;  %v2657_v10 = vld [vmem:[#allocation2 + $0x30] sm:$0xf] }
 0x12c   : > { %v2724_v58 = vshrl.u32 %v2657_v10, 16 }
 0x12d   : > { %1806 = vmatmul.bf16.gmra.mxu3 %v4160_v41  ;;  %2184 = vmatmul.bf16.gmra.mxu0 %v2084_v42  ;;  %v2656_v41 = vld [vmem:[#allocation2 + $0x2c] sm:$0x1]  ;;  %v3150_v2 = vpack.c.b16 %v3135_v23, %v3134_v12  ;;  %v2706_v45 = vor.u32 %v2705_v28, %v2702_v27  ;;  %v2727_v12 = vshll.u32 %v2657_v10, 16  ;;  %v2733_v23 = vshll.u32 %v5325_v47, 16 }
 0x12e   : > { %v5296_v48 = vpop.f32.mrf.mxu2  ;;  %v2719_v49 = vshll.u32 %v2656_v41, 16  ;;  %v3073_v5 = vrot.slane %v2656_v41, 5  ;;  %v2737_v27 = vshrl.u32 %v5325_v47, 16  ;;  %v2251_v50 = vsel %vm5008_vm13, %v2249_v1, %v2250_v9  ;;  %v2659_v1 = vld [vmem:[#allocation2 + $0x38] sm:$0x1] }
 0x12f   : > { %v2707_v16 = vrot.slane %v2706_v45, 4  ;;  %v3071_v45 = vsel %vm5008_vm13, %v4061_v20, %v3070_v60  ;;  %v2208_v20 = vld [vmem:[#allocation2 + $0x24] sm:$0xe] }
 0x130   : > { %v5302_v59 = vpop.f32.mrf.mxu3  ;;  %v5312_v24 = vpop.f32.mrf.mxu1  ;;  %v2721_v8 = vrot.slane %v2719_v49, 5  ;;  %v2729_v49 = vrot.slane %v2727_v12, 5  ;;  %v2739_v6 = vrot.slane %v2737_v27, 4  ;;  %v4186_v27 = vld [vmem:[#allocation2 + $0x24] sm:$0xff] }
 0x132   : > { %v5316_v18 = vpop.f32.mrf.mxu0  ;;  %v2722_v41 = vsel %vm4825_vm10, %v2717_v17, %v2721_v8  ;;  %v2254_v8 = vrot.slane %v5088_v15, 5 }
 0x136   : > { %v5318_v42 = vpop.f32.mrf.mxu2 }
 0x138   : > { %v5320_v0 = vpop.f32.mrf.mxu3  ;;  %v1349_v52 = vpop.f32.mrf.mxu1 }
 0x139   : > { %v1350_v36 = vadd.f32 %v1349_v52, %v5259_v40  ;;  %v3072_v40 = vrot.slane %v3070_v60, 4 }
 0x13a   : > { %v2150_v3 = vpop.f32.mrf.mxu0 }
 0x13b   : > { %2399 = vmatmul.bf16.vlgmr.msra.gmra.mxu1 %v2327_v46  ;;  %2594 = vmatmul.bf16.vlgmr.msra.gmra.mxu2 %v4185_v19  ;;  %v2248_v19 = vsel %vm5008_vm13, %v3877_v7, %v2247_v13  ;;  %v3074_v57 = vsel %vm5008_vm13, %v3072_v40, %v3073_v5  ;;  %v2726_v13 = vrot.slane %v2724_v58, 4  ;;  %v2743_v5 = vshll.u32 %v2659_v1, 16 }
 0x13c   : > { %v2313_v7 = vunpack.c.l.b16 %v2248_v19  ;;  %v3137_v17 = vunpack.c.l.b16 %v3074_v57  ;;  %v3031_v19 = vld [vmem:[#allocation2 + $0x30] sm:$0xe] }
 0x13d   : > { %2972 = vmatmul.bf16.vlgmr.msra.gmra.mxu3 %v2900_v44  ;;  %3222 = vmatmul.bf16.vlgmr.msra.gmra.mxu0 %v3150_v2  ;;  %v2712_v44 = vsel %vm4825_vm10, %v2707_v16, %v2711_v35  ;;  %v2314_v35 = vunpack.c.l.b16 %v2251_v50  ;;  %v2887_v16 = vunpack.c.l.b16 %v2722_v41  ;;  %v3878_v41 = vrot.slane %v2208_v20, 9 }
 0x13e   : > { %v1578_v22 = vpop.f32.mrf.mxu2  ;;  %v2886_v9 = vunpack.c.l.b16 %v2712_v44 }
 0x13f   : > { %v1618_v28 = vadd.f32 %v1578_v22, %v1350_v36  ;;  %v5343_v36 = vrot.slane %v2733_v23, 5  ;;  %v2730_v22 = vor.u32 %v2729_v49, %v2726_v13  ;;  %v2328_v23 = vpack.c.b16 %v2314_v35, %v2313_v7  ;;  %v2660_v35 = vld [vmem:[#allocation2 + $0x3c] sm:$0xf] }
 0x140   : > { %v1772_v37 = vpop.f32.mrf.mxu3  ;;  %v1351_v46 = vpop.f32.mrf.mxu1  ;;  %v4062_v49 = vrot.slane %v3031_v19, 9 }
 0x141   : > { %v1812_v52 = vadd.f32 %v1772_v37, %v1618_v28  ;;  %v1352_v2 = vadd.f32 %v1351_v46, %v5277_v33  ;;  %v3136_v33 = vunpack.c.l.b16 %v3071_v45  ;;  %v2740_v40 = vor.u32 %v2739_v6, %v5343_v36 }
 0x142   : > { %v2152_v43 = vpop.f32.mrf.mxu0  ;;  %v3077_v28 = vrot.slane %v5325_v47, 5  ;;  %v2901_v37 = vpack.c.b16 %v2887_v16, %v2886_v9  ;;  %v2257_v45 = vrot.slane %v5114_v32, 5  ;;  %v2731_v57 = vrot.slane %v2730_v22, 4  ;;  %v5354_v9 = vld [vmem:[#allocation2 + $0x40] sm:$0xf] }
 0x143   : > { %v5345_v10 = vadd.f32 %v2150_v3, %v1812_v52  ;;  %v3151_v46 = vpack.c.b16 %v3137_v17, %v3136_v33  ;;  %v2256_v52 = vrot.slane %v2254_v8, 4  ;;  %v2741_v13 = vrot.slane %v2740_v40, 4 }
 0x144   : > { %v3079_v6 = vrot.slane %v3077_v28, 4  ;;  %v3080_v47 = vrot.slane %v2659_v1, 5  ;;  %v2255_v16 = vsel %vm5008_vm13, %v3878_v41, %v2254_v8  ;;  %v2736_v33 = vsel %vm4825_vm10, %v2731_v57, %v5343_v36  ;;  %v2662_v57 = vld [vmem:[#allocation2 + $0x44] sm:$0x1] }
 0x145   : > { %v2258_v32 = vsel %vm5008_vm13, %v2256_v52, %v2257_v45  ;;  %v2748_v8 = vshrl.u32 %v2660_v35, 16  ;;  %v2751_v40 = vshll.u32 %v2660_v35, 16  ;;  %v2261_v35 = vrot.slane %v5133_v11, 5 }
 0x146   : > { %v1580_v60 = vpop.f32.mrf.mxu2  ;;  %v3081_v20 = vsel %vm5008_vm13, %v3079_v6, %v3080_v47  ;;  %v4187_v47 = vld [vmem:[#allocation2 + $0x30] sm:$0xff] }
 0x147   : > { %v1619_v58 = vadd.f32 %v1580_v60, %v1352_v2  ;;  %v2745_v2 = vrot.slane %v2743_v5, 5  ;;  %v3078_v60 = vsel %vm5008_vm13, %v4062_v49, %v3077_v28  ;;  %v2757_v5 = vshll.u32 %v5354_v9, 16 }
 0x148   : > { %v1774_v12 = vpop.f32.mrf.mxu3  ;;  %v1354_v3 = vpop.f32.mrf.mxu1  ;;  %v3138_v19 = vunpack.c.l.b16 %v3078_v60  ;;  %v3139_v28 = vunpack.c.l.b16 %v3081_v20  ;;  %v2753_v41 = vrot.slane %v2751_v40, 5  ;;  %v3084_v20 = vrot.slane %v5354_v9, 5 }
 0x149   : > { %v1813_v50 = vadd.f32 %v1774_v12, %v1619_v58  ;;  %v1355_v44 = vadd.f32 %v1354_v3, %v5292_v54  ;;  %v2761_v58 = vshrl.u32 %v5354_v9, 16  ;;  %v2316_v3 = vunpack.c.l.b16 %v2258_v32  ;;  %v2209_v32 = vld [vmem:[#allocation2 + $0x30] sm:$0xe] }
 0x14a   : > { %v2155_v15 = vpop.f32.mrf.mxu0  ;;  %v2759_v52 = vrot.slane %v2757_v5, 5  ;;  %v2263_v40 = vrot.slane %v2261_v35, 4  ;;  %v2663_v5 = vld [vmem:[#allocation2 + $0x48] sm:$0xf]  ;;  %v3087_v9 = vrot.slane %v2662_v57, 5 }
 0x14b   : > { %2404 = vmatmul.bf16.gmra.mxu1 %v2328_v23  ;;  %2599 = vmatmul.bf16.gmra.mxu2 %v4186_v27  ;;  %v5352_v7 = vadd.f32 %v2152_v43, %v1813_v50  ;;  %v2746_v43 = vsel %vm4825_vm10, %v2741_v13, %v2745_v2  ;;  %v2315_v27 = vunpack.c.l.b16 %v2255_v16  ;;  %v2763_v45 = vrot.slane %v2761_v58, 4  ;;  %v5377_v58 = vld [vmem:[#allocation2 + $0x4c] sm:$0xf] }
 0x14c   : > { %v3152_v16 = vpack.c.b16 %v3139_v28, %v3138_v19  ;;  %v2772_v19 = vshrl.u32 %v2663_v5, 16  ;;  %v2775_v28 = vshll.u32 %v2663_v5, 16  ;;  %v2268_v5 = vrot.slane %v5160_v53, 5 }
 0x14d   : > { %2977 = vmatmul.bf16.gmra.mxu3 %v2901_v37  ;;  %3227 = vmatmul.bf16.gmra.mxu0 %v3151_v46  ;;  %v2888_v37 = vunpack.c.l.b16 %v2736_v33  ;;  %v2889_v46 = vunpack.c.l.b16 %v2746_v43  ;;  %v2329_v6 = vpack.c.b16 %v2316_v3, %v2315_v27 }
 0x14e   : > { %v1583_v54 = vpop.f32.mrf.mxu2 }
 0x14f   : > { %v1620_v17 = vadd.f32 %v1583_v54, %v1355_v44  ;;  %v2750_v44 = vrot.slane %v2748_v8, 4  ;;  %v3879_v8 = vrot.slane %v2209_v32, 9  ;;  %v2777_v32 = vrot.slane %v2775_v28, 5 }
 0x150   : > { %v1777_v1 = vpop.f32.mrf.mxu3  ;;  %v1356_v22 = vpop.f32.mrf.mxu1 }
 0x151   : > { %v1814_v12 = vadd.f32 %v1777_v1, %v1620_v17  ;;  %v1357_v36 = vadd.f32 %v1356_v22, %v5316_v18  ;;  %v2902_v18 = vpack.c.b16 %v2889_v46, %v2888_v37  ;;  %v2754_v33 = vor.u32 %v2753_v41, %v2750_v44  ;;  %v3032_v22 = vld [vmem:[#allocation2 + $0x3c] sm:$0xe] }
 0x152   : > { %v2157_v23 = vpop.f32.mrf.mxu0  ;;  %v2764_v17 = vor.u32 %v2763_v45, %v2759_v52  ;;  %v4063_v3 = vrot.slane %v3032_v22, 9  ;;  %v3086_v37 = vrot.slane %v3084_v20, 4  ;;  %v2781_v44 = vshll.u32 %v5377_v58, 16 }
 0x153   : > { %v5372_v50 = vadd.f32 %v2155_v15, %v1814_v12  ;;  %v2767_v15 = vshll.u32 %v2662_v57, 16  ;;  %v2264_v12 = vrot.slane %v5144_v30, 5  ;;  %v2785_v41 = vshrl.u32 %v5377_v58, 16 }
 0x154   : > { %v2765_v27 = vrot.slane %v2764_v17, 4 }
 0x155   : > { %v2265_v30 = vsel %vm5008_vm13, %v2263_v40, %v2264_v12  ;;  %v2787_v17 = vrot.slane %v2785_v41, 4  ;;  %v2210_v12 = vld [vmem:[#allocation2 + $0x3c] sm:$0xe]  ;;  %v3033_v41 = vld [vmem:[#allocation2 + $0x48] sm:$0xe] }
 0x156   : > { %v1585_v13 = vpop.f32.mrf.mxu2 }
 0x157   : > { %v1621_v2 = vadd.f32 %v1585_v13, %v1357_v36  ;;  %v2755_v36 = vrot.slane %v2754_v33, 4  ;;  %v5397_v33 = vrot.slane %v2781_v44, 5 }
 0x158   : > { %v1779_v49 = vpop.f32.mrf.mxu3  ;;  %v1359_v54 = vpop.f32.mrf.mxu1 }
 0x159   : > { %v1815_v1 = vadd.f32 %v1779_v49, %v1621_v2  ;;  %v1360_v43 = vadd.f32 %v1359_v54, %v5256_v29  ;;  %v2769_v29 = vrot.slane %v2767_v15, 5  ;;  %v2262_v2 = vsel %vm5008_vm13, %v3879_v8, %v2261_v35 }
 0x15a   : > { %v2160_v60 = vpop.f32.mrf.mxu0  ;;  %v2760_v49 = vsel %vm4825_vm10, %v2755_v36, %v2759_v52  ;;  %v3085_v54 = vsel %vm5008_vm13, %v4063_v3, %v3084_v20  ;;  %v2774_v35 = vrot.slane %v2772_v19, 4  ;;  %v2317_v15 = vunpack.c.l.b16 %v2262_v2 }
 0x15b   : > { %2409 = vmatmul.bf16.gmra.mxu1 %v2329_v6  ;;  %2604 = vmatmul.bf16.gmra.mxu2 %v4187_v47  ;;  %v5379_v11 = vadd.f32 %v2157_v23, %v1815_v1  ;;  %v2770_v57 = vsel %vm4825_vm10, %v2765_v27, %v2769_v29  ;;  %v2318_v52 = vunpack.c.l.b16 %v2265_v30  ;;  %v2665_v1 = vld [vmem:[#allocation2 + $0x50] sm:$0x1]  ;;  %v2890_v22 = vunpack.c.l.b16 %v2760_v49 }
 0x15c   : > { %v2891_v8 = vunpack.c.l.b16 %v2770_v57  ;;  %v2778_v36 = vor.u32 %v2777_v32, %v2774_v35  ;;  %v2788_v27 = vor.u32 %v2787_v17, %v5397_v33  ;;  %v2791_v29 = vshll.u32 %v2665_v1, 16  ;;  %v2666_v35 = vld [vmem:[#allocation2 + $0x54] sm:$0xf]  ;;  %v5408_v32 = vld [vmem:[#allocation2 + $0x58] sm:$0xf] }
 0x15d   : > { %2982 = vmatmul.bf16.gmra.mxu3 %v2902_v18  ;;  %3232 = vmatmul.bf16.gmra.mxu0 %v3152_v16  ;;  %v3088_v16 = vsel %vm5008_vm13, %v3086_v37, %v3087_v9  ;;  %v2330_v9 = vpack.c.b16 %v2318_v52, %v2317_v15  ;;  %v3091_v19 = vrot.slane %v5377_v58, 5  ;;  %v2270_v2 = vrot.slane %v2268_v5, 4 }
 0x15e   : > { %v1588_v46 = vpop.f32.mrf.mxu2  ;;  %v3141_v40 = vunpack.c.l.b16 %v3088_v16  ;;  %v2903_v28 = vpack.c.b16 %v2891_v8, %v2890_v22  ;;  %v2271_v30 = vrot.slane %v5169_v4, 5  ;;  %v2779_v49 = vrot.slane %v2778_v36, 4 }
 0x15f   : > { %v1622_v45 = vadd.f32 %v1588_v46, %v1360_v43  ;;  %v4188_v46 = vld [vmem:[#allocation2 + $0x3c] sm:$0xff]  ;;  %v2789_v57 = vrot.slane %v2788_v27, 4  ;;  %v3094_v58 = vrot.slane %v2665_v1, 5 }
 0x160   : > { %v1782_v23 = vpop.f32.mrf.mxu3  ;;  %v1361_v13 = vpop.f32.mrf.mxu1  ;;  %v2272_v4 = vsel %vm5008_vm13, %v2270_v2, %v2271_v30  ;;  %v2784_v15 = vsel %vm4825_vm10, %v2779_v49, %v5397_v33 }
 0x161   : > { %v1816_v6 = vadd.f32 %v1782_v23, %v1622_v45  ;;  %v1362_v47 = vadd.f32 %v1361_v13, %v5271_v63  ;;  %v3140_v63 = vunpack.c.l.b16 %v3085_v54  ;;  %v3880_v13 = vrot.slane %v2210_v12, 9 }
 0x162   : > { %v2162_v18 = vpop.f32.mrf.mxu0  ;;  %v3093_v54 = vrot.slane %v3091_v19, 4  ;;  %v2809_v12 = vshrl.u32 %v5408_v32, 16 }
 0x163   : > { %v5399_v43 = vadd.f32 %v2160_v60, %v1816_v6  ;;  %v3153_v44 = vpack.c.b16 %v3141_v40, %v3140_v63  ;;  %v2793_v6 = vrot.slane %v2791_v29, 5  ;;  %v2269_v17 = vsel %vm5008_vm13, %v3880_v13, %v2268_v5 }
 0x164   : > { %v3095_v8 = vsel %vm5008_vm13, %v3093_v54, %v3094_v58  ;;  %v2796_v40 = vshrl.u32 %v2666_v35, 16  ;;  %v2799_v5 = vshll.u32 %v2666_v35, 16  ;;  %v2319_v29 = vunpack.c.l.b16 %v2269_v17  ;;  %v2211_v58 = vld [vmem:[#allocation2 + $0x48] sm:$0xe] }
 0x166   : > { %v1590_v20 = vpop.f32.mrf.mxu2 }
 0x167   : > { %v1623_v3 = vadd.f32 %v1590_v20, %v1362_v47  ;;  %v4064_v47 = vrot.slane %v3033_v41, 9  ;;  %v2805_v20 = vshll.u32 %v5408_v32, 16 }
 0x168   : > { %v1784_v37 = vpop.f32.mrf.mxu3  ;;  %v1364_v60 = vpop.f32.mrf.mxu1 }
 0x169   : > { %v1817_v45 = vadd.f32 %v1784_v37, %v1623_v3  ;;  %v1365_v23 = vadd.f32 %v1364_v60, %v5289_v38  ;;  %v3092_v22 = vsel %vm5008_vm13, %v4064_v47, %v3091_v19  ;;  %v2320_v3 = vunpack.c.l.b16 %v2272_v4 }
 0x16a   : > { %v2165_v53 = vpop.f32.mrf.mxu0  ;;  %v2892_v37 = vunpack.c.l.b16 %v2784_v15  ;;  %v3143_v19 = vunpack.c.l.b16 %v3095_v8  ;;  %v2807_v41 = vrot.slane %v2805_v20, 5  ;;  %v3098_v15 = vrot.slane %v5408_v32, 5  ;;  %v5430_v8 = vld [vmem:[#allocation2 + $0x64] sm:$0xf] }
 0x16b   : > { %2414 = vmatmul.bf16.gmra.mxu1 %v2330_v9  ;;  %2609 = vmatmul.bf16.gmra.mxu2 %v4188_v46  ;;  %v5406_v16 = vadd.f32 %v2162_v18, %v1817_v45  ;;  %v2794_v18 = vsel %vm4825_vm10, %v2789_v57, %v2793_v6  ;;  %v3142_v46 = vunpack.c.l.b16 %v3092_v22  ;;  %v2811_v45 = vrot.slane %v2809_v12, 4  ;;  %v4189_v57 = vld [vmem:[#allocation2 + $0x48] sm:$0xff]  ;;  %v2669_v22 = vld [vmem:[#allocation2 + $0x60] sm:$0xf] }
 0x16c   : > { %v2893_v9 = vunpack.c.l.b16 %v2794_v18  ;;  %v2331_v49 = vpack.c.b16 %v2320_v3, %v2319_v29  ;;  %v2275_v6 = vrot.slane %v5174_v21, 5  ;;  %v2278_v21 = vrot.slane %v5198_v55, 5 }
 0x16d   : > { %2987 = vmatmul.bf16.gmra.mxu3 %v2903_v28  ;;  %3237 = vmatmul.bf16.gmra.mxu0 %v3153_v44  ;;  %v2798_v28 = vrot.slane %v2796_v40, 4  ;;  %v2801_v44 = vrot.slane %v2799_v5, 5  ;;  %v3154_v54 = vpack.c.b16 %v3143_v19, %v3142_v46  ;;  %v2820_v3 = vshrl.u32 %v2669_v22, 16 }
 0x16e   : > { %v1593_v38 = vpop.f32.mrf.mxu2  ;;  %v2277_v18 = vrot.slane %v2275_v6, 4 }
 0x16f   : > { %v1624_v52 = vadd.f32 %v1593_v38, %v1365_v23  ;;  %v2668_v23 = vld [vmem:[#allocation2 + $0x5c] sm:$0x1]  ;;  %v2802_v35 = vor.u32 %v2801_v44, %v2798_v28  ;;  %v2812_v38 = vor.u32 %v2811_v45, %v2807_v41 }
 0x170   : > { %v1787_v1 = vpop.f32.mrf.mxu3  ;;  %v1366_v63 = vpop.f32.mrf.mxu1  ;;  %v2279_v44 = vsel %vm5008_vm13, %v2277_v18, %v2278_v21  ;;  %v2212_v18 = vld [vmem:[#allocation2 + $0x54] sm:$0xe] }
 0x171   : > { %v1818_v36 = vadd.f32 %v1787_v1, %v1624_v52  ;;  %v1367_v33 = vadd.f32 %v1366_v63, %v5312_v24  ;;  %v2904_v24 = vpack.c.b16 %v2893_v9, %v2892_v37  ;;  %v3034_v52 = vld [vmem:[#allocation2 + $0x54] sm:$0xe]  ;;  %v3881_v1 = vrot.slane %v2211_v58, 9  ;;  %v2671_v58 = vld [vmem:[#allocation2 + $0x68] sm:$0x1] }
 0x172   : > { %v2167_v27 = vpop.f32.mrf.mxu0  ;;  %v2803_v40 = vrot.slane %v2802_v35, 4  ;;  %v2813_v5 = vrot.slane %v2812_v38, 4  ;;  %v4065_v32 = vrot.slane %v3034_v52, 9  ;;  %v2823_v37 = vshll.u32 %v2669_v22, 16 }
 0x173   : > { %v5426_v60 = vadd.f32 %v2165_v53, %v1818_v36  ;;  %v2815_v53 = vshll.u32 %v2668_v23, 16  ;;  %v3100_v36 = vrot.slane %v3098_v15, 4  ;;  %v2829_v9 = vshll.u32 %v5430_v8, 16 }
 0x174   : > { %v2276_v55 = vsel %vm5008_vm13, %v3881_v1, %v2275_v6 }
 0x175   : > { %v2817_v20 = vrot.slane %v2815_v53, 5 }
 0x176   : > { %v1595_v13 = vpop.f32.mrf.mxu2 }
 0x177   : > { %v1625_v2 = vadd.f32 %v1595_v13, %v1367_v33  ;;  %v3101_v33 = vrot.slane %v2668_v23, 5  ;;  %v2818_v13 = vsel %vm4825_vm10, %v2813_v5, %v2817_v20 }
 0x178   : > { %v1789_v30 = vpop.f32.mrf.mxu3  ;;  %v1369_v47 = vpop.f32.mrf.mxu1  ;;  %v2895_v38 = vunpack.c.l.b16 %v2818_v13  ;;  %v2672_v13 = vld [vmem:[#allocation2 + $0x6c] sm:$0xf] }
 0x179   : > { %v1819_v17 = vadd.f32 %v1789_v30, %v1625_v2  ;;  %v1370_v12 = vadd.f32 %v1369_v47, %v5265_v56  ;;  %v2808_v56 = vsel %vm4825_vm10, %v2803_v40, %v2807_v41  ;;  %v3099_v2 = vsel %vm5008_vm13, %v4065_v32, %v3098_v15  ;;  %v4190_v32 = vld [vmem:[#allocation2 + $0x54] sm:$0xff] }
 0x17a   : > { %v2170_v4 = vpop.f32.mrf.mxu0  ;;  %v3102_v30 = vsel %vm5008_vm13, %v3100_v36, %v3101_v33  ;;  %v2321_v47 = vunpack.c.l.b16 %v2276_v55  ;;  %v2894_v35 = vunpack.c.l.b16 %v2808_v56  ;;  %v3144_v53 = vunpack.c.l.b16 %v3099_v2  ;;  %v5462_v2 = vld [vmem:[#allocation2 + $0x70] sm:$0xf] }
 0x17b   : > { %2419 = vmatmul.bf16.gmra.mxu1 %v2331_v49  ;;  %2614 = vmatmul.bf16.gmra.mxu2 %v4189_v57  ;;  %v5432_v63 = vadd.f32 %v2167_v27, %v1819_v17  ;;  %v2833_v27 = vshrl.u32 %v5430_v8, 16  ;;  %v2822_v49 = vrot.slane %v2820_v3, 4  ;;  %v2825_v57 = vrot.slane %v2823_v37, 5  ;;  %v3035_v3 = vld [vmem:[#allocation2 + $0x60] sm:$0xe] }
 0x17c   : > { %v3145_v17 = vunpack.c.l.b16 %v3102_v30  ;;  %v2282_v15 = vrot.slane %v5209_v14, 5  ;;  %v2839_v40 = vshll.u32 %v2671_v58, 16  ;;  %v2905_v33 = vpack.c.b16 %v2895_v38, %v2894_v35 }
 0x17d   : > { %2992 = vmatmul.bf16.gmra.mxu3 %v2904_v24  ;;  %3242 = vmatmul.bf16.gmra.mxu0 %v3154_v54  ;;  %v5450_v24 = vrot.slane %v2829_v9, 5  ;;  %v2835_v6 = vrot.slane %v2833_v27, 4  ;;  %v2322_v54 = vunpack.c.l.b16 %v2279_v44  ;;  %v2826_v22 = vor.u32 %v2825_v57, %v2822_v49 }
 0x17e   : > { %v1598_v29 = vpop.f32.mrf.mxu2  ;;  %v3882_v9 = vrot.slane %v2212_v18, 9  ;;  %v2284_v14 = vrot.slane %v2282_v15, 4  ;;  %v2285_v27 = vrot.slane %v5227_v39, 5  ;;  %v4066_v55 = vrot.slane %v3035_v3, 9 }
 0x17f   : > { %v1626_v46 = vadd.f32 %v1598_v29, %v1370_v12  ;;  %v2836_v21 = vor.u32 %v2835_v6, %v5450_v24  ;;  %v2332_v12 = vpack.c.b16 %v2322_v54, %v2321_v47  ;;  %v3155_v29 = vpack.c.b16 %v3145_v17, %v3144_v53 }
 0x180   : > { %v1792_v19 = vpop.f32.mrf.mxu3  ;;  %v1371_v28 = vpop.f32.mrf.mxu1  ;;  %v3108_v56 = vrot.slane %v2671_v58, 5  ;;  %v2283_v39 = vsel %vm5008_vm13, %v3882_v9, %v2282_v15  ;;  %v2286_v49 = vsel %vm5008_vm13, %v2284_v14, %v2285_v27  ;;  %v2844_v35 = vshrl.u32 %v2672_v13, 16  ;;  %v4191_v14 = vld [vmem:[#allocation2 + $0x60] sm:$0xff] }
 0x181   : > { %v1820_v45 = vadd.f32 %v1792_v19, %v1626_v46  ;;  %v1372_v52 = vadd.f32 %v1371_v28, %v5283_v31  ;;  %v2827_v46 = vrot.slane %v2826_v22, 4  ;;  %v2837_v19 = vrot.slane %v2836_v21, 4 }
 0x182   : > { %v2172_v23 = vpop.f32.mrf.mxu0  ;;  %v2841_v28 = vrot.slane %v2839_v40, 5  ;;  %v2847_v38 = vshll.u32 %v2672_v13, 16  ;;  %v2853_v53 = vshll.u32 %v5462_v2, 16  ;;  %v2857_v17 = vshrl.u32 %v5462_v2, 16 }
 0x183   : > { %v5452_v41 = vadd.f32 %v2170_v4, %v1820_v45  ;;  %v3105_v4 = vrot.slane %v5430_v8, 5  ;;  %v2832_v57 = vsel %vm4825_vm10, %v2827_v46, %v5450_v24  ;;  %v2323_v15 = vunpack.c.l.b16 %v2283_v39 }
 0x184   : > { %v2842_v47 = vsel %vm4825_vm10, %v2837_v19, %v2841_v28  ;;  %v2896_v18 = vunpack.c.l.b16 %v2832_v57  ;;  %v2289_v46 = vrot.slane %v5236_v62, 5  ;;  %v2292_v62 = vrot.slane %v5254_v25, 5 }
 0x185   : > { %v3107_v44 = vrot.slane %v3105_v4, 4  ;;  %v2897_v22 = vunpack.c.l.b16 %v2842_v47 }
 0x186   : > { %v1600_v1 = vpop.f32.mrf.mxu2 }
 0x187   : > { %v1627_v5 = vadd.f32 %v1600_v1, %v1372_v52  ;;  %v3109_v54 = vsel %vm5008_vm13, %v3107_v44, %v3108_v56  ;;  %v2324_v1 = vunpack.c.l.b16 %v2286_v49  ;;  %v2906_v27 = vpack.c.b16 %v2897_v22, %v2896_v18 }
 0x188   : > { %v1794_v20 = vpop.f32.mrf.mxu3  ;;  %v1374_v36 = vpop.f32.mrf.mxu1  ;;  %v3147_v40 = vunpack.c.l.b16 %v3109_v54  ;;  %v2291_v49 = vrot.slane %v2289_v46, 4 }
 0x189   : > { %v1821_v37 = vadd.f32 %v1794_v20, %v1627_v5  ;;  %v1375_v8 = vadd.f32 %v1374_v36, %v5296_v48  ;;  %v3106_v48 = vsel %vm5008_vm13, %v4066_v55, %v3105_v4  ;;  %v2846_v20 = vrot.slane %v2844_v35, 4  ;;  %v2213_v55 = vld [vmem:[#allocation2 + $0x60] sm:$0xe] }
 0x18a   : > { %v2175_v31 = vpop.f32.mrf.mxu0  ;;  %v3146_v21 = vunpack.c.l.b16 %v3106_v48  ;;  %v2859_v4 = vrot.slane %v2857_v17, 4  ;;  %v2333_v9 = vpack.c.b16 %v2324_v1, %v2323_v15  ;;  %v3883_v39 = vrot.slane %v2213_v55, 9 }
 0x18b   : > { %2424 = vmatmul.bf16.gmra.mxu1 %v2332_v12  ;;  %2619 = vmatmul.bf16.gmra.mxu2 %v4190_v32  ;;  %v5459_v45 = vadd.f32 %v2172_v23, %v1821_v37  ;;  %v2849_v12 = vrot.slane %v2847_v38, 5  ;;  %v2855_v32 = vrot.slane %v2853_v53, 5 }
 0x18c   : > { %v3156_v28 = vpack.c.b16 %v3147_v40, %v3146_v21 }
 0x18d   : > { %2997 = vmatmul.bf16.gmra.mxu3 %v2905_v33  ;;  %3247 = vmatmul.bf16.gmra.mxu0 %v3155_v29  ;;  %v2674_v33 = vld [vmem:[#allocation2 + $0x74] sm:$0x1]  ;;  %v2860_v44 = vor.u32 %v2859_v4, %v2855_v32 }
 0x18e   : > { %v1603_v30 = vpop.f32.mrf.mxu2  ;;  %v2863_v56 = vshll.u32 %v2674_v33, 16  ;;  %v3115_v35 = vrot.slane %v2674_v33, 5 }
 0x18f   : > { %v1628_v23 = vadd.f32 %v1603_v30, %v1375_v8  ;;  %v3112_v30 = vrot.slane %v5462_v2, 5 }
 0x190   : > { %v1797_v6 = vpop.f32.mrf.mxu3  ;;  %v1376_v58 = vpop.f32.mrf.mxu1  ;;  %v2865_v47 = vrot.slane %v2863_v56, 5 }
 0x191   : > { %v1822_v52 = vadd.f32 %v1797_v6, %v1628_v23  ;;  %v1377_v36 = vadd.f32 %v1376_v58, %v5318_v42  ;;  %v3036_v42 = vld [vmem:[#allocation2 + $0x6c] sm:$0xe]  ;;  %v2861_v6 = vrot.slane %v2860_v44, 4  ;;  %v3114_v58 = vrot.slane %v3112_v30, 4 }
 0x192   : > { %v2177_v24 = vpop.f32.mrf.mxu0  ;;  %v4067_v54 = vrot.slane %v3036_v42, 9 }
 0x193   : > { %v5479_v5 = vadd.f32 %v2175_v31, %v1822_v52  ;;  %v2850_v31 = vor.u32 %v2849_v12, %v2846_v20  ;;  %v2290_v52 = vsel %vm5008_vm13, %v3883_v39, %v2289_v46  ;;  %v3116_v22 = vsel %vm5008_vm13, %v3114_v58, %v3115_v35 }
 0x194   : > { %v3113_v18 = vsel %vm5008_vm13, %v4067_v54, %v3112_v30  ;;  %v2325_v21 = vunpack.c.l.b16 %v2290_v52  ;;  %v3149_v33 = vunpack.c.l.b16 %v3116_v22 }
 0x195   : > { %v2851_v23 = vrot.slane %v2850_v31, 4 }
 0x196   : > { %v1605_v29 = vpop.f32.mrf.mxu2 }
 0x197   : > { %v1629_v3 = vadd.f32 %v1605_v29, %v1377_v36  ;;  %v2856_v25 = vsel %vm4825_vm10, %v2851_v23, %v2855_v32  ;;  %v3148_v36 = vunpack.c.l.b16 %v3113_v18 }
 0x198   : > { %v1799_v37 = vpop.f32.mrf.mxu3  ;;  %v1379_v19 = vpop.f32.mrf.mxu1  ;;  %v2898_v12 = vunpack.c.l.b16 %v2856_v25 }
 0x199   : > { %v1823_v8 = vadd.f32 %v1799_v37, %v1629_v3  ;;  %v1380_v48 = vadd.f32 %v1379_v19, %v5269_v51  ;;  %v2866_v51 = vsel %vm4825_vm10, %v2861_v6, %v2865_v47  ;;  %v3157_v46 = vpack.c.b16 %v3149_v33, %v3148_v36 }
 0x19a   : > { %v2180_v13 = vpop.f32.mrf.mxu0  ;;  %v2899_v4 = vunpack.c.l.b16 %v2866_v51 }
 0x19b   : > { %2429 = vmatmul.bf16.gmra.mxu1 %v2333_v9  ;;  %2624 = vmatmul.bf16.gmra.mxu2 %v4191_v14  ;;  %v5484_v57 = vadd.f32 %v2177_v24, %v1823_v8  ;;  %v2293_v24 = vsel %vm5008_vm13, %v2291_v49, %v2292_v62  ;;  %v4192_v9 = vld [vmem:[#allocation2 + $0x6c] sm:$0xff] }
 0x19c   : > { %v2326_v40 = vunpack.c.l.b16 %v2293_v24 }
 0x19d   : > { %3002 = vmatmul.bf16.gmra.mxu3 %v2906_v27  ;;  %3252 = vmatmul.bf16.gmra.mxu0 %v3156_v28  ;;  %v2907_v27 = vpack.c.b16 %v2899_v4, %v2898_v12 }
 0x19e   : > { %v1608_v2 = vpop.f32.mrf.mxu2  ;;  %v2334_v37 = vpack.c.b16 %v2326_v40, %v2325_v21 }
 0x19f   : > { %v1630_v38 = vadd.f32 %v1608_v2, %v1380_v48 }
 0x1a0   : > { %v1802_v53 = vpop.f32.mrf.mxu3  ;;  %v1381_v17 = vpop.f32.mrf.mxu1 }
 0x1a1   : > { %v1824_v15 = vadd.f32 %v1802_v53, %v1630_v38  ;;  %v1382_v32 = vadd.f32 %v1381_v17, %v5286_v26 }
 0x1a2   : > { %v2182_v1 = vpop.f32.mrf.mxu0 }
 0x1a3   : > { %v5500_v20 = vadd.f32 %v2180_v13, %v1824_v15 }
 0x1a6   : > { %v1610_v29 = vpop.f32.mrf.mxu2 }
 0x1a7   : > { %v1631_v3 = vadd.f32 %v1610_v29, %v1382_v32 }
 0x1a8   : > { %v1804_v34 = vpop.f32.mrf.mxu3  ;;  %v1384_v14 = vpop.f32.mrf.mxu1 }
 0x1a9   : > { %v1825_v61 = vadd.f32 %v1804_v34, %v1631_v3  ;;  %v1385_v55 = vadd.f32 %v1384_v14, %v5302_v59 }
 0x1aa   : > { %v2185_v19 = vpop.f32.mrf.mxu0 }
 0x1ab   : > { %2434 = vmatmul.bf16.gmra.mxu1 %v2334_v37  ;;  %2629 = vmatmul.bf16.gmra.mxu2 %v4192_v9  ;;  %v5503_v28 = vadd.f32 %v2182_v1, %v1825_v61 }
 0x1ad   : > { %3007 = vmatmul.bf16.gmra.mxu3 %v2907_v27  ;;  %3257 = vmatmul.bf16.gmra.mxu0 %v3157_v46 }
 0x1ae   : > { %v1613_v31 = vpop.f32.mrf.mxu2 }
 0x1af   : > { %v1632_v26 = vadd.f32 %v1613_v31, %v1385_v55 }
 0x1b0   : > { %v1807_v44 = vpop.f32.mrf.mxu3  ;;  %v1386_v56 = vpop.f32.mrf.mxu1 }
 0x1b1   : > { %v1826_v8 = vadd.f32 %v1807_v44, %v1632_v26  ;;  %v1387_v42 = vadd.f32 %v1386_v56, %v5320_v0 }
 0x1b2   : > { %v2187_v13 = vpop.f32.mrf.mxu0 }
 0x1b3   : > { %v5506_v30 = vadd.f32 %v2185_v19, %v1826_v8 }
 0x1b6   : > { %v1615_v39 = vpop.f32.mrf.mxu2 }
 0x1b7   : > { %v1633_v49 = vadd.f32 %v1615_v39, %v1387_v42 }
 0x1b8   : > { %v1809_v62 = vpop.f32.mrf.mxu3  ;;  %v2400_v23 = vpop.f32.mrf.mxu1 }
 0x1b9   : > { %v1827_v6 = vadd.f32 %v1809_v62, %v1633_v49  ;;  %v2440_v59 = vadd.f32 %v2400_v23, %v5345_v10 }
 0x1ba   : > { %v3223_v47 = vpop.f32.mrf.mxu0 }
 0x1bb   : > { %v5509_v48 = vadd.f32 %v2187_v13, %v1827_v6 }
 0x1be   : > { %v2595_v54 = vpop.f32.mrf.mxu2 }
 0x1bf   : > { %v2635_v58 = vadd.f32 %v2595_v54, %v2440_v59 }
 0x1c0   : > { %v2973_v35 = vpop.f32.mrf.mxu3  ;;  %v2402_v2 = vpop.f32.mrf.mxu1 }
 0x1c1   : > { %v3013_v38 = vadd.f32 %v2973_v35, %v2635_v58  ;;  %v2441_v0 = vadd.f32 %v2402_v2, %v5352_v7 }
 0x1c2   : > { %v3225_v53 = vpop.f32.mrf.mxu0 }
 0x1c3   : > { %v3263_v17 = vadd.f32 %v3223_v47, %v3013_v38 }
 0x1c5   : > { %3279 = vst [vmem:[%s4573_s30] sm:$0xff] %v3263_v17  ;;  %v3316_v10 = vmul.f32 %v3263_v17, %v3263_v17 }
 0x1c6   : > { %v2597_v52 = vpop.f32.mrf.mxu2 }
 0x1c7   : > { %v2636_v24 = vadd.f32 %v2597_v52, %v2441_v0 }
 0x1c8   : > { %v2975_v25 = vpop.f32.mrf.mxu3  ;;  %v2405_v15 = vpop.f32.mrf.mxu1 }
 0x1c9   : > { %v3014_v1 = vadd.f32 %v2975_v25, %v2636_v24  ;;  %v2442_v40 = vadd.f32 %v2405_v15, %v5372_v50 }
 0x1ca   : > { %v3228_v51 = vpop.f32.mrf.mxu0 }
 0x1cb   : > { %v3264_v18 = vadd.f32 %v3225_v53, %v3014_v1 }
 0x1cd   : > { %3280 = vst [vmem:[%s4573_s30 + $0x8] sm:$0xff] %v3264_v18  ;;  %v3295_v22 = vadd.f32 %v3264_v18, %v3263_v17  ;;  %v3317_v21 = vmul.f32 %v3264_v18, %v3264_v18 }
 0x1ce   : > { %v2600_v12 = vpop.f32.mrf.mxu2 }
 0x1cf   : > { %v3332_v4 = vadd.f32 %v3317_v21, %v3316_v10  ;;  %v2637_v36 = vadd.f32 %v2600_v12, %v2442_v40 }
 0x1d0   : > { %v2978_v33 = vpop.f32.mrf.mxu3  ;;  %v2407_v32 = vpop.f32.mrf.mxu1 }
 0x1d1   : > { %v3015_v7 = vadd.f32 %v2978_v33, %v2637_v36  ;;  %v2443_v9 = vadd.f32 %v2407_v32, %v5379_v11 }
 0x1d2   : > { %v3230_v29 = vpop.f32.mrf.mxu0 }
 0x1d3   : > { %v3265_v3 = vadd.f32 %v3228_v51, %v3015_v7 }
 0x1d5   : > { %3281 = vst [vmem:[%s4573_s30 + $0x10] sm:$0xff] %v3265_v3  ;;  %v3296_v34 = vadd.f32 %v3295_v22, %v3265_v3  ;;  %v3318_v37 = vmul.f32 %v3265_v3, %v3265_v3 }
 0x1d6   : > { %v2602_v14 = vpop.f32.mrf.mxu2 }
 0x1d7   : > { %v3333_v27 = vadd.f32 %v3332_v4, %v3318_v37  ;;  %v2638_v46 = vadd.f32 %v2602_v14, %v2443_v9 }
 0x1d8   : > { %v2980_v61 = vpop.f32.mrf.mxu3  ;;  %v2410_v19 = vpop.f32.mrf.mxu1 }
 0x1d9   : > { %v3016_v50 = vadd.f32 %v2980_v61, %v2638_v46  ;;  %v2444_v56 = vadd.f32 %v2410_v19, %v5399_v43 }
 0x1da   : > { %v3233_v55 = vpop.f32.mrf.mxu0 }
 0x1db   : > { %v3266_v31 = vadd.f32 %v3230_v29, %v3016_v50 }
 0x1dd   : > { %3282 = vst [vmem:[%s4573_s30 + $0x18] sm:$0xff] %v3266_v31  ;;  %v3297_v26 = vadd.f32 %v3296_v34, %v3266_v31  ;;  %v3319_v44 = vmul.f32 %v3266_v31, %v3266_v31 }
 0x1de   : > { %v2605_v8 = vpop.f32.mrf.mxu2 }
 0x1df   : > { %v3334_v13 = vadd.f32 %v3333_v27, %v3319_v44  ;;  %v2639_v42 = vadd.f32 %v2605_v8, %v2444_v56 }
 0x1e0   : > { %v2983_v39 = vpop.f32.mrf.mxu3  ;;  %v2412_v49 = vpop.f32.mrf.mxu1 }
 0x1e1   : > { %v3017_v11 = vadd.f32 %v2983_v39, %v2639_v42  ;;  %v2445_v59 = vadd.f32 %v2412_v49, %v5406_v16 }
 0x1e2   : > { %v3235_v62 = vpop.f32.mrf.mxu0 }
 0x1e3   : > { %v3267_v23 = vadd.f32 %v3233_v55, %v3017_v11 }
 0x1e5   : > { %3283 = vst [vmem:[%s4573_s30 + $0x20] sm:$0xff] %v3267_v23  ;;  %v3298_v6 = vadd.f32 %v3297_v26, %v3267_v23  ;;  %v3320_v47 = vmul.f32 %v3267_v23, %v3267_v23 }
 0x1e6   : > { %v2607_v54 = vpop.f32.mrf.mxu2 }
 0x1e7   : > { %v3335_v58 = vadd.f32 %v3334_v13, %v3320_v47  ;;  %v2640_v35 = vadd.f32 %v2607_v54, %v2445_v59 }
 0x1e8   : > { %v2985_v2 = vpop.f32.mrf.mxu3  ;;  %v2415_v38 = vpop.f32.mrf.mxu1 }
 0x1e9   : > { %v3018_v43 = vadd.f32 %v2985_v2, %v2640_v35  ;;  %v2446_v24 = vadd.f32 %v2415_v38, %v5426_v60 }
 0x1ea   : > { %v3238_v53 = vpop.f32.mrf.mxu0 }
 0x1eb   : > { %v3268_v17 = vadd.f32 %v3235_v62, %v3018_v43 }
 0x1ed   : > { %3284 = vst [vmem:[%s4573_s30 + $0x28] sm:$0xff] %v3268_v17  ;;  %v3299_v0 = vadd.f32 %v3298_v6, %v3268_v17  ;;  %v3321_v52 = vmul.f32 %v3268_v17, %v3268_v17 }
 0x1ee   : > { %v2610_v25 = vpop.f32.mrf.mxu2 }
 0x1ef   : > { %v3336_v15 = vadd.f32 %v3335_v58, %v3321_v52  ;;  %v2641_v1 = vadd.f32 %v2610_v25, %v2446_v24 }
 0x1f0   : > { %v2988_v51 = vpop.f32.mrf.mxu3  ;;  %v2417_v18 = vpop.f32.mrf.mxu1 }
 0x1f1   : > { %v3019_v16 = vadd.f32 %v2988_v51, %v2641_v1  ;;  %v2447_v12 = vadd.f32 %v2417_v18, %v5432_v63 }
 0x1f2   : > { %v3240_v10 = vpop.f32.mrf.mxu0 }
 0x1f3   : > { %v3269_v22 = vadd.f32 %v3238_v53, %v3019_v16 }
 0x1f5   : > { %3285 = vst [vmem:[%s4573_s30 + $0x30] sm:$0xff] %v3269_v22  ;;  %v3300_v21 = vadd.f32 %v3299_v0, %v3269_v22  ;;  %v3322_v40 = vmul.f32 %v3269_v22, %v3269_v22 }
 0x1f6   : > { %v2612_v4 = vpop.f32.mrf.mxu2 }
 0x1f7   : > { %v3337_v36 = vadd.f32 %v3336_v15, %v3322_v40  ;;  %v2642_v33 = vadd.f32 %v2612_v4, %v2447_v12 }
 0x1f8   : > { %v2990_v32 = vpop.f32.mrf.mxu3  ;;  %v2420_v7 = vpop.f32.mrf.mxu1 }
 0x1f9   : > { %v3020_v60 = vadd.f32 %v2990_v32, %v2642_v33  ;;  %v2448_v9 = vadd.f32 %v2420_v7, %v5452_v41 }
 0x1fa   : > { %v3243_v29 = vpop.f32.mrf.mxu0 }
 0x1fb   : > { %v3270_v3 = vadd.f32 %v3240_v10, %v3020_v60 }
 0x1fd   : > { %3286 = vst [vmem:[%s4573_s30 + $0x38] sm:$0xff] %v3270_v3  ;;  %v3301_v34 = vadd.f32 %v3300_v21, %v3270_v3  ;;  %v3323_v37 = vmul.f32 %v3270_v3, %v3270_v3 }
 0x1fe   : > { %v2615_v14 = vpop.f32.mrf.mxu2 }
 0x1ff   : > { %v3338_v27 = vadd.f32 %v3337_v36, %v3323_v37  ;;  %v2643_v46 = vadd.f32 %v2615_v14, %v2448_v9 }
 0x200   : > { %v2993_v61 = vpop.f32.mrf.mxu3  ;;  %v2422_v19 = vpop.f32.mrf.mxu1 }
 0x201   : > { %v3021_v63 = vadd.f32 %v2993_v61, %v2643_v46  ;;  %v2449_v44 = vadd.f32 %v2422_v19, %v5459_v45 }
 0x202   : > { %v3245_v50 = vpop.f32.mrf.mxu0 }
 0x203   : > { %v3271_v55 = vadd.f32 %v3243_v29, %v3021_v63 }
 0x205   : > { %3287 = vst [vmem:[%s4573_s30 + $0x40] sm:$0xff] %v3271_v55  ;;  %v3302_v31 = vadd.f32 %v3301_v34, %v3271_v55  ;;  %v3324_v26 = vmul.f32 %v3271_v55, %v3271_v55 }
 0x206   : > { %v2617_v56 = vpop.f32.mrf.mxu2 }
 0x207   : > { %v3339_v8 = vadd.f32 %v3338_v27, %v3324_v26  ;;  %v2644_v13 = vadd.f32 %v2617_v56, %v2449_v44 }
 0x208   : > { %v2995_v42 = vpop.f32.mrf.mxu3  ;;  %v2425_v39 = vpop.f32.mrf.mxu1 }
 0x209   : > { %v3022_v41 = vadd.f32 %v2995_v42, %v2644_v13  ;;  %v2450_v6 = vadd.f32 %v2425_v39, %v5479_v5 }
 0x20a   : > { %v3248_v49 = vpop.f32.mrf.mxu0 }
 0x20b   : > { %v3272_v11 = vadd.f32 %v3245_v50, %v3022_v41 }
 0x20d   : > { %3288 = vst [vmem:[%s4573_s30 + $0x48] sm:$0xff] %v3272_v11  ;;  %v3303_v62 = vadd.f32 %v3302_v31, %v3272_v11  ;;  %v3325_v23 = vmul.f32 %v3272_v11, %v3272_v11 }
 0x20e   : > { %v2620_v47 = vpop.f32.mrf.mxu2 }
 0x20f   : > { %v3340_v59 = vadd.f32 %v3339_v8, %v3325_v23  ;;  %v2645_v54 = vadd.f32 %v2620_v47, %v2450_v6 }
 0x210   : > { %v2998_v58 = vpop.f32.mrf.mxu3  ;;  %v2427_v35 = vpop.f32.mrf.mxu1 }
 0x211   : > { %v3023_v45 = vadd.f32 %v2998_v58, %v2645_v54  ;;  %v2451_v17 = vadd.f32 %v2427_v35, %v5484_v57 }
 0x212   : > { %v3250_v2 = vpop.f32.mrf.mxu0 }
 0x213   : > { %v3273_v38 = vadd.f32 %v3248_v49, %v3023_v45 }
 0x215   : > { %3289 = vst [vmem:[%s4573_s30 + $0x50] sm:$0xff] %v3273_v38  ;;  %v3304_v43 = vadd.f32 %v3303_v62, %v3273_v38  ;;  %v3326_v53 = vmul.f32 %v3273_v38, %v3273_v38 }
 0x216   : > { %v2622_v0 = vpop.f32.mrf.mxu2 }
 0x217   : > { %v3341_v52 = vadd.f32 %v3340_v59, %v3326_v53  ;;  %v2646_v24 = vadd.f32 %v2622_v0, %v2451_v17 }
 0x218   : > { %v3000_v25 = vpop.f32.mrf.mxu3  ;;  %v2430_v5 = vpop.f32.mrf.mxu1 }
 0x219   : > { %v3024_v15 = vadd.f32 %v3000_v25, %v2646_v24  ;;  %v2452_v10 = vadd.f32 %v2430_v5, %v5500_v20 }
 0x21a   : > { %v3253_v51 = vpop.f32.mrf.mxu0 }
 0x21b   : > { %v3274_v1 = vadd.f32 %v3250_v2, %v3024_v15 }
 0x21d   : > { %3290 = vst [vmem:[%s4573_s30 + $0x58] sm:$0xff] %v3274_v1  ;;  %v3305_v18 = vadd.f32 %v3304_v43, %v3274_v1  ;;  %v3327_v16 = vmul.f32 %v3274_v1, %v3274_v1 }
 0x21e   : > { %v2625_v22 = vpop.f32.mrf.mxu2 }
 0x21f   : > { %v3342_v21 = vadd.f32 %v3341_v52, %v3327_v16  ;;  %v2647_v40 = vadd.f32 %v2625_v22, %v2452_v10 }
 0x220   : > { %v3003_v12 = vpop.f32.mrf.mxu3  ;;  %v2432_v57 = vpop.f32.mrf.mxu1 }
 0x221   : > { %v3025_v4 = vadd.f32 %v3003_v12, %v2647_v40  ;;  %v2453_v7 = vadd.f32 %v2432_v57, %v5503_v28 }
 0x222   : > { %v3255_v60 = vpop.f32.mrf.mxu0 }
 0x223   : > { %v3275_v36 = vadd.f32 %v3253_v51, %v3025_v4 }
 0x225   : > { %3291 = vst [vmem:[%s4573_s30 + $0x60] sm:$0xff] %v3275_v36  ;;  %v3306_v33 = vadd.f32 %v3305_v18, %v3275_v36  ;;  %v3328_v32 = vmul.f32 %v3275_v36, %v3275_v36 }
 0x226   : > { %v2627_v29 = vpop.f32.mrf.mxu2 }
 0x227   : > { %v3343_v3 = vadd.f32 %v3342_v21, %v3328_v32  ;;  %v2648_v34 = vadd.f32 %v2627_v29, %v2453_v7 }
 0x228   : > { %v3005_v37 = vpop.f32.mrf.mxu3  ;;  %v2435_v20 = vpop.f32.mrf.mxu1 }
 0x229   : > { %v3026_v9 = vadd.f32 %v3005_v37, %v2648_v34  ;;  %v2454_v61 = vadd.f32 %v2435_v20, %v5506_v30 }
 0x22a   : > { %v3258_v28 = vpop.f32.mrf.mxu0 }
 0x22b   : > { %v3276_v14 = vadd.f32 %v3255_v60, %v3026_v9 }
 0x22d   : > { %3292 = vst [vmem:[%s4573_s30 + $0x68] sm:$0xff] %v3276_v14  ;;  %v3307_v27 = vadd.f32 %v3306_v33, %v3276_v14  ;;  %v3329_v46 = vmul.f32 %v3276_v14, %v3276_v14 }
 0x22e   : > { %v2630_v19 = vpop.f32.mrf.mxu2 }
 0x22f   : > { %v3344_v63 = vadd.f32 %v3343_v3, %v3329_v46  ;;  %v2649_v50 = vadd.f32 %v2630_v19, %v2454_v61 }
 0x230   : > { %v3008_v55 = vpop.f32.mrf.mxu3  ;;  %v2437_v26 = vpop.f32.mrf.mxu1 }
 0x231   : > { %v3027_v31 = vadd.f32 %v3008_v55, %v2649_v50  ;;  %v2455_v13 = vadd.f32 %v2437_v26, %v5509_v48 }
 0x232   : > { %v3260_v11 = vpop.f32.mrf.mxu0 }
 0x233   : > { %v3277_v44 = vadd.f32 %v3258_v28, %v3027_v31 }
 0x235   : > { %3293 = vst [vmem:[%s4573_s30 + $0x70] sm:$0xff] %v3277_v44  ;;  %v3308_v56 = vadd.f32 %v3307_v27, %v3277_v44  ;;  %v3330_v8 = vmul.f32 %v3277_v44, %v3277_v44 }
 0x236   : > { %v2632_v42 = vpop.f32.mrf.mxu2 }
 0x237   : > { %v3345_v39 = vadd.f32 %v3344_v63, %v3330_v8  ;;  %v2650_v41 = vadd.f32 %v2632_v42, %v2455_v13 }
 0x238   : > { %v3010_v30 = vpop.f32.mrf.mxu3 }
 0x239   : > { %v3028_v49 = vadd.f32 %v3010_v30, %v2650_v41 }
 0x23b   : > { %v3278_v62 = vadd.f32 %v3260_v11, %v3028_v49 }
 0x23d   : > { %3294 = vst [vmem:[%s4573_s30 + $0x78] sm:$0xff] %v3278_v62  ;;  %v3309_v23 = vadd.f32 %v3308_v56, %v3278_v62  ;;  %v3331_v6 = vmul.f32 %v3278_v62, %v3278_v62  ;;  %s3383_s30 = scalar_lea.hbm %s5600_s7, %s4118_s21 }
 0x23e   : > { %s3387_s27 = sshll.u32 %s3383_s30, 4  ;;  %s3388_s27 = int_to_ptr.hbm [resolvable:$true] %s3387_s27 }
 0x23f   : > { %v3310_v47 = vrot.slane %v3309_v23, 4  ;;  %v3346_v59 = vadd.f32 %v3345_v39, %v3331_v6  ;;  %s4331_s9 = sshra.s32 %s3388_s27, 4  ;;  %s4332_s9 = int_to_ptr.hbm [resolvable:$true] %s4331_s9 }
 0x240   : > { %s4333_s11 = scalar_lea.hbm %s4332_s9, 2  ;;  %p4338_p11 = scmp.lt.s32.totalorder %s4332_s9, %s5600_s7 }
 0x241   : > { %v3311_v54 = vadd.f32 %v3310_v47, %v3309_v23  ;;  %v3347_v58 = vrot.slane %v3346_v59, 4  ;;  %p4334_p7 = scmp.ne.s32.totalorder %s4332_s9, %s4333_s11  ;;  %p4339_p12 = scmp.lt.s32.totalorder %s4337_s18, %s4333_s11 }
 0x243   : > { %v3312_v35 = vrot.slane %v3311_v54, 2  ;;  %v3348_v48 = vadd.f32 %v3347_v58, %v3346_v59  ;;  %p4335_p9 = pnand %p4334_p7, %p4505_p3  ;;  %p4340_p13 = por %p4339_p12, %p4338_p11 }
 0x245   : > { %v3313_v45 = vadd.f32 %v3312_v35, %v3311_v54  ;;  %v3349_v2 = vrot.slane %v3348_v48, 2  ;;  %p4336_p10 = pneg %p4335_p9 }
 0x247   : > { %v3314_v38 = vrot.slane %v3313_v45, 1  ;;  %v3350_v43 = vadd.f32 %v3349_v2, %v3348_v48  ;;  %p4341_p0 = pnand %p4340_p13, %p4336_p10 }
 0x249   : > { %v3351_v53 = vrot.slane %v3350_v43, 1  ;;  %v3315_v17 = vadd.f32 %v3314_v38, %v3313_v45 }
 0x24b   : > { %v3352_v0 = vadd.f32 %v3351_v53, %v3350_v43 }
 0x24d   : > { %v3354_v52 = vsel %vm730_vm3, %v3315_v17, %v3352_v0 }
 0x24e   : > { %3355 = vst [vmem:[%s399_s20] sm:$0x3] %v3354_v52 }
 0x24f   : > { %4344 = shalt.err (!%p4341_p0)
}
 0x250   : > { %4241 = dma.vmem_to_hbm [thread:$0]  (%p4505_p3), %s3386_s28, 32, %s3388_s27, %s3367_s0  }
 0x251 PF: > { %p4247_p1 = scmp.ge.s32.totalorder %s4411_s8, 2  ;;  %s3412_s22 = sand.u32 1, %s4383_s24  }
 0x252   : > { %s3413_s20 = scalar_lea.sflag [#allocation4], %s3412_s22 }
 0x253   : > { %p4244_p2 = pnand %p4247_p1, %p4514_p8 }
 0x255   : > { %p4245_p4 = pneg %p4244_p2 }
 0x257   : > { %4378 = dma.done.wait (%p4245_p4), %s3413_s20, 32  }
 0x258   : > { %4380 = vsyncadd (%p4245_p4), %s3413_s20, 4294967264  ;;  %s21_s8 = sadd.s32 1, %s4411_s8   ;;  %s5625_s28 = sld [smem:[#allocation6_spill]] }
 0x259   : > { %p18_p5 = scmp.ge.s32.totalorder %s21_s8, 6   ;;  %s5626_s14 = sld [smem:[#allocation7_spill]] }
 0x25a   : > { %s5627_s30 = sld [smem:[#allocation8_spill]]  ;;  %s5628_s24 = smov %s4387_s25 }
 0x25b   : > { %s5629_s25 = smov %s4391_s26  ;;  %s5630_s26 = smov %s4523_s19 }
 0x25c   : > { %s5631_s27 = smov %s4403_s29  ;;  %20 = sbr.rel (!%p18_p5) target bundleno = 7 (0x7), region = 116 }
 0x25f   : > { %s5632_s29 = smov %s5626_s14 }
 0x261   :  { %3419 = vsyncpa [#allocation4], 1 }
 0x262   :  { %3421 = vsyncpa [#allocation4 + $0x1], 1 }

// kernel: dncnn_forward.5
= control target key start
LH: loop header
LB: loop body
LE: loop exit
PB: predicated region body
PF: predicated region fallthrough
CT: control target
= control target key end

     0   :  { %s4384_s24 = smov 0   ;;  %s4386_s25 = smov 0   ;;  %s5453_s0 = inlined_call_operand.vmem [shape: f32[1,128], index: 0, kind: input, shape index: {}]   ;;  %s5454_s1 = inlined_call_operand.vmem [shape: f32[1,128], index: 1, kind: input, shape index: {}]   ;;  %s5455_s2 = inlined_call_operand.vmem [shape: f32[2,16,16,128], index: 2, kind: input, shape index: {}, may-alias: {2,3,4}]   ;;  %s5456_s3 = inlined_call_operand.vmem [shape: f32[2,16,16,128], index: 3, kind: input, shape index: {}, may-alias: {2,3,4}]   ;;  %s5457_s4 = inlined_call_operand.vmem [shape: f32[2,16,16,128], index: 4, kind: input, shape index: {}, may-alias: {2,3,4}]   ;;  %s5458_s5 = inlined_call_operand.vmem [shape: bf16[3,3,128,128], index: 5, kind: input, shape index: {}]   ;;  %s5459_s6 = inlined_call_operand.vmem [shape: f32[2,16,16,128], index: 6, kind: output, shape index: {0}]   ;;  %s5460_s7 = inlined_call_operand.vmem [shape: f32[2,2,2,128], index: 7, kind: output, shape index: {1}]  }
   0x1   :  { %s4388_s26 = smov 0   ;;  %s4390_s27 = smov 0  }
   0x2   :  { %s4392_s28 = smov 0  }
   0x3 LB: > { %s27_s29 = sadd.s32 1, %s4333_s26  ;;  %s30_s30 = sadd.s32 1, %s4337_s27  ;;  %s4341_s28 = sphi %s4392_s28, %s18_s28   ;;  %s4337_s27 = sphi %s4390_s27, %s5477_s27   ;;  %s4333_s26 = sphi %s4388_s26, %s5476_s26   ;;  %s4329_s25 = sphi %s4386_s25, %s5475_s25   ;;  %s4325_s24 = sphi %s4384_s24, %s5474_s24  }
   0x4   : > { %p28_p0 = scmp.ge.s32.totalorder %s27_s29, 2  ;;  %p3578_p1 = scmp.ge.s32.totalorder %s4341_s28, 1 }
   0x5   : > { %p324_p2 = scmp.lt.s32.totalorder %s4341_s28, 5 }
   0x6   : > { %s5479_s29 = smov (%p28_p0, %s27_s29), 0  ;;  %s5481_s30 = smov (!%p28_p0, %s30_s30), %s4337_s27 }
   0x7   : > { %p325_p3 = pnand %p3578_p1, %p324_p2  ;;  %p32_p4 = scmp.ge.s32.totalorder %s5481_s30, 2 }
   0x8   : > { %s3579_s8 = sshll.u32 (!%p325_p3), %s4325_s24, 3  ;;  %p401_p5 = scmp.lt.s32.totalorder (!%p325_p3), %s4329_s25, 1 }
   0x9   : > { %s5483_s30 = smov (%p32_p4, %s5481_s30), 0  ;;  %328 = sbr.rel (%p325_p3) target bundleno = 582 (0x246), region = 44 }
   0xa   : > { %p403_p6 = scmp.lt.s32.totalorder (!%p325_p3), %s3579_s8, 15  ;;  %s3583_s9 = sadd.s32 (!%p325_p3), 4294967295, %s4325_s24 }
   0xb   : > { %p4427_p7 = scmp.gt.s32.totalorder (!%p325_p3), %s3583_s9, 0  ;;  %s428_s13 = sadd.s32 (!%p325_p3), 1, %s4325_s24 }
   0xc   : > { %p4435_p8 = scmp.lt.s32.totalorder (!%p325_p3), %s428_s13, 1  ;;  %p458_p11 = scmp.lt.s32.totalorder (!%p325_p3), %s4325_s24, 1 }
   0xd   : > { %p3598_p12 = scmp.le.s32.totalorder (!%p325_p3), %s4325_s24, 0 }
   0xe   : > { %v4343_v0 = vmov 0   ;;  %s5485_s25 = smov (!%p401_p5, %s4329_s25), 1  ;;  %s5487_s8 = smov (!%p403_p6, %s3579_s8), 15  ;;  %v4442_v1 = vld [vmem:[%s5453_s0] ss:$0 sm:$0xff]  ;;  %vm747_vm0 = vcmask 1043456  }
   0xf   : > { %470 = vst [vmem:[#allocation2 + $0xc] sm:$0xf] %v4343_v0  ;;  %s4425_s10 = sshll.u32 %s5485_s25, 5  ;;  %s3580_s12 = sshll.u32 %s5487_s8, 1  ;;  %v4459_v2 = vld [vmem:[%s5454_s1] ss:$0 sm:$0xff] }
  0x10   : > { %467 = vst [vmem:[#allocation2] sm:$0xf] %v4343_v0  ;;  %s407_s14 = sadd.s32 %s4425_s10, %s3580_s12  ;;  %s5489_s9 = smov (!%p4427_p7, %s3583_s9), 0  ;;  %vm748_vm1 = vsmask.f32 7938  ;;  %vm754_vm4 = vcmask 1040384  }
  0x11   : > { %468 = vst [vmem:[#allocation2 + $0x4] sm:$0xf] %v4343_v0  ;;  %s3582_s18 = sshll.u32 %s407_s14, 3  ;;  %s5491_s13 = smov (!%p4435_p8, %s428_s13), 1  ;;  %vm583_vm2 = vsmask.f32 256  ;;  %vm4543_vm5 = vmand %vm747_vm0, %vm748_vm1 }
  0x12   : > { %469 = vst [vmem:[#allocation2 + $0x8] sm:$0x1] %v4343_v0  ;;  %s4449_s21 = scalar_lea.vmem %s5455_s2, %s3582_s18  ;;  %s4454_s8 = scalar_lea.vmem %s5459_s6, %s3582_s18  ;;  %vm584_vm3 = vsmask.f32 4368  ;;  %vm4561_vm7 = vmand %vm754_vm4, %vm583_vm2 }
  0x13   : > { %471 = vst [vmem:[#allocation2 + $0x10] sm:$0xf] %v4343_v0  ;;  %v497_v3 = vld [vmem:[%s4449_s21] sm:$0xff]  ;;  %v498_v4 = vld [vmem:[%s4449_s21 + $0x8] sm:$0xff]  ;;  %v499_v5 = vld [vmem:[%s4449_s21 + $0x10] sm:$0xff]  ;;  %s3584_s11 = sshll.u32 %s5489_s9, 3 }
  0x14   : > { %472 = vst [vmem:[#allocation2 + $0x14] sm:$0x1] %v4343_v0  ;;  %v516_v6 = vmul.f32 %v4442_v1, %v497_v3  ;;  %v517_v7 = vmul.f32 %v4442_v1, %v498_v4  ;;  %v518_v8 = vmul.f32 %v4442_v1, %v499_v5  ;;  %v500_v9 = vld [vmem:[%s4449_s21 + $0x18] sm:$0xff]  ;;  %v501_v10 = vld [vmem:[%s4449_s21 + $0x20] sm:$0xff]  ;;  %v502_v11 = vld [vmem:[%s4449_s21 + $0x28] sm:$0xff]  ;;  %p4488_p9 = scmp.lt.s32.totalorder %s3584_s11, 15 }
  0x15   : > { %473 = vst [vmem:[#allocation2 + $0x18] sm:$0xf] %v4343_v0  ;;  %v519_v12 = vmul.f32 %v4442_v1, %v500_v9  ;;  %v520_v13 = vmul.f32 %v4442_v1, %v501_v10  ;;  %v521_v14 = vmul.f32 %v4442_v1, %v502_v11  ;;  %v503_v15 = vld [vmem:[%s4449_s21 + $0x30] sm:$0xff]  ;;  %v504_v16 = vld [vmem:[%s4449_s21 + $0x38] sm:$0xff]  ;;  %s3588_s15 = sshll.u32 %s5491_s13, 3  ;;  %v505_v21 = vld [vmem:[%s4449_s21 + $0x40] sm:$0xff] }
  0x16   : > { %474 = vst [vmem:[#allocation2 + $0x1c] sm:$0xf] %v4343_v0  ;;  %v535_v17 = vadd.f32 %v4459_v2, %v516_v6  ;;  %v536_v18 = vadd.f32 %v4459_v2, %v517_v7  ;;  %v537_v19 = vadd.f32 %v4459_v2, %v518_v8  ;;  %v522_v20 = vmul.f32 %v4442_v1, %v503_v15  ;;  %p434_p10 = scmp.lt.s32.totalorder %s3588_s15, 15  ;;  %v506_v26 = vld [vmem:[%s4449_s21 + $0x48] sm:$0xff]  ;;  %s5493_s11 = smov (!%p4488_p9, %s3584_s11), 15  ;;  %v507_v51 = vld [vmem:[%s4449_s21 + $0x50] sm:$0xff]  ;;  %vm4553_vm6 = vmor %vm583_vm2, %vm584_vm3 }
  0x17   : > { %475 = vst [vmem:[#allocation2 + $0x20] sm:$0x1] %v4343_v0  ;;  %v538_v22 = vadd.f32 %v4459_v2, %v519_v12  ;;  %v539_v23 = vadd.f32 %v4459_v2, %v520_v13  ;;  %v540_v24 = vadd.f32 %v4459_v2, %v521_v14  ;;  %v523_v25 = vmul.f32 %v4442_v1, %v504_v16  ;;  %s3585_s9 = sshll.u32 %s5493_s11, 1  ;;  %s3596_s13 = sshll.u32 %s5485_s25, 1  ;;  %v4532_v46 = vld [vmem:[#allocation2 + $0xc] sm:$0xf] }
  0x18   : > { %476 = vst [vmem:[#allocation2 + $0x24] sm:$0xf] %v4343_v0  ;;  %v551_v27 = vmax.f32 %v535_v17, 0.0  ;;  %v552_v28 = vmax.f32 %v536_v18, 0.0  ;;  %v553_v29 = vmax.f32 %v537_v19, 0.0  ;;  %s5495_s15 = smov (!%p434_p10, %s3588_s15), 15  ;;  %v4510_v31 = vadd.f32 %v4459_v2, %v522_v20  ;;  %s421_s17 = sadd.s32 %s3585_s9, %s4425_s10 }
  0x19   : > { %477 = vst [vmem:[#allocation2 + $0x28] sm:$0xf] %v4343_v0  ;;  %v554_v30 = vmax.f32 %v538_v22, 0.0  ;;  %v4513_v32 = vadd.f32 %v4459_v2, %v523_v25  ;;  %v524_v33 = vmul.f32 %v4442_v1, %v505_v21  ;;  %v555_v37 = vmax.f32 %v539_v23, 0.0  ;;  %s3589_s18 = sshll.u32 %s5495_s15, 1  ;;  %s3587_s19 = sshll.u32 %s421_s17, 3 }
  0x1a   : > { %478 = vst [vmem:[#allocation2 + $0x2c] sm:$0x1] %v4343_v0  ;;  %v567_v34 = vpack.c.bf16 %v551_v27, %v551_v27  ;;  %v568_v35 = vpack.c.bf16 %v552_v28, %v552_v28  ;;  %v569_v36 = vpack.c.bf16 %v553_v29, %v553_v29  ;;  %v556_v39 = vmax.f32 %v540_v24, 0.0  ;;  %s438_s20 = sadd.s32 %s3589_s18, %s4425_s10  ;;  %s4530_s12 = scalar_lea.vmem %s5456_s3, %s3587_s19  ;;  %v508_v22 = vld [vmem:[%s4449_s21 + $0x58] sm:$0xff] }
  0x1b   : > { %479 = vst [vmem:[#allocation2 + $0x30] sm:$0xf] %v4343_v0  ;;  %v570_v38 = vpack.c.bf16 %v554_v30, %v554_v30  ;;  %v4521_v40 = vadd.f32 %v4459_v2, %v524_v33  ;;  %v525_v41 = vmul.f32 %v4442_v1, %v506_v26  ;;  %v571_v45 = vpack.c.bf16 %v555_v37, %v555_v37  ;;  %s3591_s16 = sshll.u32 %s438_s20, 3  ;;  %v756_v55 = vld [vmem:[#allocation2 + $0x14] sm:$0x1] }
  0x1c   : > { %480 = vst [vmem:[#allocation2 + $0x34] sm:$0xf] %v4343_v0  ;;  %v587_v42 = vshrl.u32 %v567_v34, 16  ;;  %v590_v43 = vshll.u32 %v567_v34, 16  ;;  %v595_v44 = vshrl.u32 %v568_v35, 16  ;;  %v598_v47 = vshll.u32 %v568_v35, 16  ;;  %s4539_s14 = scalar_lea.vmem %s5457_s4, %s3591_s16 }
  0x1d   : > { %481 = vst [vmem:[#allocation2 + $0x38] sm:$0x1] %v4343_v0  ;;  %v604_v48 = vshrl.u32 %v569_v36, 16  ;;  %v607_v49 = vshll.u32 %v569_v36, 16  ;;  %v572_v50 = vpack.c.bf16 %v556_v39, %v556_v39  ;;  %v612_v56 = vshrl.u32 %v570_v38, 16  ;;  %s459_s15 = scalar_select %p458_p11, %s4325_s24, 1 }
  0x1e   : > { %482 = vst [vmem:[#allocation2 + $0x3c] sm:$0xf] %v4343_v0  ;;  %v589_v52 = vrot.slane %v587_v42, 7  ;;  %v597_v54 = vrot.slane %v595_v44, 7  ;;  %v615_v57 = vshll.u32 %v570_v38, 16  ;;  %v621_v60 = vshrl.u32 %v571_v45, 16 }
  0x1f   : > { %483 = vst [vmem:[#allocation2 + $0x40] sm:$0xf] %v4343_v0  ;;  %v606_v59 = vrot.slane %v604_v48, 7  ;;  %v624_v61 = vshll.u32 %v571_v45, 16  ;;  %v544_v62 = vadd.f32 %v4459_v2, %v525_v41  ;;  %v4565_v7 = vld [vmem:[#allocation2 + $0x18] sm:$0xf]  ;;  %s461_s9 = sadd.s32 %s3596_s13, %s459_s15  ;;  %v526_v16 = vmul.f32 %v4442_v1, %v507_v51 }
  0x20   : > { %484 = vst [vmem:[#allocation2 + $0x44] sm:$0x1] %v4343_v0  ;;  %v592_v63 = vor.u32 %v590_v43, %v589_v52  ;;  %v593_v3 = vrot.slane %v589_v52, 4  ;;  %v600_v4 = vor.u32 %v598_v47, %v597_v54  ;;  %v602_v5 = vrot.slane %v597_v54, 4  ;;  %s3597_s17 = sshll.u32 %s461_s9, 1 }
  0x21   : > { %485 = vst [vmem:[#allocation2 + $0x48] sm:$0xf] %v4343_v0  ;;  %v609_v8 = vor.u32 %v607_v49, %v606_v59  ;;  %v610_v9 = vrot.slane %v606_v59, 4  ;;  %v614_v10 = vrot.slane %v612_v56, 7  ;;  %v623_v11 = vrot.slane %v621_v60, 7  ;;  %s4581_s18 = scalar_lea.vmem %s5460_s7, %s3597_s17 }
  0x22   : > { %486 = vst [vmem:[#allocation2 + $0x4c] sm:$0xf] %v4343_v0  ;;  %v751_v12 = vsel %vm4543_vm5, %v592_v63, %v4532_v46  ;;  %v601_v13 = vsel %vm4553_vm6, %v593_v3, %v600_v4  ;;  %v763_v14 = vld [vmem:[#allocation2 + $0x20] sm:$0x1]  ;;  %v629_v15 = vshrl.u32 %v572_v50, 16  ;;  %v757_v17 = vsel %vm4561_vm7, %v602_v5, %v756_v55 }
  0x23   : > { %487 = vst [vmem:[#allocation2 + $0x50] sm:$0x1] %v4343_v0  ;;  %v617_v18 = vor.u32 %v615_v57, %v614_v10  ;;  %v619_v19 = vrot.slane %v614_v10, 4  ;;  %v4585_v20 = vor.u32 %v624_v61, %v623_v11  ;;  %v4587_v21 = vld [vmem:[#allocation2 + $0x24] sm:$0xf]  ;;  %v627_v23 = vrot.slane %v623_v11, 4 }
  0x24   : > { %488 = vst [vmem:[#allocation2 + $0x54] sm:$0xf] %v4343_v0  ;;  %v631_v24 = vrot.slane %v629_v15, 7  ;;  %v632_v25 = vshll.u32 %v572_v50, 16  ;;  %v557_v26 = vmax.f32 %v4510_v31, 0.0  ;;  %v760_v27 = vsel %vm4543_vm5, %v609_v8, %v4565_v7  ;;  %v510_v8 = vld [vmem:[%s4449_s21 + $0x68] sm:$0xff] }
  0x25   : > { %489 = vst [vmem:[#allocation2 + $0x58] sm:$0xf] %v4343_v0  ;;  %v618_v28 = vsel %vm4553_vm6, %v610_v9, %v617_v18  ;;  %v764_v29 = vsel %vm4561_vm7, %v619_v19, %v763_v14  ;;  %v558_v30 = vmax.f32 %v4513_v32, 0.0  ;;  %v767_v31 = vsel %vm4543_vm5, %v4585_v20, %v4587_v21  ;;  %v509_v32 = vld [vmem:[%s4449_s21 + $0x60] sm:$0xff]  ;;  %v770_v45 = vld [vmem:[#allocation2 + $0x2c] sm:$0x1] }
  0x26   : > { %490 = vst [vmem:[#allocation2 + $0x5c] sm:$0x1] %v4343_v0  ;;  %v634_v33 = vor.u32 %v632_v25, %v631_v24  ;;  %v573_v34 = vpack.c.bf16 %v557_v26, %v557_v26  ;;  %v559_v35 = vmax.f32 %v4521_v40, 0.0  ;;  %v560_v37 = vmax.f32 %v544_v62, 0.0  ;;  %v773_v50 = vld [vmem:[#allocation2 + $0x30] sm:$0xf] }
  0x27   : > { %491 = vst [vmem:[#allocation2 + $0x60] sm:$0xf] %v4343_v0  ;;  %v574_v36 = vpack.c.bf16 %v558_v30, %v558_v30  ;;  %v545_v38 = vadd.f32 %v4459_v2, %v526_v16  ;;  %v527_v39 = vmul.f32 %v4442_v1, %v508_v22  ;;  %v636_v42 = vrot.slane %v631_v24, 4  ;;  %v777_v61 = vld [vmem:[#allocation2 + $0x38] sm:$0x1] }
  0x28   : > { %492 = vst [vmem:[#allocation2 + $0x64] sm:$0xf] %v4343_v0  ;;  %v635_v41 = vsel %vm4553_vm6, %v627_v23, %v634_v33  ;;  %v638_v43 = vshrl.u32 %v573_v34, 16  ;;  %v641_v44 = vshll.u32 %v573_v34, 16  ;;  %v575_v47 = vpack.c.bf16 %v559_v35, %v559_v35  ;;  %v784_v24 = vld [vmem:[#allocation2 + $0x44] sm:$0x1] }
  0x29   : > { %493 = vst [vmem:[#allocation2 + $0x68] sm:$0x1] %v4343_v0  ;;  %v646_v40 = vshrl.u32 %v574_v36, 16  ;;  %v649_v46 = vshll.u32 %v574_v36, 16  ;;  %v576_v48 = vpack.c.bf16 %v560_v37, %v560_v37  ;;  %v561_v51 = vmax.f32 %v545_v38, 0.0 }
  0x2a   : > { %494 = vst [vmem:[#allocation2 + $0x6c] sm:$0xf] %v4343_v0  ;;  %v640_v49 = vrot.slane %v638_v43, 7  ;;  %v546_v52 = vadd.f32 %v4459_v2, %v527_v39  ;;  %v655_v55 = vshrl.u32 %v575_v47, 16  ;;  %v658_v56 = vshll.u32 %v575_v47, 16 }
  0x2b   : > { %495 = vst [vmem:[#allocation2 + $0x70] sm:$0xf] %v4343_v0  ;;  %v648_v54 = vrot.slane %v646_v40, 7  ;;  %v663_v57 = vshrl.u32 %v576_v48, 16  ;;  %v666_v62 = vshll.u32 %v576_v48, 16  ;;  %v577_v63 = vpack.c.bf16 %v561_v51, %v561_v51 }
  0x2c   : > { %496 = vst [vmem:[#allocation2 + $0x74] sm:$0x1] %v4343_v0  ;;  %v528_v0 = vmul.f32 %v4442_v1, %v509_v32  ;;  %v643_v59 = vor.u32 %v641_v44, %v640_v49  ;;  %v644_v60 = vrot.slane %v640_v49, 4  ;;  %v657_v5 = vrot.slane %v655_v55, 7  ;;  %v787_v33 = vld [vmem:[#allocation2 + $0x48] sm:$0xf] }
  0x2d   : > { %752 = vst [vmem:[#allocation2 + $0xc] sm:$0xf] %v751_v12  ;;  %v651_v3 = vor.u32 %v649_v46, %v648_v54  ;;  %v653_v4 = vrot.slane %v648_v54, 4  ;;  %v665_v7 = vrot.slane %v663_v57, 7  ;;  %v771_v9 = vsel %vm4561_vm7, %v636_v42, %v770_v45  ;;  %v791_v40 = vld [vmem:[#allocation2 + $0x50] sm:$0x1] }
  0x2e   : > { %753 = vst [vmem:[#allocation2 + $0x10] sm:$0xf] %v601_v13  ;;  %v672_v10 = vshrl.u32 %v577_v63, 16  ;;  %v675_v11 = vshll.u32 %v577_v63, 16  ;;  %v562_v12 = vmax.f32 %v546_v52, 0.0  ;;  %v511_v13 = vld [vmem:[%s4449_s21 + $0x70] sm:$0xff]  ;;  %v774_v14 = vsel %vm4543_vm5, %v643_v59, %v773_v50 }
  0x2f   : > { %758 = vst [vmem:[#allocation2 + $0x14] sm:$0x1] %v757_v17  ;;  %v652_v15 = vsel %vm4553_vm6, %v644_v60, %v651_v3  ;;  %v660_v16 = vor.u32 %v658_v56, %v657_v5  ;;  %v780_v17 = vld [vmem:[#allocation2 + $0x3c] sm:$0xf]  ;;  %v661_v18 = vrot.slane %v657_v5, 4  ;;  %v668_v19 = vor.u32 %v666_v62, %v665_v7 }
  0x30   : > { %761 = vst [vmem:[#allocation2 + $0x18] sm:$0xf] %v760_v27  ;;  %v670_v20 = vrot.slane %v665_v7, 4  ;;  %v674_v21 = vrot.slane %v672_v10, 7  ;;  %v578_v22 = vpack.c.bf16 %v562_v12, %v562_v12  ;;  %v778_v23 = vsel %vm4561_vm7, %v653_v4, %v777_v61  ;;  %v794_v59 = vld [vmem:[#allocation2 + $0x54] sm:$0xf] }
  0x31   : > { %762 = vst [vmem:[#allocation2 + $0x1c] sm:$0xf] %v618_v28  ;;  %v547_v25 = vadd.f32 %v4459_v2, %v528_v0  ;;  %v529_v26 = vmul.f32 %v4442_v1, %v510_v8  ;;  %v530_v27 = vmul.f32 %v4442_v1, %v511_v13  ;;  %v512_v28 = vld [vmem:[%s4449_s21 + $0x78] sm:$0xff]  ;;  %v669_v30 = vsel %vm4553_vm6, %v661_v18, %v668_v19 }
  0x32   : > { %765 = vst [vmem:[#allocation2 + $0x20] sm:$0x1] %v764_v29  ;;  %v781_v29 = vsel %vm4543_vm5, %v660_v16, %v780_v17  ;;  %v680_v34 = vshrl.u32 %v578_v22, 16  ;;  %v683_v35 = vshll.u32 %v578_v22, 16  ;;  %v785_v38 = vsel %vm4561_vm7, %v670_v20, %v784_v24  ;;  %v798_v10 = vld [vmem:[#allocation2 + $0x5c] sm:$0x1] }
  0x33   : > { %768 = vst [vmem:[#allocation2 + $0x24] sm:$0xf] %v767_v31  ;;  %v677_v31 = vor.u32 %v675_v11, %v674_v21  ;;  %v563_v36 = vmax.f32 %v547_v25, 0.0  ;;  %v548_v37 = vadd.f32 %v4459_v2, %v529_v26  ;;  %v678_v39 = vrot.slane %v674_v21, 4  ;;  %v801_v11 = vld [vmem:[#allocation2 + $0x60] sm:$0xf] }
  0x34   : > { %769 = vst [vmem:[#allocation2 + $0x28] sm:$0xf] %v635_v41  ;;  %v549_v32 = vadd.f32 %v4459_v2, %v530_v27  ;;  %v531_v41 = vmul.f32 %v4442_v1, %v512_v28  ;;  %v682_v43 = vrot.slane %v680_v34, 7  ;;  %v805_v22 = vld [vmem:[#allocation2 + $0x68] sm:$0x1] }
  0x35   : > { %772 = vst [vmem:[#allocation2 + $0x2c] sm:$0x1] %v771_v9  ;;  %v788_v42 = vsel %vm4543_vm5, %v677_v31, %v787_v33  ;;  %v579_v44 = vpack.c.bf16 %v563_v36, %v563_v36  ;;  %v564_v45 = vmax.f32 %v548_v37, 0.0 }
  0x36   : > { %775 = vst [vmem:[#allocation2 + $0x30] sm:$0xf] %v774_v14  ;;  %v565_v46 = vmax.f32 %v549_v32, 0.0  ;;  %v550_v47 = vadd.f32 %v4459_v2, %v531_v41  ;;  %v685_v48 = vor.u32 %v683_v35, %v682_v43  ;;  %v687_v49 = vrot.slane %v682_v43, 4 }
  0x37   : > { %776 = vst [vmem:[#allocation2 + $0x34] sm:$0xf] %v652_v15  ;;  %v689_v50 = vshrl.u32 %v579_v44, 16  ;;  %v692_v51 = vshll.u32 %v579_v44, 16  ;;  %v580_v52 = vpack.c.bf16 %v564_v45, %v564_v45 }
  0x38   : > { %779 = vst [vmem:[#allocation2 + $0x38] sm:$0x1] %v778_v23  ;;  %v581_v0 = vpack.c.bf16 %v565_v46, %v565_v46  ;;  %v566_v54 = vmax.f32 %v550_v47, 0.0  ;;  %v686_v55 = vsel %vm4553_vm6, %v678_v39, %v685_v48  ;;  %v792_v56 = vsel %vm4561_vm7, %v687_v49, %v791_v40 }
  0x39   : > { %782 = vst [vmem:[#allocation2 + $0x3c] sm:$0xf] %v781_v29  ;;  %v691_v57 = vrot.slane %v689_v50, 7  ;;  %v697_v60 = vshrl.u32 %v580_v52, 16  ;;  %v700_v61 = vshll.u32 %v580_v52, 16 }
  0x3a   : > { %783 = vst [vmem:[#allocation2 + $0x40] sm:$0xf] %v669_v30  ;;  %v706_v62 = vshrl.u32 %v581_v0, 16  ;;  %v709_v63 = vshll.u32 %v581_v0, 16  ;;  %v582_v4 = vpack.c.bf16 %v566_v54, %v566_v54 }
  0x3b   : > { %786 = vst [vmem:[#allocation2 + $0x44] sm:$0x1] %v785_v38  ;;  %v694_v3 = vor.u32 %v692_v51, %v691_v57  ;;  %v695_v5 = vrot.slane %v691_v57, 4  ;;  %v699_v7 = vrot.slane %v697_v60, 7 }
  0x3c   : > { %789 = vst [vmem:[#allocation2 + $0x48] sm:$0xf] %v788_v42  ;;  %v708_v8 = vrot.slane %v706_v62, 7  ;;  %v714_v12 = vshrl.u32 %v582_v4, 16  ;;  %v717_v13 = vshll.u32 %v582_v4, 16 }
  0x3d   : > { %790 = vst [vmem:[#allocation2 + $0x4c] sm:$0xf] %v686_v55  ;;  %v795_v9 = vsel %vm4543_vm5, %v694_v3, %v794_v59  ;;  %v702_v14 = vor.u32 %v700_v61, %v699_v7  ;;  %v704_v15 = vrot.slane %v699_v7, 4 }
  0x3e   : > { %793 = vst [vmem:[#allocation2 + $0x50] sm:$0x1] %v792_v56  ;;  %v711_v16 = vor.u32 %v709_v63, %v708_v8  ;;  %v712_v17 = vrot.slane %v708_v8, 4  ;;  %v716_v18 = vrot.slane %v714_v12, 7 }
  0x3f   : > { %796 = vst [vmem:[#allocation2 + $0x54] sm:$0xf] %v795_v9  ;;  %v703_v19 = vsel %vm4553_vm6, %v695_v5, %v702_v14  ;;  %v799_v20 = vsel %vm4561_vm7, %v704_v15, %v798_v10 }
  0x40   : > { %v802_v21 = vsel %vm4543_vm5, %v711_v16, %v801_v11  ;;  %797 = vst [vmem:[#allocation2 + $0x58] sm:$0xf] %v703_v19  ;;  %v719_v23 = vor.u32 %v717_v13, %v716_v18  ;;  %v721_v24 = vrot.slane %v716_v18, 4  ;;  %811 = sbr.rel (%p3598_p12) target bundleno = 88 (0x58), region = 48 }
  0x41   : > { %800 = vst [vmem:[#allocation2 + $0x5c] sm:$0x1] %v799_v20 }
  0x42   : > { %803 = vst [vmem:[#allocation2 + $0x60] sm:$0xf] %v802_v21  ;;  %v720_v25 = vsel %vm4553_vm6, %v712_v17, %v719_v23  ;;  %v806_v26 = vsel %vm4561_vm7, %v721_v24, %v805_v22 }
  0x43   : > { %804 = vst [vmem:[#allocation2 + $0x64] sm:$0xf] %v720_v25 }
  0x44   : > { %807 = vst [vmem:[#allocation2 + $0x68] sm:$0x1] %v806_v26 }
  0x45   : > { %v812_v27 = vld [vmem:[%s4530_s12 + $0x70] sm:$0xff]  ;;  %v813_v28 = vld [vmem:[%s4530_s12 + $0x78] sm:$0xff]  ;;  %v842_v44 = vld [vmem:[#allocation2] sm:$0xf] }
  0x46   : > { %v814_v29 = vmul.f32 %v4442_v1, %v812_v27  ;;  %v815_v30 = vmul.f32 %v4442_v1, %v813_v28  ;;  %v846_v45 = vld [vmem:[#allocation2 + $0x8] sm:$0x1] }
  0x48   : > { %v816_v31 = vadd.f32 %v4459_v2, %v814_v29  ;;  %v817_v33 = vadd.f32 %v4459_v2, %v815_v30 }
  0x4a   : > { %v818_v34 = vmax.f32 %v816_v31, 0.0  ;;  %v819_v35 = vmax.f32 %v817_v33, 0.0 }
  0x4c   : > { %v820_v36 = vpack.c.bf16 %v818_v34, %v818_v34  ;;  %v821_v37 = vpack.c.bf16 %v819_v35, %v819_v35 }
  0x4e   : > { %v823_v38 = vshrl.u32 %v820_v36, 16  ;;  %v826_v39 = vshll.u32 %v820_v36, 16  ;;  %v831_v32 = vshrl.u32 %v821_v37, 16  ;;  %v834_v41 = vshll.u32 %v821_v37, 16 }
  0x50   : > { %v825_v42 = vrot.slane %v823_v38, 7  ;;  %v833_v43 = vrot.slane %v831_v32, 7 }
  0x52   : > { %v828_v40 = vor.u32 %v826_v39, %v825_v42  ;;  %v829_v46 = vrot.slane %v825_v42, 4  ;;  %v836_v47 = vor.u32 %v834_v41, %v833_v43  ;;  %v838_v48 = vrot.slane %v833_v43, 4 }
  0x54   : > { %v843_v49 = vsel %vm4543_vm5, %v828_v40, %v842_v44  ;;  %v837_v50 = vsel %vm4553_vm6, %v829_v46, %v836_v47  ;;  %v847_v51 = vsel %vm4561_vm7, %v838_v48, %v846_v45 }
  0x55   : > { %844 = vst [vmem:[#allocation2] sm:$0xf] %v843_v49 }
  0x56   : > { %845 = vst [vmem:[#allocation2 + $0x4] sm:$0xf] %v837_v50 }
  0x57   : > { %848 = vst [vmem:[#allocation2 + $0x8] sm:$0x1] %v847_v51 }
  0x58 PF: > { %p3599_p13 = scmp.ge.s32.totalorder %s4325_s24, 1 }
  0x5a   : > { %852 = sbr.rel (%p3599_p13) target bundleno = 114 (0x72), region = 52 }
  0x5f   : > { %v853_v52 = vld [vmem:[%s4539_s14] sm:$0xff]  ;;  %v854_v0 = vld [vmem:[%s4539_s14 + $0x8] sm:$0xff]  ;;  %v888_v10 = vld [vmem:[#allocation2 + $0x74] sm:$0x1] }
  0x60   : > { %v855_v54 = vmul.f32 %v4442_v1, %v853_v52  ;;  %v856_v55 = vmul.f32 %v4442_v1, %v854_v0  ;;  %v884_v9 = vld [vmem:[#allocation2 + $0x6c] sm:$0xf] }
  0x62   : > { %v857_v56 = vadd.f32 %v4459_v2, %v855_v54  ;;  %v858_v57 = vadd.f32 %v4459_v2, %v856_v55 }
  0x64   : > { %v859_v59 = vmax.f32 %v857_v56, 0.0  ;;  %v860_v60 = vmax.f32 %v858_v57, 0.0 }
  0x66   : > { %v861_v61 = vpack.c.bf16 %v859_v59, %v859_v59  ;;  %v862_v62 = vpack.c.bf16 %v860_v60, %v860_v60 }
  0x68   : > { %v864_v63 = vshrl.u32 %v861_v61, 16  ;;  %v867_v3 = vshll.u32 %v861_v61, 16  ;;  %v872_v4 = vshrl.u32 %v862_v62, 16  ;;  %v875_v5 = vshll.u32 %v862_v62, 16 }
  0x6a   : > { %v866_v7 = vrot.slane %v864_v63, 7  ;;  %v874_v8 = vrot.slane %v872_v4, 7 }
  0x6c   : > { %v869_v11 = vor.u32 %v867_v3, %v866_v7  ;;  %v870_v12 = vrot.slane %v866_v7, 4  ;;  %v877_v13 = vor.u32 %v875_v5, %v874_v8  ;;  %v879_v1 = vrot.slane %v874_v8, 4 }
  0x6e   : > { %v885_v14 = vsel %vm4543_vm5, %v869_v11, %v884_v9  ;;  %v878_v2 = vsel %vm4553_vm6, %v870_v12, %v877_v13  ;;  %v889_v15 = vsel %vm4561_vm7, %v879_v1, %v888_v10 }
  0x6f   : > { %886 = vst [vmem:[#allocation2 + $0x6c] sm:$0xf] %v885_v14 }
  0x70   : > { %887 = vst [vmem:[#allocation2 + $0x70] sm:$0xf] %v878_v2 }
  0x71   : > { %890 = vst [vmem:[#allocation2 + $0x74] sm:$0x1] %v889_v15 }
  0x72 PF: > { %v4161_v16 = vld [vmem:[%s5458_s5 + $0x78] sm:$0xff]  ;;  %v4160_v53 = vld [vmem:[%s5458_s5 + $0x70] sm:$0xff]  ;;  %vm931_vm8 = vsmask.f32 3328  ;;  %v4694_v22 = vld [vmem:[#allocation2 + $0x20] sm:$0x1] }
  0x73   : > { %4234 = vmatpush.bf16.msra.mxu1 %v4161_v16  ;;  %4235 = vmatpush.bf16.msra.mxu2 %v4161_v16  ;;  %v895_v17 = vld [vmem:[#allocation2 + $0x18] sm:$0xf]  ;;  %v4690_v58 = vld [vmem:[#allocation2 + $0x1c] sm:$0xf]  ;;  %v899_v21 = vld [vmem:[#allocation2 + $0x30] sm:$0xf] }
  0x74   : > { %4236 = vmatpush.bf16.msra.mxu3 %v4161_v16  ;;  %1223 = vmatpush.bf16.msra.mxu0 %v4161_v16  ;;  %v983_v6 = vshrl.u32 %v895_v17, 16  ;;  %v986_v18 = vshll.u32 %v895_v17, 16  ;;  %v992_v19 = vshll.u32 %v4690_v58, 16  ;;  %v996_v20 = vshrl.u32 %v4690_v58, 16  ;;  %v4696_v25 = vld [vmem:[#allocation2 + $0x34] sm:$0xf] }
  0x75   : > { %v4159_v26 = vld [vmem:[%s5458_s5 + $0x68] sm:$0xff]  ;;  %v1031_v29 = vshrl.u32 %v899_v21, 16  ;;  %v4703_v33 = vld [vmem:[#allocation2 + $0x38] sm:$0x1]  ;;  %v1034_v34 = vshll.u32 %v899_v21, 16  ;;  %v1040_v35 = vshll.u32 %v4696_v25, 16 }
  0x76   : > { %v985_v23 = vrot.slane %v983_v6, 4  ;;  %v988_v24 = vrot.slane %v986_v18, 5  ;;  %v4701_v27 = vrot.slane %v992_v19, 5  ;;  %v998_v28 = vrot.slane %v996_v20, 4  ;;  %v903_v30 = vld [vmem:[#allocation2 + $0x48] sm:$0xf] }
  0x77   : > { %4237 = vmatpush.bf16.msra.mxu1 %v4160_v53  ;;  %4238 = vmatpush.bf16.msra.mxu2 %v4160_v53  ;;  %v1044_v36 = vshrl.u32 %v4696_v25, 16  ;;  %v1002_v38 = vshll.u32 %v4694_v22, 16  ;;  %v1033_v39 = vrot.slane %v1031_v29, 4  ;;  %v904_v32 = vld [vmem:[#allocation2 + $0x4c] sm:$0xf]  ;;  %v1079_v41 = vshrl.u32 %v903_v30, 16 }
  0x78   : > { %4239 = vmatpush.bf16.msra.mxu3 %v4160_v53  ;;  %1224 = vmatpush.bf16.msra.mxu0 %v4160_v53  ;;  %v989_v31 = vor.u32 %v988_v24, %v985_v23  ;;  %v999_v37 = vor.u32 %v998_v28, %v4701_v27  ;;  %vm932_vm9 = vsmask.f32 7440  ;;  %v1036_v42 = vrot.slane %v1034_v34, 5  ;;  %v4158_v45 = vld [vmem:[%s5458_s5 + $0x60] sm:$0xff]  ;;  %v929_v51 = vld [vmem:[#allocation2 + $0x50] sm:$0x1] }
  0x79   : > { %v4709_v43 = vrot.slane %v1040_v35, 5  ;;  %v1046_v44 = vrot.slane %v1044_v36, 4  ;;  %v1050_v40 = vshll.u32 %v4703_v33, 16  ;;  %v1081_v46 = vrot.slane %v1079_v41, 4  ;;  %v891_v0 = vld [vmem:[#allocation2] sm:$0xf]  ;;  %vm4718_vm10 = vmor %vm931_vm8, %vm932_vm9 }
  0x7a   : > { %v1082_v47 = vshll.u32 %v903_v30, 16  ;;  %v990_v48 = vrot.slane %v989_v31, 4  ;;  %v1037_v49 = vor.u32 %v1036_v42, %v1033_v39  ;;  %v1088_v52 = vshll.u32 %v904_v32, 16  ;;  %v4157_v62 = vld [vmem:[%s5458_s5 + $0x58] sm:$0xff]  ;;  %v4725_v5 = vld [vmem:[#allocation2 + $0x4] sm:$0xf] }
  0x7b   : > { %4240 = vmatpush.bf16.msra.mxu1 %v4159_v26  ;;  %4241 = vmatpush.bf16.msra.mxu2 %v4159_v26  ;;  %v1047_v50 = vor.u32 %v1046_v44, %v4709_v43  ;;  %v1000_v55 = vrot.slane %v999_v37, 4  ;;  %v1004_v56 = vrot.slane %v1002_v38, 5  ;;  %v1092_v59 = vshrl.u32 %v904_v32, 16  ;;  %v4732_v14 = vld [vmem:[#allocation2 + $0x8] sm:$0x1]  ;;  %v4156_v6 = vld [vmem:[%s5458_s5 + $0x50] sm:$0xff] }
  0x7c   : > { %4242 = vmatpush.bf16.msra.mxu3 %v4159_v26  ;;  %1225 = vmatpush.bf16.msra.mxu0 %v4159_v26  ;;  %v1084_v57 = vrot.slane %v1082_v47, 5  ;;  %v1038_v60 = vrot.slane %v1037_v49, 4  ;;  %v1090_v61 = vrot.slane %v1088_v52, 5  ;;  %v1098_v4 = vshll.u32 %v929_v51, 16  ;;  %v897_v17 = vld [vmem:[#allocation2 + $0x24] sm:$0xf] }
  0x7d   : > { %v1094_v3 = vrot.slane %v1092_v59, 4  ;;  %v935_v7 = vshrl.u32 %v891_v0, 16  ;;  %v995_v8 = vsel %vm4718_vm10, %v990_v48, %v4701_v27  ;;  %v1048_v9 = vrot.slane %v1047_v50, 4  ;;  %v4744_v23 = vld [vmem:[#allocation2 + $0x28] sm:$0xf] }
  0x7e   : > { %v1085_v63 = vor.u32 %v1084_v57, %v1081_v46  ;;  %v1052_v10 = vrot.slane %v1050_v40, 5  ;;  %v938_v11 = vshll.u32 %v891_v0, 16  ;;  %v1005_v12 = vsel %vm4718_vm10, %v1000_v55, %v1004_v56  ;;  %v901_v39 = vld [vmem:[#allocation2 + $0x3c] sm:$0xf]  ;;  %v4155_v32 = vld [vmem:[%s5458_s5 + $0x48] sm:$0xff] }
  0x7f   : > { %4243 = vmatpush.bf16.msra.mxu1 %v4158_v45  ;;  %4244 = vmatpush.bf16.msra.mxu2 %v4158_v45  ;;  %v1095_v1 = vor.u32 %v1094_v3, %v1090_v61  ;;  %v1100_v2 = vrot.slane %v1098_v4, 5  ;;  %v937_v15 = vrot.slane %v935_v7, 4  ;;  %v944_v53 = vshll.u32 %v4725_v5, 16  ;;  %v4768_v0 = vld [vmem:[#allocation2 + $0x2c] sm:$0x1] }
  0x80   : > { %4245 = vmatpush.bf16.msra.mxu3 %v4158_v45  ;;  %1226 = vmatpush.bf16.msra.mxu0 %v4158_v45  ;;  %v1086_v13 = vrot.slane %v1085_v63, 4  ;;  %v940_v16 = vrot.slane %v938_v11, 5  ;;  %v4738_v18 = vunpack.c.l.b16 %v995_v8  ;;  %v1043_v19 = vsel %vm4718_vm10, %v1038_v60, %v4709_v43  ;;  %v4758_v45 = vld [vmem:[#allocation2 + $0x40] sm:$0xf]  ;;  %v905_v4 = vld [vmem:[#allocation2 + $0x54] sm:$0xf] }
  0x81   : > { %v1096_v20 = vrot.slane %v1095_v1, 4  ;;  %v948_v21 = vshrl.u32 %v4725_v5, 16  ;;  %v1053_v24 = vsel %vm4718_vm10, %v1048_v9, %v1052_v10  ;;  %v946_v27 = vrot.slane %v944_v53, 5  ;;  %v4154_v60 = vld [vmem:[%s5458_s5 + $0x40] sm:$0xff]  ;;  %v4169_v1 = vld [vmem:[%s5458_s5 + $0xb8] sm:$0xff] }
  0x82   : > { %v941_v26 = vor.u32 %v940_v16, %v937_v15  ;;  %v954_v28 = vshll.u32 %v4732_v14, 16  ;;  %v1091_v29 = vsel %vm4718_vm10, %v1086_v13, %v1090_v61  ;;  %v1007_v31 = vshrl.u32 %v897_v17, 16  ;;  %v4777_v8 = vld [vmem:[#allocation2 + $0x44] sm:$0x1]  ;;  %v4789_v53 = vld [vmem:[#allocation2 + $0x58] sm:$0xf] }
  0x83   : > { %4246 = vmatpush.bf16.msra.mxu1 %v4157_v62  ;;  %4247 = vmatpush.bf16.msra.mxu2 %v4157_v62  ;;  %v950_v30 = vrot.slane %v948_v21, 4  ;;  %v1010_v34 = vshll.u32 %v897_v17, 16  ;;  %v1101_v35 = vsel %vm4718_vm10, %v1096_v20, %v1100_v2  ;;  %v1016_v38 = vshll.u32 %v4744_v23, 16  ;;  %v4153_v2 = vld [vmem:[%s5458_s5 + $0x38] sm:$0xff] }
  0x84   : > { %4248 = vmatpush.bf16.msra.mxu3 %v4157_v62  ;;  %1227 = vmatpush.bf16.msra.mxu0 %v4157_v62  ;;  %v942_v36 = vrot.slane %v941_v26, 4  ;;  %v956_v37 = vrot.slane %v954_v28, 5  ;;  %v1009_v42 = vrot.slane %v1007_v31, 4  ;;  %v1020_v44 = vshrl.u32 %v4744_v23, 16  ;;  %v893_v28 = vld [vmem:[#allocation2 + $0xc] sm:$0xf] }
  0x85   : > { %v951_v41 = vor.u32 %v950_v30, %v946_v27  ;;  %v1012_v43 = vrot.slane %v1010_v34, 5  ;;  %v1148_v40 = vunpack.c.l.b16 %v1005_v12  ;;  %v1151_v46 = vunpack.c.l.b16 %v1043_v19  ;;  %v4794_v19 = vld [vmem:[#allocation2 + $0x5c] sm:$0x1] }
  0x86   : > { %v1152_v47 = vunpack.c.l.b16 %v1053_v24  ;;  %v947_v48 = vsel %vm4718_vm10, %v942_v36, %v946_v27  ;;  %v4762_v49 = vunpack.c.l.b16 %v1091_v29  ;;  %v4764_v50 = vunpack.c.l.b16 %v1101_v35  ;;  %v4185_v29 = vld [vmem:[%s5458_s5 + $0xf8] sm:$0xff]  ;;  %v4168_v36 = vld [vmem:[%s5458_s5 + $0xb0] sm:$0xff] }
  0x87   : > { %4249 = vmatpush.bf16.msra.mxu1 %v4156_v6  ;;  %4250 = vmatpush.bf16.msra.mxu2 %v4156_v6  ;;  %v952_v51 = vrot.slane %v951_v41, 4  ;;  %v4766_v52 = vrot.slane %v1016_v38, 5  ;;  %v1022_v55 = vrot.slane %v1020_v44, 4  ;;  %v1055_v56 = vshrl.u32 %v901_v39, 16  ;;  %v4193_v30 = vld [vmem:[%s5458_s5 + $0x138] sm:$0xff] }
  0x88   : > { %4251 = vmatpush.bf16.msra.mxu3 %v4156_v6  ;;  %1228 = vmatpush.bf16.msra.mxu0 %v4156_v6  ;;  %v1058_v57 = vshll.u32 %v901_v39, 16  ;;  %v1064_v59 = vshll.u32 %v4758_v45, 16  ;;  %v1143_v62 = vunpack.c.l.b16 %v947_v48  ;;  %v1013_v63 = vor.u32 %v1012_v43, %v1009_v42 }
  0x89   : > { %v957_v61 = vsel %vm4718_vm10, %v952_v51, %v956_v37  ;;  %v1068_v3 = vshrl.u32 %v4758_v45, 16  ;;  %v1057_v9 = vrot.slane %v1055_v56, 4  ;;  %v1161_v12 = vpack.c.b16 %v1148_v40, %v4738_v18  ;;  %v4152_v37 = vld [vmem:[%s5458_s5 + $0x30] sm:$0xff] }
  0x8a   : > { %v1144_v7 = vunpack.c.l.b16 %v957_v61  ;;  %v1060_v10 = vrot.slane %v1058_v57, 5  ;;  %v4779_v11 = vrot.slane %v1064_v59, 5  ;;  %v1163_v13 = vpack.c.b16 %v1152_v47, %v1151_v46  ;;  %v4813_v40 = vld [vmem:[#allocation2 + $0x10] sm:$0xf]  ;;  %v4815_v51 = vld [vmem:[#allocation2 + $0x14] sm:$0x1] }
  0x8b   : > { %4252 = vmatpush.bf16.msra.mxu1 %v4155_v32  ;;  %4253 = vmatpush.bf16.msra.mxu2 %v4155_v32  ;;  %v1026_v15 = vshll.u32 %v4768_v0, 16  ;;  %v1070_v16 = vrot.slane %v1068_v3, 4  ;;  %v1165_v17 = vpack.c.b16 %v4764_v50, %v4762_v49  ;;  %v1023_v6 = vor.u32 %v1022_v55, %v4766_v52  ;;  %v4184_v55 = vld [vmem:[%s5458_s5 + $0xf0] sm:$0xff] }
  0x8c   : > { %4254 = vmatpush.bf16.msra.mxu3 %v4155_v32  ;;  %1229 = vmatpush.bf16.msra.mxu0 %v4155_v32  ;;  %v1061_v18 = vor.u32 %v1060_v10, %v1057_v9  ;;  %v1103_v20 = vshrl.u32 %v905_v4, 16  ;;  %v1159_v21 = vpack.c.b16 %v1144_v7, %v1143_v62  ;;  %v1074_v26 = vshll.u32 %v4777_v8, 16  ;;  %v4192_v56 = vld [vmem:[%s5458_s5 + $0x130] sm:$0xff]  ;;  %v4167_v62 = vld [vmem:[%s5458_s5 + $0xa8] sm:$0xff] }
  0x8d   : > { %v1071_v24 = vor.u32 %v1070_v16, %v4779_v11  ;;  %v1106_v27 = vshll.u32 %v905_v4, 16  ;;  %v1014_v31 = vrot.slane %v1013_v63, 4  ;;  %v1112_v35 = vshll.u32 %v4789_v53, 16  ;;  %v4151_v63 = vld [vmem:[%s5458_s5 + $0x28] sm:$0xff] }
  0x8e   : > { %v1105_v34 = vrot.slane %v1103_v20, 4  ;;  %v1028_v38 = vrot.slane %v1026_v15, 5  ;;  %v1116_v32 = vshrl.u32 %v4789_v53, 16  ;;  %v1122_v41 = vshll.u32 %v4794_v19, 16 }
  0x8f   : > { %4255 = vmatpush.bf16.msra.mxu1 %v4154_v60  ;;  %4256 = vmatpush.bf16.msra.mxu2 %v4154_v60  ;;  %v1108_v39 = vrot.slane %v1106_v27, 5  ;;  %v1024_v42 = vrot.slane %v1023_v6, 4  ;;  %v1062_v43 = vrot.slane %v1061_v18, 4  ;;  %v1114_v44 = vrot.slane %v1112_v35, 5  ;;  %v4183_v6 = vld [vmem:[%s5458_s5 + $0xe8] sm:$0xff] }
  0x90   : > { %4257 = vmatpush.bf16.msra.mxu3 %v4154_v60  ;;  %1230 = vmatpush.bf16.msra.mxu0 %v4154_v60  ;;  %v959_v46 = vshrl.u32 %v893_v28, 16  ;;  %v1072_v47 = vrot.slane %v1071_v24, 4  ;;  %v1076_v48 = vrot.slane %v1074_v26, 5  ;;  %v1118_v50 = vrot.slane %v1116_v32, 4  ;;  %v4166_v24 = vld [vmem:[%s5458_s5 + $0xa0] sm:$0xff] }
  0x91   : > { %v1109_v49 = vor.u32 %v1108_v39, %v1105_v34  ;;  %v1019_v57 = vsel %vm4718_vm10, %v1014_v31, %v4766_v52  ;;  %v1124_v59 = vrot.slane %v1122_v41, 5  ;;  %v962_v61 = vshll.u32 %v893_v28, 16  ;;  %v4150_v26 = vld [vmem:[%s5458_s5 + $0x20] sm:$0xff]  ;;  %v4858_v32 = vld [vmem:[#allocation2 + $0x10] sm:$0xf] }
  0x92   : > { %1241 = vmatmul.bf16.vlgmr.msra.gmra.mxu1 %v1161_v12  ;;  %1251 = vmatmul.bf16.vlgmr.msra.gmra.mxu2 %v1163_v13  ;;  %v961_v60 = vrot.slane %v959_v46, 4  ;;  %v1119_v4 = vor.u32 %v1118_v50, %v1114_v44  ;;  %v968_v7 = vshll.u32 %v4813_v40, 16  ;;  %v972_v9 = vshrl.u32 %v4813_v40, 16 }
  0x93   : > { %1597 = vmatpush.bf16.msrb.mxu2 %v4169_v1  ;;  %1368 = vmatpush.bf16.msrb.mxu1 %v4153_v2  ;;  %v1110_v3 = vrot.slane %v1109_v49, 4  ;;  %v1029_v52 = vsel %vm4718_vm10, %v1024_v42, %v1028_v38  ;;  %v1067_v10 = vsel %vm4718_vm10, %v1062_v43, %v4779_v11  ;;  %v964_v12 = vrot.slane %v962_v61, 5  ;;  %v4191_v11 = vld [vmem:[%s5458_s5 + $0x128] sm:$0xff]  ;;  %v4182_v42 = vld [vmem:[%s5458_s5 + $0xe0] sm:$0xff]  ;;  %v4149_v49 = vld [vmem:[%s5458_s5 + $0x18] sm:$0xff] }
  0x94   : > { %1261 = vmatmul.bf16.vlgmr.msra.gmra.mxu3 %v1165_v17  ;;  %1231 = vmatmul.bf16.vlgmr.msra.gmra.mxu0 %v1159_v21  ;;  %v978_v13 = vshll.u32 %v4815_v51, 16  ;;  %v1077_v1 = vsel %vm4718_vm10, %v1072_v47, %v1076_v48  ;;  %v1120_v2 = vrot.slane %v1119_v4, 4  ;;  %v970_v15 = vrot.slane %v968_v7, 5  ;;  %v1856_v17 = vld [vmem:[#allocation2 + $0xc] sm:$0xf]  ;;  %v4190_v43 = vld [vmem:[%s5458_s5 + $0x120] sm:$0xff] }
  0x95   : > { %1791 = vmatpush.bf16.msrb.mxu3 %v4185_v29  ;;  %2169 = vmatpush.bf16.msrb.mxu0 %v4193_v30  ;;  %v974_v16 = vrot.slane %v972_v9, 4  ;;  %v1149_v18 = vunpack.c.l.b16 %v1019_v57  ;;  %v1115_v20 = vsel %vm4718_vm10, %v1110_v3, %v1114_v44  ;;  %v965_v21 = vor.u32 %v964_v12, %v961_v60  ;;  %v4165_v48 = vld [vmem:[%s5458_s5 + $0x98] sm:$0xff] }
  0x96   : > { %v1150_v27 = vunpack.c.l.b16 %v1029_v52  ;;  %v1125_v28 = vsel %vm4718_vm10, %v1120_v2, %v1124_v59  ;;  %v980_v30 = vrot.slane %v978_v13, 5  ;;  %v1153_v31 = vunpack.c.l.b16 %v1067_v10  ;;  %v4181_v3 = vld [vmem:[%s5458_s5 + $0xd8] sm:$0xff]  ;;  %v1417_v10 = vld [vmem:[#allocation2] sm:$0xe]  ;;  %v4164_v2 = vld [vmem:[%s5458_s5 + $0x90] sm:$0xff] }
  0x97   : > { %1598 = vmatpush.bf16.msrb.mxu2 %v4168_v36  ;;  %1369 = vmatpush.bf16.msrb.mxu1 %v4152_v37  ;;  %v975_v29 = vor.u32 %v974_v16, %v970_v15  ;;  %v1154_v34 = vunpack.c.l.b16 %v1077_v1  ;;  %v966_v35 = vrot.slane %v965_v21, 4  ;;  %v1881_v36 = vshrl.u32 %v1856_v17, 16  ;;  %v4189_v52 = vld [vmem:[%s5458_s5 + $0x118] sm:$0xff]  ;;  %v4180_v16 = vld [vmem:[%s5458_s5 + $0xd0] sm:$0xff] }
  0x98   : > { %v1157_v37 = vunpack.c.l.b16 %v1115_v20  ;;  %v1158_v38 = vunpack.c.l.b16 %v1125_v28  ;;  %v1884_v41 = vshll.u32 %v1856_v17, 16  ;;  %v1162_v47 = vpack.c.b16 %v1150_v27, %v1149_v18  ;;  %v4188_v18 = vld [vmem:[%s5458_s5 + $0x110] sm:$0xff]  ;;  %v1859_v27 = vld [vmem:[#allocation2 + $0x18] sm:$0xf]  ;;  %v4147_v28 = vld [vmem:[%s5458_s5 + $0x8] sm:$0xff] }
  0x99   : > { %1792 = vmatpush.bf16.msrb.mxu3 %v4184_v55  ;;  %2170 = vmatpush.bf16.msrb.mxu0 %v4192_v56  ;;  %v976_v39 = vrot.slane %v975_v29, 4  ;;  %v971_v44 = vsel %vm4718_vm10, %v966_v35, %v970_v15  ;;  %v1883_v46 = vrot.slane %v1881_v36, 4  ;;  %v4876_v56 = vld [vmem:[#allocation2 + $0x14] sm:$0x1]  ;;  %v1164_v59 = vpack.c.b16 %v1154_v34, %v1153_v31  ;;  %v4911_v29 = vld [vmem:[#allocation2 + $0x1c] sm:$0xf] }
  0x9a   : > { %v1145_v55 = vunpack.c.l.b16 %v971_v44  ;;  %v1886_v57 = vrot.slane %v1884_v41, 5  ;;  %v1890_v61 = vshll.u32 %v4858_v32, 16  ;;  %v1446_v4 = vrot.slane %v4725_v5, 5  ;;  %v4148_v5 = vld [vmem:[%s5458_s5 + $0x10] sm:$0xff]  ;;  %v4179_v36 = vld [vmem:[%s5458_s5 + $0xc8] sm:$0xff]  ;;  %v4146_v44 = vld [vmem:[%s5458_s5] sm:$0xff] }
  0x9b   : > { %1599 = vmatpush.bf16.msrb.mxu2 %v4167_v62  ;;  %1370 = vmatpush.bf16.msrb.mxu1 %v4151_v63  ;;  %v981_v50 = vsel %vm4718_vm10, %v976_v39, %v980_v30  ;;  %v1894_v62 = vshrl.u32 %v4858_v32, 16  ;;  %v1166_v63 = vpack.c.b16 %v1158_v38, %v1157_v37  ;;  %v1900_v1 = vshll.u32 %v4876_v56, 16  ;;  %v4187_v37 = vld [vmem:[%s5458_s5 + $0x108] sm:$0xff] }
  0x9c   : > { %v1146_v60 = vunpack.c.l.b16 %v981_v50  ;;  %v1887_v7 = vor.u32 %v1886_v57, %v1883_v46  ;;  %v1892_v12 = vrot.slane %v1890_v61, 5  ;;  %vm1441_vm11 = vcmask 1042432   ;;  %v1419_v61 = vld [vmem:[#allocation2 + $0x18] sm:$0xe] }
  0x9d   : > { %1793 = vmatpush.bf16.msrb.mxu3 %v4183_v6  ;;  %2171 = vmatpush.bf16.msrb.mxu0 %v4191_v11  ;;  %v1896_v13 = vrot.slane %v1894_v62, 4  ;;  %vm1442_vm12 = vcmask 1046532   ;;  %v3712_v17 = vrot.slane %v1417_v10, 9  ;;  %v1448_v6 = vrot.slane %v1446_v4, 4  ;;  %v4178_v62 = vld [vmem:[%s5458_s5 + $0xc0] sm:$0xff] }
  0x9e   : > { %v1160_v9 = vpack.c.b16 %v1146_v60, %v1145_v55  ;;  %v1449_v11 = vrot.slane %v4732_v14, 5  ;;  %vm4901_vm13 = vmor %vm1441_vm11, %vm1442_vm12  ;;  %v1888_v21 = vrot.slane %v1887_v7, 4  ;;  %v4163_v14 = vld [vmem:[%s5458_s5 + $0x88] sm:$0xff]  ;;  %v1905_v34 = vshrl.u32 %v1859_v27, 16  ;;  %v4956_v10 = vld [vmem:[#allocation2 + $0x20] sm:$0x1] }
  0x9f   : > { %1600 = vmatpush.bf16.msrb.mxu2 %v4166_v24  ;;  %1371 = vmatpush.bf16.msrb.mxu1 %v4150_v26  ;;  %v1897_v15 = vor.u32 %v1896_v13, %v1892_v12  ;;  %v1902_v26 = vrot.slane %v1900_v1, 5  ;;  %v1447_v30 = vsel %vm4901_vm13, %v3712_v17, %v1446_v4  ;;  %v1908_v35 = vshll.u32 %v1859_v27, 16  ;;  %v4138_v13 = vld [vmem:[#allocation2] sm:$0xff]  ;;  %v1418_v17 = vld [vmem:[#allocation2 + $0xc] sm:$0xe]  ;;  %v4224_v27 = vld [vmem:[%s5458_s5 + $0x1f0] sm:$0xff] }
  0xa0   : > { %v1450_v31 = vsel %vm4901_vm13, %v1448_v6, %v1449_v11  ;;  %v1893_v38 = vsel %vm4718_vm10, %v1888_v21, %v1892_v12  ;;  %v1914_v41 = vshll.u32 %v4911_v29, 16  ;;  %v1517_v46 = vunpack.c.l.b16 %v1447_v30 }
  0xa1   : > { %1794 = vmatpush.bf16.msrb.mxu3 %v4182_v42  ;;  %2172 = vmatpush.bf16.msrb.mxu0 %v4190_v43  ;;  %v1898_v24 = vrot.slane %v1897_v15, 4  ;;  %v1918_v42 = vshrl.u32 %v4911_v29, 16  ;;  %v4162_v43 = vld [vmem:[%s5458_s5 + $0x80] sm:$0xff]  ;;  %v1460_v50 = vrot.slane %v4690_v58, 5  ;;  %v2089_v55 = vunpack.c.l.b16 %v1893_v38  ;;  %v4170_v15 = vld [vmem:[#allocation2 + $0xc] sm:$0xff] }
  0xa2   : > { %1246 = vmatmul.bf16.gmra.mxu1 %v1162_v47  ;;  %1256 = vmatmul.bf16.gmra.mxu2 %v1164_v59  ;;  %v1518_v47 = vunpack.c.l.b16 %v1450_v31  ;;  %v1907_v59 = vrot.slane %v1905_v34, 4  ;;  %v1910_v60 = vrot.slane %v1908_v35, 5  ;;  %v3714_v7 = vrot.slane %v1419_v61, 9  ;;  %v1862_v35 = vld [vmem:[#allocation2 + $0x24] sm:$0xf] }
  0xa3   : > { %1601 = vmatpush.bf16.msrb.mxu2 %v4165_v48  ;;  %1372 = vmatpush.bf16.msrb.mxu1 %v4149_v49  ;;  %v1903_v39 = vsel %vm4718_vm10, %v1898_v24, %v1902_v26  ;;  %v4217_v48 = vld [vmem:[%s5458_s5 + $0x1b8] sm:$0xff]  ;;  %v1920_v4 = vrot.slane %v1918_v42, 4  ;;  %v1462_v58 = vrot.slane %v1460_v50, 4  ;;  %v1463_v12 = vrot.slane %v4694_v22, 5  ;;  %v4216_v22 = vld [vmem:[%s5458_s5 + $0x1b0] sm:$0xff] }
  0xa4   : > { %1266 = vmatmul.bf16.gmra.mxu3 %v1166_v63  ;;  %1236 = vmatmul.bf16.gmra.mxu0 %v1160_v9  ;;  %v4201_v49 = vld [vmem:[%s5458_s5 + $0x178] sm:$0xff]  ;;  %v2090_v57 = vunpack.c.l.b16 %v1903_v39  ;;  %v4186_v63 = vld [vmem:[%s5458_s5 + $0x100] sm:$0xff]  ;;  %v1533_v1 = vpack.c.b16 %v1518_v47, %v1517_v46  ;;  %v4200_v24 = vld [vmem:[%s5458_s5 + $0x170] sm:$0xff]  ;;  %v1456_v31 = vrot.slane %v4815_v51, 5  ;;  %v1929_v42 = vshrl.u32 %v1862_v35, 16 }
  0xa5   : > { %1795 = vmatpush.bf16.msrb.mxu3 %v4181_v3  ;;  %2173 = vmatpush.bf16.msrb.mxu0 %v4189_v52  ;;  %v4948_v3 = vrot.slane %v1914_v41, 5  ;;  %v4225_v9 = vld [vmem:[%s5458_s5 + $0x1f8] sm:$0xff]  ;;  %v1464_v6 = vsel %vm4901_vm13, %v1462_v58, %v1463_v12  ;;  %v4215_v41 = vld [vmem:[%s5458_s5 + $0x1a8] sm:$0xff] }
  0xa6   : > { %v4233_v52 = vld [vmem:[%s5458_s5 + $0x238] sm:$0xff]  ;;  %v1522_v26 = vunpack.c.l.b16 %v1464_v6  ;;  %v4199_v51 = vld [vmem:[%s5458_s5 + $0x168] sm:$0xff]  ;;  %v1931_v61 = vrot.slane %v1929_v42, 4 }
  0xa7   : > { %1602 = vmatpush.bf16.msrb.mxu2 %v4164_v2  ;;  %1373 = vmatpush.bf16.msrb.mxu1 %v4148_v5  ;;  %v1453_v2 = vrot.slane %v4813_v40, 5  ;;  %v1461_v5 = vsel %vm4901_vm13, %v3714_v7, %v1460_v50  ;;  %v1921_v21 = vor.u32 %v1920_v4, %v4948_v3  ;;  %v1924_v40 = vshll.u32 %v4956_v10, 16  ;;  %v4231_v46 = vld [vmem:[%s5458_s5 + $0x228] sm:$0xff] }
  0xa8   : > { %v1521_v11 = vunpack.c.l.b16 %v1461_v5  ;;  %v1467_v7 = vrot.slane %v4744_v23, 5 }
  0xa9   : > { %1796 = vmatpush.bf16.msrb.mxu3 %v4180_v16  ;;  %2174 = vmatpush.bf16.msrb.mxu0 %v4188_v18  ;;  %v2105_v16 = vpack.c.b16 %v2090_v57, %v2089_v55  ;;  %v1911_v18 = vor.u32 %v1910_v60, %v1907_v59  ;;  %v1455_v30 = vrot.slane %v1453_v2, 4  ;;  %v1922_v38 = vrot.slane %v1921_v21, 4 }
  0xaa   : > { %v4979_v34 = vpack.c.b16 %v1522_v26, %v1521_v11  ;;  %v1926_v39 = vrot.slane %v1924_v40, 5  ;;  %v4171_v11 = vld [vmem:[#allocation2 + $0x18] sm:$0xff] }
  0xab   : > { %1603 = vmatpush.bf16.msrb.mxu2 %v4163_v14  ;;  %1374 = vmatpush.bf16.msrb.mxu1 %v4147_v28  ;;  %v4232_v14 = vld [vmem:[%s5458_s5 + $0x230] sm:$0xff]  ;;  %v3713_v28 = vrot.slane %v1418_v17, 9 }
  0xac   : > { %v1927_v57 = vsel %vm4718_vm10, %v1922_v38, %v1926_v39 }
  0xad   : > { %1797 = vmatpush.bf16.msrb.mxu3 %v4179_v36  ;;  %2175 = vmatpush.bf16.msrb.mxu0 %v4187_v37  ;;  %v4981_v36 = vld [vmem:[#allocation2 + $0x28] sm:$0xf]  ;;  %v1912_v37 = vrot.slane %v1911_v18, 4  ;;  %v1454_v47 = vsel %vm4901_vm13, %v3713_v28, %v1453_v2  ;;  %v4198_v28 = vld [vmem:[%s5458_s5 + $0x160] sm:$0xff] }
  0xae   : > { %v1942_v50 = vshrl.u32 %v4981_v36, 16  ;;  %v1519_v59 = vunpack.c.l.b16 %v1454_v47 }
  0xaf   : > { %1604 = vmatpush.bf16.msrb.mxu2 %v4162_v43  ;;  %1375 = vmatpush.bf16.msrb.mxu1 %v4146_v44  ;;  %v1932_v43 = vshll.u32 %v1862_v35, 16  ;;  %v4223_v44 = vld [vmem:[%s5458_s5 + $0x1e8] sm:$0xff]  ;;  %v1917_v55 = vsel %vm4718_vm10, %v1912_v37, %v4948_v3  ;;  %v1420_v3 = vld [vmem:[#allocation2 + $0x24] sm:$0xe] }
  0xb0   : > { %v1944_v4 = vrot.slane %v1942_v50, 4  ;;  %v2091_v58 = vunpack.c.l.b16 %v1917_v55  ;;  %v3715_v12 = vrot.slane %v1420_v3, 9  ;;  %v4230_v35 = vld [vmem:[%s5458_s5 + $0x220] sm:$0xff]  ;;  %v5037_v50 = vld [vmem:[#allocation2 + $0x38] sm:$0x1] }
  0xb1   : > { %1798 = vmatpush.bf16.msrb.mxu3 %v4178_v62  ;;  %2176 = vmatpush.bf16.msrb.mxu0 %v4186_v63  ;;  %v1934_v62 = vrot.slane %v1932_v43, 5  ;;  %v4140_v55 = vld [vmem:[#allocation2 + $0x18] sm:$0xff] }
  0xb2   : > { %1376 = vmatmul.bf16.vlgmr.msrb.gmra.mxu1 %v4138_v13  ;;  %1605 = vmatmul.bf16.vlgmr.msrb.gmra.mxu2 %v1533_v1  ;;  %v1469_v13 = vrot.slane %v1467_v7, 4  ;;  %v1470_v1 = vrot.slane %v4768_v0, 5  ;;  %v1468_v6 = vsel %vm4901_vm13, %v3715_v12, %v1467_v7  ;;  %v4197_v3 = vld [vmem:[%s5458_s5 + $0x158] sm:$0xff] }
  0xb3   : > { %2614 = vmatpush.bf16.msra.mxu2 %v4217_v48  ;;  %2419 = vmatpush.bf16.msra.mxu1 %v4201_v49  ;;  %v1457_v48 = vsel %vm4901_vm13, %v1455_v30, %v1456_v31  ;;  %v1938_v49 = vshll.u32 %v4981_v36, 16  ;;  %v1935_v5 = vor.u32 %v1934_v62, %v1931_v61  ;;  %v1523_v18 = vunpack.c.l.b16 %v1468_v6  ;;  %v1865_v30 = vld [vmem:[#allocation2 + $0x30] sm:$0xf]  ;;  %v5026_v31 = vld [vmem:[#allocation2 + $0x34] sm:$0xf] }
  0xb4   : > { %1799 = vmatmul.bf16.vlgmr.msrb.gmra.mxu3 %v4170_v15  ;;  %2177 = vmatmul.bf16.vlgmr.msrb.gmra.mxu0 %v2105_v16  ;;  %v1520_v60 = vunpack.c.l.b16 %v1457_v48  ;;  %v4139_v15 = vld [vmem:[#allocation2 + $0xc] sm:$0xff]  ;;  %v1471_v23 = vsel %vm4901_vm13, %v1469_v13, %v1470_v1  ;;  %v1953_v39 = vshrl.u32 %v1865_v30, 16  ;;  %v1966_v42 = vshrl.u32 %v5026_v31, 16  ;;  %v1868_v12 = vld [vmem:[#allocation2 + $0x3c] sm:$0xf] }
  0xb5   : > { %2992 = vmatpush.bf16.msra.mxu3 %v4225_v9  ;;  %3242 = vmatpush.bf16.msra.mxu0 %v4233_v52  ;;  %v1940_v63 = vrot.slane %v1938_v49, 5  ;;  %v2092_v9 = vunpack.c.l.b16 %v1927_v57  ;;  %v5007_v52 = vld [vmem:[#allocation2 + $0x2c] sm:$0x1]  ;;  %v1524_v21 = vunpack.c.l.b16 %v1471_v23  ;;  %v1936_v0 = vrot.slane %v1935_v5, 4  ;;  %v4172_v57 = vld [vmem:[#allocation2 + $0x24] sm:$0xff] }
  0xb6   : > { %v1534_v2 = vpack.c.b16 %v1520_v60, %v1519_v59  ;;  %v1948_v17 = vshll.u32 %v5007_v52, 16  ;;  %v1968_v49 = vrot.slane %v1966_v42, 4  ;;  %v1972_v62 = vshll.u32 %v5037_v50, 16  ;;  %v5053_v13 = vld [vmem:[#allocation2 + $0x40] sm:$0xf] }
  0xb7   : > { %2615 = vmatpush.bf16.msra.mxu2 %v4216_v22  ;;  %2420 = vmatpush.bf16.msra.mxu1 %v4200_v24  ;;  %v1945_v16 = vor.u32 %v1944_v4, %v1940_v63  ;;  %v2106_v22 = vpack.c.b16 %v2092_v9, %v2091_v58  ;;  %v5015_v40 = vpack.c.b16 %v1524_v21, %v1523_v18  ;;  %v4213_v58 = vld [vmem:[%s5458_s5 + $0x198] sm:$0xff]  ;;  %v1977_v5 = vshrl.u32 %v1868_v12, 16  ;;  %v5067_v42 = vld [vmem:[#allocation2 + $0x4c] sm:$0xf] }
  0xb8   : > { %v1950_v26 = vrot.slane %v1948_v17, 5  ;;  %v1941_v37 = vsel %vm4718_vm10, %v1936_v0, %v1940_v63  ;;  %v1974_v7 = vrot.slane %v1972_v62, 5  ;;  %v4221_v9 = vld [vmem:[%s5458_s5 + $0x1d8] sm:$0xff]  ;;  %v1990_v17 = vshrl.u32 %v5053_v13, 16 }
  0xb9   : > { %2993 = vmatpush.bf16.msra.mxu3 %v4224_v27  ;;  %3243 = vmatpush.bf16.msra.mxu0 %v4232_v14  ;;  %v1946_v24 = vrot.slane %v1945_v16, 4  ;;  %v4214_v27 = vld [vmem:[%s5458_s5 + $0x1a0] sm:$0xff]  ;;  %v2093_v43 = vunpack.c.l.b16 %v1941_v37  ;;  %v1986_v16 = vshll.u32 %v5053_v13, 16  ;;  %v1474_v0 = vrot.slane %v4696_v25, 5  ;;  %v4212_v25 = vld [vmem:[%s5458_s5 + $0x190] sm:$0xff] }
  0xba   : > { %v4222_v14 = vld [vmem:[%s5458_s5 + $0x1e0] sm:$0xff]  ;;  %v1992_v21 = vrot.slane %v1990_v17, 4 }
  0xbb   : > { %2616 = vmatpush.bf16.msra.mxu2 %v4215_v41  ;;  %2421 = vmatpush.bf16.msra.mxu1 %v4199_v51  ;;  %v1951_v38 = vsel %vm4718_vm10, %v1946_v24, %v1950_v26  ;;  %v1956_v41 = vshll.u32 %v1865_v30, 16  ;;  %v1962_v51 = vshll.u32 %v5026_v31, 16  ;;  %v1988_v18 = vrot.slane %v1986_v16, 5  ;;  %v5062_v24 = vld [vmem:[#allocation2 + $0x44] sm:$0x1] }
  0xbc   : > { %v4141_v26 = vld [vmem:[#allocation2 + $0x24] sm:$0xff]  ;;  %v1996_v37 = vshll.u32 %v5062_v24, 16  ;;  %v1422_v16 = vld [vmem:[#allocation2 + $0x3c] sm:$0xe] }
  0xbd   : > { %2994 = vmatpush.bf16.msra.mxu3 %v4223_v44  ;;  %3244 = vmatpush.bf16.msra.mxu0 %v4231_v46  ;;  %v2094_v44 = vunpack.c.l.b16 %v1951_v38  ;;  %v1955_v46 = vrot.slane %v1953_v39, 4  ;;  %v1958_v47 = vrot.slane %v1956_v41, 5  ;;  %v1964_v48 = vrot.slane %v1962_v51, 5  ;;  %v1871_v51 = vld [vmem:[#allocation2 + $0x48] sm:$0xf] }
  0xbe   : > { %v1476_v39 = vrot.slane %v1474_v0, 4  ;;  %v1477_v41 = vrot.slane %v4703_v33, 5  ;;  %v4196_v33 = vld [vmem:[%s5458_s5 + $0x150] sm:$0xff] }
  0xbf   : > { %2617 = vmatpush.bf16.msra.mxu2 %v4214_v27  ;;  %2422 = vmatpush.bf16.msra.mxu1 %v4198_v28  ;;  %v2107_v59 = vpack.c.b16 %v2094_v44, %v2093_v43  ;;  %v1959_v60 = vor.u32 %v1958_v47, %v1955_v46  ;;  %v1969_v61 = vor.u32 %v1968_v49, %v1964_v48  ;;  %v1421_v27 = vld [vmem:[#allocation2 + $0x30] sm:$0xe] }
  0xc0   : > { %v3716_v38 = vrot.slane %v1421_v27, 9  ;;  %v4220_v43 = vld [vmem:[%s5458_s5 + $0x1d0] sm:$0xff]  ;;  %v1478_v49 = vsel %vm4901_vm13, %v1476_v39, %v1477_v41  ;;  %v4195_v41 = vld [vmem:[%s5458_s5 + $0x148] sm:$0xff] }
  0xc1   : > { %2995 = vmatpush.bf16.msra.mxu3 %v4222_v14  ;;  %3245 = vmatpush.bf16.msra.mxu0 %v4230_v35  ;;  %v1960_v63 = vrot.slane %v1959_v60, 4  ;;  %v1970_v4 = vrot.slane %v1969_v61, 4  ;;  %v4173_v14 = vld [vmem:[#allocation2 + $0x30] sm:$0xff]  ;;  %v1993_v35 = vor.u32 %v1992_v21, %v1988_v18  ;;  %v2014_v60 = vshrl.u32 %v5067_v42, 16 }
  0xc2   : > { %1381 = vmatmul.bf16.gmra.mxu1 %v4139_v15  ;;  %1610 = vmatmul.bf16.gmra.mxu2 %v1534_v2  ;;  %v1980_v15 = vshll.u32 %v1868_v12, 16  ;;  %v4228_v47 = vld [vmem:[%s5458_s5 + $0x210] sm:$0xff] }
  0xc3   : > { %2618 = vmatpush.bf16.msra.mxu2 %v4213_v58  ;;  %2423 = vmatpush.bf16.msra.mxu1 %v4197_v3  ;;  %v1965_v1 = vsel %vm4718_vm10, %v1960_v63, %v1964_v48  ;;  %v1975_v2 = vsel %vm4718_vm10, %v1970_v4, %v1974_v7  ;;  %v1994_v46 = vrot.slane %v1993_v35, 4  ;;  %v1475_v48 = vsel %vm4901_vm13, %v3716_v38, %v1474_v0  ;;  %v5102_v35 = vld [vmem:[#allocation2 + $0x58] sm:$0xf] }
  0xc4   : > { %1804 = vmatmul.bf16.gmra.mxu3 %v4171_v11  ;;  %2182 = vmatmul.bf16.gmra.mxu0 %v2106_v22  ;;  %v2095_v6 = vunpack.c.l.b16 %v1965_v1  ;;  %v2096_v23 = vunpack.c.l.b16 %v1975_v2  ;;  %v1979_v11 = vrot.slane %v1977_v5, 4  ;;  %v1982_v22 = vrot.slane %v1980_v15, 5  ;;  %v5091_v1 = vld [vmem:[#allocation2 + $0x50] sm:$0x1] }
  0xc5   : > { %2996 = vmatpush.bf16.msra.mxu3 %v4221_v9  ;;  %v1525_v63 = vunpack.c.l.b16 %v1475_v48  ;;  %v1526_v4 = vunpack.c.l.b16 %v1478_v49  ;;  %v2016_v3 = vrot.slane %v2014_v60, 4  ;;  %v1481_v2 = vrot.slane %v4758_v45, 5  ;;  %v4142_v5 = vld [vmem:[#allocation2 + $0x30] sm:$0xff]  ;;  %v4211_v45 = vld [vmem:[%s5458_s5 + $0x188] sm:$0xff]  ;;  %v5120_v60 = vld [vmem:[#allocation2 + $0x5c] sm:$0x1] }
  0xc6   : > { %v2108_v28 = vpack.c.b16 %v2096_v23, %v2095_v6  ;;  %v1983_v30 = vor.u32 %v1982_v22, %v1979_v11  ;;  %v2020_v23 = vshll.u32 %v5091_v1, 16  ;;  %v4174_v11 = vld [vmem:[#allocation2 + $0x3c] sm:$0xff]  ;;  %v1484_v0 = vrot.slane %v4777_v8, 5 }
  0xc7   : > { %2619 = vmatpush.bf16.msra.mxu2 %v4212_v25  ;;  %2424 = vmatpush.bf16.msra.mxu1 %v4196_v33  ;;  %v1537_v15 = vpack.c.b16 %v1526_v4, %v1525_v63  ;;  %v1483_v21 = vrot.slane %v1481_v2, 4  ;;  %v2038_v33 = vshrl.u32 %v5102_v35, 16  ;;  %v4301_v63 = vld [vmem:[#allocation2 + $0x4c] sm:$0xf] }
  0xc8   : > { %v1984_v44 = vrot.slane %v1983_v30, 4  ;;  %v1874_v30 = vld [vmem:[#allocation2 + $0x54] sm:$0xf]  ;;  %v1488_v4 = vrot.slane %v4301_v63, 5 }
  0xc9   : > { %2997 = vmatpush.bf16.msra.mxu3 %v4220_v43  ;;  %v2028_v25 = vshll.u32 %v1874_v30, 16  ;;  %v2034_v43 = vshll.u32 %v5102_v35, 16 }
  0xca   : > { %v1989_v61 = vsel %vm4718_vm10, %v1984_v44, %v1988_v18  ;;  %v3717_v18 = vrot.slane %v1422_v16, 9  ;;  %v4227_v44 = vld [vmem:[%s5458_s5 + $0x208] sm:$0xff] }
  0xcb   : > { %2620 = vmatpush.bf16.msra.mxu2 %v4211_v45  ;;  %2425 = vmatpush.bf16.msra.mxu1 %v4195_v41 }
  0xcc   : > { %v1482_v8 = vsel %vm4901_vm13, %v3717_v18, %v1481_v2  ;;  %v1877_v18 = vld [vmem:[#allocation2 + $0x60] sm:$0xf] }
  0xd2   : > { %1386 = vmatmul.bf16.gmra.mxu1 %v4140_v55  ;;  %1615 = vmatmul.bf16.gmra.mxu2 %v4979_v34  ;;  %v4229_v34 = vld [vmem:[%s5458_s5 + $0x218] sm:$0xff]  ;;  %v2001_v55 = vshrl.u32 %v1871_v51, 16 }
  0xd3   : > { %3246 = vmatpush.bf16.msra.mxu0 %v4229_v34  ;;  %v2097_v34 = vunpack.c.l.b16 %v1989_v61  ;;  %v4143_v61 = vld [vmem:[#allocation2 + $0x3c] sm:$0xff] }
  0xd4   : > { %1809 = vmatmul.bf16.gmra.mxu3 %v4172_v57  ;;  %2187 = vmatmul.bf16.gmra.mxu0 %v2107_v59  ;;  %v2004_v57 = vshll.u32 %v1871_v51, 16  ;;  %v2010_v59 = vshll.u32 %v5067_v42, 16  ;;  %v2003_v7 = vrot.slane %v2001_v55, 4  ;;  %v2025_v51 = vshrl.u32 %v1874_v30, 16 }
  0xd5   : > { %v2030_v55 = vrot.slane %v2028_v25, 5  ;;  %v2052_v30 = vshll.u32 %v1877_v18, 16 }
  0xd6   : > { %v2006_v58 = vrot.slane %v2004_v57, 5  ;;  %v2012_v9 = vrot.slane %v2010_v59, 5  ;;  %v2027_v49 = vrot.slane %v2025_v51, 4  ;;  %v2036_v57 = vrot.slane %v2034_v43, 5 }
  0xd7   : > { %3247 = vmatpush.bf16.msra.mxu0 %v4228_v47  ;;  %v2040_v59 = vrot.slane %v2038_v33, 4  ;;  %v2054_v33 = vrot.slane %v2052_v30, 5 }
  0xd8   : > { %v2007_v17 = vor.u32 %v2006_v58, %v2003_v7  ;;  %v2017_v6 = vor.u32 %v2016_v3, %v2012_v9  ;;  %v4175_v7 = vld [vmem:[#allocation2 + $0x48] sm:$0xff]  ;;  %v2031_v3 = vor.u32 %v2030_v55, %v2027_v49  ;;  %v4176_v55 = vld [vmem:[#allocation2 + $0x54] sm:$0xff] }
  0xda   : > { %v2018_v27 = vrot.slane %v2017_v6, 4 }
  0xdb   : > { %3248 = vmatpush.bf16.msra.mxu0 %v4227_v44 }
  0xe2   : > { %1391 = vmatmul.bf16.gmra.mxu1 %v4141_v26  ;;  %1620 = vmatmul.bf16.gmra.mxu2 %v5015_v40  ;;  %v1998_v40 = vrot.slane %v1996_v37, 5  ;;  %v2008_v26 = vrot.slane %v2007_v17, 4  ;;  %v1485_v37 = vsel %vm4901_vm13, %v1483_v21, %v1484_v0  ;;  %v2032_v17 = vrot.slane %v2031_v3, 4  ;;  %v5129_v21 = vld [vmem:[#allocation2 + $0x64] sm:$0xf] }
  0xe3   : > { %v4194_v0 = vld [vmem:[%s5458_s5 + $0x140] sm:$0xff] }
  0xe4   : > { %1814 = vmatmul.bf16.gmra.mxu3 %v4173_v14  ;;  %2192 = vmatmul.bf16.gmra.mxu0 %v2108_v28  ;;  %v1999_v62 = vsel %vm4718_vm10, %v1994_v46, %v1998_v40  ;;  %v2022_v14 = vrot.slane %v2020_v23, 5  ;;  %v4219_v28 = vld [vmem:[%s5458_s5 + $0x1c8] sm:$0xff]  ;;  %v2013_v38 = vsel %vm4718_vm10, %v2008_v26, %v2012_v9  ;;  %v1527_v46 = vunpack.c.l.b16 %v1482_v8 }
  0xe5   : > { %v2098_v12 = vunpack.c.l.b16 %v1999_v62  ;;  %2998 = vmatpush.bf16.msra.mxu3 %v4219_v28  ;;  %v1528_v40 = vunpack.c.l.b16 %v1485_v37  ;;  %v2099_v47 = vunpack.c.l.b16 %v2013_v38  ;;  %v1423_v9 = vld [vmem:[#allocation2 + $0x48] sm:$0xe]  ;;  %v2049_v28 = vshrl.u32 %v1877_v18, 16  ;;  %2426 = vmatpush.bf16.msra.mxu1 %v4194_v0  ;;  %v4226_v38 = vld [vmem:[%s5458_s5 + $0x200] sm:$0xff] }
  0xe6   : > { %v2023_v39 = vsel %vm4718_vm10, %v2018_v27, %v2022_v14  ;;  %v3718_v2 = vrot.slane %v1423_v9, 9  ;;  %v2037_v14 = vsel %vm4718_vm10, %v2032_v17, %v2036_v57  ;;  %v2058_v8 = vshll.u32 %v5129_v21, 16  ;;  %3249 = vmatpush.bf16.msra.mxu0 %v4226_v38  ;;  %v5155_v9 = vld [vmem:[#allocation2 + $0x1c] sm:$0xf] }
  0xe7   : > { %v2109_v22 = vpack.c.b16 %v2098_v12, %v2097_v34  ;;  %v2100_v48 = vunpack.c.l.b16 %v2023_v39  ;;  %v1538_v62 = vpack.c.b16 %v1528_v40, %v1527_v46  ;;  %v2041_v34 = vor.u32 %v2040_v59, %v2036_v57  ;;  %v5147_v40 = vld [vmem:[#allocation2 + $0x68] sm:$0x1] }
  0xe8   : > { %v2044_v12 = vshll.u32 %v5120_v60, 16  ;;  %v1489_v26 = vsel %vm4901_vm13, %v3718_v2, %v1488_v4  ;;  %v2062_v37 = vshrl.u32 %v5129_v21, 16  ;;  %v2101_v51 = vunpack.c.l.b16 %v2037_v14 }
  0xe9   : > { %v2110_v58 = vpack.c.b16 %v2100_v48, %v2099_v47  ;;  %v2042_v6 = vrot.slane %v2041_v34, 4  ;;  %v1529_v39 = vunpack.c.l.b16 %v1489_v26  ;;  %v2051_v43 = vrot.slane %v2049_v28, 4  ;;  %v4144_v47 = vld [vmem:[#allocation2 + $0x48] sm:$0xff] }
  0xea   : > { %v2046_v23 = vrot.slane %v2044_v12, 5  ;;  %v2060_v44 = vrot.slane %v2058_v8, 5  ;;  %v2064_v46 = vrot.slane %v2062_v37, 4  ;;  %v1495_v59 = vrot.slane %v4789_v53, 5 }
  0xeb   : > { %v2055_v63 = vor.u32 %v2054_v33, %v2051_v43  ;;  %v1498_v12 = vrot.slane %v4794_v19, 5 }
  0xec   : > { %v2047_v45 = vsel %vm4718_vm10, %v2042_v6, %v2046_v23  ;;  %v1497_v34 = vrot.slane %v1495_v59, 4  ;;  %v2713_v6 = vshll.u32 %v5155_v9, 16  ;;  %v2717_v23 = vshrl.u32 %v5155_v9, 16 }
  0xed   : > { %v2102_v25 = vunpack.c.l.b16 %v2047_v45  ;;  %v2056_v2 = vrot.slane %v2055_v63, 4 }
  0xee   : > { %v1499_v19 = vsel %vm4901_vm13, %v1497_v34, %v1498_v12  ;;  %v2715_v28 = vrot.slane %v2713_v6, 5  ;;  %v2719_v30 = vrot.slane %v2717_v23, 4 }
  0xef   : > { %v2111_v57 = vpack.c.b16 %v2102_v25, %v2101_v51  ;;  %v2061_v26 = vsel %vm4718_vm10, %v2056_v2, %v2060_v44  ;;  %v1532_v37 = vunpack.c.l.b16 %v1499_v19  ;;  %v2268_v25 = vrot.slane %v4858_v32, 5 }
  0xf0   : > { %v2103_v38 = vunpack.c.l.b16 %v2061_v26  ;;  %v2720_v33 = vor.u32 %v2719_v30, %v2715_v28 }
  0xf2   : > { %1396 = vmatmul.bf16.gmra.mxu1 %v4142_v5  ;;  %1625 = vmatmul.bf16.gmra.mxu2 %v1537_v15  ;;  %v1490_v5 = vrot.slane %v1488_v4, 4  ;;  %v4302_v15 = vld [vmem:[#allocation2 + $0x50] sm:$0x1]  ;;  %v2065_v4 = vor.u32 %v2064_v46, %v2060_v44  ;;  %v4145_v44 = vld [vmem:[#allocation2 + $0x54] sm:$0xff]  ;;  %v2721_v12 = vrot.slane %v2720_v33, 4 }
  0xf3   : > { %v1491_v16 = vrot.slane %v4302_v15, 5 }
  0xf4   : > { %1819 = vmatmul.bf16.gmra.mxu3 %v4174_v11  ;;  %2197 = vmatmul.bf16.gmra.mxu0 %v2109_v22  ;;  %v4210_v11 = vld [vmem:[%s5458_s5 + $0x180] sm:$0xff]  ;;  %v2066_v53 = vrot.slane %v2065_v4, 4  ;;  %v3057_v4 = vld [vmem:[#allocation2 + $0x18] sm:$0xe] }
  0xf5   : > { %v4218_v22 = vld [vmem:[%s5458_s5 + $0x1c0] sm:$0xff]  ;;  %2621 = vmatpush.bf16.msra.mxu2 %v4210_v11  ;;  %v1492_v27 = vsel %vm4901_vm13, %v1490_v5, %v1491_v16 }
  0xf6   : > { %2999 = vmatpush.bf16.msra.mxu3 %v4218_v22  ;;  %v1530_v41 = vunpack.c.l.b16 %v1492_v27 }
  0xf8   : > { %v1539_v48 = vpack.c.b16 %v1530_v41, %v1529_v39  ;;  %v2681_v41 = vld [vmem:[#allocation2 + $0x20] sm:$0x1] }
 0x102   : > { %1401 = vmatmul.bf16.gmra.mxu1 %v4143_v61  ;;  %1630 = vmatmul.bf16.gmra.mxu2 %v1538_v62  ;;  %v1424_v62 = vld [vmem:[#allocation2 + $0x54] sm:$0xe] }
 0x103   : > { %v3719_v3 = vrot.slane %v1424_v62, 9  ;;  %v4177_v62 = vld [vmem:[#allocation2 + $0x60] sm:$0xff] }
 0x104   : > { %1824 = vmatmul.bf16.gmra.mxu3 %v4175_v7  ;;  %2202 = vmatmul.bf16.gmra.mxu0 %v2110_v58  ;;  %v2068_v7 = vshll.u32 %v5147_v40, 16  ;;  %v2679_v58 = vld [vmem:[#allocation2 + $0x18] sm:$0xf] }
 0x105   : > { %v2704_v16 = vshrl.u32 %v2679_v58, 16  ;;  %v2707_v17 = vshll.u32 %v2679_v58, 16  ;;  %v1496_v18 = vsel %vm4901_vm13, %v3719_v3, %v1495_v59  ;;  %v2270_v3 = vrot.slane %v2268_v25, 4 }
 0x106   : > { %v2070_v5 = vrot.slane %v2068_v7, 5  ;;  %v1531_v8 = vunpack.c.l.b16 %v1496_v18  ;;  %v2271_v7 = vrot.slane %v4876_v56, 5 }
 0x107   : > { %v2706_v14 = vrot.slane %v2704_v16, 4  ;;  %v2709_v45 = vrot.slane %v2707_v17, 5  ;;  %v3094_v16 = vrot.slane %v2681_v41, 5  ;;  %v5187_v17 = vld [vmem:[#allocation2 + $0x28] sm:$0xf] }
 0x108   : > { %v2071_v27 = vsel %vm4718_vm10, %v2066_v53, %v2070_v5  ;;  %v4080_v53 = vrot.slane %v3057_v4, 9  ;;  %v2272_v23 = vsel %vm4901_vm13, %v2270_v3, %v2271_v7 }
 0x109   : > { %v2104_v39 = vunpack.c.l.b16 %v2071_v27  ;;  %v2710_v43 = vor.u32 %v2709_v45, %v2706_v14 }
 0x10b   : > { %v2112_v63 = vpack.c.b16 %v2104_v39, %v2103_v38  ;;  %v2711_v34 = vrot.slane %v2710_v43, 4  ;;  %v2741_v38 = vshrl.u32 %v5187_v17, 16 }
 0x10d   : > { %v2716_v19 = vsel %vm4718_vm10, %v2711_v34, %v2715_v28  ;;  %v2275_v34 = vrot.slane %v4911_v29, 5  ;;  %v2278_v29 = vrot.slane %v4956_v10, 5 }
 0x10f   : > { %v5149_v49 = vpop.f32.mrf.mxu1 }
 0x111   : > { %v5152_v61 = vpop.f32.mrf.mxu0 }
 0x112   : > { %1406 = vmatmul.bf16.gmra.mxu1 %v4144_v47  ;;  %1635 = vmatmul.bf16.gmra.mxu2 %v1539_v48  ;;  %v1540_v47 = vpack.c.b16 %v1532_v37, %v1531_v8  ;;  %v2234_v48 = vld [vmem:[#allocation2 + $0xc] sm:$0xe]  ;;  %v2737_v37 = vshll.u32 %v5187_v17, 16 }
 0x113   : > { %v3896_v32 = vrot.slane %v2234_v48, 9 }
 0x114   : > { %1829 = vmatmul.bf16.gmra.mxu3 %v4176_v55  ;;  %2207 = vmatmul.bf16.gmra.mxu0 %v2111_v57  ;;  %v2723_v55 = vshll.u32 %v2681_v41, 16  ;;  %v3091_v57 = vrot.slane %v5155_v9, 5  ;;  %v2682_v9 = vld [vmem:[#allocation2 + $0x24] sm:$0xf]  ;;  %v2340_v41 = vunpack.c.l.b16 %v2272_v23 }
 0x115   : > { %v5158_v15 = vpop.f32.mrf.mxu2  ;;  %v2269_v56 = vsel %vm4901_vm13, %v3896_v32, %v2268_v25  ;;  %v2728_v30 = vshrl.u32 %v2682_v9, 16  ;;  %v2731_v8 = vshll.u32 %v2682_v9, 16  ;;  %v2912_v25 = vunpack.c.l.b16 %v2716_v19  ;;  %v4202_v32 = vld [vmem:[#allocation2 + $0x18] sm:$0xff] }
 0x116   : > { %v2725_v2 = vrot.slane %v2723_v55, 5  ;;  %v3093_v5 = vrot.slane %v3091_v57, 4  ;;  %v3092_v27 = vsel %vm4901_vm13, %v4080_v53, %v3091_v57  ;;  %v2339_v28 = vunpack.c.l.b16 %v2269_v56  ;;  %v2235_v53 = vld [vmem:[#allocation2 + $0x18] sm:$0xe] }
 0x117   : > { %v5162_v11 = vpop.f32.mrf.mxu3  ;;  %v5164_v22 = vpop.f32.mrf.mxu1  ;;  %v3162_v33 = vunpack.c.l.b16 %v3092_v27  ;;  %v2733_v48 = vrot.slane %v2731_v8, 5  ;;  %v2739_v55 = vrot.slane %v2737_v37, 5  ;;  %v2743_v57 = vrot.slane %v2741_v38, 4  ;;  %v5218_v8 = vld [vmem:[#allocation2 + $0x34] sm:$0xf] }
 0x118   : > { %v2726_v26 = vsel %vm4718_vm10, %v2721_v12, %v2725_v2  ;;  %v3095_v14 = vsel %vm4901_vm13, %v3093_v5, %v3094_v16  ;;  %v2355_v7 = vpack.c.b16 %v2340_v41, %v2339_v28  ;;  %v3098_v19 = vrot.slane %v5187_v17, 5 }
 0x119   : > { %v5170_v0 = vpop.f32.mrf.mxu0  ;;  %v2913_v43 = vunpack.c.l.b16 %v2726_v26  ;;  %v2744_v16 = vor.u32 %v2743_v57, %v2739_v55  ;;  %v3058_v26 = vld [vmem:[#allocation2 + $0x24] sm:$0xe]  ;;  %v3897_v27 = vrot.slane %v2235_v53, 9 }
 0x11a   : > { %v4081_v41 = vrot.slane %v3058_v26, 9 }
 0x11b   : > { %v2928_v3 = vpack.c.b16 %v2913_v43, %v2912_v25  ;;  %v2745_v38 = vrot.slane %v2744_v16, 4 }
 0x11d   : > { %v5176_v51 = vpop.f32.mrf.mxu2 }
 0x11f   : > { %v5179_v46 = vpop.f32.mrf.mxu3  ;;  %v5182_v59 = vpop.f32.mrf.mxu1 }
 0x121   : > { %v5185_v58 = vpop.f32.mrf.mxu0 }
 0x122   : > { %1411 = vmatmul.bf16.gmra.mxu1 %v4145_v44  ;;  %1640 = vmatmul.bf16.gmra.mxu2 %v1540_v47  ;;  %v3163_v44 = vunpack.c.l.b16 %v3095_v14  ;;  %v2730_v47 = vrot.slane %v2728_v30, 4  ;;  %v2277_v14 = vrot.slane %v2275_v34, 4  ;;  %v2685_v30 = vld [vmem:[#allocation2 + $0x30] sm:$0xf] }
 0x123   : > { %v2752_v17 = vshrl.u32 %v2685_v30, 16 }
 0x124   : > { %1834 = vmatmul.bf16.gmra.mxu3 %v4177_v62  ;;  %2212 = vmatmul.bf16.gmra.mxu0 %v2112_v63  ;;  %v2684_v62 = vld [vmem:[#allocation2 + $0x2c] sm:$0x1]  ;;  %v3178_v2 = vpack.c.b16 %v3163_v44, %v3162_v33  ;;  %v2734_v5 = vor.u32 %v2733_v48, %v2730_v47  ;;  %v2755_v33 = vshll.u32 %v2685_v30, 16  ;;  %v2761_v44 = vshll.u32 %v5218_v8, 16 }
 0x125   : > { %v5189_v6 = vpop.f32.mrf.mxu2  ;;  %v2747_v9 = vshll.u32 %v2684_v62, 16  ;;  %v3101_v25 = vrot.slane %v2684_v62, 5  ;;  %v2765_v47 = vshrl.u32 %v5218_v8, 16  ;;  %v2279_v10 = vsel %vm4901_vm13, %v2277_v14, %v2278_v29  ;;  %v2687_v14 = vld [vmem:[#allocation2 + $0x38] sm:$0x1] }
 0x126   : > { %v2735_v37 = vrot.slane %v2734_v5, 4  ;;  %v3099_v5 = vsel %vm4901_vm13, %v4081_v41, %v3098_v19  ;;  %v2236_v41 = vld [vmem:[#allocation2 + $0x24] sm:$0xe] }
 0x127   : > { %v5195_v18 = vpop.f32.mrf.mxu3  ;;  %v5205_v45 = vpop.f32.mrf.mxu1  ;;  %v2749_v28 = vrot.slane %v2747_v9, 5  ;;  %v2757_v9 = vrot.slane %v2755_v33, 5  ;;  %v2767_v26 = vrot.slane %v2765_v47, 4  ;;  %v4203_v47 = vld [vmem:[#allocation2 + $0x24] sm:$0xff] }
 0x129   : > { %v5209_v39 = vpop.f32.mrf.mxu0  ;;  %v2750_v62 = vsel %vm4718_vm10, %v2745_v38, %v2749_v28  ;;  %v2282_v28 = vrot.slane %v4981_v36, 5 }
 0x12d   : > { %v5211_v63 = vpop.f32.mrf.mxu2 }
 0x12f   : > { %v5213_v4 = vpop.f32.mrf.mxu3  ;;  %v1377_v12 = vpop.f32.mrf.mxu1 }
 0x130   : > { %v1378_v56 = vadd.f32 %v1377_v12, %v5152_v61  ;;  %v3100_v61 = vrot.slane %v3098_v19, 4 }
 0x131   : > { %v2178_v23 = vpop.f32.mrf.mxu0 }
 0x132   : > { %2427 = vmatmul.bf16.vlgmr.msra.gmra.mxu1 %v2355_v7  ;;  %2622 = vmatmul.bf16.vlgmr.msra.gmra.mxu2 %v4202_v32  ;;  %v2276_v32 = vsel %vm4901_vm13, %v3897_v27, %v2275_v34  ;;  %v3102_v16 = vsel %vm4901_vm13, %v3100_v61, %v3101_v25  ;;  %v2754_v34 = vrot.slane %v2752_v17, 4  ;;  %v2771_v25 = vshll.u32 %v2687_v14, 16 }
 0x133   : > { %v2341_v27 = vunpack.c.l.b16 %v2276_v32  ;;  %v3165_v38 = vunpack.c.l.b16 %v3102_v16  ;;  %v3059_v32 = vld [vmem:[#allocation2 + $0x30] sm:$0xe] }
 0x134   : > { %3000 = vmatmul.bf16.vlgmr.msra.gmra.mxu3 %v2928_v3  ;;  %3250 = vmatmul.bf16.vlgmr.msra.gmra.mxu0 %v3178_v2  ;;  %v2740_v3 = vsel %vm4718_vm10, %v2735_v37, %v2739_v55  ;;  %v2342_v55 = vunpack.c.l.b16 %v2279_v10  ;;  %v2915_v37 = vunpack.c.l.b16 %v2750_v62  ;;  %v3898_v62 = vrot.slane %v2236_v41, 9 }
 0x135   : > { %v1606_v43 = vpop.f32.mrf.mxu2  ;;  %v2914_v29 = vunpack.c.l.b16 %v2740_v3 }
 0x136   : > { %v1646_v48 = vadd.f32 %v1606_v43, %v1378_v56  ;;  %v5236_v56 = vrot.slane %v2761_v44, 5  ;;  %v2758_v43 = vor.u32 %v2757_v9, %v2754_v34  ;;  %v2356_v44 = vpack.c.b16 %v2342_v55, %v2341_v27  ;;  %v2688_v55 = vld [vmem:[#allocation2 + $0x3c] sm:$0xf] }
 0x137   : > { %v1800_v57 = vpop.f32.mrf.mxu3  ;;  %v1379_v7 = vpop.f32.mrf.mxu1  ;;  %v4082_v9 = vrot.slane %v3059_v32, 9 }
 0x138   : > { %v1840_v12 = vadd.f32 %v1800_v57, %v1646_v48  ;;  %v1380_v2 = vadd.f32 %v1379_v7, %v5170_v0  ;;  %v3164_v0 = vunpack.c.l.b16 %v3099_v5  ;;  %v2768_v61 = vor.u32 %v2767_v26, %v5236_v56 }
 0x139   : > { %v2180_v53 = vpop.f32.mrf.mxu0  ;;  %v3105_v48 = vrot.slane %v5218_v8, 5  ;;  %v2929_v57 = vpack.c.b16 %v2915_v37, %v2914_v29  ;;  %v2285_v5 = vrot.slane %v5007_v52, 5  ;;  %v2759_v16 = vrot.slane %v2758_v43, 4  ;;  %v5247_v29 = vld [vmem:[#allocation2 + $0x40] sm:$0xf] }
 0x13a   : > { %v5238_v30 = vadd.f32 %v2178_v23, %v1840_v12  ;;  %v3179_v7 = vpack.c.b16 %v3165_v38, %v3164_v0  ;;  %v2284_v12 = vrot.slane %v2282_v28, 4  ;;  %v2769_v34 = vrot.slane %v2768_v61, 4 }
 0x13b   : > { %v3107_v26 = vrot.slane %v3105_v48, 4  ;;  %v3108_v8 = vrot.slane %v2687_v14, 5  ;;  %v2283_v37 = vsel %vm4901_vm13, %v3898_v62, %v2282_v28  ;;  %v2764_v0 = vsel %vm4718_vm10, %v2759_v16, %v5236_v56  ;;  %v2690_v16 = vld [vmem:[#allocation2 + $0x44] sm:$0x1] }
 0x13c   : > { %v2286_v52 = vsel %vm4901_vm13, %v2284_v12, %v2285_v5  ;;  %v2776_v28 = vshrl.u32 %v2688_v55, 16  ;;  %v2779_v61 = vshll.u32 %v2688_v55, 16  ;;  %v2289_v55 = vrot.slane %v5026_v31, 5 }
 0x13d   : > { %v1608_v19 = vpop.f32.mrf.mxu2  ;;  %v3109_v41 = vsel %vm4901_vm13, %v3107_v26, %v3108_v8  ;;  %v4204_v8 = vld [vmem:[#allocation2 + $0x30] sm:$0xff] }
 0x13e   : > { %v1647_v17 = vadd.f32 %v1608_v19, %v1380_v2  ;;  %v2773_v2 = vrot.slane %v2771_v25, 5  ;;  %v3106_v19 = vsel %vm4901_vm13, %v4082_v9, %v3105_v48  ;;  %v2785_v25 = vshll.u32 %v5247_v29, 16 }
 0x13f   : > { %v1802_v33 = vpop.f32.mrf.mxu3  ;;  %v1382_v23 = vpop.f32.mrf.mxu1  ;;  %v3166_v32 = vunpack.c.l.b16 %v3106_v19  ;;  %v3167_v48 = vunpack.c.l.b16 %v3109_v41  ;;  %v2781_v62 = vrot.slane %v2779_v61, 5  ;;  %v3112_v41 = vrot.slane %v5247_v29, 5 }
 0x140   : > { %v1841_v10 = vadd.f32 %v1802_v33, %v1647_v17  ;;  %v1383_v3 = vadd.f32 %v1382_v23, %v5185_v58  ;;  %v2789_v17 = vshrl.u32 %v5247_v29, 16  ;;  %v2344_v23 = vunpack.c.l.b16 %v2286_v52  ;;  %v2237_v52 = vld [vmem:[#allocation2 + $0x30] sm:$0xe] }
 0x141   : > { %v2183_v36 = vpop.f32.mrf.mxu0  ;;  %v2787_v12 = vrot.slane %v2785_v25, 5  ;;  %v2291_v61 = vrot.slane %v2289_v55, 4  ;;  %v2691_v25 = vld [vmem:[#allocation2 + $0x48] sm:$0xf]  ;;  %v3115_v29 = vrot.slane %v2690_v16, 5 }
 0x142   : > { %2432 = vmatmul.bf16.gmra.mxu1 %v2356_v44  ;;  %2627 = vmatmul.bf16.gmra.mxu2 %v4203_v47  ;;  %v5245_v27 = vadd.f32 %v2180_v53, %v1841_v10  ;;  %v2774_v53 = vsel %vm4718_vm10, %v2769_v34, %v2773_v2  ;;  %v2343_v47 = vunpack.c.l.b16 %v2283_v37  ;;  %v2791_v5 = vrot.slane %v2789_v17, 4  ;;  %v5270_v17 = vld [vmem:[#allocation2 + $0x4c] sm:$0xf] }
 0x143   : > { %v3180_v37 = vpack.c.b16 %v3167_v48, %v3166_v32  ;;  %v2800_v32 = vshrl.u32 %v2691_v25, 16  ;;  %v2803_v48 = vshll.u32 %v2691_v25, 16  ;;  %v2296_v25 = vrot.slane %v5053_v13, 5 }
 0x144   : > { %3005 = vmatmul.bf16.gmra.mxu3 %v2929_v57  ;;  %3255 = vmatmul.bf16.gmra.mxu0 %v3179_v7  ;;  %v2916_v57 = vunpack.c.l.b16 %v2764_v0  ;;  %v2917_v7 = vunpack.c.l.b16 %v2774_v53  ;;  %v2357_v26 = vpack.c.b16 %v2344_v23, %v2343_v47 }
 0x145   : > { %v1611_v58 = vpop.f32.mrf.mxu2 }
 0x146   : > { %v1648_v38 = vadd.f32 %v1611_v58, %v1383_v3  ;;  %v2778_v3 = vrot.slane %v2776_v28, 4  ;;  %v3899_v28 = vrot.slane %v2237_v52, 9  ;;  %v2805_v52 = vrot.slane %v2803_v48, 5 }
 0x147   : > { %v1805_v14 = vpop.f32.mrf.mxu3  ;;  %v1384_v43 = vpop.f32.mrf.mxu1 }
 0x148   : > { %v1842_v33 = vadd.f32 %v1805_v14, %v1648_v38  ;;  %v1385_v56 = vadd.f32 %v1384_v43, %v5209_v39  ;;  %v2930_v39 = vpack.c.b16 %v2917_v7, %v2916_v57  ;;  %v2782_v0 = vor.u32 %v2781_v62, %v2778_v3  ;;  %v3060_v43 = vld [vmem:[#allocation2 + $0x3c] sm:$0xe] }
 0x149   : > { %v2185_v44 = vpop.f32.mrf.mxu0  ;;  %v2792_v38 = vor.u32 %v2791_v5, %v2787_v12  ;;  %v4083_v23 = vrot.slane %v3060_v43, 9  ;;  %v3114_v57 = vrot.slane %v3112_v41, 4  ;;  %v2809_v3 = vshll.u32 %v5270_v17, 16 }
 0x14a   : > { %v5265_v10 = vadd.f32 %v2183_v36, %v1842_v33  ;;  %v2795_v36 = vshll.u32 %v2690_v16, 16  ;;  %v2292_v33 = vrot.slane %v5037_v50, 5  ;;  %v2813_v62 = vshrl.u32 %v5270_v17, 16 }
 0x14b   : > { %v2793_v47 = vrot.slane %v2792_v38, 4 }
 0x14c   : > { %v2293_v50 = vsel %vm4901_vm13, %v2291_v61, %v2292_v33  ;;  %v2815_v38 = vrot.slane %v2813_v62, 4  ;;  %v2238_v33 = vld [vmem:[#allocation2 + $0x3c] sm:$0xe]  ;;  %v3061_v62 = vld [vmem:[#allocation2 + $0x48] sm:$0xe] }
 0x14d   : > { %v1613_v34 = vpop.f32.mrf.mxu2 }
 0x14e   : > { %v1649_v2 = vadd.f32 %v1613_v34, %v1385_v56  ;;  %v2783_v56 = vrot.slane %v2782_v0, 4  ;;  %v5290_v0 = vrot.slane %v2809_v3, 5 }
 0x14f   : > { %v1807_v9 = vpop.f32.mrf.mxu3  ;;  %v1387_v58 = vpop.f32.mrf.mxu1 }
 0x150   : > { %v1843_v14 = vadd.f32 %v1807_v9, %v1649_v2  ;;  %v1388_v53 = vadd.f32 %v1387_v58, %v5149_v49  ;;  %v2797_v49 = vrot.slane %v2795_v36, 5  ;;  %v2290_v2 = vsel %vm4901_vm13, %v3899_v28, %v2289_v55 }
 0x151   : > { %v2188_v19 = vpop.f32.mrf.mxu0  ;;  %v2788_v9 = vsel %vm4718_vm10, %v2783_v56, %v2787_v12  ;;  %v3113_v58 = vsel %vm4901_vm13, %v4083_v23, %v3112_v41  ;;  %v2802_v55 = vrot.slane %v2800_v32, 4  ;;  %v2345_v36 = vunpack.c.l.b16 %v2290_v2 }
 0x152   : > { %2437 = vmatmul.bf16.gmra.mxu1 %v2357_v26  ;;  %2632 = vmatmul.bf16.gmra.mxu2 %v4204_v8  ;;  %v5272_v31 = vadd.f32 %v2185_v44, %v1843_v14  ;;  %v2798_v16 = vsel %vm4718_vm10, %v2793_v47, %v2797_v49  ;;  %v2346_v12 = vunpack.c.l.b16 %v2293_v50  ;;  %v2693_v14 = vld [vmem:[#allocation2 + $0x50] sm:$0x1]  ;;  %v2918_v43 = vunpack.c.l.b16 %v2788_v9 }
 0x153   : > { %v2919_v28 = vunpack.c.l.b16 %v2798_v16  ;;  %v2806_v56 = vor.u32 %v2805_v52, %v2802_v55  ;;  %v2816_v47 = vor.u32 %v2815_v38, %v5290_v0  ;;  %v2819_v49 = vshll.u32 %v2693_v14, 16  ;;  %v2694_v55 = vld [vmem:[#allocation2 + $0x54] sm:$0xf]  ;;  %v5301_v52 = vld [vmem:[#allocation2 + $0x58] sm:$0xf] }
 0x154   : > { %3010 = vmatmul.bf16.gmra.mxu3 %v2930_v39  ;;  %3260 = vmatmul.bf16.gmra.mxu0 %v3180_v37  ;;  %v3116_v37 = vsel %vm4901_vm13, %v3114_v57, %v3115_v29  ;;  %v2358_v29 = vpack.c.b16 %v2346_v12, %v2345_v36  ;;  %v3119_v32 = vrot.slane %v5270_v17, 5  ;;  %v2298_v2 = vrot.slane %v2296_v25, 4 }
 0x155   : > { %v1616_v7 = vpop.f32.mrf.mxu2  ;;  %v3169_v61 = vunpack.c.l.b16 %v3116_v37  ;;  %v2931_v48 = vpack.c.b16 %v2919_v28, %v2918_v43  ;;  %v2299_v50 = vrot.slane %v5062_v24, 5  ;;  %v2807_v9 = vrot.slane %v2806_v56, 4 }
 0x156   : > { %v1650_v5 = vadd.f32 %v1616_v7, %v1388_v53  ;;  %v4205_v7 = vld [vmem:[#allocation2 + $0x3c] sm:$0xff]  ;;  %v2817_v16 = vrot.slane %v2816_v47, 4  ;;  %v3122_v17 = vrot.slane %v2693_v14, 5 }
 0x157   : > { %v1810_v44 = vpop.f32.mrf.mxu3  ;;  %v1389_v34 = vpop.f32.mrf.mxu1  ;;  %v2300_v24 = vsel %vm4901_vm13, %v2298_v2, %v2299_v50  ;;  %v2812_v36 = vsel %vm4718_vm10, %v2807_v9, %v5290_v0 }
 0x158   : > { %v1844_v26 = vadd.f32 %v1810_v44, %v1650_v5  ;;  %v1390_v8 = vadd.f32 %v1389_v34, %v5164_v22  ;;  %v3168_v22 = vunpack.c.l.b16 %v3113_v58  ;;  %v3900_v34 = vrot.slane %v2238_v33, 9 }
 0x159   : > { %v2190_v39 = vpop.f32.mrf.mxu0  ;;  %v3121_v58 = vrot.slane %v3119_v32, 4  ;;  %v2837_v33 = vshrl.u32 %v5301_v52, 16 }
 0x15a   : > { %v5292_v53 = vadd.f32 %v2188_v19, %v1844_v26  ;;  %v3181_v3 = vpack.c.b16 %v3169_v61, %v3168_v22  ;;  %v2821_v26 = vrot.slane %v2819_v49, 5  ;;  %v2297_v38 = vsel %vm4901_vm13, %v3900_v34, %v2296_v25 }
 0x15b   : > { %v3123_v28 = vsel %vm4901_vm13, %v3121_v58, %v3122_v17  ;;  %v2824_v61 = vshrl.u32 %v2694_v55, 16  ;;  %v2827_v25 = vshll.u32 %v2694_v55, 16  ;;  %v2347_v49 = vunpack.c.l.b16 %v2297_v38  ;;  %v2239_v17 = vld [vmem:[#allocation2 + $0x48] sm:$0xe] }
 0x15d   : > { %v1618_v41 = vpop.f32.mrf.mxu2 }
 0x15e   : > { %v1651_v23 = vadd.f32 %v1618_v41, %v1390_v8  ;;  %v4084_v8 = vrot.slane %v3061_v62, 9  ;;  %v2833_v41 = vshll.u32 %v5301_v52, 16 }
 0x15f   : > { %v1812_v57 = vpop.f32.mrf.mxu3  ;;  %v1392_v19 = vpop.f32.mrf.mxu1 }
 0x160   : > { %v1845_v5 = vadd.f32 %v1812_v57, %v1651_v23  ;;  %v1393_v44 = vadd.f32 %v1392_v19, %v5182_v59  ;;  %v3120_v43 = vsel %vm4901_vm13, %v4084_v8, %v3119_v32  ;;  %v2348_v23 = vunpack.c.l.b16 %v2300_v24 }
 0x161   : > { %v2193_v13 = vpop.f32.mrf.mxu0  ;;  %v2920_v57 = vunpack.c.l.b16 %v2812_v36  ;;  %v3171_v32 = vunpack.c.l.b16 %v3123_v28  ;;  %v2835_v62 = vrot.slane %v2833_v41, 5  ;;  %v3126_v36 = vrot.slane %v5301_v52, 5  ;;  %v5323_v28 = vld [vmem:[#allocation2 + $0x64] sm:$0xf] }
 0x162   : > { %2442 = vmatmul.bf16.gmra.mxu1 %v2358_v29  ;;  %2637 = vmatmul.bf16.gmra.mxu2 %v4205_v7  ;;  %v5299_v37 = vadd.f32 %v2190_v39, %v1845_v5  ;;  %v2822_v39 = vsel %vm4718_vm10, %v2817_v16, %v2821_v26  ;;  %v3170_v7 = vunpack.c.l.b16 %v3120_v43  ;;  %v2839_v5 = vrot.slane %v2837_v33, 4  ;;  %v4206_v16 = vld [vmem:[#allocation2 + $0x48] sm:$0xff]  ;;  %v2697_v43 = vld [vmem:[#allocation2 + $0x60] sm:$0xf] }
 0x163   : > { %v2921_v29 = vunpack.c.l.b16 %v2822_v39  ;;  %v2359_v9 = vpack.c.b16 %v2348_v23, %v2347_v49  ;;  %v2303_v26 = vrot.slane %v5067_v42, 5  ;;  %v2306_v42 = vrot.slane %v5091_v1, 5 }
 0x164   : > { %3015 = vmatmul.bf16.gmra.mxu3 %v2931_v48  ;;  %3265 = vmatmul.bf16.gmra.mxu0 %v3181_v3  ;;  %v2826_v48 = vrot.slane %v2824_v61, 4  ;;  %v2829_v3 = vrot.slane %v2827_v25, 5  ;;  %v3182_v58 = vpack.c.b16 %v3171_v32, %v3170_v7  ;;  %v2848_v23 = vshrl.u32 %v2697_v43, 16 }
 0x165   : > { %v1621_v59 = vpop.f32.mrf.mxu2  ;;  %v2305_v39 = vrot.slane %v2303_v26, 4 }
 0x166   : > { %v1652_v12 = vadd.f32 %v1621_v59, %v1393_v44  ;;  %v2696_v44 = vld [vmem:[#allocation2 + $0x5c] sm:$0x1]  ;;  %v2830_v55 = vor.u32 %v2829_v3, %v2826_v48  ;;  %v2840_v59 = vor.u32 %v2839_v5, %v2835_v62 }
 0x167   : > { %v1815_v14 = vpop.f32.mrf.mxu3  ;;  %v1394_v22 = vpop.f32.mrf.mxu1  ;;  %v2307_v3 = vsel %vm4901_vm13, %v2305_v39, %v2306_v42  ;;  %v2240_v39 = vld [vmem:[#allocation2 + $0x54] sm:$0xe] }
 0x168   : > { %v1846_v56 = vadd.f32 %v1815_v14, %v1652_v12  ;;  %v1395_v0 = vadd.f32 %v1394_v22, %v5205_v45  ;;  %v2932_v45 = vpack.c.b16 %v2921_v29, %v2920_v57  ;;  %v3062_v12 = vld [vmem:[#allocation2 + $0x54] sm:$0xe]  ;;  %v3901_v14 = vrot.slane %v2239_v17, 9  ;;  %v2699_v17 = vld [vmem:[#allocation2 + $0x68] sm:$0x1] }
 0x169   : > { %v2195_v47 = vpop.f32.mrf.mxu0  ;;  %v2831_v61 = vrot.slane %v2830_v55, 4  ;;  %v2841_v25 = vrot.slane %v2840_v59, 4  ;;  %v4085_v52 = vrot.slane %v3062_v12, 9  ;;  %v2851_v57 = vshll.u32 %v2697_v43, 16 }
 0x16a   : > { %v5319_v19 = vadd.f32 %v2193_v13, %v1846_v56  ;;  %v2843_v13 = vshll.u32 %v2696_v44, 16  ;;  %v3128_v56 = vrot.slane %v3126_v36, 4  ;;  %v2857_v29 = vshll.u32 %v5323_v28, 16 }
 0x16b   : > { %v2304_v1 = vsel %vm4901_vm13, %v3901_v14, %v2303_v26 }
 0x16c   : > { %v2845_v41 = vrot.slane %v2843_v13, 5 }
 0x16d   : > { %v1623_v34 = vpop.f32.mrf.mxu2 }
 0x16e   : > { %v1653_v2 = vadd.f32 %v1623_v34, %v1395_v0  ;;  %v3129_v0 = vrot.slane %v2696_v44, 5  ;;  %v2846_v34 = vsel %vm4718_vm10, %v2841_v25, %v2845_v41 }
 0x16f   : > { %v1817_v50 = vpop.f32.mrf.mxu3  ;;  %v1397_v8 = vpop.f32.mrf.mxu1  ;;  %v2923_v59 = vunpack.c.l.b16 %v2846_v34  ;;  %v2700_v34 = vld [vmem:[#allocation2 + $0x6c] sm:$0xf] }
 0x170   : > { %v1847_v38 = vadd.f32 %v1817_v50, %v1653_v2  ;;  %v1398_v33 = vadd.f32 %v1397_v8, %v5158_v15  ;;  %v2836_v15 = vsel %vm4718_vm10, %v2831_v61, %v2835_v62  ;;  %v3127_v2 = vsel %vm4901_vm13, %v4085_v52, %v3126_v36  ;;  %v4207_v52 = vld [vmem:[#allocation2 + $0x54] sm:$0xff] }
 0x171   : > { %v2198_v24 = vpop.f32.mrf.mxu0  ;;  %v3130_v50 = vsel %vm4901_vm13, %v3128_v56, %v3129_v0  ;;  %v2349_v8 = vunpack.c.l.b16 %v2304_v1  ;;  %v2922_v55 = vunpack.c.l.b16 %v2836_v15  ;;  %v3172_v13 = vunpack.c.l.b16 %v3127_v2  ;;  %v5355_v2 = vld [vmem:[#allocation2 + $0x70] sm:$0xf] }
 0x172   : > { %2447 = vmatmul.bf16.gmra.mxu1 %v2359_v9  ;;  %2642 = vmatmul.bf16.gmra.mxu2 %v4206_v16  ;;  %v5325_v22 = vadd.f32 %v2195_v47, %v1847_v38  ;;  %v2861_v47 = vshrl.u32 %v5323_v28, 16  ;;  %v2850_v9 = vrot.slane %v2848_v23, 4  ;;  %v2853_v16 = vrot.slane %v2851_v57, 5  ;;  %v3063_v23 = vld [vmem:[#allocation2 + $0x60] sm:$0xe] }
 0x173   : > { %v3173_v38 = vunpack.c.l.b16 %v3130_v50  ;;  %v2310_v36 = vrot.slane %v5102_v35, 5  ;;  %v2867_v61 = vshll.u32 %v2699_v17, 16  ;;  %v2933_v0 = vpack.c.b16 %v2923_v59, %v2922_v55 }
 0x174   : > { %3020 = vmatmul.bf16.gmra.mxu3 %v2932_v45  ;;  %3270 = vmatmul.bf16.gmra.mxu0 %v3182_v58  ;;  %v5343_v45 = vrot.slane %v2857_v29, 5  ;;  %v2863_v26 = vrot.slane %v2861_v47, 4  ;;  %v2350_v58 = vunpack.c.l.b16 %v2307_v3  ;;  %v2854_v43 = vor.u32 %v2853_v16, %v2850_v9 }
 0x175   : > { %v1626_v49 = vpop.f32.mrf.mxu2  ;;  %v3902_v29 = vrot.slane %v2240_v39, 9  ;;  %v2312_v35 = vrot.slane %v2310_v36, 4  ;;  %v2313_v47 = vrot.slane %v5120_v60, 5  ;;  %v4086_v1 = vrot.slane %v3063_v23, 9 }
 0x176   : > { %v1654_v7 = vadd.f32 %v1626_v49, %v1398_v33  ;;  %v2864_v42 = vor.u32 %v2863_v26, %v5343_v45  ;;  %v2360_v33 = vpack.c.b16 %v2350_v58, %v2349_v8  ;;  %v3183_v49 = vpack.c.b16 %v3173_v38, %v3172_v13 }
 0x177   : > { %v1820_v32 = vpop.f32.mrf.mxu3  ;;  %v1399_v48 = vpop.f32.mrf.mxu1  ;;  %v3136_v15 = vrot.slane %v2699_v17, 5  ;;  %v2311_v60 = vsel %vm4901_vm13, %v3902_v29, %v2310_v36  ;;  %v2314_v9 = vsel %vm4901_vm13, %v2312_v35, %v2313_v47  ;;  %v2872_v55 = vshrl.u32 %v2700_v34, 16  ;;  %v4208_v35 = vld [vmem:[#allocation2 + $0x60] sm:$0xff] }
 0x178   : > { %v1848_v5 = vadd.f32 %v1820_v32, %v1654_v7  ;;  %v1400_v12 = vadd.f32 %v1399_v48, %v5176_v51  ;;  %v2855_v7 = vrot.slane %v2854_v43, 4  ;;  %v2865_v32 = vrot.slane %v2864_v42, 4 }
 0x179   : > { %v2200_v44 = vpop.f32.mrf.mxu0  ;;  %v2869_v48 = vrot.slane %v2867_v61, 5  ;;  %v2875_v59 = vshll.u32 %v2700_v34, 16  ;;  %v2881_v13 = vshll.u32 %v5355_v2, 16  ;;  %v2885_v38 = vshrl.u32 %v5355_v2, 16 }
 0x17a   : > { %v5345_v62 = vadd.f32 %v2198_v24, %v1848_v5  ;;  %v3133_v24 = vrot.slane %v5323_v28, 5  ;;  %v2860_v16 = vsel %vm4718_vm10, %v2855_v7, %v5343_v45  ;;  %v2351_v36 = vunpack.c.l.b16 %v2311_v60 }
 0x17b   : > { %v2870_v8 = vsel %vm4718_vm10, %v2865_v32, %v2869_v48  ;;  %v2924_v39 = vunpack.c.l.b16 %v2860_v16  ;;  %v2317_v7 = vrot.slane %v5129_v21, 5  ;;  %v2320_v21 = vrot.slane %v5147_v40, 5 }
 0x17c   : > { %v3135_v3 = vrot.slane %v3133_v24, 4  ;;  %v2925_v43 = vunpack.c.l.b16 %v2870_v8 }
 0x17d   : > { %v1628_v14 = vpop.f32.mrf.mxu2 }
 0x17e   : > { %v1655_v25 = vadd.f32 %v1628_v14, %v1400_v12  ;;  %v3137_v58 = vsel %vm4901_vm13, %v3135_v3, %v3136_v15  ;;  %v2352_v14 = vunpack.c.l.b16 %v2314_v9  ;;  %v2934_v47 = vpack.c.b16 %v2925_v43, %v2924_v39 }
 0x17f   : > { %v1822_v41 = vpop.f32.mrf.mxu3  ;;  %v1402_v56 = vpop.f32.mrf.mxu1  ;;  %v3175_v61 = vunpack.c.l.b16 %v3137_v58  ;;  %v2319_v9 = vrot.slane %v2317_v7, 4 }
 0x180   : > { %v1849_v57 = vadd.f32 %v1822_v41, %v1655_v25  ;;  %v1403_v28 = vadd.f32 %v1402_v56, %v5189_v6  ;;  %v3134_v6 = vsel %vm4901_vm13, %v4086_v1, %v3133_v24  ;;  %v2874_v41 = vrot.slane %v2872_v55, 4  ;;  %v2241_v1 = vld [vmem:[#allocation2 + $0x60] sm:$0xe] }
 0x181   : > { %v2203_v51 = vpop.f32.mrf.mxu0  ;;  %v3174_v42 = vunpack.c.l.b16 %v3134_v6  ;;  %v2887_v24 = vrot.slane %v2885_v38, 4  ;;  %v2361_v29 = vpack.c.b16 %v2352_v14, %v2351_v36  ;;  %v3903_v60 = vrot.slane %v2241_v1, 9 }
 0x182   : > { %2452 = vmatmul.bf16.gmra.mxu1 %v2360_v33  ;;  %2647 = vmatmul.bf16.gmra.mxu2 %v4207_v52  ;;  %v5352_v5 = vadd.f32 %v2200_v44, %v1849_v57  ;;  %v2877_v33 = vrot.slane %v2875_v59, 5  ;;  %v2883_v52 = vrot.slane %v2881_v13, 5 }
 0x183   : > { %v3184_v48 = vpack.c.b16 %v3175_v61, %v3174_v42 }
 0x184   : > { %3025 = vmatmul.bf16.gmra.mxu3 %v2933_v0  ;;  %3275 = vmatmul.bf16.gmra.mxu0 %v3183_v49  ;;  %v2702_v0 = vld [vmem:[#allocation2 + $0x74] sm:$0x1]  ;;  %v2888_v3 = vor.u32 %v2887_v24, %v2883_v52 }
 0x185   : > { %v1631_v50 = vpop.f32.mrf.mxu2  ;;  %v2891_v15 = vshll.u32 %v2702_v0, 16  ;;  %v3143_v55 = vrot.slane %v2702_v0, 5 }
 0x186   : > { %v1656_v44 = vadd.f32 %v1631_v50, %v1403_v28  ;;  %v3140_v50 = vrot.slane %v5355_v2, 5 }
 0x187   : > { %v1825_v26 = vpop.f32.mrf.mxu3  ;;  %v1404_v17 = vpop.f32.mrf.mxu1  ;;  %v2893_v8 = vrot.slane %v2891_v15, 5 }
 0x188   : > { %v1850_v12 = vadd.f32 %v1825_v26, %v1656_v44  ;;  %v1405_v56 = vadd.f32 %v1404_v17, %v5211_v63  ;;  %v3064_v63 = vld [vmem:[#allocation2 + $0x6c] sm:$0xe]  ;;  %v2889_v26 = vrot.slane %v2888_v3, 4  ;;  %v3142_v17 = vrot.slane %v3140_v50, 4 }
 0x189   : > { %v2205_v45 = vpop.f32.mrf.mxu0  ;;  %v4087_v58 = vrot.slane %v3064_v63, 9 }
 0x18a   : > { %v5372_v25 = vadd.f32 %v2203_v51, %v1850_v12  ;;  %v2878_v51 = vor.u32 %v2877_v33, %v2874_v41  ;;  %v2318_v12 = vsel %vm4901_vm13, %v3903_v60, %v2317_v7  ;;  %v3144_v43 = vsel %vm4901_vm13, %v3142_v17, %v3143_v55 }
 0x18b   : > { %v3141_v39 = vsel %vm4901_vm13, %v4087_v58, %v3140_v50  ;;  %v2353_v42 = vunpack.c.l.b16 %v2318_v12  ;;  %v3177_v0 = vunpack.c.l.b16 %v3144_v43 }
 0x18c   : > { %v2879_v44 = vrot.slane %v2878_v51, 4 }
 0x18d   : > { %v1633_v49 = vpop.f32.mrf.mxu2 }
 0x18e   : > { %v1657_v23 = vadd.f32 %v1633_v49, %v1405_v56  ;;  %v2884_v40 = vsel %vm4718_vm10, %v2879_v44, %v2883_v52  ;;  %v3176_v56 = vunpack.c.l.b16 %v3141_v39 }
 0x18f   : > { %v1827_v57 = vpop.f32.mrf.mxu3  ;;  %v1407_v32 = vpop.f32.mrf.mxu1  ;;  %v2926_v33 = vunpack.c.l.b16 %v2884_v40 }
 0x190   : > { %v1851_v28 = vadd.f32 %v1827_v57, %v1657_v23  ;;  %v1408_v6 = vadd.f32 %v1407_v32, %v5162_v11  ;;  %v2894_v11 = vsel %vm4718_vm10, %v2889_v26, %v2893_v8  ;;  %v3185_v7 = vpack.c.b16 %v3177_v0, %v3176_v56 }
 0x191   : > { %v2208_v34 = vpop.f32.mrf.mxu0  ;;  %v2927_v24 = vunpack.c.l.b16 %v2894_v11 }
 0x192   : > { %2457 = vmatmul.bf16.gmra.mxu1 %v2361_v29  ;;  %2652 = vmatmul.bf16.gmra.mxu2 %v4208_v35  ;;  %v5377_v16 = vadd.f32 %v2205_v45, %v1851_v28  ;;  %v2321_v45 = vsel %vm4901_vm13, %v2319_v9, %v2320_v21  ;;  %v4209_v29 = vld [vmem:[#allocation2 + $0x6c] sm:$0xff] }
 0x193   : > { %v2354_v61 = vunpack.c.l.b16 %v2321_v45 }
 0x194   : > { %3030 = vmatmul.bf16.gmra.mxu3 %v2934_v47  ;;  %3280 = vmatmul.bf16.gmra.mxu0 %v3184_v48  ;;  %v2935_v47 = vpack.c.b16 %v2927_v24, %v2926_v33 }
 0x195   : > { %v1636_v2 = vpop.f32.mrf.mxu2  ;;  %v2362_v57 = vpack.c.b16 %v2354_v61, %v2353_v42 }
 0x196   : > { %v1658_v59 = vadd.f32 %v1636_v2, %v1408_v6 }
 0x197   : > { %v1830_v13 = vpop.f32.mrf.mxu3  ;;  %v1409_v38 = vpop.f32.mrf.mxu1 }
 0x198   : > { %v1852_v36 = vadd.f32 %v1830_v13, %v1658_v59  ;;  %v1410_v52 = vadd.f32 %v1409_v38, %v5179_v46 }
 0x199   : > { %v2210_v14 = vpop.f32.mrf.mxu0 }
 0x19a   : > { %v5393_v41 = vadd.f32 %v2208_v34, %v1852_v36 }
 0x19d   : > { %v1638_v49 = vpop.f32.mrf.mxu2 }
 0x19e   : > { %v1659_v23 = vadd.f32 %v1638_v49, %v1410_v52 }
 0x19f   : > { %v1832_v54 = vpop.f32.mrf.mxu3  ;;  %v1412_v35 = vpop.f32.mrf.mxu1 }
 0x1a0   : > { %v1853_v20 = vadd.f32 %v1832_v54, %v1659_v23  ;;  %v1413_v1 = vadd.f32 %v1412_v35, %v5195_v18 }
 0x1a1   : > { %v2213_v32 = vpop.f32.mrf.mxu0 }
 0x1a2   : > { %2462 = vmatmul.bf16.gmra.mxu1 %v2362_v57  ;;  %2657 = vmatmul.bf16.gmra.mxu2 %v4209_v29  ;;  %v5396_v48 = vadd.f32 %v2210_v14, %v1853_v20 }
 0x1a4   : > { %3035 = vmatmul.bf16.gmra.mxu3 %v2935_v47  ;;  %3285 = vmatmul.bf16.gmra.mxu0 %v3185_v7 }
 0x1a5   : > { %v1641_v51 = vpop.f32.mrf.mxu2 }
 0x1a6   : > { %v1660_v46 = vadd.f32 %v1641_v51, %v1413_v1 }
 0x1a7   : > { %v1835_v3 = vpop.f32.mrf.mxu3  ;;  %v1414_v15 = vpop.f32.mrf.mxu1 }
 0x1a8   : > { %v1854_v28 = vadd.f32 %v1835_v3, %v1660_v46  ;;  %v1415_v63 = vadd.f32 %v1414_v15, %v5213_v4 }
 0x1a9   : > { %v2215_v34 = vpop.f32.mrf.mxu0 }
 0x1aa   : > { %v5399_v50 = vadd.f32 %v2213_v32, %v1854_v28 }
 0x1ad   : > { %v1643_v60 = vpop.f32.mrf.mxu2 }
 0x1ae   : > { %v1661_v9 = vadd.f32 %v1643_v60, %v1415_v63 }
 0x1af   : > { %v1837_v21 = vpop.f32.mrf.mxu3  ;;  %v2428_v44 = vpop.f32.mrf.mxu1 }
 0x1b0   : > { %v1855_v26 = vadd.f32 %v1837_v21, %v1661_v9  ;;  %v2468_v18 = vadd.f32 %v2428_v44, %v5238_v30 }
 0x1b1   : > { %v3251_v8 = vpop.f32.mrf.mxu0 }
 0x1b2   : > { %v5402_v6 = vadd.f32 %v2215_v34, %v1855_v26 }
 0x1b5   : > { %v2623_v58 = vpop.f32.mrf.mxu2 }
 0x1b6   : > { %v2663_v17 = vadd.f32 %v2623_v58, %v2468_v18 }
 0x1b7   : > { %v3001_v55 = vpop.f32.mrf.mxu3  ;;  %v2430_v2 = vpop.f32.mrf.mxu1 }
 0x1b8   : > { %v3041_v59 = vadd.f32 %v3001_v55, %v2663_v17  ;;  %v2469_v4 = vadd.f32 %v2430_v2, %v5245_v27 }
 0x1b9   : > { %v3253_v13 = vpop.f32.mrf.mxu0 }
 0x1ba   : > { %v3291_v38 = vadd.f32 %v3251_v8, %v3041_v59 }
 0x1bc   : > { %3307 = vst [vmem:[%s4454_s8] sm:$0xff] %v3291_v38  ;;  %v3344_v30 = vmul.f32 %v3291_v38, %v3291_v38 }
 0x1bd   : > { %v2625_v12 = vpop.f32.mrf.mxu2 }
 0x1be   : > { %v2664_v45 = vadd.f32 %v2625_v12, %v2469_v4 }
 0x1bf   : > { %v3003_v40 = vpop.f32.mrf.mxu3  ;;  %v2433_v36 = vpop.f32.mrf.mxu1 }
 0x1c0   : > { %v3042_v14 = vadd.f32 %v3003_v40, %v2664_v45  ;;  %v2470_v61 = vadd.f32 %v2433_v36, %v5265_v10 }
 0x1c1   : > { %v3256_v11 = vpop.f32.mrf.mxu0 }
 0x1c2   : > { %v3292_v39 = vadd.f32 %v3253_v13, %v3042_v14 }
 0x1c4   : > { %3308 = vst [vmem:[%s4454_s8 + $0x8] sm:$0xff] %v3292_v39  ;;  %v3323_v43 = vadd.f32 %v3292_v39, %v3291_v38  ;;  %v3345_v42 = vmul.f32 %v3292_v39, %v3292_v39 }
 0x1c5   : > { %v2628_v33 = vpop.f32.mrf.mxu2 }
 0x1c6   : > { %v3360_v24 = vadd.f32 %v3345_v42, %v3344_v30  ;;  %v2665_v56 = vadd.f32 %v2628_v33, %v2470_v61 }
 0x1c7   : > { %v3006_v0 = vpop.f32.mrf.mxu3  ;;  %v2435_v52 = vpop.f32.mrf.mxu1 }
 0x1c8   : > { %v3043_v27 = vadd.f32 %v3006_v0, %v2665_v56  ;;  %v2471_v29 = vadd.f32 %v2435_v52, %v5272_v31 }
 0x1c9   : > { %v3258_v49 = vpop.f32.mrf.mxu0 }
 0x1ca   : > { %v3293_v23 = vadd.f32 %v3256_v11, %v3043_v27 }
 0x1cc   : > { %3309 = vst [vmem:[%s4454_s8 + $0x10] sm:$0xff] %v3293_v23  ;;  %v3324_v54 = vadd.f32 %v3323_v43, %v3293_v23  ;;  %v3346_v57 = vmul.f32 %v3293_v23, %v3293_v23 }
 0x1cd   : > { %v2630_v35 = vpop.f32.mrf.mxu2 }
 0x1ce   : > { %v3361_v47 = vadd.f32 %v3360_v24, %v3346_v57  ;;  %v2666_v7 = vadd.f32 %v2630_v35, %v2471_v29 }
 0x1cf   : > { %v3008_v20 = vpop.f32.mrf.mxu3  ;;  %v2438_v32 = vpop.f32.mrf.mxu1 }
 0x1d0   : > { %v3044_v10 = vadd.f32 %v3008_v20, %v2666_v7  ;;  %v2472_v15 = vadd.f32 %v2438_v32, %v5292_v53 }
 0x1d1   : > { %v3261_v1 = vpop.f32.mrf.mxu0 }
 0x1d2   : > { %v3294_v51 = vadd.f32 %v3258_v49, %v3044_v10 }
 0x1d4   : > { %3310 = vst [vmem:[%s4454_s8 + $0x18] sm:$0xff] %v3294_v51  ;;  %v3325_v46 = vadd.f32 %v3324_v54, %v3294_v51  ;;  %v3347_v3 = vmul.f32 %v3294_v51, %v3294_v51 }
 0x1d5   : > { %v2633_v28 = vpop.f32.mrf.mxu2 }
 0x1d6   : > { %v3362_v34 = vadd.f32 %v3361_v47, %v3347_v3  ;;  %v2667_v63 = vadd.f32 %v2633_v28, %v2472_v15 }
 0x1d7   : > { %v3011_v60 = vpop.f32.mrf.mxu3  ;;  %v2440_v9 = vpop.f32.mrf.mxu1 }
 0x1d8   : > { %v3045_v31 = vadd.f32 %v3011_v60, %v2667_v63  ;;  %v2473_v18 = vadd.f32 %v2440_v9, %v5299_v37 }
 0x1d9   : > { %v3263_v21 = vpop.f32.mrf.mxu0 }
 0x1da   : > { %v3295_v44 = vadd.f32 %v3261_v1, %v3045_v31 }
 0x1dc   : > { %3311 = vst [vmem:[%s4454_s8 + $0x20] sm:$0xff] %v3295_v44  ;;  %v3326_v26 = vadd.f32 %v3325_v46, %v3295_v44  ;;  %v3348_v8 = vmul.f32 %v3295_v44, %v3295_v44 }
 0x1dd   : > { %v2635_v58 = vpop.f32.mrf.mxu2 }
 0x1de   : > { %v3363_v17 = vadd.f32 %v3362_v34, %v3348_v8  ;;  %v2668_v55 = vadd.f32 %v2635_v58, %v2473_v18 }
 0x1df   : > { %v3013_v2 = vpop.f32.mrf.mxu3  ;;  %v2443_v59 = vpop.f32.mrf.mxu1 }
 0x1e0   : > { %v3046_v53 = vadd.f32 %v3013_v2, %v2668_v55  ;;  %v2474_v45 = vadd.f32 %v2443_v59, %v5319_v19 }
 0x1e1   : > { %v3266_v13 = vpop.f32.mrf.mxu0 }
 0x1e2   : > { %v3296_v38 = vadd.f32 %v3263_v21, %v3046_v53 }
 0x1e4   : > { %3312 = vst [vmem:[%s4454_s8 + $0x28] sm:$0xff] %v3296_v38  ;;  %v3327_v4 = vadd.f32 %v3326_v26, %v3296_v38  ;;  %v3349_v12 = vmul.f32 %v3296_v38, %v3296_v38 }
 0x1e5   : > { %v2638_v40 = vpop.f32.mrf.mxu2 }
 0x1e6   : > { %v3364_v36 = vadd.f32 %v3363_v17, %v3349_v12  ;;  %v2669_v14 = vadd.f32 %v2638_v40, %v2474_v45 }
 0x1e7   : > { %v3016_v11 = vpop.f32.mrf.mxu3  ;;  %v2445_v39 = vpop.f32.mrf.mxu1 }
 0x1e8   : > { %v3047_v37 = vadd.f32 %v3016_v11, %v2669_v14  ;;  %v2475_v33 = vadd.f32 %v2445_v39, %v5325_v22 }
 0x1e9   : > { %v3268_v30 = vpop.f32.mrf.mxu0 }
 0x1ea   : > { %v3297_v43 = vadd.f32 %v3266_v13, %v3047_v37 }
 0x1ec   : > { %3313 = vst [vmem:[%s4454_s8 + $0x30] sm:$0xff] %v3297_v43  ;;  %v3328_v42 = vadd.f32 %v3327_v4, %v3297_v43  ;;  %v3350_v61 = vmul.f32 %v3297_v43, %v3297_v43 }
 0x1ed   : > { %v2640_v24 = vpop.f32.mrf.mxu2 }
 0x1ee   : > { %v3365_v56 = vadd.f32 %v3364_v36, %v3350_v61  ;;  %v2670_v0 = vadd.f32 %v2640_v24, %v2475_v33 }
 0x1ef   : > { %v3018_v52 = vpop.f32.mrf.mxu3  ;;  %v2448_v27 = vpop.f32.mrf.mxu1 }
 0x1f0   : > { %v3048_v19 = vadd.f32 %v3018_v52, %v2670_v0  ;;  %v2476_v29 = vadd.f32 %v2448_v27, %v5345_v62 }
 0x1f1   : > { %v3271_v49 = vpop.f32.mrf.mxu0 }
 0x1f2   : > { %v3298_v23 = vadd.f32 %v3268_v30, %v3048_v19 }
 0x1f4   : > { %3314 = vst [vmem:[%s4454_s8 + $0x38] sm:$0xff] %v3298_v23  ;;  %v3329_v54 = vadd.f32 %v3328_v42, %v3298_v23  ;;  %v3351_v57 = vmul.f32 %v3298_v23, %v3298_v23 }
 0x1f5   : > { %v2643_v35 = vpop.f32.mrf.mxu2 }
 0x1f6   : > { %v3366_v47 = vadd.f32 %v3365_v56, %v3351_v57  ;;  %v2671_v7 = vadd.f32 %v2643_v35, %v2476_v29 }
 0x1f7   : > { %v3021_v20 = vpop.f32.mrf.mxu3  ;;  %v2450_v32 = vpop.f32.mrf.mxu1 }
 0x1f8   : > { %v3049_v22 = vadd.f32 %v3021_v20, %v2671_v7  ;;  %v2477_v3 = vadd.f32 %v2450_v32, %v5352_v5 }
 0x1f9   : > { %v3273_v10 = vpop.f32.mrf.mxu0 }
 0x1fa   : > { %v3299_v1 = vadd.f32 %v3271_v49, %v3049_v22 }
 0x1fc   : > { %3315 = vst [vmem:[%s4454_s8 + $0x40] sm:$0xff] %v3299_v1  ;;  %v3330_v51 = vadd.f32 %v3329_v54, %v3299_v1  ;;  %v3352_v46 = vmul.f32 %v3299_v1, %v3299_v1 }
 0x1fd   : > { %v2645_v15 = vpop.f32.mrf.mxu2 }
 0x1fe   : > { %v3367_v28 = vadd.f32 %v3366_v47, %v3352_v46  ;;  %v2672_v34 = vadd.f32 %v2645_v15, %v2477_v3 }
 0x1ff   : > { %v3023_v63 = vpop.f32.mrf.mxu3  ;;  %v2453_v60 = vpop.f32.mrf.mxu1 }
 0x200   : > { %v3050_v62 = vadd.f32 %v3023_v63, %v2672_v34  ;;  %v2478_v26 = vadd.f32 %v2453_v60, %v5372_v25 }
 0x201   : > { %v3276_v9 = vpop.f32.mrf.mxu0 }
 0x202   : > { %v3300_v31 = vadd.f32 %v3273_v10, %v3050_v62 }
 0x204   : > { %3316 = vst [vmem:[%s4454_s8 + $0x48] sm:$0xff] %v3300_v31  ;;  %v3331_v21 = vadd.f32 %v3330_v51, %v3300_v31  ;;  %v3353_v44 = vmul.f32 %v3300_v31, %v3300_v31 }
 0x205   : > { %v2648_v8 = vpop.f32.mrf.mxu2 }
 0x206   : > { %v3368_v18 = vadd.f32 %v3367_v28, %v3353_v44  ;;  %v2673_v58 = vadd.f32 %v2648_v8, %v2478_v26 }
 0x207   : > { %v3026_v17 = vpop.f32.mrf.mxu3  ;;  %v2455_v55 = vpop.f32.mrf.mxu1 }
 0x208   : > { %v3051_v5 = vadd.f32 %v3026_v17, %v2673_v58  ;;  %v2479_v38 = vadd.f32 %v2455_v55, %v5377_v16 }
 0x209   : > { %v3278_v2 = vpop.f32.mrf.mxu0 }
 0x20a   : > { %v3301_v59 = vadd.f32 %v3276_v9, %v3051_v5 }
 0x20c   : > { %3317 = vst [vmem:[%s4454_s8 + $0x50] sm:$0xff] %v3301_v59  ;;  %v3332_v53 = vadd.f32 %v3331_v21, %v3301_v59  ;;  %v3354_v13 = vmul.f32 %v3301_v59, %v3301_v59 }
 0x20d   : > { %v2650_v4 = vpop.f32.mrf.mxu2 }
 0x20e   : > { %v3369_v12 = vadd.f32 %v3368_v18, %v3354_v13  ;;  %v2674_v45 = vadd.f32 %v2650_v4, %v2479_v38 }
 0x20f   : > { %v3028_v40 = vpop.f32.mrf.mxu3  ;;  %v2458_v25 = vpop.f32.mrf.mxu1 }
 0x210   : > { %v3052_v36 = vadd.f32 %v3028_v40, %v2674_v45  ;;  %v2480_v30 = vadd.f32 %v2458_v25, %v5393_v41 }
 0x211   : > { %v3281_v11 = vpop.f32.mrf.mxu0 }
 0x212   : > { %v3302_v14 = vadd.f32 %v3278_v2, %v3052_v36 }
 0x214   : > { %3318 = vst [vmem:[%s4454_s8 + $0x58] sm:$0xff] %v3302_v14  ;;  %v3333_v39 = vadd.f32 %v3332_v53, %v3302_v14  ;;  %v3355_v37 = vmul.f32 %v3302_v14, %v3302_v14 }
 0x215   : > { %v2653_v43 = vpop.f32.mrf.mxu2 }
 0x216   : > { %v3370_v42 = vadd.f32 %v3369_v12, %v3355_v37  ;;  %v2675_v61 = vadd.f32 %v2653_v43, %v2480_v30 }
 0x217   : > { %v3031_v33 = vpop.f32.mrf.mxu3  ;;  %v2460_v16 = vpop.f32.mrf.mxu1 }
 0x218   : > { %v3053_v24 = vadd.f32 %v3031_v33, %v2675_v61  ;;  %v2481_v27 = vadd.f32 %v2460_v16, %v5396_v48 }
 0x219   : > { %v3283_v19 = vpop.f32.mrf.mxu0 }
 0x21a   : > { %v3303_v56 = vadd.f32 %v3281_v11, %v3053_v24 }
 0x21c   : > { %3319 = vst [vmem:[%s4454_s8 + $0x60] sm:$0xff] %v3303_v56  ;;  %v3334_v0 = vadd.f32 %v3333_v39, %v3303_v56  ;;  %v3356_v52 = vmul.f32 %v3303_v56, %v3303_v56 }
 0x21d   : > { %v2655_v49 = vpop.f32.mrf.mxu2 }
 0x21e   : > { %v3371_v23 = vadd.f32 %v3370_v42, %v3356_v52  ;;  %v2676_v54 = vadd.f32 %v2655_v49, %v2481_v27 }
 0x21f   : > { %v3033_v57 = vpop.f32.mrf.mxu3  ;;  %v2463_v41 = vpop.f32.mrf.mxu1 }
 0x220   : > { %v3054_v29 = vadd.f32 %v3033_v57, %v2676_v54  ;;  %v2482_v20 = vadd.f32 %v2463_v41, %v5399_v50 }
 0x221   : > { %v3286_v48 = vpop.f32.mrf.mxu0 }
 0x222   : > { %v3304_v35 = vadd.f32 %v3283_v19, %v3054_v29 }
 0x224   : > { %3320 = vst [vmem:[%s4454_s8 + $0x68] sm:$0xff] %v3304_v35  ;;  %v3335_v47 = vadd.f32 %v3334_v0, %v3304_v35  ;;  %v3357_v7 = vmul.f32 %v3304_v35, %v3304_v35 }
 0x225   : > { %v2658_v32 = vpop.f32.mrf.mxu2 }
 0x226   : > { %v3372_v22 = vadd.f32 %v3371_v23, %v3357_v7  ;;  %v2677_v10 = vadd.f32 %v2658_v32, %v2482_v20 }
 0x227   : > { %v3036_v1 = vpop.f32.mrf.mxu3  ;;  %v2465_v46 = vpop.f32.mrf.mxu1 }
 0x228   : > { %v3055_v51 = vadd.f32 %v3036_v1, %v2677_v10  ;;  %v2483_v34 = vadd.f32 %v2465_v46, %v5402_v6 }
 0x229   : > { %v3288_v50 = vpop.f32.mrf.mxu0 }
 0x22a   : > { %v3305_v3 = vadd.f32 %v3286_v48, %v3055_v51 }
 0x22c   : > { %3321 = vst [vmem:[%s4454_s8 + $0x70] sm:$0xff] %v3305_v3  ;;  %v3336_v15 = vadd.f32 %v3335_v47, %v3305_v3  ;;  %v3358_v28 = vmul.f32 %v3305_v3, %v3305_v3 }
 0x22d   : > { %v2660_v63 = vpop.f32.mrf.mxu2 }
 0x22e   : > { %v3373_v60 = vadd.f32 %v3372_v22, %v3358_v28  ;;  %v2678_v62 = vadd.f32 %v2660_v63, %v2483_v34 }
 0x22f   : > { %v3038_v9 = vpop.f32.mrf.mxu3 }
 0x230   : > { %v3056_v31 = vadd.f32 %v3038_v9, %v2678_v62 }
 0x232   : > { %v3306_v21 = vadd.f32 %v3288_v50, %v3056_v31 }
 0x234   : > { %3322 = vst [vmem:[%s4454_s8 + $0x78] sm:$0xff] %v3306_v21  ;;  %v3337_v44 = vadd.f32 %v3336_v15, %v3306_v21  ;;  %v3359_v26 = vmul.f32 %v3306_v21, %v3306_v21 }
 0x236   : > { %v3338_v8 = vrot.slane %v3337_v44, 4  ;;  %v3374_v18 = vadd.f32 %v3373_v60, %v3359_v26 }
 0x238   : > { %v3339_v58 = vadd.f32 %v3338_v8, %v3337_v44  ;;  %v3375_v17 = vrot.slane %v3374_v18, 4 }
 0x23a   : > { %v3340_v55 = vrot.slane %v3339_v58, 2  ;;  %v3376_v5 = vadd.f32 %v3375_v17, %v3374_v18 }
 0x23c   : > { %v3341_v2 = vadd.f32 %v3340_v55, %v3339_v58  ;;  %v3377_v59 = vrot.slane %v3376_v5, 2 }
 0x23e   : > { %v3342_v6 = vrot.slane %v3341_v2, 1  ;;  %v3378_v53 = vadd.f32 %v3377_v59, %v3376_v5 }
 0x240   : > { %v3379_v13 = vrot.slane %v3378_v53, 1  ;;  %v3343_v38 = vadd.f32 %v3342_v6, %v3341_v2 }
 0x242   : > { %v3380_v4 = vadd.f32 %v3379_v13, %v3378_v53 }
 0x244   : > { %v3382_v12 = vsel %vm754_vm4, %v3343_v38, %v3380_v4 }
 0x245   : > { %3383 = vst [vmem:[%s4581_s18] sm:$0x3] %v3382_v12 }
 0x246 PF: > { %s18_s28 = sadd.s32 1, %s4341_s28   ;;  %s5474_s24 = smov %s4333_s26 }
 0x247   : > { %p15_p0 = scmp.ge.s32.totalorder %s18_s28, 6   ;;  %s5475_s25 = smov %s4337_s27 }
 0x248   : > { %s5476_s26 = smov %s5479_s29  ;;  %s5477_s27 = smov %s5483_s30 }
 0x249   :  { %17 = sbr.rel (!%p15_p0) target bundleno = 3 (0x3), region = 111 }

// kernel: dncnn_forward.7
= control target key start
LH: loop header
LB: loop body
LE: loop exit
PB: predicated region body
PF: predicated region fallthrough
CT: control target
= control target key end

     0   :  { %13 = vsyncpa [#allocation4], 0  ;;  %s5611_s0 = inlined_call_operand.vmem [shape: f32[1,128], index: 0, kind: input, shape index: {}]   ;;  %s5612_s1 = inlined_call_operand.vmem [shape: f32[1,128], index: 1, kind: input, shape index: {}]   ;;  %s5613_s2 = inlined_call_operand.vmem [shape: f32[2,16,16,128], index: 2, kind: input, shape index: {}, may-alias: {2,3,4}]   ;;  %s5614_s3 = inlined_call_operand.vmem [shape: f32[2,16,16,128], index: 3, kind: input, shape index: {}, may-alias: {2,3,4}]   ;;  %s5615_s4 = inlined_call_operand.vmem [shape: f32[2,16,16,128], index: 4, kind: input, shape index: {}, may-alias: {2,3,4}]   ;;  %s5616_s5 = inlined_call_operand.vmem [shape: bf16[3,3,128,128], index: 5, kind: input, shape index: {}]   ;;  %s5617_s6 = inlined_call_operand.vmem [shape: f32[2,16,16,128], index: 6, kind: output, shape index: {0}]   ;;  %s5618_s7 = inlined_call_operand.hbm [shape: f32[2,2,2,128], index: 7, kind: output, shape index: {1}]  }
   0x1   :  { %15 = vsyncpa [#allocation4 + $0x1], 0  ;;  %s4474_s24 = smov 0   ;;  %s4476_s25 = smov 0  }
   0x2   :  { %s4478_s26 = smov 0   ;;  %s4480_s27 = smov 0  }
   0x3   :  { %s4482_s28 = smov 0   ;;  %s4484_s29 = smov 0  }
   0x4   :  { %s4486_s30 = smov 0   ;;  %s4488_s8 = smov 0  }
   0x5 LB: > { %5624 = sst [smem:[#allocation6_spill]] %s4423_s29  ;;  %s3573_s9 = sadd.s32 4294967295, %s4431_s8   ;;  %s4431_s8 = sphi %s4488_s8, %s21_s8   ;;  %s4427_s30 = sphi %s4486_s30, %s5649_s30   ;;  %s4423_s29 = sphi %s4484_s29, %s5648_s29   ;;  %s4419_s28 = sphi %s4482_s28, %s5647_s28   ;;  %s4415_s27 = sphi %s4480_s27, %s5646_s27   ;;  %s4411_s26 = sphi %s4478_s26, %s5652_s26   ;;  %s4407_s25 = sphi %s4476_s25, %s5651_s25   ;;  %s4403_s24 = sphi %s4474_s24, %s5650_s24  }
   0x6   : > { %5625 = sst [smem:[#allocation7_spill]] %s4427_s30  ;;  %s3574_s10 = sadd.s32 4294967294, %s4431_s8  }
   0x7   : > { %s30_s11 = sadd.s32 1, %s4423_s29  ;;  %s33_s12 = sadd.s32 1, %s4427_s30 }
   0x8   : > { %p31_p0 = scmp.ge.s32.totalorder %s30_s11, 2  ;;  %p239_p1 = scmp.ne.s32.totalorder %s4411_s26, %s4407_s25 }
   0x9   : > { %p240_p2 = scmp.eq.s32.totalorder %s3573_s9, 3  ;;  %p245_p5 = scmp.ne.s32.totalorder %s4407_s25, %s4403_s24 }
   0xa   : > { %s5654_s11 = smov (%p31_p0, %s30_s11), 0  ;;  %s5656_s12 = smov (!%p31_p0, %s33_s12), %s4427_s30 }
   0xb   : > { %5626 = sst [smem:[#allocation8_spill]] %s5654_s11  ;;  %s225_s13 = ssub.s32 %s4423_s29, %s5654_s11 }
   0xc   : > { %p4525_p3 = por %p240_p2, %p239_p1  ;;  %p35_p4 = scmp.ge.s32.totalorder %s5656_s12, 2 }
   0xd   : > { %p246_p6 = scmp.eq.s32.totalorder %s3574_s10, 3  ;;  %p3579_p7 = scmp.ge.s32.totalorder %s4431_s8, 1 }
   0xe   : > { %s5658_s12 = smov (%p35_p4, %s5656_s12), 0  ;;  %p327_p9 = scmp.lt.s32.totalorder %s4431_s8, 5 }
   0xf   : > { %5628 = sst [smem:[#allocation9_spill]] %s5658_s12  ;;  %p4534_p8 = por %p246_p6, %p245_p5 }
  0x10   : > { %s224_s16 = ssub.s32 %s4427_s30, %s5658_s12  ;;  %s229_s17 = sadd.s32 1, %s4411_s26 }
  0x11   : > { %s226_s18 = sor.u32 %s225_s13, %s224_s16  ;;  %p328_p10 = pnand %p3579_p7, %p327_p9 }
  0x12   : > { %p227_p11 = scmp.eq.s32.totalorder %s226_s18, 0  ;;  %s5619_s20 = sand.u32 (!%p328_p10), 1, %s4407_s25  }
  0x13   : > { %331 = sbr.rel (%p328_p10) target bundleno = 596 (0x254), region = 44  ;;  %s3581_s21 = sshll.u32 (!%p328_p10), %s4415_s27, 3 }
  0x14   : > { %s4543_s19 = scalar_select %p227_p11, %s4411_s26, %s229_s17  }
  0x15   : > { %s4550_s22 = sshll.u32 (!%p328_p10), %s5619_s20, 1  ;;  %p401_p12 = scmp.lt.s32.totalorder (!%p328_p10), %s4419_s28, 1 }
  0x16   : > { %5630 = sst [smem:[#allocation10_spill]] %s4543_s19  ;;  %p403_p13 = scmp.lt.s32.totalorder (!%p328_p10), %s3581_s21, 15 }
  0x17   : > { %s3585_s10 = sadd.s32 (!%p328_p10), 4294967295, %s4415_s27  ;;  %s428_s18 = sadd.s32 (!%p328_p10), 1, %s4415_s27 }
  0x18   : > { %v4433_v0 = vmov 0   ;;  %s402_s23 = scalar_select %p401_p12, %s4419_s28, 1  ;;  %v4572_v1 = vld [vmem:[%s5611_s0] ss:$0 sm:$0xff]  ;;  %vm739_vm0 = vcmask 1043456   ;;  %vm746_vm4 = vcmask 1040384  }
  0x19   : > { %462 = vst [vmem:[#allocation2 + $0xc] sm:$0xf] %v4433_v0  ;;  %s5660_s21 = smov (!%p403_p13, %s3581_s21), 15  ;;  %p4562_p0 = scmp.gt.s32.totalorder %s3585_s10, 0  ;;  %v4593_v2 = vld [vmem:[%s5612_s1] ss:$0 sm:$0xff] }
  0x1a   : > { %459 = vst [vmem:[#allocation2] sm:$0xf] %v4433_v0  ;;  %s4558_s9 = sshll.u32 %s402_s23, 5  ;;  %s3582_s13 = sshll.u32 %s5660_s21, 1  ;;  %vm740_vm1 = vsmask.f32 7938 }
  0x1b   : > { %460 = vst [vmem:[#allocation2 + $0x4] sm:$0xf] %v4433_v0  ;;  %s407_s17 = sadd.s32 %s4558_s9, %s3582_s13  ;;  %p4575_p1 = scmp.lt.s32.totalorder %s428_s18, 1  ;;  %vm575_vm2 = vsmask.f32 256  ;;  %vm4669_vm5 = vmand %vm739_vm0, %vm740_vm1 }
  0x1c   : > { %461 = vst [vmem:[#allocation2 + $0x8] sm:$0x1] %v4433_v0  ;;  %s3584_s23 = sshll.u32 %s407_s17, 3  ;;  %s5662_s10 = smov (!%p4562_p0, %s3585_s10), 0  ;;  %vm576_vm3 = vsmask.f32 4368  ;;  %vm4683_vm6 = vmand %vm746_vm4, %vm575_vm2 }
  0x1d   : > { %463 = vst [vmem:[#allocation2 + $0x10] sm:$0xf] %v4433_v0  ;;  %s4583_s13 = scalar_lea.vmem %s5613_s2, %s3584_s23  ;;  %s4588_s12 = scalar_lea.vmem %s5617_s6, %s3584_s23  ;;  %vm4692_vm7 = vmor %vm575_vm2, %vm576_vm3 }
  0x1e   : > { %464 = vst [vmem:[#allocation2 + $0x14] sm:$0x1] %v4433_v0  ;;  %v489_v3 = vld [vmem:[%s4583_s13] sm:$0xff]  ;;  %v490_v4 = vld [vmem:[%s4583_s13 + $0x8] sm:$0xff]  ;;  %v491_v5 = vld [vmem:[%s4583_s13 + $0x10] sm:$0xff]  ;;  %s5664_s18 = smov (!%p4575_p1, %s428_s18), 1 }
  0x1f   : > { %465 = vst [vmem:[#allocation2 + $0x18] sm:$0xf] %v4433_v0  ;;  %v508_v6 = vmul.f32 %v4572_v1, %v489_v3  ;;  %v509_v7 = vmul.f32 %v4572_v1, %v490_v4  ;;  %v510_v8 = vmul.f32 %v4572_v1, %v491_v5  ;;  %v492_v9 = vld [vmem:[%s4583_s13 + $0x18] sm:$0xff]  ;;  %v493_v10 = vld [vmem:[%s4583_s13 + $0x20] sm:$0xff]  ;;  %v494_v11 = vld [vmem:[%s4583_s13 + $0x28] sm:$0xff]  ;;  %s3586_s29 = sshll.u32 %s5662_s10, 3 }
  0x20   : > { %466 = vst [vmem:[#allocation2 + $0x1c] sm:$0xf] %v4433_v0  ;;  %v511_v12 = vmul.f32 %v4572_v1, %v492_v9  ;;  %v512_v13 = vmul.f32 %v4572_v1, %v493_v10  ;;  %v513_v14 = vmul.f32 %v4572_v1, %v494_v11  ;;  %v495_v15 = vld [vmem:[%s4583_s13 + $0x30] sm:$0xff]  ;;  %v496_v16 = vld [vmem:[%s4583_s13 + $0x38] sm:$0xff]  ;;  %p4622_p2 = scmp.lt.s32.totalorder %s3586_s29, 15  ;;  %s3590_s11 = sshll.u32 %s5664_s18, 3 }
  0x21   : > { %467 = vst [vmem:[#allocation2 + $0x20] sm:$0x1] %v4433_v0  ;;  %v527_v17 = vadd.f32 %v4593_v2, %v508_v6  ;;  %v528_v18 = vadd.f32 %v4593_v2, %v509_v7  ;;  %v529_v19 = vadd.f32 %v4593_v2, %v510_v8  ;;  %v514_v20 = vmul.f32 %v4572_v1, %v495_v15  ;;  %v497_v21 = vld [vmem:[%s4583_s13 + $0x40] sm:$0xff]  ;;  %p434_p4 = scmp.lt.s32.totalorder %s3590_s11, 15  ;;  %v498_v26 = vld [vmem:[%s4583_s13 + $0x48] sm:$0xff]  ;;  %p3598_p5 = scmp.le.s32.totalorder %s4415_s27, 0 }
  0x22   : > { %468 = vst [vmem:[#allocation2 + $0x24] sm:$0xf] %v4433_v0  ;;  %v530_v22 = vadd.f32 %v4593_v2, %v511_v12  ;;  %v531_v23 = vadd.f32 %v4593_v2, %v512_v13  ;;  %v532_v24 = vadd.f32 %v4593_v2, %v513_v14  ;;  %v515_v25 = vmul.f32 %v4572_v1, %v496_v16  ;;  %s5666_s29 = smov (!%p4622_p2, %s3586_s29), 15  ;;  %v4673_v48 = vld [vmem:[#allocation2 + $0xc] sm:$0xf] }
  0x23   : > { %469 = vst [vmem:[#allocation2 + $0x28] sm:$0xf] %v4433_v0  ;;  %v543_v27 = vmax.f32 %v527_v17, 0.0  ;;  %v544_v28 = vmax.f32 %v528_v18, 0.0  ;;  %v545_v29 = vmax.f32 %v529_v19, 0.0  ;;  %v4642_v30 = vadd.f32 %v4593_v2, %v514_v20  ;;  %s5668_s11 = smov (!%p434_p4, %s3590_s11), 15 }
  0x24   : > { %470 = vst [vmem:[#allocation2 + $0x2c] sm:$0x1] %v4433_v0  ;;  %v546_v31 = vmax.f32 %v530_v22, 0.0  ;;  %v4646_v32 = vadd.f32 %v4593_v2, %v515_v25  ;;  %v4649_v33 = vmul.f32 %v4572_v1, %v497_v21  ;;  %v4652_v34 = vmul.f32 %v4572_v1, %v498_v26  ;;  %s3587_s19 = sshll.u32 %s5666_s29, 1  ;;  %s3591_s16 = sshll.u32 %s5668_s11, 1 }
  0x25   : > { %471 = vst [vmem:[#allocation2 + $0x30] sm:$0xf] %v4433_v0  ;;  %v559_v35 = vpack.c.bf16 %v543_v27, %v543_v27  ;;  %v560_v36 = vpack.c.bf16 %v544_v28, %v544_v28  ;;  %v561_v37 = vpack.c.bf16 %v545_v29, %v545_v29  ;;  %v547_v38 = vmax.f32 %v531_v23, 0.0  ;;  %s421_s10 = sadd.s32 %s3587_s19, %s4558_s9  ;;  %s438_s23 = sadd.s32 %s3591_s16, %s4558_s9  ;;  %v748_v50 = vld [vmem:[#allocation2 + $0x14] sm:$0x1] }
  0x26   : > { %472 = vst [vmem:[#allocation2 + $0x34] sm:$0xf] %v4433_v0  ;;  %v562_v39 = vpack.c.bf16 %v546_v31, %v546_v31  ;;  %v548_v40 = vmax.f32 %v532_v24, 0.0  ;;  %v549_v41 = vmax.f32 %v4642_v30, 0.0  ;;  %v550_v42 = vmax.f32 %v4646_v32, 0.0  ;;  %s3589_s18 = sshll.u32 %s421_s10, 3 }
  0x27   : > { %473 = vst [vmem:[#allocation2 + $0x38] sm:$0x1] %v4433_v0  ;;  %v579_v43 = vshrl.u32 %v559_v35, 16  ;;  %v582_v44 = vshll.u32 %v559_v35, 16  ;;  %v587_v45 = vshrl.u32 %v560_v36, 16  ;;  %v563_v46 = vpack.c.bf16 %v547_v38, %v547_v38  ;;  %s4665_s17 = scalar_lea.vmem %s5614_s3, %s3589_s18  ;;  %s3593_s29 = sshll.u32 %s438_s23, 3 }
  0x28   : > { %474 = vst [vmem:[#allocation2 + $0x3c] sm:$0xf] %v4433_v0  ;;  %v590_v49 = vshll.u32 %v560_v36, 16  ;;  %v596_v51 = vshrl.u32 %v561_v37, 16  ;;  %v599_v52 = vshll.u32 %v561_v37, 16  ;;  %v564_v53 = vpack.c.bf16 %v548_v40, %v548_v40  ;;  %s4679_s11 = scalar_lea.vmem %s5615_s4, %s3593_s29  ;;  %v499_v31 = vld [vmem:[%s4583_s13 + $0x50] sm:$0xff] }
  0x29   : > { %475 = vst [vmem:[#allocation2 + $0x40] sm:$0xf] %v4433_v0  ;;  %v581_v54 = vrot.slane %v579_v43, 7  ;;  %v589_v55 = vrot.slane %v587_v45, 7  ;;  %v4687_v57 = vld [vmem:[#allocation2 + $0x18] sm:$0xf]  ;;  %v565_v26 = vpack.c.bf16 %v549_v41, %v549_v41  ;;  %v566_v30 = vpack.c.bf16 %v550_v42, %v550_v42 }
  0x2a   : > { %476 = vst [vmem:[#allocation2 + $0x44] sm:$0x1] %v4433_v0  ;;  %v604_v58 = vshrl.u32 %v562_v39, 16  ;;  %v607_v59 = vshll.u32 %v562_v39, 16  ;;  %v598_v61 = vrot.slane %v596_v51, 7  ;;  %v613_v62 = vshrl.u32 %v563_v46, 16 }
  0x2b   : > { %477 = vst [vmem:[#allocation2 + $0x48] sm:$0xf] %v4433_v0  ;;  %v616_v63 = vshll.u32 %v563_v46, 16  ;;  %v621_v3 = vshrl.u32 %v564_v53, 16  ;;  %v584_v4 = vor.u32 %v582_v44, %v581_v54  ;;  %v585_v5 = vrot.slane %v581_v54, 4  ;;  %v500_v35 = vld [vmem:[%s4583_s13 + $0x58] sm:$0xff] }
  0x2c   : > { %478 = vst [vmem:[#allocation2 + $0x4c] sm:$0xf] %v4433_v0  ;;  %v592_v6 = vor.u32 %v590_v49, %v589_v55  ;;  %v594_v7 = vrot.slane %v589_v55, 4  ;;  %v755_v8 = vld [vmem:[#allocation2 + $0x20] sm:$0x1]  ;;  %v601_v9 = vor.u32 %v599_v52, %v598_v61  ;;  %v602_v10 = vrot.slane %v598_v61, 4 }
  0x2d   : > { %479 = vst [vmem:[#allocation2 + $0x50] sm:$0x1] %v4433_v0  ;;  %v606_v11 = vrot.slane %v604_v58, 7  ;;  %v615_v12 = vrot.slane %v613_v62, 7  ;;  %v743_v13 = vsel %vm4669_vm5, %v584_v4, %v4673_v48  ;;  %v4706_v16 = vld [vmem:[#allocation2 + $0x24] sm:$0xf]  ;;  %v535_v32 = vadd.f32 %v4593_v2, %v4649_v33 }
  0x2e   : > { %480 = vst [vmem:[#allocation2 + $0x54] sm:$0xf] %v4433_v0  ;;  %v593_v14 = vsel %vm4692_vm7, %v585_v5, %v592_v6  ;;  %v749_v15 = vsel %vm4683_vm6, %v594_v7, %v748_v50  ;;  %v623_v17 = vrot.slane %v621_v3, 7  ;;  %v752_v18 = vsel %vm4669_vm5, %v601_v9, %v4687_v57  ;;  %v762_v22 = vld [vmem:[#allocation2 + $0x2c] sm:$0x1]  ;;  %v501_v40 = vld [vmem:[%s4583_s13 + $0x60] sm:$0xff] }
  0x2f   : > { %481 = vst [vmem:[#allocation2 + $0x58] sm:$0xf] %v4433_v0  ;;  %v609_v19 = vor.u32 %v607_v59, %v606_v11  ;;  %v611_v20 = vrot.slane %v606_v11, 4  ;;  %v618_v21 = vor.u32 %v616_v63, %v615_v12  ;;  %v619_v23 = vrot.slane %v615_v12, 4  ;;  %v765_v46 = vld [vmem:[#allocation2 + $0x30] sm:$0xf] }
  0x30   : > { %482 = vst [vmem:[#allocation2 + $0x5c] sm:$0x1] %v4433_v0  ;;  %v624_v24 = vshll.u32 %v564_v53, 16  ;;  %v628_v25 = vrot.slane %v623_v17, 4  ;;  %v630_v38 = vshrl.u32 %v565_v26, 16  ;;  %v633_v39 = vshll.u32 %v565_v26, 16 }
  0x31   : > { %483 = vst [vmem:[#allocation2 + $0x60] sm:$0xf] %v4433_v0  ;;  %v610_v27 = vsel %vm4692_vm7, %v602_v10, %v609_v19  ;;  %v756_v28 = vsel %vm4683_vm6, %v611_v20, %v755_v8  ;;  %v759_v29 = vsel %vm4669_vm5, %v618_v21, %v4706_v16  ;;  %v638_v41 = vshrl.u32 %v566_v30, 16  ;;  %v769_v53 = vld [vmem:[#allocation2 + $0x38] sm:$0x1]  ;;  %v502_v5 = vld [vmem:[%s4583_s13 + $0x68] sm:$0xff] }
  0x32   : > { %484 = vst [vmem:[#allocation2 + $0x64] sm:$0xf] %v4433_v0  ;;  %v626_v36 = vor.u32 %v624_v24, %v623_v17  ;;  %v763_v37 = vsel %vm4683_vm6, %v628_v25, %v762_v22  ;;  %v641_v43 = vshll.u32 %v566_v30, 16  ;;  %v536_v42 = vadd.f32 %v4593_v2, %v4652_v34  ;;  %v503_v6 = vld [vmem:[%s4583_s13 + $0x70] sm:$0xff]  ;;  %v772_v11 = vld [vmem:[#allocation2 + $0x3c] sm:$0xf] }
  0x33   : > { %485 = vst [vmem:[#allocation2 + $0x68] sm:$0x1] %v4433_v0  ;;  %v632_v45 = vrot.slane %v630_v38, 7  ;;  %v518_v48 = vmul.f32 %v4572_v1, %v499_v31  ;;  %v519_v49 = vmul.f32 %v4572_v1, %v500_v35  ;;  %v551_v50 = vmax.f32 %v535_v32, 0.0  ;;  %v776_v17 = vld [vmem:[#allocation2 + $0x44] sm:$0x1] }
  0x34   : > { %486 = vst [vmem:[#allocation2 + $0x6c] sm:$0xf] %v4433_v0  ;;  %v627_v44 = vsel %vm4692_vm7, %v619_v23, %v626_v36  ;;  %v552_v51 = vmax.f32 %v536_v42, 0.0  ;;  %v520_v52 = vmul.f32 %v4572_v1, %v501_v40  ;;  %v521_v19 = vmul.f32 %v4572_v1, %v502_v5 }
  0x35   : > { %487 = vst [vmem:[#allocation2 + $0x70] sm:$0xf] %v4433_v0  ;;  %v635_v33 = vor.u32 %v633_v39, %v632_v45  ;;  %v636_v34 = vrot.slane %v632_v45, 4  ;;  %v537_v54 = vadd.f32 %v4593_v2, %v518_v48  ;;  %v538_v55 = vadd.f32 %v4593_v2, %v519_v49  ;;  %v783_v45 = vld [vmem:[#allocation2 + $0x50] sm:$0x1] }
  0x36   : > { %488 = vst [vmem:[#allocation2 + $0x74] sm:$0x1] %v4433_v0  ;;  %v640_v0 = vrot.slane %v638_v41, 7  ;;  %v567_v59 = vpack.c.bf16 %v551_v50, %v551_v50  ;;  %v568_v61 = vpack.c.bf16 %v552_v51, %v552_v51  ;;  %v539_v4 = vadd.f32 %v4593_v2, %v520_v52  ;;  %v504_v41 = vld [vmem:[%s4583_s13 + $0x78] sm:$0xff]  ;;  %v786_v51 = vld [vmem:[#allocation2 + $0x54] sm:$0xf] }
  0x37   : > { %744 = vst [vmem:[#allocation2 + $0xc] sm:$0xf] %v743_v13  ;;  %v766_v62 = vsel %vm4669_vm5, %v635_v33, %v765_v46  ;;  %v553_v63 = vmax.f32 %v537_v54, 0.0  ;;  %v554_v3 = vmax.f32 %v538_v55, 0.0  ;;  %v522_v20 = vmul.f32 %v4572_v1, %v503_v6  ;;  %v790_v6 = vld [vmem:[#allocation2 + $0x5c] sm:$0x1] }
  0x38   : > { %745 = vst [vmem:[#allocation2 + $0x10] sm:$0xf] %v593_v14  ;;  %v643_v57 = vor.u32 %v641_v43, %v640_v0  ;;  %v645_v58 = vrot.slane %v640_v0, 4  ;;  %v647_v9 = vshrl.u32 %v567_v59, 16  ;;  %v650_v10 = vshll.u32 %v567_v59, 16  ;;  %s399_s13 = scalar_lea.vmem [#allocation3], %s4550_s22 }
  0x39   : > { %750 = vst [vmem:[#allocation2 + $0x14] sm:$0x1] %v749_v15  ;;  %v655_v12 = vshrl.u32 %v568_v61, 16  ;;  %v658_v13 = vshll.u32 %v568_v61, 16  ;;  %v569_v14 = vpack.c.bf16 %v553_v63, %v553_v63  ;;  %v570_v15 = vpack.c.bf16 %v554_v3, %v554_v3 }
  0x3a   : > { %753 = vst [vmem:[#allocation2 + $0x18] sm:$0xf] %v752_v18  ;;  %v644_v7 = vsel %vm4692_vm7, %v636_v34, %v643_v57  ;;  %v770_v8 = vsel %vm4683_vm6, %v645_v58, %v769_v53  ;;  %v649_v16 = vrot.slane %v647_v9, 7  ;;  %v555_v18 = vmax.f32 %v539_v4, 0.0 }
  0x3b   : > { %754 = vst [vmem:[#allocation2 + $0x1c] sm:$0xf] %v610_v27  ;;  %v657_v21 = vrot.slane %v655_v12, 7  ;;  %v664_v22 = vshrl.u32 %v569_v14, 16  ;;  %v667_v23 = vshll.u32 %v569_v14, 16  ;;  %v672_v24 = vshrl.u32 %v570_v15, 16 }
  0x3c   : > { %757 = vst [vmem:[#allocation2 + $0x20] sm:$0x1] %v756_v28  ;;  %v652_v25 = vor.u32 %v650_v10, %v649_v16  ;;  %v653_v26 = vrot.slane %v649_v16, 4  ;;  %v779_v27 = vld [vmem:[#allocation2 + $0x48] sm:$0xf]  ;;  %v675_v28 = vshll.u32 %v570_v15, 16  ;;  %v540_v40 = vadd.f32 %v4593_v2, %v521_v19 }
  0x3d   : > { %760 = vst [vmem:[#allocation2 + $0x24] sm:$0xf] %v759_v29  ;;  %v571_v29 = vpack.c.bf16 %v555_v18, %v555_v18  ;;  %v660_v30 = vor.u32 %v658_v13, %v657_v21  ;;  %v662_v31 = vrot.slane %v657_v21, 4  ;;  %v666_v35 = vrot.slane %v664_v22, 7  ;;  %v797_v21 = vld [vmem:[#allocation2 + $0x68] sm:$0x1] }
  0x3e   : > { %761 = vst [vmem:[#allocation2 + $0x28] sm:$0xf] %v627_v44  ;;  %v674_v36 = vrot.slane %v672_v24, 7  ;;  %v556_v0 = vmax.f32 %v540_v40, 0.0  ;;  %v541_v52 = vadd.f32 %v4593_v2, %v522_v20  ;;  %v523_v33 = vmul.f32 %v4572_v1, %v504_v41 }
  0x3f   : > { %764 = vst [vmem:[#allocation2 + $0x2c] sm:$0x1] %v763_v37  ;;  %v773_v37 = vsel %vm4669_vm5, %v652_v25, %v772_v11  ;;  %v681_v38 = vshrl.u32 %v571_v29, 16  ;;  %v684_v39 = vshll.u32 %v571_v29, 16  ;;  %v661_v43 = vsel %vm4692_vm7, %v653_v26, %v660_v30 }
  0x40   : > { %767 = vst [vmem:[#allocation2 + $0x30] sm:$0xf] %v766_v62  ;;  %v777_v32 = vsel %vm4683_vm6, %v662_v31, %v776_v17  ;;  %v669_v42 = vor.u32 %v667_v23, %v666_v35  ;;  %v670_v44 = vrot.slane %v666_v35, 4  ;;  %v677_v46 = vor.u32 %v675_v28, %v674_v36  ;;  %v793_v17 = vld [vmem:[#allocation2 + $0x60] sm:$0xf] }
  0x41   : > { %768 = vst [vmem:[#allocation2 + $0x34] sm:$0xf] %v644_v7  ;;  %v679_v48 = vrot.slane %v674_v36, 4  ;;  %v683_v49 = vrot.slane %v681_v38, 7  ;;  %v572_v55 = vpack.c.bf16 %v556_v0, %v556_v0  ;;  %v557_v57 = vmax.f32 %v541_v52, 0.0 }
  0x42   : > { %771 = vst [vmem:[#allocation2 + $0x38] sm:$0x1] %v770_v8  ;;  %v780_v50 = vsel %vm4669_vm5, %v669_v42, %v779_v27  ;;  %v678_v34 = vsel %vm4692_vm7, %v670_v44, %v677_v46  ;;  %v542_v58 = vadd.f32 %v4593_v2, %v523_v33 }
  0x43   : > { %774 = vst [vmem:[#allocation2 + $0x3c] sm:$0xf] %v773_v37  ;;  %v784_v53 = vsel %vm4683_vm6, %v679_v48, %v783_v45  ;;  %v686_v54 = vor.u32 %v684_v39, %v683_v49  ;;  %v689_v61 = vshrl.u32 %v572_v55, 16  ;;  %v692_v62 = vshll.u32 %v572_v55, 16 }
  0x44   : > { %775 = vst [vmem:[#allocation2 + $0x40] sm:$0xf] %v661_v43  ;;  %v573_v63 = vpack.c.bf16 %v557_v57, %v557_v57  ;;  %v558_v3 = vmax.f32 %v542_v58, 0.0  ;;  %v687_v4 = vrot.slane %v683_v49, 4 }
  0x45   : > { %778 = vst [vmem:[#allocation2 + $0x44] sm:$0x1] %v777_v32  ;;  %v787_v59 = vsel %vm4669_vm5, %v686_v54, %v786_v51  ;;  %v691_v5 = vrot.slane %v689_v61, 7 }
  0x46   : > { %781 = vst [vmem:[#allocation2 + $0x48] sm:$0xf] %v780_v50  ;;  %v698_v7 = vshrl.u32 %v573_v63, 16  ;;  %v701_v8 = vshll.u32 %v573_v63, 16  ;;  %v574_v9 = vpack.c.bf16 %v558_v3, %v558_v3 }
  0x47   : > { %782 = vst [vmem:[#allocation2 + $0x4c] sm:$0xf] %v678_v34  ;;  %v694_v10 = vor.u32 %v692_v62, %v691_v5  ;;  %v696_v11 = vrot.slane %v691_v5, 4 }
  0x48   : > { %785 = vst [vmem:[#allocation2 + $0x50] sm:$0x1] %v784_v53  ;;  %v700_v12 = vrot.slane %v698_v7, 7  ;;  %v706_v13 = vshrl.u32 %v574_v9, 16  ;;  %v709_v14 = vshll.u32 %v574_v9, 16 }
  0x49   : > { %788 = vst [vmem:[#allocation2 + $0x54] sm:$0xf] %v787_v59  ;;  %v695_v15 = vsel %vm4692_vm7, %v687_v4, %v694_v10  ;;  %v791_v16 = vsel %vm4683_vm6, %v696_v11, %v790_v6 }
  0x4a   : > { %789 = vst [vmem:[#allocation2 + $0x58] sm:$0xf] %v695_v15  ;;  %v703_v18 = vor.u32 %v701_v8, %v700_v12  ;;  %v704_v19 = vrot.slane %v700_v12, 4  ;;  %v708_v20 = vrot.slane %v706_v13, 7 }
  0x4b   : > { %792 = vst [vmem:[#allocation2 + $0x5c] sm:$0x1] %v791_v16 }
  0x4c   : > { %v794_v22 = vsel %vm4669_vm5, %v703_v18, %v793_v17  ;;  %v711_v23 = vor.u32 %v709_v14, %v708_v20  ;;  %v713_v24 = vrot.slane %v708_v20, 4  ;;  %803 = sbr.rel (%p3598_p5) target bundleno = 100 (0x64), region = 48 }
  0x4d   : > { %795 = vst [vmem:[#allocation2 + $0x60] sm:$0xf] %v794_v22 }
  0x4e   : > { %v712_v25 = vsel %vm4692_vm7, %v704_v19, %v711_v23  ;;  %v798_v26 = vsel %vm4683_vm6, %v713_v24, %v797_v21 }
  0x4f   : > { %796 = vst [vmem:[#allocation2 + $0x64] sm:$0xf] %v712_v25 }
  0x50   : > { %799 = vst [vmem:[#allocation2 + $0x68] sm:$0x1] %v798_v26 }
  0x51   : > { %v804_v27 = vld [vmem:[%s4665_s17 + $0x70] sm:$0xff]  ;;  %v805_v28 = vld [vmem:[%s4665_s17 + $0x78] sm:$0xff]  ;;  %v834_v45 = vld [vmem:[#allocation2] sm:$0xf] }
  0x52   : > { %v806_v29 = vmul.f32 %v4572_v1, %v804_v27  ;;  %v807_v30 = vmul.f32 %v4572_v1, %v805_v28  ;;  %v838_v46 = vld [vmem:[#allocation2 + $0x8] sm:$0x1] }
  0x54   : > { %v808_v31 = vadd.f32 %v4593_v2, %v806_v29  ;;  %v809_v35 = vadd.f32 %v4593_v2, %v807_v30 }
  0x56   : > { %v810_v36 = vmax.f32 %v808_v31, 0.0  ;;  %v811_v37 = vmax.f32 %v809_v35, 0.0 }
  0x58   : > { %v812_v38 = vpack.c.bf16 %v810_v36, %v810_v36  ;;  %v813_v39 = vpack.c.bf16 %v811_v37, %v811_v37 }
  0x5a   : > { %v815_v40 = vshrl.u32 %v812_v38, 16  ;;  %v818_v41 = vshll.u32 %v812_v38, 16  ;;  %v823_v43 = vshrl.u32 %v813_v39, 16  ;;  %v826_v32 = vshll.u32 %v813_v39, 16 }
  0x5c   : > { %v817_v42 = vrot.slane %v815_v40, 7  ;;  %v825_v44 = vrot.slane %v823_v43, 7 }
  0x5e   : > { %v820_v48 = vor.u32 %v818_v41, %v817_v42  ;;  %v821_v49 = vrot.slane %v817_v42, 4  ;;  %v828_v0 = vor.u32 %v826_v32, %v825_v44  ;;  %v830_v50 = vrot.slane %v825_v44, 4 }
  0x60   : > { %v835_v51 = vsel %vm4669_vm5, %v820_v48, %v834_v45  ;;  %v829_v52 = vsel %vm4692_vm7, %v821_v49, %v828_v0  ;;  %v839_v33 = vsel %vm4683_vm6, %v830_v50, %v838_v46 }
  0x61   : > { %836 = vst [vmem:[#allocation2] sm:$0xf] %v835_v51 }
  0x62   : > { %837 = vst [vmem:[#allocation2 + $0x4] sm:$0xf] %v829_v52 }
  0x63   : > { %840 = vst [vmem:[#allocation2 + $0x8] sm:$0x1] %v839_v33 }
  0x64 PF: > { %p3599_p6 = scmp.ge.s32.totalorder %s4415_s27, 1 }
  0x66   : > { %844 = sbr.rel (%p3599_p6) target bundleno = 126 (0x7e), region = 52 }
  0x6b   : > { %v845_v34 = vld [vmem:[%s4679_s11] sm:$0xff]  ;;  %v846_v53 = vld [vmem:[%s4679_s11 + $0x8] sm:$0xff]  ;;  %v880_v10 = vld [vmem:[#allocation2 + $0x74] sm:$0x1] }
  0x6c   : > { %v847_v54 = vmul.f32 %v4572_v1, %v845_v34  ;;  %v848_v55 = vmul.f32 %v4572_v1, %v846_v53  ;;  %v876_v9 = vld [vmem:[#allocation2 + $0x6c] sm:$0xf] }
  0x6e   : > { %v849_v57 = vadd.f32 %v4593_v2, %v847_v54  ;;  %v850_v58 = vadd.f32 %v4593_v2, %v848_v55 }
  0x70   : > { %v851_v59 = vmax.f32 %v849_v57, 0.0  ;;  %v852_v61 = vmax.f32 %v850_v58, 0.0 }
  0x72   : > { %v853_v62 = vpack.c.bf16 %v851_v59, %v851_v59  ;;  %v854_v63 = vpack.c.bf16 %v852_v61, %v852_v61 }
  0x74   : > { %v856_v3 = vshrl.u32 %v853_v62, 16  ;;  %v859_v4 = vshll.u32 %v853_v62, 16  ;;  %v864_v5 = vshrl.u32 %v854_v63, 16  ;;  %v867_v6 = vshll.u32 %v854_v63, 16 }
  0x76   : > { %v858_v7 = vrot.slane %v856_v3, 7  ;;  %v866_v8 = vrot.slane %v864_v5, 7 }
  0x78   : > { %v861_v11 = vor.u32 %v859_v4, %v858_v7  ;;  %v862_v12 = vrot.slane %v858_v7, 4  ;;  %v869_v13 = vor.u32 %v867_v6, %v866_v8  ;;  %v871_v1 = vrot.slane %v866_v8, 4 }
  0x7a   : > { %v877_v14 = vsel %vm4669_vm5, %v861_v11, %v876_v9  ;;  %v870_v2 = vsel %vm4692_vm7, %v862_v12, %v869_v13  ;;  %v881_v15 = vsel %vm4683_vm6, %v871_v1, %v880_v10 }
  0x7b   : > { %878 = vst [vmem:[#allocation2 + $0x6c] sm:$0xf] %v877_v14 }
  0x7c   : > { %879 = vst [vmem:[#allocation2 + $0x70] sm:$0xf] %v870_v2 }
  0x7d   : > { %882 = vst [vmem:[#allocation2 + $0x74] sm:$0x1] %v881_v15 }
  0x7e PF: > { %v4164_v16 = vld [vmem:[%s5616_s5 + $0x78] sm:$0xff]  ;;  %v4163_v47 = vld [vmem:[%s5616_s5 + $0x70] sm:$0xff]  ;;  %vm923_vm8 = vsmask.f32 3328  ;;  %v4819_v22 = vld [vmem:[#allocation2 + $0x20] sm:$0x1] }
  0x7f   : > { %4237 = vmatpush.bf16.msra.mxu1 %v4164_v16  ;;  %4238 = vmatpush.bf16.msra.mxu2 %v4164_v16  ;;  %v887_v17 = vld [vmem:[#allocation2 + $0x18] sm:$0xf]  ;;  %v4815_v60 = vld [vmem:[#allocation2 + $0x1c] sm:$0xf]  ;;  %v891_v21 = vld [vmem:[#allocation2 + $0x30] sm:$0xf] }
  0x80   : > { %4239 = vmatpush.bf16.msra.mxu3 %v4164_v16  ;;  %1215 = vmatpush.bf16.msra.mxu0 %v4164_v16  ;;  %v975_v56 = vshrl.u32 %v887_v17, 16  ;;  %v978_v18 = vshll.u32 %v887_v17, 16  ;;  %v984_v19 = vshll.u32 %v4815_v60, 16  ;;  %v988_v20 = vshrl.u32 %v4815_v60, 16  ;;  %v4821_v25 = vld [vmem:[#allocation2 + $0x34] sm:$0xf] }
  0x81   : > { %v4162_v26 = vld [vmem:[%s5616_s5 + $0x68] sm:$0xff]  ;;  %v1023_v29 = vshrl.u32 %v891_v21, 16  ;;  %v4828_v35 = vld [vmem:[#allocation2 + $0x38] sm:$0x1]  ;;  %v1026_v36 = vshll.u32 %v891_v21, 16  ;;  %v1032_v37 = vshll.u32 %v4821_v25, 16 }
  0x82   : > { %v977_v23 = vrot.slane %v975_v56, 4  ;;  %v980_v24 = vrot.slane %v978_v18, 5  ;;  %v4826_v27 = vrot.slane %v984_v19, 5  ;;  %v990_v28 = vrot.slane %v988_v20, 4  ;;  %v895_v30 = vld [vmem:[#allocation2 + $0x48] sm:$0xf] }
  0x83   : > { %4240 = vmatpush.bf16.msra.mxu1 %v4163_v47  ;;  %4241 = vmatpush.bf16.msra.mxu2 %v4163_v47  ;;  %v1036_v38 = vshrl.u32 %v4821_v25, 16  ;;  %v994_v40 = vshll.u32 %v4819_v22, 16  ;;  %v1025_v41 = vrot.slane %v1023_v29, 4  ;;  %v896_v43 = vld [vmem:[#allocation2 + $0x4c] sm:$0xf]  ;;  %v1071_v32 = vshrl.u32 %v895_v30, 16 }
  0x84   : > { %4242 = vmatpush.bf16.msra.mxu3 %v4163_v47  ;;  %1216 = vmatpush.bf16.msra.mxu0 %v4163_v47  ;;  %v981_v31 = vor.u32 %v980_v24, %v977_v23  ;;  %v991_v39 = vor.u32 %v990_v28, %v4826_v27  ;;  %vm924_vm9 = vsmask.f32 7440  ;;  %v1028_v42 = vrot.slane %v1026_v36, 5  ;;  %v4161_v46 = vld [vmem:[%s5616_s5 + $0x60] sm:$0xff]  ;;  %v921_v33 = vld [vmem:[#allocation2 + $0x50] sm:$0x1] }
  0x85   : > { %v4834_v44 = vrot.slane %v1032_v37, 5  ;;  %v1038_v45 = vrot.slane %v1036_v38, 4  ;;  %v1042_v48 = vshll.u32 %v4828_v35, 16  ;;  %v1073_v49 = vrot.slane %v1071_v32, 4  ;;  %v883_v53 = vld [vmem:[#allocation2] sm:$0xf]  ;;  %vm4843_vm10 = vmor %vm923_vm8, %vm924_vm9 }
  0x86   : > { %v1074_v0 = vshll.u32 %v895_v30, 16  ;;  %v982_v50 = vrot.slane %v981_v31, 4  ;;  %v1029_v51 = vor.u32 %v1028_v42, %v1025_v41  ;;  %v1080_v34 = vshll.u32 %v896_v43, 16  ;;  %v4160_v63 = vld [vmem:[%s5616_s5 + $0x58] sm:$0xff]  ;;  %v4850_v6 = vld [vmem:[#allocation2 + $0x4] sm:$0xf] }
  0x87   : > { %4243 = vmatpush.bf16.msra.mxu1 %v4162_v26  ;;  %4244 = vmatpush.bf16.msra.mxu2 %v4162_v26  ;;  %v1039_v52 = vor.u32 %v1038_v45, %v4834_v44  ;;  %v992_v55 = vrot.slane %v991_v39, 4  ;;  %v996_v57 = vrot.slane %v994_v40, 5  ;;  %v1084_v59 = vshrl.u32 %v896_v43, 16  ;;  %v4857_v14 = vld [vmem:[#allocation2 + $0x8] sm:$0x1]  ;;  %v4159_v56 = vld [vmem:[%s5616_s5 + $0x50] sm:$0xff] }
  0x88   : > { %4245 = vmatpush.bf16.msra.mxu3 %v4162_v26  ;;  %1217 = vmatpush.bf16.msra.mxu0 %v4162_v26  ;;  %v1076_v58 = vrot.slane %v1074_v0, 5  ;;  %v1030_v61 = vrot.slane %v1029_v51, 4  ;;  %v1082_v62 = vrot.slane %v1080_v34, 5  ;;  %v1090_v5 = vshll.u32 %v921_v33, 16  ;;  %v889_v17 = vld [vmem:[#allocation2 + $0x24] sm:$0xf] }
  0x89   : > { %v1086_v4 = vrot.slane %v1084_v59, 4  ;;  %v927_v7 = vshrl.u32 %v883_v53, 16  ;;  %v987_v8 = vsel %vm4843_vm10, %v982_v50, %v4826_v27  ;;  %v1040_v9 = vrot.slane %v1039_v52, 4  ;;  %v4869_v23 = vld [vmem:[#allocation2 + $0x28] sm:$0xf]  ;;  %s4137_s19 = sshll.u32 %s4419_s28, 1 }
  0x8a   : > { %v1077_v3 = vor.u32 %v1076_v58, %v1073_v49  ;;  %v1044_v10 = vrot.slane %v1042_v48, 5  ;;  %v930_v11 = vshll.u32 %v883_v53, 16  ;;  %v997_v12 = vsel %vm4843_vm10, %v992_v55, %v996_v57  ;;  %v893_v41 = vld [vmem:[#allocation2 + $0x3c] sm:$0xf]  ;;  %v4158_v43 = vld [vmem:[%s5616_s5 + $0x48] sm:$0xff]  ;;  %s3401_s10 = sadd.s32 %s4415_s27, %s4137_s19  ;;  %s3405_s28 = sshll.u32 %s399_s13, 4  ;;  %s3406_s28 = int_to_ptr.vmem [resolvable:$true] %s3405_s28 }
  0x8b   : > { %4246 = vmatpush.bf16.msra.mxu1 %v4161_v46  ;;  %4247 = vmatpush.bf16.msra.mxu2 %v4161_v46  ;;  %v1087_v1 = vor.u32 %v1086_v4, %v1082_v62  ;;  %v1092_v2 = vrot.slane %v1090_v5, 5  ;;  %v929_v15 = vrot.slane %v927_v7, 4  ;;  %v936_v47 = vshll.u32 %v4850_v6, 16  ;;  %v4893_v53 = vld [vmem:[#allocation2 + $0x2c] sm:$0x1]  ;;  %s4138_s16 = sshll.u32 %s3401_s10, 1 }
  0x8c   : > { %4248 = vmatpush.bf16.msra.mxu3 %v4161_v46  ;;  %1218 = vmatpush.bf16.msra.mxu0 %v4161_v46  ;;  %v1078_v13 = vrot.slane %v1077_v3, 4  ;;  %v932_v16 = vrot.slane %v930_v11, 5  ;;  %v4863_v18 = vunpack.c.l.b16 %v987_v8  ;;  %v1035_v19 = vsel %vm4843_vm10, %v1030_v61, %v4834_v44  ;;  %v4883_v46 = vld [vmem:[#allocation2 + $0x40] sm:$0xf]  ;;  %v897_v5 = vld [vmem:[#allocation2 + $0x54] sm:$0xf] }
  0x8d   : > { %v1088_v20 = vrot.slane %v1087_v1, 4  ;;  %v940_v21 = vshrl.u32 %v4850_v6, 16  ;;  %v1045_v24 = vsel %vm4843_vm10, %v1040_v9, %v1044_v10  ;;  %v938_v27 = vrot.slane %v936_v47, 5  ;;  %v4157_v61 = vld [vmem:[%s5616_s5 + $0x40] sm:$0xff]  ;;  %v4172_v1 = vld [vmem:[%s5616_s5 + $0xb8] sm:$0xff]  ;;  %s5644_s21 = sand.u32 1, %s4407_s25  }
  0x8e   : > { %v933_v26 = vor.u32 %v932_v16, %v929_v15  ;;  %v946_v28 = vshll.u32 %v4857_v14, 16  ;;  %v1083_v29 = vsel %vm4843_vm10, %v1078_v13, %v1082_v62  ;;  %v999_v31 = vshrl.u32 %v889_v17, 16  ;;  %v4902_v8 = vld [vmem:[#allocation2 + $0x44] sm:$0x1]  ;;  %v4914_v47 = vld [vmem:[#allocation2 + $0x58] sm:$0xf] }
  0x8f   : > { %4249 = vmatpush.bf16.msra.mxu1 %v4160_v63  ;;  %4250 = vmatpush.bf16.msra.mxu2 %v4160_v63  ;;  %v942_v30 = vrot.slane %v940_v21, 4  ;;  %v1002_v36 = vshll.u32 %v889_v17, 16  ;;  %v1093_v37 = vsel %vm4843_vm10, %v1088_v20, %v1092_v2  ;;  %v1008_v40 = vshll.u32 %v4869_v23, 16  ;;  %v4156_v2 = vld [vmem:[%s5616_s5 + $0x38] sm:$0xff]  ;;  %s3387_s20 = scalar_lea.sflag [#allocation4], %s5644_s21  ;;  %s4357_s11 = scalar_lea.hbm %s5618_s7, 8 }
  0x90   : > { %4251 = vmatpush.bf16.msra.mxu3 %v4160_v63  ;;  %1219 = vmatpush.bf16.msra.mxu0 %v4160_v63  ;;  %v934_v38 = vrot.slane %v933_v26, 4  ;;  %v948_v39 = vrot.slane %v946_v28, 5  ;;  %v1001_v42 = vrot.slane %v999_v31, 4  ;;  %v1012_v45 = vshrl.u32 %v4869_v23, 16  ;;  %v885_v28 = vld [vmem:[#allocation2 + $0xc] sm:$0xf] }
  0x91   : > { %v943_v32 = vor.u32 %v942_v30, %v938_v27  ;;  %v1004_v44 = vrot.slane %v1002_v36, 5  ;;  %v1140_v48 = vunpack.c.l.b16 %v997_v12  ;;  %v1143_v49 = vunpack.c.l.b16 %v1035_v19  ;;  %v4919_v19 = vld [vmem:[#allocation2 + $0x5c] sm:$0x1] }
  0x92   : > { %v1144_v0 = vunpack.c.l.b16 %v1045_v24  ;;  %v939_v50 = vsel %vm4843_vm10, %v934_v38, %v938_v27  ;;  %v4887_v51 = vunpack.c.l.b16 %v1083_v29  ;;  %v4889_v52 = vunpack.c.l.b16 %v1093_v37  ;;  %v4188_v29 = vld [vmem:[%s5616_s5 + $0xf8] sm:$0xff]  ;;  %v4171_v38 = vld [vmem:[%s5616_s5 + $0xb0] sm:$0xff] }
  0x93   : > { %4252 = vmatpush.bf16.msra.mxu1 %v4159_v56  ;;  %4253 = vmatpush.bf16.msra.mxu2 %v4159_v56  ;;  %v944_v33 = vrot.slane %v943_v32, 4  ;;  %v4891_v34 = vrot.slane %v1008_v40, 5  ;;  %v1014_v55 = vrot.slane %v1012_v45, 4  ;;  %v1047_v57 = vshrl.u32 %v893_v41, 16  ;;  %v4196_v30 = vld [vmem:[%s5616_s5 + $0x138] sm:$0xff] }
  0x94   : > { %4254 = vmatpush.bf16.msra.mxu3 %v4159_v56  ;;  %1220 = vmatpush.bf16.msra.mxu0 %v4159_v56  ;;  %v1050_v58 = vshll.u32 %v893_v41, 16  ;;  %v1056_v59 = vshll.u32 %v4883_v46, 16  ;;  %v1135_v63 = vunpack.c.l.b16 %v939_v50  ;;  %v1005_v3 = vor.u32 %v1004_v44, %v1001_v42 }
  0x95   : > { %v949_v62 = vsel %vm4843_vm10, %v944_v33, %v948_v39  ;;  %v1060_v4 = vshrl.u32 %v4883_v46, 16  ;;  %v1049_v9 = vrot.slane %v1047_v57, 4  ;;  %v1153_v12 = vpack.c.b16 %v1140_v48, %v4863_v18  ;;  %v4155_v39 = vld [vmem:[%s5616_s5 + $0x30] sm:$0xff] }
  0x96   : > { %v1136_v7 = vunpack.c.l.b16 %v949_v62  ;;  %v1052_v10 = vrot.slane %v1050_v58, 5  ;;  %v4904_v11 = vrot.slane %v1056_v59, 5  ;;  %v1155_v13 = vpack.c.b16 %v1144_v0, %v1143_v49  ;;  %v4938_v48 = vld [vmem:[#allocation2 + $0x10] sm:$0xf]  ;;  %v4940_v33 = vld [vmem:[#allocation2 + $0x14] sm:$0x1] }
  0x97   : > { %4255 = vmatpush.bf16.msra.mxu1 %v4158_v43  ;;  %4256 = vmatpush.bf16.msra.mxu2 %v4158_v43  ;;  %v1018_v15 = vshll.u32 %v4893_v53, 16  ;;  %v1062_v16 = vrot.slane %v1060_v4, 4  ;;  %v1157_v17 = vpack.c.b16 %v4889_v52, %v4887_v51  ;;  %v1015_v56 = vor.u32 %v1014_v55, %v4891_v34  ;;  %v4187_v55 = vld [vmem:[%s5616_s5 + $0xf0] sm:$0xff] }
  0x98   : > { %4257 = vmatpush.bf16.msra.mxu3 %v4158_v43  ;;  %1221 = vmatpush.bf16.msra.mxu0 %v4158_v43  ;;  %v1053_v18 = vor.u32 %v1052_v10, %v1049_v9  ;;  %v1095_v20 = vshrl.u32 %v897_v5, 16  ;;  %v1151_v21 = vpack.c.b16 %v1136_v7, %v1135_v63  ;;  %v1066_v26 = vshll.u32 %v4902_v8, 16  ;;  %v4195_v57 = vld [vmem:[%s5616_s5 + $0x130] sm:$0xff]  ;;  %v4170_v63 = vld [vmem:[%s5616_s5 + $0xa8] sm:$0xff] }
  0x99   : > { %v1063_v24 = vor.u32 %v1062_v16, %v4904_v11  ;;  %v1098_v27 = vshll.u32 %v897_v5, 16  ;;  %v1006_v31 = vrot.slane %v1005_v3, 4  ;;  %v1104_v37 = vshll.u32 %v4914_v47, 16  ;;  %v4154_v3 = vld [vmem:[%s5616_s5 + $0x28] sm:$0xff] }
  0x9a   : > { %v1097_v36 = vrot.slane %v1095_v20, 4  ;;  %v1020_v40 = vrot.slane %v1018_v15, 5  ;;  %v1108_v43 = vshrl.u32 %v4914_v47, 16  ;;  %v1114_v32 = vshll.u32 %v4919_v19, 16 }
  0x9b   : > { %4258 = vmatpush.bf16.msra.mxu1 %v4157_v61  ;;  %4259 = vmatpush.bf16.msra.mxu2 %v4157_v61  ;;  %v1100_v41 = vrot.slane %v1098_v27, 5  ;;  %v1016_v42 = vrot.slane %v1015_v56, 4  ;;  %v1054_v44 = vrot.slane %v1053_v18, 4  ;;  %v1106_v45 = vrot.slane %v1104_v37, 5  ;;  %v4186_v56 = vld [vmem:[%s5616_s5 + $0xe8] sm:$0xff] }
  0x9c   : > { %4260 = vmatpush.bf16.msra.mxu3 %v4157_v61  ;;  %1222 = vmatpush.bf16.msra.mxu0 %v4157_v61  ;;  %v951_v49 = vshrl.u32 %v885_v28, 16  ;;  %v1064_v0 = vrot.slane %v1063_v24, 4  ;;  %v1068_v50 = vrot.slane %v1066_v26, 5  ;;  %v1110_v52 = vrot.slane %v1108_v43, 4  ;;  %v4169_v24 = vld [vmem:[%s5616_s5 + $0xa0] sm:$0xff] }
  0x9d   : > { %v1101_v51 = vor.u32 %v1100_v41, %v1097_v36  ;;  %v1011_v58 = vsel %vm4843_vm10, %v1006_v31, %v4891_v34  ;;  %v1116_v59 = vrot.slane %v1114_v32, 5  ;;  %v954_v62 = vshll.u32 %v885_v28, 16  ;;  %v4153_v26 = vld [vmem:[%s5616_s5 + $0x20] sm:$0xff]  ;;  %v4983_v43 = vld [vmem:[#allocation2 + $0x10] sm:$0xf] }
  0x9e   : > { %1233 = vmatmul.bf16.vlgmr.msra.gmra.mxu1 %v1153_v12  ;;  %1243 = vmatmul.bf16.vlgmr.msra.gmra.mxu2 %v1155_v13  ;;  %v953_v61 = vrot.slane %v951_v49, 4  ;;  %v1111_v5 = vor.u32 %v1110_v52, %v1106_v45  ;;  %v960_v7 = vshll.u32 %v4938_v48, 16  ;;  %v964_v9 = vshrl.u32 %v4938_v48, 16 }
  0x9f   : > { %1589 = vmatpush.bf16.msrb.mxu2 %v4172_v1  ;;  %1360 = vmatpush.bf16.msrb.mxu1 %v4156_v2  ;;  %v1102_v4 = vrot.slane %v1101_v51, 4  ;;  %v1021_v34 = vsel %vm4843_vm10, %v1016_v42, %v1020_v40  ;;  %v1059_v10 = vsel %vm4843_vm10, %v1054_v44, %v4904_v11  ;;  %v956_v12 = vrot.slane %v954_v62, 5  ;;  %v4194_v11 = vld [vmem:[%s5616_s5 + $0x128] sm:$0xff]  ;;  %v4185_v42 = vld [vmem:[%s5616_s5 + $0xe0] sm:$0xff]  ;;  %v4152_v51 = vld [vmem:[%s5616_s5 + $0x18] sm:$0xff] }
  0xa0   : > { %1253 = vmatmul.bf16.vlgmr.msra.gmra.mxu3 %v1157_v17  ;;  %1223 = vmatmul.bf16.vlgmr.msra.gmra.mxu0 %v1151_v21  ;;  %v970_v13 = vshll.u32 %v4940_v33, 16  ;;  %v1069_v1 = vsel %vm4843_vm10, %v1064_v0, %v1068_v50  ;;  %v1112_v2 = vrot.slane %v1111_v5, 4  ;;  %v962_v15 = vrot.slane %v960_v7, 5  ;;  %v1848_v17 = vld [vmem:[#allocation2 + $0xc] sm:$0xf]  ;;  %v4193_v44 = vld [vmem:[%s5616_s5 + $0x120] sm:$0xff] }
  0xa1   : > { %1783 = vmatpush.bf16.msrb.mxu3 %v4188_v29  ;;  %2161 = vmatpush.bf16.msrb.mxu0 %v4196_v30  ;;  %v966_v16 = vrot.slane %v964_v9, 4  ;;  %v1141_v18 = vunpack.c.l.b16 %v1011_v58  ;;  %v1107_v20 = vsel %vm4843_vm10, %v1102_v4, %v1106_v45  ;;  %v957_v21 = vor.u32 %v956_v12, %v953_v61  ;;  %v4168_v50 = vld [vmem:[%s5616_s5 + $0x98] sm:$0xff] }
  0xa2   : > { %v1142_v27 = vunpack.c.l.b16 %v1021_v34  ;;  %v1117_v28 = vsel %vm4843_vm10, %v1112_v2, %v1116_v59  ;;  %v972_v30 = vrot.slane %v970_v13, 5  ;;  %v1145_v31 = vunpack.c.l.b16 %v1059_v10  ;;  %v4184_v4 = vld [vmem:[%s5616_s5 + $0xd8] sm:$0xff]  ;;  %v1409_v10 = vld [vmem:[#allocation2] sm:$0xe]  ;;  %v4167_v2 = vld [vmem:[%s5616_s5 + $0x90] sm:$0xff] }
  0xa3   : > { %1590 = vmatpush.bf16.msrb.mxu2 %v4171_v38  ;;  %1361 = vmatpush.bf16.msrb.mxu1 %v4155_v39  ;;  %v967_v29 = vor.u32 %v966_v16, %v962_v15  ;;  %v1146_v36 = vunpack.c.l.b16 %v1069_v1  ;;  %v958_v37 = vrot.slane %v957_v21, 4  ;;  %v1873_v38 = vshrl.u32 %v1848_v17, 16  ;;  %v4192_v34 = vld [vmem:[%s5616_s5 + $0x118] sm:$0xff]  ;;  %v4183_v16 = vld [vmem:[%s5616_s5 + $0xd0] sm:$0xff] }
  0xa4   : > { %v1149_v39 = vunpack.c.l.b16 %v1107_v20  ;;  %v1150_v40 = vunpack.c.l.b16 %v1117_v28  ;;  %v1876_v32 = vshll.u32 %v1848_v17, 16  ;;  %v1154_v0 = vpack.c.b16 %v1142_v27, %v1141_v18  ;;  %v4191_v18 = vld [vmem:[%s5616_s5 + $0x110] sm:$0xff]  ;;  %v1851_v27 = vld [vmem:[#allocation2 + $0x18] sm:$0xf]  ;;  %v4150_v28 = vld [vmem:[%s5616_s5 + $0x8] sm:$0xff] }
  0xa5   : > { %1784 = vmatpush.bf16.msrb.mxu3 %v4187_v55  ;;  %2162 = vmatpush.bf16.msrb.mxu0 %v4195_v57  ;;  %v968_v41 = vrot.slane %v967_v29, 4  ;;  %v963_v45 = vsel %vm4843_vm10, %v958_v37, %v962_v15  ;;  %v1875_v49 = vrot.slane %v1873_v38, 4  ;;  %v5001_v57 = vld [vmem:[#allocation2 + $0x14] sm:$0x1]  ;;  %v1156_v59 = vpack.c.b16 %v1146_v36, %v1145_v31  ;;  %v5036_v29 = vld [vmem:[#allocation2 + $0x1c] sm:$0xf] }
  0xa6   : > { %v1137_v55 = vunpack.c.l.b16 %v963_v45  ;;  %v1878_v58 = vrot.slane %v1876_v32, 5  ;;  %v1882_v62 = vshll.u32 %v4983_v43, 16  ;;  %v1438_v5 = vrot.slane %v4850_v6, 5  ;;  %v4151_v6 = vld [vmem:[%s5616_s5 + $0x10] sm:$0xff]  ;;  %v4182_v38 = vld [vmem:[%s5616_s5 + $0xc8] sm:$0xff]  ;;  %v4149_v45 = vld [vmem:[%s5616_s5] sm:$0xff] }
  0xa7   : > { %1591 = vmatpush.bf16.msrb.mxu2 %v4170_v63  ;;  %1362 = vmatpush.bf16.msrb.mxu1 %v4154_v3  ;;  %v973_v52 = vsel %vm4843_vm10, %v968_v41, %v972_v30  ;;  %v1886_v63 = vshrl.u32 %v4983_v43, 16  ;;  %v1158_v3 = vpack.c.b16 %v1150_v40, %v1149_v39  ;;  %v1892_v1 = vshll.u32 %v5001_v57, 16  ;;  %v4190_v39 = vld [vmem:[%s5616_s5 + $0x108] sm:$0xff] }
  0xa8   : > { %v1138_v61 = vunpack.c.l.b16 %v973_v52  ;;  %v1879_v7 = vor.u32 %v1878_v58, %v1875_v49  ;;  %v1884_v12 = vrot.slane %v1882_v62, 5  ;;  %vm1433_vm11 = vcmask 1042432   ;;  %v1411_v62 = vld [vmem:[#allocation2 + $0x18] sm:$0xe] }
  0xa9   : > { %1785 = vmatpush.bf16.msrb.mxu3 %v4186_v56  ;;  %2163 = vmatpush.bf16.msrb.mxu0 %v4194_v11  ;;  %v1888_v13 = vrot.slane %v1886_v63, 4  ;;  %vm1434_vm12 = vcmask 1046532   ;;  %v3712_v17 = vrot.slane %v1409_v10, 9  ;;  %v1440_v56 = vrot.slane %v1438_v5, 4  ;;  %v4181_v63 = vld [vmem:[%s5616_s5 + $0xc0] sm:$0xff] }
  0xaa   : > { %v1152_v9 = vpack.c.b16 %v1138_v61, %v1137_v55  ;;  %v1441_v11 = vrot.slane %v4857_v14, 5  ;;  %vm5026_vm13 = vmor %vm1433_vm11, %vm1434_vm12  ;;  %v1880_v21 = vrot.slane %v1879_v7, 4  ;;  %v4166_v14 = vld [vmem:[%s5616_s5 + $0x88] sm:$0xff]  ;;  %v1897_v36 = vshrl.u32 %v1851_v27, 16  ;;  %v5081_v10 = vld [vmem:[#allocation2 + $0x20] sm:$0x1] }
  0xab   : > { %1592 = vmatpush.bf16.msrb.mxu2 %v4169_v24  ;;  %1363 = vmatpush.bf16.msrb.mxu1 %v4153_v26  ;;  %v1889_v15 = vor.u32 %v1888_v13, %v1884_v12  ;;  %v1894_v26 = vrot.slane %v1892_v1, 5  ;;  %v1439_v30 = vsel %vm5026_vm13, %v3712_v17, %v1438_v5  ;;  %v1900_v37 = vshll.u32 %v1851_v27, 16  ;;  %v4141_v13 = vld [vmem:[#allocation2] sm:$0xff]  ;;  %v1410_v17 = vld [vmem:[#allocation2 + $0xc] sm:$0xe]  ;;  %v4227_v27 = vld [vmem:[%s5616_s5 + $0x1f0] sm:$0xff] }
  0xac   : > { %v1442_v31 = vsel %vm5026_vm13, %v1440_v56, %v1441_v11  ;;  %v1885_v40 = vsel %vm4843_vm10, %v1880_v21, %v1884_v12  ;;  %v1906_v32 = vshll.u32 %v5036_v29, 16  ;;  %v1509_v49 = vunpack.c.l.b16 %v1439_v30 }
  0xad   : > { %1786 = vmatpush.bf16.msrb.mxu3 %v4185_v42  ;;  %2164 = vmatpush.bf16.msrb.mxu0 %v4193_v44  ;;  %v1890_v24 = vrot.slane %v1889_v15, 4  ;;  %v1910_v42 = vshrl.u32 %v5036_v29, 16  ;;  %v4165_v44 = vld [vmem:[%s5616_s5 + $0x80] sm:$0xff]  ;;  %v1452_v52 = vrot.slane %v4815_v60, 5  ;;  %v2081_v55 = vunpack.c.l.b16 %v1885_v40  ;;  %v4173_v15 = vld [vmem:[#allocation2 + $0xc] sm:$0xff] }
  0xae   : > { %1238 = vmatmul.bf16.gmra.mxu1 %v1154_v0  ;;  %1248 = vmatmul.bf16.gmra.mxu2 %v1156_v59  ;;  %v1510_v0 = vunpack.c.l.b16 %v1442_v31  ;;  %v1899_v59 = vrot.slane %v1897_v36, 4  ;;  %v1902_v61 = vrot.slane %v1900_v37, 5  ;;  %v3714_v7 = vrot.slane %v1411_v62, 9  ;;  %v1854_v37 = vld [vmem:[#allocation2 + $0x24] sm:$0xf] }
  0xaf   : > { %1593 = vmatpush.bf16.msrb.mxu2 %v4168_v50  ;;  %1364 = vmatpush.bf16.msrb.mxu1 %v4152_v51  ;;  %v1895_v41 = vsel %vm4843_vm10, %v1890_v24, %v1894_v26  ;;  %v4220_v50 = vld [vmem:[%s5616_s5 + $0x1b8] sm:$0xff]  ;;  %v1912_v5 = vrot.slane %v1910_v42, 4  ;;  %v1454_v60 = vrot.slane %v1452_v52, 4  ;;  %v1455_v12 = vrot.slane %v4819_v22, 5  ;;  %v4219_v22 = vld [vmem:[%s5616_s5 + $0x1b0] sm:$0xff] }
  0xb0   : > { %1258 = vmatmul.bf16.gmra.mxu3 %v1158_v3  ;;  %1228 = vmatmul.bf16.gmra.mxu0 %v1152_v9  ;;  %v4204_v51 = vld [vmem:[%s5616_s5 + $0x178] sm:$0xff]  ;;  %v2082_v58 = vunpack.c.l.b16 %v1895_v41  ;;  %v4189_v3 = vld [vmem:[%s5616_s5 + $0x100] sm:$0xff]  ;;  %v1525_v1 = vpack.c.b16 %v1510_v0, %v1509_v49  ;;  %v4203_v24 = vld [vmem:[%s5616_s5 + $0x170] sm:$0xff]  ;;  %v1448_v31 = vrot.slane %v4940_v33, 5  ;;  %v1921_v42 = vshrl.u32 %v1854_v37, 16 }
  0xb1   : > { %1787 = vmatpush.bf16.msrb.mxu3 %v4184_v4  ;;  %2165 = vmatpush.bf16.msrb.mxu0 %v4192_v34  ;;  %v5073_v4 = vrot.slane %v1906_v32, 5  ;;  %v4228_v9 = vld [vmem:[%s5616_s5 + $0x1f8] sm:$0xff]  ;;  %v1456_v56 = vsel %vm5026_vm13, %v1454_v60, %v1455_v12  ;;  %v4218_v32 = vld [vmem:[%s5616_s5 + $0x1a8] sm:$0xff] }
  0xb2   : > { %v4236_v34 = vld [vmem:[%s5616_s5 + $0x238] sm:$0xff]  ;;  %v1514_v26 = vunpack.c.l.b16 %v1456_v56  ;;  %v4202_v33 = vld [vmem:[%s5616_s5 + $0x168] sm:$0xff]  ;;  %v1923_v62 = vrot.slane %v1921_v42, 4 }
  0xb3   : > { %1594 = vmatpush.bf16.msrb.mxu2 %v4167_v2  ;;  %1365 = vmatpush.bf16.msrb.mxu1 %v4151_v6  ;;  %v1445_v2 = vrot.slane %v4938_v48, 5  ;;  %v1453_v6 = vsel %vm5026_vm13, %v3714_v7, %v1452_v52  ;;  %v1913_v21 = vor.u32 %v1912_v5, %v5073_v4  ;;  %v1916_v48 = vshll.u32 %v5081_v10, 16  ;;  %v4234_v49 = vld [vmem:[%s5616_s5 + $0x228] sm:$0xff] }
  0xb4   : > { %v1513_v11 = vunpack.c.l.b16 %v1453_v6  ;;  %v1459_v7 = vrot.slane %v4869_v23, 5 }
  0xb5   : > { %1788 = vmatpush.bf16.msrb.mxu3 %v4183_v16  ;;  %2166 = vmatpush.bf16.msrb.mxu0 %v4191_v18  ;;  %v2097_v16 = vpack.c.b16 %v2082_v58, %v2081_v55  ;;  %v1903_v18 = vor.u32 %v1902_v61, %v1899_v59  ;;  %v1447_v30 = vrot.slane %v1445_v2, 4  ;;  %v1914_v40 = vrot.slane %v1913_v21, 4 }
  0xb6   : > { %v5104_v36 = vpack.c.b16 %v1514_v26, %v1513_v11  ;;  %v1918_v41 = vrot.slane %v1916_v48, 5  ;;  %v4174_v11 = vld [vmem:[#allocation2 + $0x18] sm:$0xff] }
  0xb7   : > { %1595 = vmatpush.bf16.msrb.mxu2 %v4166_v14  ;;  %1366 = vmatpush.bf16.msrb.mxu1 %v4150_v28  ;;  %v4235_v14 = vld [vmem:[%s5616_s5 + $0x230] sm:$0xff]  ;;  %v3713_v28 = vrot.slane %v1410_v17, 9 }
  0xb8   : > { %v1919_v58 = vsel %vm4843_vm10, %v1914_v40, %v1918_v41 }
  0xb9   : > { %1789 = vmatpush.bf16.msrb.mxu3 %v4182_v38  ;;  %2167 = vmatpush.bf16.msrb.mxu0 %v4190_v39  ;;  %v5106_v38 = vld [vmem:[#allocation2 + $0x28] sm:$0xf]  ;;  %v1904_v39 = vrot.slane %v1903_v18, 4  ;;  %v1446_v0 = vsel %vm5026_vm13, %v3713_v28, %v1445_v2  ;;  %v4201_v28 = vld [vmem:[%s5616_s5 + $0x160] sm:$0xff] }
  0xba   : > { %v1934_v52 = vshrl.u32 %v5106_v38, 16  ;;  %v1511_v59 = vunpack.c.l.b16 %v1446_v0 }
  0xbb   : > { %1596 = vmatpush.bf16.msrb.mxu2 %v4165_v44  ;;  %1367 = vmatpush.bf16.msrb.mxu1 %v4149_v45  ;;  %v1924_v44 = vshll.u32 %v1854_v37, 16  ;;  %v4226_v45 = vld [vmem:[%s5616_s5 + $0x1e8] sm:$0xff]  ;;  %v1909_v55 = vsel %vm4843_vm10, %v1904_v39, %v5073_v4  ;;  %v1412_v4 = vld [vmem:[#allocation2 + $0x24] sm:$0xe] }
  0xbc   : > { %v1936_v5 = vrot.slane %v1934_v52, 4  ;;  %v2083_v60 = vunpack.c.l.b16 %v1909_v55  ;;  %v3715_v12 = vrot.slane %v1412_v4, 9  ;;  %v4233_v37 = vld [vmem:[%s5616_s5 + $0x220] sm:$0xff]  ;;  %v5162_v52 = vld [vmem:[#allocation2 + $0x38] sm:$0x1] }
  0xbd   : > { %1790 = vmatpush.bf16.msrb.mxu3 %v4181_v63  ;;  %2168 = vmatpush.bf16.msrb.mxu0 %v4189_v3  ;;  %v1926_v63 = vrot.slane %v1924_v44, 5  ;;  %v4143_v55 = vld [vmem:[#allocation2 + $0x18] sm:$0xff] }
  0xbe   : > { %1368 = vmatmul.bf16.vlgmr.msrb.gmra.mxu1 %v4141_v13  ;;  %1597 = vmatmul.bf16.vlgmr.msrb.gmra.mxu2 %v1525_v1  ;;  %v1461_v13 = vrot.slane %v1459_v7, 4  ;;  %v1462_v1 = vrot.slane %v4893_v53, 5  ;;  %v1460_v56 = vsel %vm5026_vm13, %v3715_v12, %v1459_v7  ;;  %v4200_v4 = vld [vmem:[%s5616_s5 + $0x158] sm:$0xff] }
  0xbf   : > { %2606 = vmatpush.bf16.msra.mxu2 %v4220_v50  ;;  %2411 = vmatpush.bf16.msra.mxu1 %v4204_v51  ;;  %v1449_v50 = vsel %vm5026_vm13, %v1447_v30, %v1448_v31  ;;  %v1930_v51 = vshll.u32 %v5106_v38, 16  ;;  %v1927_v6 = vor.u32 %v1926_v63, %v1923_v62  ;;  %v1515_v18 = vunpack.c.l.b16 %v1460_v56  ;;  %v1857_v30 = vld [vmem:[#allocation2 + $0x30] sm:$0xf]  ;;  %v5151_v31 = vld [vmem:[#allocation2 + $0x34] sm:$0xf] }
  0xc0   : > { %1791 = vmatmul.bf16.vlgmr.msrb.gmra.mxu3 %v4173_v15  ;;  %2169 = vmatmul.bf16.vlgmr.msrb.gmra.mxu0 %v2097_v16  ;;  %v1512_v61 = vunpack.c.l.b16 %v1449_v50  ;;  %v4142_v15 = vld [vmem:[#allocation2 + $0xc] sm:$0xff]  ;;  %v1463_v23 = vsel %vm5026_vm13, %v1461_v13, %v1462_v1  ;;  %v1945_v41 = vshrl.u32 %v1857_v30, 16  ;;  %v1958_v42 = vshrl.u32 %v5151_v31, 16  ;;  %v1860_v12 = vld [vmem:[#allocation2 + $0x3c] sm:$0xf] }
  0xc1   : > { %2984 = vmatpush.bf16.msra.mxu3 %v4228_v9  ;;  %3234 = vmatpush.bf16.msra.mxu0 %v4236_v34  ;;  %v1932_v3 = vrot.slane %v1930_v51, 5  ;;  %v2084_v9 = vunpack.c.l.b16 %v1919_v58  ;;  %v5132_v34 = vld [vmem:[#allocation2 + $0x2c] sm:$0x1]  ;;  %v1516_v21 = vunpack.c.l.b16 %v1463_v23  ;;  %v1928_v53 = vrot.slane %v1927_v6, 4  ;;  %v4175_v58 = vld [vmem:[#allocation2 + $0x24] sm:$0xff] }
  0xc2   : > { %v1526_v2 = vpack.c.b16 %v1512_v61, %v1511_v59  ;;  %v1940_v17 = vshll.u32 %v5132_v34, 16  ;;  %v1960_v51 = vrot.slane %v1958_v42, 4  ;;  %v1964_v63 = vshll.u32 %v5162_v52, 16  ;;  %v5178_v13 = vld [vmem:[#allocation2 + $0x40] sm:$0xf] }
  0xc3   : > { %2607 = vmatpush.bf16.msra.mxu2 %v4219_v22  ;;  %2412 = vmatpush.bf16.msra.mxu1 %v4203_v24  ;;  %v1937_v16 = vor.u32 %v1936_v5, %v1932_v3  ;;  %v2098_v22 = vpack.c.b16 %v2084_v9, %v2083_v60  ;;  %v5140_v48 = vpack.c.b16 %v1516_v21, %v1515_v18  ;;  %v4216_v60 = vld [vmem:[%s5616_s5 + $0x198] sm:$0xff]  ;;  %v1969_v6 = vshrl.u32 %v1860_v12, 16  ;;  %v5192_v42 = vld [vmem:[#allocation2 + $0x4c] sm:$0xf] }
  0xc4   : > { %v1942_v26 = vrot.slane %v1940_v17, 5  ;;  %v1933_v39 = vsel %vm4843_vm10, %v1928_v53, %v1932_v3  ;;  %v1966_v7 = vrot.slane %v1964_v63, 5  ;;  %v4224_v9 = vld [vmem:[%s5616_s5 + $0x1d8] sm:$0xff]  ;;  %v1982_v17 = vshrl.u32 %v5178_v13, 16 }
  0xc5   : > { %2985 = vmatpush.bf16.msra.mxu3 %v4227_v27  ;;  %3235 = vmatpush.bf16.msra.mxu0 %v4235_v14  ;;  %v1938_v24 = vrot.slane %v1937_v16, 4  ;;  %v4217_v27 = vld [vmem:[%s5616_s5 + $0x1a0] sm:$0xff]  ;;  %v2085_v44 = vunpack.c.l.b16 %v1933_v39  ;;  %v1978_v16 = vshll.u32 %v5178_v13, 16  ;;  %v1466_v53 = vrot.slane %v4821_v25, 5  ;;  %v4215_v25 = vld [vmem:[%s5616_s5 + $0x190] sm:$0xff] }
  0xc6   : > { %v4225_v14 = vld [vmem:[%s5616_s5 + $0x1e0] sm:$0xff]  ;;  %v1984_v21 = vrot.slane %v1982_v17, 4 }
  0xc7   : > { %2608 = vmatpush.bf16.msra.mxu2 %v4218_v32  ;;  %2413 = vmatpush.bf16.msra.mxu1 %v4202_v33  ;;  %v1943_v40 = vsel %vm4843_vm10, %v1938_v24, %v1942_v26  ;;  %v1948_v32 = vshll.u32 %v1857_v30, 16  ;;  %v1954_v33 = vshll.u32 %v5151_v31, 16  ;;  %v1980_v18 = vrot.slane %v1978_v16, 5  ;;  %v5187_v24 = vld [vmem:[#allocation2 + $0x44] sm:$0x1] }
  0xc8   : > { %v4144_v26 = vld [vmem:[#allocation2 + $0x24] sm:$0xff]  ;;  %v1988_v39 = vshll.u32 %v5187_v24, 16  ;;  %v1414_v16 = vld [vmem:[#allocation2 + $0x3c] sm:$0xe] }
  0xc9   : > { %2986 = vmatpush.bf16.msra.mxu3 %v4226_v45  ;;  %3236 = vmatpush.bf16.msra.mxu0 %v4234_v49  ;;  %v2086_v45 = vunpack.c.l.b16 %v1943_v40  ;;  %v1947_v49 = vrot.slane %v1945_v41, 4  ;;  %v1950_v0 = vrot.slane %v1948_v32, 5  ;;  %v1956_v50 = vrot.slane %v1954_v33, 5  ;;  %v1863_v33 = vld [vmem:[#allocation2 + $0x48] sm:$0xf] }
  0xca   : > { %v1468_v41 = vrot.slane %v1466_v53, 4  ;;  %v1469_v32 = vrot.slane %v4828_v35, 5  ;;  %v4199_v35 = vld [vmem:[%s5616_s5 + $0x150] sm:$0xff] }
  0xcb   : > { %2609 = vmatpush.bf16.msra.mxu2 %v4217_v27  ;;  %2414 = vmatpush.bf16.msra.mxu1 %v4201_v28  ;;  %v2099_v59 = vpack.c.b16 %v2086_v45, %v2085_v44  ;;  %v1951_v61 = vor.u32 %v1950_v0, %v1947_v49  ;;  %v1961_v62 = vor.u32 %v1960_v51, %v1956_v50  ;;  %v1413_v27 = vld [vmem:[#allocation2 + $0x30] sm:$0xe] }
  0xcc   : > { %v3716_v40 = vrot.slane %v1413_v27, 9  ;;  %v4223_v44 = vld [vmem:[%s5616_s5 + $0x1d0] sm:$0xff]  ;;  %v1470_v51 = vsel %vm5026_vm13, %v1468_v41, %v1469_v32  ;;  %v4198_v32 = vld [vmem:[%s5616_s5 + $0x148] sm:$0xff] }
  0xcd   : > { %2987 = vmatpush.bf16.msra.mxu3 %v4225_v14  ;;  %3237 = vmatpush.bf16.msra.mxu0 %v4233_v37  ;;  %v1952_v3 = vrot.slane %v1951_v61, 4  ;;  %v1962_v5 = vrot.slane %v1961_v62, 4  ;;  %v4176_v14 = vld [vmem:[#allocation2 + $0x30] sm:$0xff]  ;;  %v1985_v37 = vor.u32 %v1984_v21, %v1980_v18  ;;  %v2006_v61 = vshrl.u32 %v5192_v42, 16 }
  0xce   : > { %1373 = vmatmul.bf16.gmra.mxu1 %v4142_v15  ;;  %1602 = vmatmul.bf16.gmra.mxu2 %v1526_v2  ;;  %v1972_v15 = vshll.u32 %v1860_v12, 16  ;;  %v4231_v0 = vld [vmem:[%s5616_s5 + $0x210] sm:$0xff] }
  0xcf   : > { %2610 = vmatpush.bf16.msra.mxu2 %v4216_v60  ;;  %2415 = vmatpush.bf16.msra.mxu1 %v4200_v4  ;;  %v1957_v1 = vsel %vm4843_vm10, %v1952_v3, %v1956_v50  ;;  %v1967_v2 = vsel %vm4843_vm10, %v1962_v5, %v1966_v7  ;;  %v1986_v49 = vrot.slane %v1985_v37, 4  ;;  %v1467_v50 = vsel %vm5026_vm13, %v3716_v40, %v1466_v53  ;;  %v5227_v37 = vld [vmem:[#allocation2 + $0x58] sm:$0xf] }
  0xd0   : > { %1796 = vmatmul.bf16.gmra.mxu3 %v4174_v11  ;;  %2174 = vmatmul.bf16.gmra.mxu0 %v2098_v22  ;;  %v2087_v56 = vunpack.c.l.b16 %v1957_v1  ;;  %v2088_v23 = vunpack.c.l.b16 %v1967_v2  ;;  %v1971_v11 = vrot.slane %v1969_v6, 4  ;;  %v1974_v22 = vrot.slane %v1972_v15, 5  ;;  %v5216_v1 = vld [vmem:[#allocation2 + $0x50] sm:$0x1] }
  0xd1   : > { %2988 = vmatpush.bf16.msra.mxu3 %v4224_v9  ;;  %v1517_v3 = vunpack.c.l.b16 %v1467_v50  ;;  %v1518_v5 = vunpack.c.l.b16 %v1470_v51  ;;  %v2008_v4 = vrot.slane %v2006_v61, 4  ;;  %v1473_v2 = vrot.slane %v4883_v46, 5  ;;  %v4145_v6 = vld [vmem:[#allocation2 + $0x30] sm:$0xff]  ;;  %v4214_v46 = vld [vmem:[%s5616_s5 + $0x188] sm:$0xff]  ;;  %v5245_v61 = vld [vmem:[#allocation2 + $0x5c] sm:$0x1] }
  0xd2   : > { %v2100_v28 = vpack.c.b16 %v2088_v23, %v2087_v56  ;;  %v1975_v30 = vor.u32 %v1974_v22, %v1971_v11  ;;  %v2012_v23 = vshll.u32 %v5216_v1, 16  ;;  %v4177_v11 = vld [vmem:[#allocation2 + $0x3c] sm:$0xff]  ;;  %v1476_v53 = vrot.slane %v4902_v8, 5 }
  0xd3   : > { %2611 = vmatpush.bf16.msra.mxu2 %v4215_v25  ;;  %2416 = vmatpush.bf16.msra.mxu1 %v4199_v35  ;;  %v1529_v15 = vpack.c.b16 %v1518_v5, %v1517_v3  ;;  %v1475_v21 = vrot.slane %v1473_v2, 4  ;;  %v2030_v35 = vshrl.u32 %v5227_v37, 16  ;;  %v4335_v3 = vld [vmem:[#allocation2 + $0x4c] sm:$0xf] }
  0xd4   : > { %v1976_v45 = vrot.slane %v1975_v30, 4  ;;  %v1866_v30 = vld [vmem:[#allocation2 + $0x54] sm:$0xf]  ;;  %v1480_v5 = vrot.slane %v4335_v3, 5 }
  0xd5   : > { %2989 = vmatpush.bf16.msra.mxu3 %v4223_v44  ;;  %v2020_v25 = vshll.u32 %v1866_v30, 16  ;;  %v2026_v44 = vshll.u32 %v5227_v37, 16 }
  0xd6   : > { %v1981_v62 = vsel %vm4843_vm10, %v1976_v45, %v1980_v18  ;;  %v3717_v18 = vrot.slane %v1414_v16, 9  ;;  %v4230_v45 = vld [vmem:[%s5616_s5 + $0x208] sm:$0xff] }
  0xd7   : > { %2612 = vmatpush.bf16.msra.mxu2 %v4214_v46  ;;  %2417 = vmatpush.bf16.msra.mxu1 %v4198_v32 }
  0xd8   : > { %v1474_v8 = vsel %vm5026_vm13, %v3717_v18, %v1473_v2  ;;  %v1869_v18 = vld [vmem:[#allocation2 + $0x60] sm:$0xf] }
  0xde   : > { %1378 = vmatmul.bf16.gmra.mxu1 %v4143_v55  ;;  %1607 = vmatmul.bf16.gmra.mxu2 %v5104_v36  ;;  %v4232_v36 = vld [vmem:[%s5616_s5 + $0x218] sm:$0xff]  ;;  %v1993_v55 = vshrl.u32 %v1863_v33, 16 }
  0xdf   : > { %3238 = vmatpush.bf16.msra.mxu0 %v4232_v36  ;;  %v2089_v36 = vunpack.c.l.b16 %v1981_v62  ;;  %v4146_v62 = vld [vmem:[#allocation2 + $0x3c] sm:$0xff] }
  0xe0   : > { %1801 = vmatmul.bf16.gmra.mxu3 %v4175_v58  ;;  %2179 = vmatmul.bf16.gmra.mxu0 %v2099_v59  ;;  %v1996_v58 = vshll.u32 %v1863_v33, 16  ;;  %v2002_v59 = vshll.u32 %v5192_v42, 16  ;;  %v1995_v7 = vrot.slane %v1993_v55, 4  ;;  %v2017_v33 = vshrl.u32 %v1866_v30, 16 }
  0xe1   : > { %v2022_v55 = vrot.slane %v2020_v25, 5  ;;  %v2044_v30 = vshll.u32 %v1869_v18, 16 }
  0xe2   : > { %v1998_v60 = vrot.slane %v1996_v58, 5  ;;  %v2004_v9 = vrot.slane %v2002_v59, 5  ;;  %v2019_v51 = vrot.slane %v2017_v33, 4  ;;  %v2028_v58 = vrot.slane %v2026_v44, 5 }
  0xe3   : > { %3239 = vmatpush.bf16.msra.mxu0 %v4231_v0  ;;  %v2032_v59 = vrot.slane %v2030_v35, 4  ;;  %v2046_v35 = vrot.slane %v2044_v30, 5 }
  0xe4   : > { %v1999_v17 = vor.u32 %v1998_v60, %v1995_v7  ;;  %v2009_v56 = vor.u32 %v2008_v4, %v2004_v9  ;;  %v4178_v7 = vld [vmem:[#allocation2 + $0x48] sm:$0xff]  ;;  %v2023_v4 = vor.u32 %v2022_v55, %v2019_v51  ;;  %v4179_v55 = vld [vmem:[#allocation2 + $0x54] sm:$0xff] }
  0xe6   : > { %v2010_v27 = vrot.slane %v2009_v56, 4 }
  0xe7   : > { %3240 = vmatpush.bf16.msra.mxu0 %v4230_v45 }
  0xee   : > { %1383 = vmatmul.bf16.gmra.mxu1 %v4144_v26  ;;  %1612 = vmatmul.bf16.gmra.mxu2 %v5140_v48  ;;  %v1990_v48 = vrot.slane %v1988_v39, 5  ;;  %v2000_v26 = vrot.slane %v1999_v17, 4  ;;  %v1477_v39 = vsel %vm5026_vm13, %v1475_v21, %v1476_v53  ;;  %v2024_v17 = vrot.slane %v2023_v4, 4  ;;  %v5254_v21 = vld [vmem:[#allocation2 + $0x64] sm:$0xf] }
  0xef   : > { %v4197_v53 = vld [vmem:[%s5616_s5 + $0x140] sm:$0xff] }
  0xf0   : > { %1806 = vmatmul.bf16.gmra.mxu3 %v4176_v14  ;;  %2184 = vmatmul.bf16.gmra.mxu0 %v2100_v28  ;;  %v1991_v63 = vsel %vm4843_vm10, %v1986_v49, %v1990_v48  ;;  %v2014_v14 = vrot.slane %v2012_v23, 5  ;;  %v4222_v28 = vld [vmem:[%s5616_s5 + $0x1c8] sm:$0xff]  ;;  %v2005_v40 = vsel %vm4843_vm10, %v2000_v26, %v2004_v9  ;;  %v1519_v49 = vunpack.c.l.b16 %v1474_v8 }
  0xf1   : > { %v2090_v12 = vunpack.c.l.b16 %v1991_v63  ;;  %2990 = vmatpush.bf16.msra.mxu3 %v4222_v28  ;;  %v1520_v48 = vunpack.c.l.b16 %v1477_v39  ;;  %v2091_v0 = vunpack.c.l.b16 %v2005_v40  ;;  %v1415_v9 = vld [vmem:[#allocation2 + $0x48] sm:$0xe]  ;;  %v2041_v28 = vshrl.u32 %v1869_v18, 16  ;;  %2418 = vmatpush.bf16.msra.mxu1 %v4197_v53  ;;  %v4229_v40 = vld [vmem:[%s5616_s5 + $0x200] sm:$0xff] }
  0xf2   : > { %v2015_v41 = vsel %vm4843_vm10, %v2010_v27, %v2014_v14  ;;  %v3718_v2 = vrot.slane %v1415_v9, 9  ;;  %v2029_v14 = vsel %vm4843_vm10, %v2024_v17, %v2028_v58  ;;  %v2050_v8 = vshll.u32 %v5254_v21, 16  ;;  %3241 = vmatpush.bf16.msra.mxu0 %v4229_v40  ;;  %v5280_v9 = vld [vmem:[#allocation2 + $0x1c] sm:$0xf] }
  0xf3   : > { %v2101_v22 = vpack.c.b16 %v2090_v12, %v2089_v36  ;;  %v2092_v50 = vunpack.c.l.b16 %v2015_v41  ;;  %v1530_v63 = vpack.c.b16 %v1520_v48, %v1519_v49  ;;  %v2033_v36 = vor.u32 %v2032_v59, %v2028_v58  ;;  %v5272_v48 = vld [vmem:[#allocation2 + $0x68] sm:$0x1] }
  0xf4   : > { %v2036_v12 = vshll.u32 %v5245_v61, 16  ;;  %v1481_v26 = vsel %vm5026_vm13, %v3718_v2, %v1480_v5  ;;  %v2054_v39 = vshrl.u32 %v5254_v21, 16  ;;  %v2093_v33 = vunpack.c.l.b16 %v2029_v14 }
  0xf5   : > { %v2102_v60 = vpack.c.b16 %v2092_v50, %v2091_v0  ;;  %v2034_v56 = vrot.slane %v2033_v36, 4  ;;  %v1521_v41 = vunpack.c.l.b16 %v1481_v26  ;;  %v2043_v44 = vrot.slane %v2041_v28, 4  ;;  %v4147_v0 = vld [vmem:[#allocation2 + $0x48] sm:$0xff] }
  0xf6   : > { %v2038_v23 = vrot.slane %v2036_v12, 5  ;;  %v2052_v45 = vrot.slane %v2050_v8, 5  ;;  %v2056_v49 = vrot.slane %v2054_v39, 4  ;;  %v1487_v59 = vrot.slane %v4914_v47, 5 }
  0xf7   : > { %v2047_v3 = vor.u32 %v2046_v35, %v2043_v44  ;;  %v1490_v12 = vrot.slane %v4919_v19, 5 }
  0xf8   : > { %v2039_v46 = vsel %vm4843_vm10, %v2034_v56, %v2038_v23  ;;  %v1489_v36 = vrot.slane %v1487_v59, 4  ;;  %v2705_v56 = vshll.u32 %v5280_v9, 16  ;;  %v2709_v23 = vshrl.u32 %v5280_v9, 16 }
  0xf9   : > { %v2094_v25 = vunpack.c.l.b16 %v2039_v46  ;;  %v2048_v2 = vrot.slane %v2047_v3, 4 }
  0xfa   : > { %v1491_v19 = vsel %vm5026_vm13, %v1489_v36, %v1490_v12  ;;  %v2707_v28 = vrot.slane %v2705_v56, 5  ;;  %v2711_v30 = vrot.slane %v2709_v23, 4 }
  0xfb   : > { %v2103_v58 = vpack.c.b16 %v2094_v25, %v2093_v33  ;;  %v2053_v26 = vsel %vm4843_vm10, %v2048_v2, %v2052_v45  ;;  %v1524_v39 = vunpack.c.l.b16 %v1491_v19  ;;  %v2260_v25 = vrot.slane %v4983_v43, 5 }
  0xfc   : > { %v2095_v40 = vunpack.c.l.b16 %v2053_v26  ;;  %v2712_v35 = vor.u32 %v2711_v30, %v2707_v28 }
  0xfe   : > { %1388 = vmatmul.bf16.gmra.mxu1 %v4145_v6  ;;  %1617 = vmatmul.bf16.gmra.mxu2 %v1529_v15  ;;  %v1482_v6 = vrot.slane %v1480_v5, 4  ;;  %v4336_v15 = vld [vmem:[#allocation2 + $0x50] sm:$0x1]  ;;  %v2057_v5 = vor.u32 %v2056_v49, %v2052_v45  ;;  %v4148_v45 = vld [vmem:[#allocation2 + $0x54] sm:$0xff]  ;;  %v2713_v12 = vrot.slane %v2712_v35, 4 }
  0xff   : > { %v1483_v16 = vrot.slane %v4336_v15, 5 }
 0x100   : > { %1811 = vmatmul.bf16.gmra.mxu3 %v4177_v11  ;;  %2189 = vmatmul.bf16.gmra.mxu0 %v2101_v22  ;;  %v4213_v11 = vld [vmem:[%s5616_s5 + $0x180] sm:$0xff]  ;;  %v2058_v47 = vrot.slane %v2057_v5, 4  ;;  %v3049_v5 = vld [vmem:[#allocation2 + $0x18] sm:$0xe] }
 0x101   : > { %v4221_v22 = vld [vmem:[%s5616_s5 + $0x1c0] sm:$0xff]  ;;  %2613 = vmatpush.bf16.msra.mxu2 %v4213_v11  ;;  %v1484_v27 = vsel %vm5026_vm13, %v1482_v6, %v1483_v16 }
 0x102   : > { %2991 = vmatpush.bf16.msra.mxu3 %v4221_v22  ;;  %v1522_v32 = vunpack.c.l.b16 %v1484_v27 }
 0x104   : > { %v1531_v50 = vpack.c.b16 %v1522_v32, %v1521_v41  ;;  %v2673_v32 = vld [vmem:[#allocation2 + $0x20] sm:$0x1] }
 0x10e   : > { %1393 = vmatmul.bf16.gmra.mxu1 %v4146_v62  ;;  %1622 = vmatmul.bf16.gmra.mxu2 %v1530_v63  ;;  %v1416_v63 = vld [vmem:[#allocation2 + $0x54] sm:$0xe] }
 0x10f   : > { %v3719_v4 = vrot.slane %v1416_v63, 9  ;;  %v4180_v63 = vld [vmem:[#allocation2 + $0x60] sm:$0xff] }
 0x110   : > { %1816 = vmatmul.bf16.gmra.mxu3 %v4178_v7  ;;  %2194 = vmatmul.bf16.gmra.mxu0 %v2102_v60  ;;  %v2060_v7 = vshll.u32 %v5272_v48, 16  ;;  %v2671_v60 = vld [vmem:[#allocation2 + $0x18] sm:$0xf] }
 0x111   : > { %v2696_v16 = vshrl.u32 %v2671_v60, 16  ;;  %v2699_v17 = vshll.u32 %v2671_v60, 16  ;;  %v1488_v18 = vsel %vm5026_vm13, %v3719_v4, %v1487_v59  ;;  %v2262_v4 = vrot.slane %v2260_v25, 4 }
 0x112   : > { %v2062_v6 = vrot.slane %v2060_v7, 5  ;;  %v1523_v8 = vunpack.c.l.b16 %v1488_v18  ;;  %v2263_v7 = vrot.slane %v5001_v57, 5 }
 0x113   : > { %v2698_v14 = vrot.slane %v2696_v16, 4  ;;  %v2701_v46 = vrot.slane %v2699_v17, 5  ;;  %v3086_v16 = vrot.slane %v2673_v32, 5  ;;  %v5312_v17 = vld [vmem:[#allocation2 + $0x28] sm:$0xf] }
 0x114   : > { %v2063_v27 = vsel %vm4843_vm10, %v2058_v47, %v2062_v6  ;;  %v4080_v47 = vrot.slane %v3049_v5, 9  ;;  %v2264_v23 = vsel %vm5026_vm13, %v2262_v4, %v2263_v7 }
 0x115   : > { %v2096_v41 = vunpack.c.l.b16 %v2063_v27  ;;  %v2702_v44 = vor.u32 %v2701_v46, %v2698_v14 }
 0x117   : > { %v2104_v3 = vpack.c.b16 %v2096_v41, %v2095_v40  ;;  %v2703_v36 = vrot.slane %v2702_v44, 4  ;;  %v2733_v40 = vshrl.u32 %v5312_v17, 16 }
 0x119   : > { %v2708_v19 = vsel %vm4843_vm10, %v2703_v36, %v2707_v28  ;;  %v2267_v36 = vrot.slane %v5036_v29, 5  ;;  %v2270_v29 = vrot.slane %v5081_v10, 5 }
 0x11b   : > { %v5274_v51 = vpop.f32.mrf.mxu1 }
 0x11d   : > { %v5277_v62 = vpop.f32.mrf.mxu0 }
 0x11e   : > { %1398 = vmatmul.bf16.gmra.mxu1 %v4147_v0  ;;  %1627 = vmatmul.bf16.gmra.mxu2 %v1531_v50  ;;  %v1532_v0 = vpack.c.b16 %v1524_v39, %v1523_v8  ;;  %v2226_v50 = vld [vmem:[#allocation2 + $0xc] sm:$0xe]  ;;  %v2729_v39 = vshll.u32 %v5312_v17, 16 }
 0x11f   : > { %v3896_v43 = vrot.slane %v2226_v50, 9 }
 0x120   : > { %1821 = vmatmul.bf16.gmra.mxu3 %v4179_v55  ;;  %2199 = vmatmul.bf16.gmra.mxu0 %v2103_v58  ;;  %v2715_v55 = vshll.u32 %v2673_v32, 16  ;;  %v3083_v58 = vrot.slane %v5280_v9, 5  ;;  %v2674_v9 = vld [vmem:[#allocation2 + $0x24] sm:$0xf]  ;;  %v2332_v32 = vunpack.c.l.b16 %v2264_v23 }
 0x121   : > { %v5283_v15 = vpop.f32.mrf.mxu2  ;;  %v2261_v57 = vsel %vm5026_vm13, %v3896_v43, %v2260_v25  ;;  %v2720_v30 = vshrl.u32 %v2674_v9, 16  ;;  %v2723_v8 = vshll.u32 %v2674_v9, 16  ;;  %v2904_v25 = vunpack.c.l.b16 %v2708_v19  ;;  %v4205_v43 = vld [vmem:[#allocation2 + $0x18] sm:$0xff] }
 0x122   : > { %v2717_v2 = vrot.slane %v2715_v55, 5  ;;  %v3085_v6 = vrot.slane %v3083_v58, 4  ;;  %v3084_v27 = vsel %vm5026_vm13, %v4080_v47, %v3083_v58  ;;  %v2331_v28 = vunpack.c.l.b16 %v2261_v57  ;;  %v2227_v47 = vld [vmem:[#allocation2 + $0x18] sm:$0xe] }
 0x123   : > { %v5287_v11 = vpop.f32.mrf.mxu3  ;;  %v5289_v22 = vpop.f32.mrf.mxu1  ;;  %v3154_v35 = vunpack.c.l.b16 %v3084_v27  ;;  %v2725_v50 = vrot.slane %v2723_v8, 5  ;;  %v2731_v55 = vrot.slane %v2729_v39, 5  ;;  %v2735_v58 = vrot.slane %v2733_v40, 4  ;;  %v5343_v8 = vld [vmem:[#allocation2 + $0x34] sm:$0xf] }
 0x124   : > { %v2718_v26 = vsel %vm4843_vm10, %v2713_v12, %v2717_v2  ;;  %v3087_v14 = vsel %vm5026_vm13, %v3085_v6, %v3086_v16  ;;  %v2347_v7 = vpack.c.b16 %v2332_v32, %v2331_v28  ;;  %v3090_v19 = vrot.slane %v5312_v17, 5 }
 0x125   : > { %v5295_v53 = vpop.f32.mrf.mxu0  ;;  %v2905_v44 = vunpack.c.l.b16 %v2718_v26  ;;  %v2736_v16 = vor.u32 %v2735_v58, %v2731_v55  ;;  %v3050_v26 = vld [vmem:[#allocation2 + $0x24] sm:$0xe]  ;;  %v3897_v27 = vrot.slane %v2227_v47, 9 }
 0x126   : > { %v4081_v32 = vrot.slane %v3050_v26, 9 }
 0x127   : > { %v2920_v4 = vpack.c.b16 %v2905_v44, %v2904_v25  ;;  %v2737_v40 = vrot.slane %v2736_v16, 4 }
 0x129   : > { %v5301_v33 = vpop.f32.mrf.mxu2 }
 0x12b   : > { %v5304_v49 = vpop.f32.mrf.mxu3  ;;  %v5307_v59 = vpop.f32.mrf.mxu1 }
 0x12d   : > { %v5310_v60 = vpop.f32.mrf.mxu0 }
 0x12e   : > { %1403 = vmatmul.bf16.gmra.mxu1 %v4148_v45  ;;  %1632 = vmatmul.bf16.gmra.mxu2 %v1532_v0  ;;  %v3155_v45 = vunpack.c.l.b16 %v3087_v14  ;;  %v2722_v0 = vrot.slane %v2720_v30, 4  ;;  %v2269_v14 = vrot.slane %v2267_v36, 4  ;;  %v2677_v30 = vld [vmem:[#allocation2 + $0x30] sm:$0xf] }
 0x12f   : > { %v2744_v17 = vshrl.u32 %v2677_v30, 16 }
 0x130   : > { %1826 = vmatmul.bf16.gmra.mxu3 %v4180_v63  ;;  %2204 = vmatmul.bf16.gmra.mxu0 %v2104_v3  ;;  %v2676_v63 = vld [vmem:[#allocation2 + $0x2c] sm:$0x1]  ;;  %v3170_v2 = vpack.c.b16 %v3155_v45, %v3154_v35  ;;  %v2726_v6 = vor.u32 %v2725_v50, %v2722_v0  ;;  %v2747_v35 = vshll.u32 %v2677_v30, 16  ;;  %v2753_v45 = vshll.u32 %v5343_v8, 16 }
 0x131   : > { %v5314_v56 = vpop.f32.mrf.mxu2  ;;  %v2739_v9 = vshll.u32 %v2676_v63, 16  ;;  %v3093_v25 = vrot.slane %v2676_v63, 5  ;;  %v2757_v0 = vshrl.u32 %v5343_v8, 16  ;;  %v2271_v10 = vsel %vm5026_vm13, %v2269_v14, %v2270_v29  ;;  %v2679_v14 = vld [vmem:[#allocation2 + $0x38] sm:$0x1] }
 0x132   : > { %v2727_v39 = vrot.slane %v2726_v6, 4  ;;  %v3091_v6 = vsel %vm5026_vm13, %v4081_v32, %v3090_v19  ;;  %v2228_v32 = vld [vmem:[#allocation2 + $0x24] sm:$0xe] }
 0x133   : > { %v5320_v18 = vpop.f32.mrf.mxu3  ;;  %v5330_v46 = vpop.f32.mrf.mxu1  ;;  %v2741_v28 = vrot.slane %v2739_v9, 5  ;;  %v2749_v9 = vrot.slane %v2747_v35, 5  ;;  %v2759_v26 = vrot.slane %v2757_v0, 4  ;;  %v4206_v0 = vld [vmem:[#allocation2 + $0x24] sm:$0xff] }
 0x135   : > { %v5334_v41 = vpop.f32.mrf.mxu0  ;;  %v2742_v63 = vsel %vm4843_vm10, %v2737_v40, %v2741_v28  ;;  %v2274_v28 = vrot.slane %v5106_v38, 5 }
 0x139   : > { %v5336_v3 = vpop.f32.mrf.mxu2 }
 0x13b   : > { %v5338_v5 = vpop.f32.mrf.mxu3  ;;  %v1369_v12 = vpop.f32.mrf.mxu1 }
 0x13c   : > { %v1370_v57 = vadd.f32 %v1369_v12, %v5277_v62  ;;  %v3092_v62 = vrot.slane %v3090_v19, 4 }
 0x13d   : > { %v2170_v23 = vpop.f32.mrf.mxu0 }
 0x13e   : > { %2419 = vmatmul.bf16.vlgmr.msra.gmra.mxu1 %v2347_v7  ;;  %2614 = vmatmul.bf16.vlgmr.msra.gmra.mxu2 %v4205_v43  ;;  %v2268_v43 = vsel %vm5026_vm13, %v3897_v27, %v2267_v36  ;;  %v3094_v16 = vsel %vm5026_vm13, %v3092_v62, %v3093_v25  ;;  %v2746_v36 = vrot.slane %v2744_v17, 4  ;;  %v2763_v25 = vshll.u32 %v2679_v14, 16 }
 0x13f   : > { %v2333_v27 = vunpack.c.l.b16 %v2268_v43  ;;  %v3157_v40 = vunpack.c.l.b16 %v3094_v16  ;;  %v3051_v43 = vld [vmem:[#allocation2 + $0x30] sm:$0xe] }
 0x140   : > { %2992 = vmatmul.bf16.vlgmr.msra.gmra.mxu3 %v2920_v4  ;;  %3242 = vmatmul.bf16.vlgmr.msra.gmra.mxu0 %v3170_v2  ;;  %v2732_v4 = vsel %vm4843_vm10, %v2727_v39, %v2731_v55  ;;  %v2334_v55 = vunpack.c.l.b16 %v2271_v10  ;;  %v2907_v39 = vunpack.c.l.b16 %v2742_v63  ;;  %v3898_v63 = vrot.slane %v2228_v32, 9 }
 0x141   : > { %v1598_v44 = vpop.f32.mrf.mxu2  ;;  %v2906_v29 = vunpack.c.l.b16 %v2732_v4 }
 0x142   : > { %v1638_v50 = vadd.f32 %v1598_v44, %v1370_v57  ;;  %v5361_v57 = vrot.slane %v2753_v45, 5  ;;  %v2750_v44 = vor.u32 %v2749_v9, %v2746_v36  ;;  %v2348_v45 = vpack.c.b16 %v2334_v55, %v2333_v27  ;;  %v2680_v55 = vld [vmem:[#allocation2 + $0x3c] sm:$0xf] }
 0x143   : > { %v1792_v58 = vpop.f32.mrf.mxu3  ;;  %v1371_v7 = vpop.f32.mrf.mxu1  ;;  %v4082_v9 = vrot.slane %v3051_v43, 9 }
 0x144   : > { %v1832_v12 = vadd.f32 %v1792_v58, %v1638_v50  ;;  %v1372_v2 = vadd.f32 %v1371_v7, %v5295_v53  ;;  %v3156_v53 = vunpack.c.l.b16 %v3091_v6  ;;  %v2760_v62 = vor.u32 %v2759_v26, %v5361_v57 }
 0x145   : > { %v2172_v47 = vpop.f32.mrf.mxu0  ;;  %v3097_v50 = vrot.slane %v5343_v8, 5  ;;  %v2921_v58 = vpack.c.b16 %v2907_v39, %v2906_v29  ;;  %v2277_v6 = vrot.slane %v5132_v34, 5  ;;  %v2751_v16 = vrot.slane %v2750_v44, 4  ;;  %v5372_v29 = vld [vmem:[#allocation2 + $0x40] sm:$0xf] }
 0x146   : > { %v5363_v30 = vadd.f32 %v2170_v23, %v1832_v12  ;;  %v3171_v7 = vpack.c.b16 %v3157_v40, %v3156_v53  ;;  %v2276_v12 = vrot.slane %v2274_v28, 4  ;;  %v2761_v36 = vrot.slane %v2760_v62, 4 }
 0x147   : > { %v3099_v26 = vrot.slane %v3097_v50, 4  ;;  %v3100_v8 = vrot.slane %v2679_v14, 5  ;;  %v2275_v39 = vsel %vm5026_vm13, %v3898_v63, %v2274_v28  ;;  %v2756_v53 = vsel %vm4843_vm10, %v2751_v16, %v5361_v57  ;;  %v2682_v16 = vld [vmem:[#allocation2 + $0x44] sm:$0x1] }
 0x148   : > { %v2278_v34 = vsel %vm5026_vm13, %v2276_v12, %v2277_v6  ;;  %v2768_v28 = vshrl.u32 %v2680_v55, 16  ;;  %v2771_v62 = vshll.u32 %v2680_v55, 16  ;;  %v2281_v55 = vrot.slane %v5151_v31, 5 }
 0x149   : > { %v1600_v19 = vpop.f32.mrf.mxu2  ;;  %v3101_v32 = vsel %vm5026_vm13, %v3099_v26, %v3100_v8  ;;  %v4207_v8 = vld [vmem:[#allocation2 + $0x30] sm:$0xff] }
 0x14a   : > { %v1639_v17 = vadd.f32 %v1600_v19, %v1372_v2  ;;  %v2765_v2 = vrot.slane %v2763_v25, 5  ;;  %v3098_v19 = vsel %vm5026_vm13, %v4082_v9, %v3097_v50  ;;  %v2777_v25 = vshll.u32 %v5372_v29, 16 }
 0x14b   : > { %v1794_v35 = vpop.f32.mrf.mxu3  ;;  %v1374_v23 = vpop.f32.mrf.mxu1  ;;  %v3158_v43 = vunpack.c.l.b16 %v3098_v19  ;;  %v3159_v50 = vunpack.c.l.b16 %v3101_v32  ;;  %v2773_v63 = vrot.slane %v2771_v62, 5  ;;  %v3104_v32 = vrot.slane %v5372_v29, 5 }
 0x14c   : > { %v1833_v10 = vadd.f32 %v1794_v35, %v1639_v17  ;;  %v1375_v4 = vadd.f32 %v1374_v23, %v5310_v60  ;;  %v2781_v17 = vshrl.u32 %v5372_v29, 16  ;;  %v2336_v23 = vunpack.c.l.b16 %v2278_v34  ;;  %v2229_v34 = vld [vmem:[#allocation2 + $0x30] sm:$0xe] }
 0x14d   : > { %v2175_v38 = vpop.f32.mrf.mxu0  ;;  %v2779_v12 = vrot.slane %v2777_v25, 5  ;;  %v2283_v62 = vrot.slane %v2281_v55, 4  ;;  %v2683_v25 = vld [vmem:[#allocation2 + $0x48] sm:$0xf]  ;;  %v3107_v29 = vrot.slane %v2682_v16, 5 }
 0x14e   : > { %2424 = vmatmul.bf16.gmra.mxu1 %v2348_v45  ;;  %2619 = vmatmul.bf16.gmra.mxu2 %v4206_v0  ;;  %v5370_v27 = vadd.f32 %v2172_v47, %v1833_v10  ;;  %v2766_v47 = vsel %vm4843_vm10, %v2761_v36, %v2765_v2  ;;  %v2335_v0 = vunpack.c.l.b16 %v2275_v39  ;;  %v2783_v6 = vrot.slane %v2781_v17, 4  ;;  %v5395_v17 = vld [vmem:[#allocation2 + $0x4c] sm:$0xf] }
 0x14f   : > { %v3172_v39 = vpack.c.b16 %v3159_v50, %v3158_v43  ;;  %v2792_v43 = vshrl.u32 %v2683_v25, 16  ;;  %v2795_v50 = vshll.u32 %v2683_v25, 16  ;;  %v2288_v25 = vrot.slane %v5178_v13, 5 }
 0x150   : > { %2997 = vmatmul.bf16.gmra.mxu3 %v2921_v58  ;;  %3247 = vmatmul.bf16.gmra.mxu0 %v3171_v7  ;;  %v2908_v58 = vunpack.c.l.b16 %v2756_v53  ;;  %v2909_v7 = vunpack.c.l.b16 %v2766_v47  ;;  %v2349_v26 = vpack.c.b16 %v2336_v23, %v2335_v0 }
 0x151   : > { %v1603_v60 = vpop.f32.mrf.mxu2 }
 0x152   : > { %v1640_v40 = vadd.f32 %v1603_v60, %v1375_v4  ;;  %v2770_v4 = vrot.slane %v2768_v28, 4  ;;  %v3899_v28 = vrot.slane %v2229_v34, 9  ;;  %v2797_v34 = vrot.slane %v2795_v50, 5 }
 0x153   : > { %v1797_v14 = vpop.f32.mrf.mxu3  ;;  %v1376_v44 = vpop.f32.mrf.mxu1 }
 0x154   : > { %v1834_v35 = vadd.f32 %v1797_v14, %v1640_v40  ;;  %v1377_v57 = vadd.f32 %v1376_v44, %v5334_v41  ;;  %v2922_v41 = vpack.c.b16 %v2909_v7, %v2908_v58  ;;  %v2774_v53 = vor.u32 %v2773_v63, %v2770_v4  ;;  %v3052_v44 = vld [vmem:[#allocation2 + $0x3c] sm:$0xe] }
 0x155   : > { %v2177_v45 = vpop.f32.mrf.mxu0  ;;  %v2784_v40 = vor.u32 %v2783_v6, %v2779_v12  ;;  %v4083_v23 = vrot.slane %v3052_v44, 9  ;;  %v3106_v58 = vrot.slane %v3104_v32, 4  ;;  %v2801_v4 = vshll.u32 %v5395_v17, 16 }
 0x156   : > { %v5390_v10 = vadd.f32 %v2175_v38, %v1834_v35  ;;  %v2787_v38 = vshll.u32 %v2682_v16, 16  ;;  %v2284_v35 = vrot.slane %v5162_v52, 5  ;;  %v2805_v63 = vshrl.u32 %v5395_v17, 16 }
 0x157   : > { %v2785_v0 = vrot.slane %v2784_v40, 4 }
 0x158   : > { %v2285_v52 = vsel %vm5026_vm13, %v2283_v62, %v2284_v35  ;;  %v2807_v40 = vrot.slane %v2805_v63, 4  ;;  %v2230_v35 = vld [vmem:[#allocation2 + $0x3c] sm:$0xe]  ;;  %v3053_v63 = vld [vmem:[#allocation2 + $0x48] sm:$0xe] }
 0x159   : > { %v1605_v36 = vpop.f32.mrf.mxu2 }
 0x15a   : > { %v1641_v2 = vadd.f32 %v1605_v36, %v1377_v57  ;;  %v2775_v57 = vrot.slane %v2774_v53, 4  ;;  %v5415_v53 = vrot.slane %v2801_v4, 5 }
 0x15b   : > { %v1799_v9 = vpop.f32.mrf.mxu3  ;;  %v1379_v60 = vpop.f32.mrf.mxu1 }
 0x15c   : > { %v1835_v14 = vadd.f32 %v1799_v9, %v1641_v2  ;;  %v1380_v47 = vadd.f32 %v1379_v60, %v5274_v51  ;;  %v2789_v51 = vrot.slane %v2787_v38, 5  ;;  %v2282_v2 = vsel %vm5026_vm13, %v3899_v28, %v2281_v55 }
 0x15d   : > { %v2180_v19 = vpop.f32.mrf.mxu0  ;;  %v2780_v9 = vsel %vm4843_vm10, %v2775_v57, %v2779_v12  ;;  %v3105_v60 = vsel %vm5026_vm13, %v4083_v23, %v3104_v32  ;;  %v2794_v55 = vrot.slane %v2792_v43, 4  ;;  %v2337_v38 = vunpack.c.l.b16 %v2282_v2 }
 0x15e   : > { %2429 = vmatmul.bf16.gmra.mxu1 %v2349_v26  ;;  %2624 = vmatmul.bf16.gmra.mxu2 %v4207_v8  ;;  %v5397_v31 = vadd.f32 %v2177_v45, %v1835_v14  ;;  %v2790_v16 = vsel %vm4843_vm10, %v2785_v0, %v2789_v51  ;;  %v2338_v12 = vunpack.c.l.b16 %v2285_v52  ;;  %v2685_v14 = vld [vmem:[#allocation2 + $0x50] sm:$0x1]  ;;  %v2910_v44 = vunpack.c.l.b16 %v2780_v9 }
 0x15f   : > { %v2911_v28 = vunpack.c.l.b16 %v2790_v16  ;;  %v2798_v57 = vor.u32 %v2797_v34, %v2794_v55  ;;  %v2808_v0 = vor.u32 %v2807_v40, %v5415_v53  ;;  %v2811_v51 = vshll.u32 %v2685_v14, 16  ;;  %v2686_v55 = vld [vmem:[#allocation2 + $0x54] sm:$0xf]  ;;  %v5426_v34 = vld [vmem:[#allocation2 + $0x58] sm:$0xf] }
 0x160   : > { %3002 = vmatmul.bf16.gmra.mxu3 %v2922_v41  ;;  %3252 = vmatmul.bf16.gmra.mxu0 %v3172_v39  ;;  %v3108_v39 = vsel %vm5026_vm13, %v3106_v58, %v3107_v29  ;;  %v2350_v29 = vpack.c.b16 %v2338_v12, %v2337_v38  ;;  %v3111_v43 = vrot.slane %v5395_v17, 5  ;;  %v2290_v2 = vrot.slane %v2288_v25, 4 }
 0x161   : > { %v1608_v7 = vpop.f32.mrf.mxu2  ;;  %v3161_v62 = vunpack.c.l.b16 %v3108_v39  ;;  %v2923_v50 = vpack.c.b16 %v2911_v28, %v2910_v44  ;;  %v2291_v52 = vrot.slane %v5187_v24, 5  ;;  %v2799_v9 = vrot.slane %v2798_v57, 4 }
 0x162   : > { %v1642_v6 = vadd.f32 %v1608_v7, %v1380_v47  ;;  %v4208_v7 = vld [vmem:[#allocation2 + $0x3c] sm:$0xff]  ;;  %v2809_v16 = vrot.slane %v2808_v0, 4  ;;  %v3114_v17 = vrot.slane %v2685_v14, 5 }
 0x163   : > { %v1802_v45 = vpop.f32.mrf.mxu3  ;;  %v1381_v36 = vpop.f32.mrf.mxu1  ;;  %v2292_v24 = vsel %vm5026_vm13, %v2290_v2, %v2291_v52  ;;  %v2804_v38 = vsel %vm4843_vm10, %v2799_v9, %v5415_v53 }
 0x164   : > { %v1836_v26 = vadd.f32 %v1802_v45, %v1642_v6  ;;  %v1382_v8 = vadd.f32 %v1381_v36, %v5289_v22  ;;  %v3160_v22 = vunpack.c.l.b16 %v3105_v60  ;;  %v3900_v36 = vrot.slane %v2230_v35, 9 }
 0x165   : > { %v2182_v41 = vpop.f32.mrf.mxu0  ;;  %v3113_v60 = vrot.slane %v3111_v43, 4  ;;  %v2829_v35 = vshrl.u32 %v5426_v34, 16 }
 0x166   : > { %v5417_v47 = vadd.f32 %v2180_v19, %v1836_v26  ;;  %v3173_v4 = vpack.c.b16 %v3161_v62, %v3160_v22  ;;  %v2813_v26 = vrot.slane %v2811_v51, 5  ;;  %v2289_v40 = vsel %vm5026_vm13, %v3900_v36, %v2288_v25 }
 0x167   : > { %v3115_v28 = vsel %vm5026_vm13, %v3113_v60, %v3114_v17  ;;  %v2816_v62 = vshrl.u32 %v2686_v55, 16  ;;  %v2819_v25 = vshll.u32 %v2686_v55, 16  ;;  %v2339_v51 = vunpack.c.l.b16 %v2289_v40  ;;  %v2231_v17 = vld [vmem:[#allocation2 + $0x48] sm:$0xe] }
 0x169   : > { %v1610_v32 = vpop.f32.mrf.mxu2 }
 0x16a   : > { %v1643_v23 = vadd.f32 %v1610_v32, %v1382_v8  ;;  %v4084_v8 = vrot.slane %v3053_v63, 9  ;;  %v2825_v32 = vshll.u32 %v5426_v34, 16 }
 0x16b   : > { %v1804_v58 = vpop.f32.mrf.mxu3  ;;  %v1384_v19 = vpop.f32.mrf.mxu1 }
 0x16c   : > { %v1837_v6 = vadd.f32 %v1804_v58, %v1643_v23  ;;  %v1385_v45 = vadd.f32 %v1384_v19, %v5307_v59  ;;  %v3112_v44 = vsel %vm5026_vm13, %v4084_v8, %v3111_v43  ;;  %v2340_v23 = vunpack.c.l.b16 %v2292_v24 }
 0x16d   : > { %v2185_v13 = vpop.f32.mrf.mxu0  ;;  %v2912_v58 = vunpack.c.l.b16 %v2804_v38  ;;  %v3163_v43 = vunpack.c.l.b16 %v3115_v28  ;;  %v2827_v63 = vrot.slane %v2825_v32, 5  ;;  %v3118_v38 = vrot.slane %v5426_v34, 5  ;;  %v5448_v28 = vld [vmem:[#allocation2 + $0x64] sm:$0xf] }
 0x16e   : > { %2434 = vmatmul.bf16.gmra.mxu1 %v2350_v29  ;;  %2629 = vmatmul.bf16.gmra.mxu2 %v4208_v7  ;;  %v5424_v39 = vadd.f32 %v2182_v41, %v1837_v6  ;;  %v2814_v41 = vsel %vm4843_vm10, %v2809_v16, %v2813_v26  ;;  %v3162_v7 = vunpack.c.l.b16 %v3112_v44  ;;  %v2831_v6 = vrot.slane %v2829_v35, 4  ;;  %v4209_v16 = vld [vmem:[#allocation2 + $0x48] sm:$0xff]  ;;  %v2689_v44 = vld [vmem:[#allocation2 + $0x60] sm:$0xf] }
 0x16f   : > { %v2913_v29 = vunpack.c.l.b16 %v2814_v41  ;;  %v2351_v9 = vpack.c.b16 %v2340_v23, %v2339_v51  ;;  %v2295_v26 = vrot.slane %v5192_v42, 5  ;;  %v2298_v42 = vrot.slane %v5216_v1, 5 }
 0x170   : > { %3007 = vmatmul.bf16.gmra.mxu3 %v2923_v50  ;;  %3257 = vmatmul.bf16.gmra.mxu0 %v3173_v4  ;;  %v2818_v50 = vrot.slane %v2816_v62, 4  ;;  %v2821_v4 = vrot.slane %v2819_v25, 5  ;;  %v3174_v60 = vpack.c.b16 %v3163_v43, %v3162_v7  ;;  %v2840_v23 = vshrl.u32 %v2689_v44, 16 }
 0x171   : > { %v1613_v59 = vpop.f32.mrf.mxu2  ;;  %v2297_v41 = vrot.slane %v2295_v26, 4 }
 0x172   : > { %v1644_v12 = vadd.f32 %v1613_v59, %v1385_v45  ;;  %v2688_v45 = vld [vmem:[#allocation2 + $0x5c] sm:$0x1]  ;;  %v2822_v55 = vor.u32 %v2821_v4, %v2818_v50  ;;  %v2832_v59 = vor.u32 %v2831_v6, %v2827_v63 }
 0x173   : > { %v1807_v14 = vpop.f32.mrf.mxu3  ;;  %v1386_v22 = vpop.f32.mrf.mxu1  ;;  %v2299_v4 = vsel %vm5026_vm13, %v2297_v41, %v2298_v42  ;;  %v2232_v41 = vld [vmem:[#allocation2 + $0x54] sm:$0xe] }
 0x174   : > { %v1838_v57 = vadd.f32 %v1807_v14, %v1644_v12  ;;  %v1387_v53 = vadd.f32 %v1386_v22, %v5330_v46  ;;  %v2924_v46 = vpack.c.b16 %v2913_v29, %v2912_v58  ;;  %v3054_v12 = vld [vmem:[#allocation2 + $0x54] sm:$0xe]  ;;  %v3901_v14 = vrot.slane %v2231_v17, 9  ;;  %v2691_v17 = vld [vmem:[#allocation2 + $0x68] sm:$0x1] }
 0x175   : > { %v2187_v0 = vpop.f32.mrf.mxu0  ;;  %v2823_v62 = vrot.slane %v2822_v55, 4  ;;  %v2833_v25 = vrot.slane %v2832_v59, 4  ;;  %v4085_v34 = vrot.slane %v3054_v12, 9  ;;  %v2843_v58 = vshll.u32 %v2689_v44, 16 }
 0x176   : > { %v5444_v19 = vadd.f32 %v2185_v13, %v1838_v57  ;;  %v2835_v13 = vshll.u32 %v2688_v45, 16  ;;  %v3120_v57 = vrot.slane %v3118_v38, 4  ;;  %v2849_v29 = vshll.u32 %v5448_v28, 16 }
 0x177   : > { %v2296_v1 = vsel %vm5026_vm13, %v3901_v14, %v2295_v26 }
 0x178   : > { %v2837_v32 = vrot.slane %v2835_v13, 5 }
 0x179   : > { %v1615_v36 = vpop.f32.mrf.mxu2 }
 0x17a   : > { %v1645_v2 = vadd.f32 %v1615_v36, %v1387_v53  ;;  %v3121_v53 = vrot.slane %v2688_v45, 5  ;;  %v2838_v36 = vsel %vm4843_vm10, %v2833_v25, %v2837_v32 }
 0x17b   : > { %v1809_v52 = vpop.f32.mrf.mxu3  ;;  %v1389_v8 = vpop.f32.mrf.mxu1  ;;  %v2915_v59 = vunpack.c.l.b16 %v2838_v36  ;;  %v2692_v36 = vld [vmem:[#allocation2 + $0x6c] sm:$0xf] }
 0x17c   : > { %v1839_v40 = vadd.f32 %v1809_v52, %v1645_v2  ;;  %v1390_v35 = vadd.f32 %v1389_v8, %v5283_v15  ;;  %v2828_v15 = vsel %vm4843_vm10, %v2823_v62, %v2827_v63  ;;  %v3119_v2 = vsel %vm5026_vm13, %v4085_v34, %v3118_v38  ;;  %v4210_v34 = vld [vmem:[#allocation2 + $0x54] sm:$0xff] }
 0x17d   : > { %v2190_v24 = vpop.f32.mrf.mxu0  ;;  %v3122_v52 = vsel %vm5026_vm13, %v3120_v57, %v3121_v53  ;;  %v2341_v8 = vunpack.c.l.b16 %v2296_v1  ;;  %v2914_v55 = vunpack.c.l.b16 %v2828_v15  ;;  %v3164_v13 = vunpack.c.l.b16 %v3119_v2  ;;  %v5480_v2 = vld [vmem:[#allocation2 + $0x70] sm:$0xf] }
 0x17e   : > { %2439 = vmatmul.bf16.gmra.mxu1 %v2351_v9  ;;  %2634 = vmatmul.bf16.gmra.mxu2 %v4209_v16  ;;  %v5450_v22 = vadd.f32 %v2187_v0, %v1839_v40  ;;  %v2853_v0 = vshrl.u32 %v5448_v28, 16  ;;  %v2842_v9 = vrot.slane %v2840_v23, 4  ;;  %v2845_v16 = vrot.slane %v2843_v58, 5  ;;  %v3055_v23 = vld [vmem:[#allocation2 + $0x60] sm:$0xe] }
 0x17f   : > { %v3165_v40 = vunpack.c.l.b16 %v3122_v52  ;;  %v2302_v38 = vrot.slane %v5227_v37, 5  ;;  %v2859_v62 = vshll.u32 %v2691_v17, 16  ;;  %v2925_v53 = vpack.c.b16 %v2915_v59, %v2914_v55 }
 0x180   : > { %3012 = vmatmul.bf16.gmra.mxu3 %v2924_v46  ;;  %3262 = vmatmul.bf16.gmra.mxu0 %v3174_v60  ;;  %v5468_v46 = vrot.slane %v2849_v29, 5  ;;  %v2855_v26 = vrot.slane %v2853_v0, 4  ;;  %v2342_v60 = vunpack.c.l.b16 %v2299_v4  ;;  %v2846_v44 = vor.u32 %v2845_v16, %v2842_v9 }
 0x181   : > { %v1618_v51 = vpop.f32.mrf.mxu2  ;;  %v3902_v29 = vrot.slane %v2232_v41, 9  ;;  %v2304_v37 = vrot.slane %v2302_v38, 4  ;;  %v2305_v0 = vrot.slane %v5245_v61, 5  ;;  %v4086_v1 = vrot.slane %v3055_v23, 9 }
 0x182   : > { %v1646_v7 = vadd.f32 %v1618_v51, %v1390_v35  ;;  %v2856_v42 = vor.u32 %v2855_v26, %v5468_v46  ;;  %v2352_v35 = vpack.c.b16 %v2342_v60, %v2341_v8  ;;  %v3175_v51 = vpack.c.b16 %v3165_v40, %v3164_v13 }
 0x183   : > { %v1812_v43 = vpop.f32.mrf.mxu3  ;;  %v1391_v50 = vpop.f32.mrf.mxu1  ;;  %v3128_v15 = vrot.slane %v2691_v17, 5  ;;  %v2303_v61 = vsel %vm5026_vm13, %v3902_v29, %v2302_v38  ;;  %v2306_v9 = vsel %vm5026_vm13, %v2304_v37, %v2305_v0  ;;  %v2864_v55 = vshrl.u32 %v2692_v36, 16  ;;  %v4211_v37 = vld [vmem:[#allocation2 + $0x60] sm:$0xff] }
 0x184   : > { %v1840_v6 = vadd.f32 %v1812_v43, %v1646_v7  ;;  %v1392_v12 = vadd.f32 %v1391_v50, %v5301_v33  ;;  %v2847_v7 = vrot.slane %v2846_v44, 4  ;;  %v2857_v43 = vrot.slane %v2856_v42, 4 }
 0x185   : > { %v2192_v45 = vpop.f32.mrf.mxu0  ;;  %v2861_v50 = vrot.slane %v2859_v62, 5  ;;  %v2867_v59 = vshll.u32 %v2692_v36, 16  ;;  %v2873_v13 = vshll.u32 %v5480_v2, 16  ;;  %v2877_v40 = vshrl.u32 %v5480_v2, 16 }
 0x186   : > { %v5470_v63 = vadd.f32 %v2190_v24, %v1840_v6  ;;  %v3125_v24 = vrot.slane %v5448_v28, 5  ;;  %v2852_v16 = vsel %vm4843_vm10, %v2847_v7, %v5468_v46  ;;  %v2343_v38 = vunpack.c.l.b16 %v2303_v61 }
 0x187   : > { %v2862_v8 = vsel %vm4843_vm10, %v2857_v43, %v2861_v50  ;;  %v2916_v41 = vunpack.c.l.b16 %v2852_v16  ;;  %v2309_v7 = vrot.slane %v5254_v21, 5  ;;  %v2312_v21 = vrot.slane %v5272_v48, 5 }
 0x188   : > { %v3127_v4 = vrot.slane %v3125_v24, 4  ;;  %v2917_v44 = vunpack.c.l.b16 %v2862_v8 }
 0x189   : > { %v1620_v14 = vpop.f32.mrf.mxu2 }
 0x18a   : > { %v1647_v25 = vadd.f32 %v1620_v14, %v1392_v12  ;;  %v3129_v60 = vsel %vm5026_vm13, %v3127_v4, %v3128_v15  ;;  %v2344_v14 = vunpack.c.l.b16 %v2306_v9  ;;  %v2926_v0 = vpack.c.b16 %v2917_v44, %v2916_v41 }
 0x18b   : > { %v1814_v32 = vpop.f32.mrf.mxu3  ;;  %v1394_v57 = vpop.f32.mrf.mxu1  ;;  %v3167_v62 = vunpack.c.l.b16 %v3129_v60  ;;  %v2311_v9 = vrot.slane %v2309_v7, 4 }
 0x18c   : > { %v1841_v58 = vadd.f32 %v1814_v32, %v1647_v25  ;;  %v1395_v28 = vadd.f32 %v1394_v57, %v5314_v56  ;;  %v3126_v56 = vsel %vm5026_vm13, %v4086_v1, %v3125_v24  ;;  %v2866_v32 = vrot.slane %v2864_v55, 4  ;;  %v2233_v1 = vld [vmem:[#allocation2 + $0x60] sm:$0xe] }
 0x18d   : > { %v2195_v33 = vpop.f32.mrf.mxu0  ;;  %v3166_v42 = vunpack.c.l.b16 %v3126_v56  ;;  %v2879_v24 = vrot.slane %v2877_v40, 4  ;;  %v2353_v29 = vpack.c.b16 %v2344_v14, %v2343_v38  ;;  %v3903_v61 = vrot.slane %v2233_v1, 9 }
 0x18e   : > { %2444 = vmatmul.bf16.gmra.mxu1 %v2352_v35  ;;  %2639 = vmatmul.bf16.gmra.mxu2 %v4210_v34  ;;  %v5477_v6 = vadd.f32 %v2192_v45, %v1841_v58  ;;  %v2869_v35 = vrot.slane %v2867_v59, 5  ;;  %v2875_v34 = vrot.slane %v2873_v13, 5 }
 0x18f   : > { %v3176_v50 = vpack.c.b16 %v3167_v62, %v3166_v42 }
 0x190   : > { %3017 = vmatmul.bf16.gmra.mxu3 %v2925_v53  ;;  %3267 = vmatmul.bf16.gmra.mxu0 %v3175_v51  ;;  %v2694_v53 = vld [vmem:[#allocation2 + $0x74] sm:$0x1]  ;;  %v2880_v4 = vor.u32 %v2879_v24, %v2875_v34 }
 0x191   : > { %v1623_v52 = vpop.f32.mrf.mxu2  ;;  %v2883_v15 = vshll.u32 %v2694_v53, 16  ;;  %v3135_v55 = vrot.slane %v2694_v53, 5 }
 0x192   : > { %v1648_v45 = vadd.f32 %v1623_v52, %v1395_v28  ;;  %v3132_v52 = vrot.slane %v5480_v2, 5 }
 0x193   : > { %v1817_v26 = vpop.f32.mrf.mxu3  ;;  %v1396_v17 = vpop.f32.mrf.mxu1  ;;  %v2885_v8 = vrot.slane %v2883_v15, 5 }
 0x194   : > { %v1842_v12 = vadd.f32 %v1817_v26, %v1648_v45  ;;  %v1397_v57 = vadd.f32 %v1396_v17, %v5336_v3  ;;  %v3056_v3 = vld [vmem:[#allocation2 + $0x6c] sm:$0xe]  ;;  %v2881_v26 = vrot.slane %v2880_v4, 4  ;;  %v3134_v17 = vrot.slane %v3132_v52, 4 }
 0x195   : > { %v2197_v46 = vpop.f32.mrf.mxu0  ;;  %v4087_v60 = vrot.slane %v3056_v3, 9 }
 0x196   : > { %v5497_v25 = vadd.f32 %v2195_v33, %v1842_v12  ;;  %v2870_v33 = vor.u32 %v2869_v35, %v2866_v32  ;;  %v2310_v12 = vsel %vm5026_vm13, %v3903_v61, %v2309_v7  ;;  %v3136_v44 = vsel %vm5026_vm13, %v3134_v17, %v3135_v55 }
 0x197   : > { %v3133_v41 = vsel %vm5026_vm13, %v4087_v60, %v3132_v52  ;;  %v2345_v42 = vunpack.c.l.b16 %v2310_v12  ;;  %v3169_v53 = vunpack.c.l.b16 %v3136_v44 }
 0x198   : > { %v2871_v45 = vrot.slane %v2870_v33, 4 }
 0x199   : > { %v1625_v51 = vpop.f32.mrf.mxu2 }
 0x19a   : > { %v1649_v23 = vadd.f32 %v1625_v51, %v1397_v57  ;;  %v2876_v48 = vsel %vm4843_vm10, %v2871_v45, %v2875_v34  ;;  %v3168_v57 = vunpack.c.l.b16 %v3133_v41 }
 0x19b   : > { %v1819_v58 = vpop.f32.mrf.mxu3  ;;  %v1399_v43 = vpop.f32.mrf.mxu1  ;;  %v2918_v35 = vunpack.c.l.b16 %v2876_v48 }
 0x19c   : > { %v1843_v28 = vadd.f32 %v1819_v58, %v1649_v23  ;;  %v1400_v56 = vadd.f32 %v1399_v43, %v5287_v11  ;;  %v2886_v11 = vsel %vm4843_vm10, %v2881_v26, %v2885_v8  ;;  %v3177_v7 = vpack.c.b16 %v3169_v53, %v3168_v57 }
 0x19d   : > { %v2200_v36 = vpop.f32.mrf.mxu0  ;;  %v2919_v24 = vunpack.c.l.b16 %v2886_v11 }
 0x19e   : > { %2449 = vmatmul.bf16.gmra.mxu1 %v2353_v29  ;;  %2644 = vmatmul.bf16.gmra.mxu2 %v4211_v37  ;;  %v5502_v16 = vadd.f32 %v2197_v46, %v1843_v28  ;;  %v2313_v46 = vsel %vm5026_vm13, %v2311_v9, %v2312_v21  ;;  %v4212_v29 = vld [vmem:[#allocation2 + $0x6c] sm:$0xff] }
 0x19f   : > { %v2346_v62 = vunpack.c.l.b16 %v2313_v46 }
 0x1a0   : > { %3022 = vmatmul.bf16.gmra.mxu3 %v2926_v0  ;;  %3272 = vmatmul.bf16.gmra.mxu0 %v3176_v50  ;;  %v2927_v0 = vpack.c.b16 %v2919_v24, %v2918_v35 }
 0x1a1   : > { %v1628_v2 = vpop.f32.mrf.mxu2  ;;  %v2354_v58 = vpack.c.b16 %v2346_v62, %v2345_v42 }
 0x1a2   : > { %v1650_v59 = vadd.f32 %v1628_v2, %v1400_v56 }
 0x1a3   : > { %v1822_v13 = vpop.f32.mrf.mxu3  ;;  %v1401_v40 = vpop.f32.mrf.mxu1 }
 0x1a4   : > { %v1844_v38 = vadd.f32 %v1822_v13, %v1650_v59  ;;  %v1402_v34 = vadd.f32 %v1401_v40, %v5304_v49 }
 0x1a5   : > { %v2202_v14 = vpop.f32.mrf.mxu0 }
 0x1a6   : > { %v5518_v32 = vadd.f32 %v2200_v36, %v1844_v38 }
 0x1a9   : > { %v1630_v51 = vpop.f32.mrf.mxu2 }
 0x1aa   : > { %v1651_v23 = vadd.f32 %v1630_v51, %v1402_v34 }
 0x1ab   : > { %v1824_v54 = vpop.f32.mrf.mxu3  ;;  %v1404_v37 = vpop.f32.mrf.mxu1 }
 0x1ac   : > { %v1845_v20 = vadd.f32 %v1824_v54, %v1651_v23  ;;  %v1405_v1 = vadd.f32 %v1404_v37, %v5320_v18 }
 0x1ad   : > { %v2205_v43 = vpop.f32.mrf.mxu0 }
 0x1ae   : > { %2454 = vmatmul.bf16.gmra.mxu1 %v2354_v58  ;;  %2649 = vmatmul.bf16.gmra.mxu2 %v4212_v29  ;;  %v5521_v50 = vadd.f32 %v2202_v14, %v1845_v20 }
 0x1b0   : > { %3027 = vmatmul.bf16.gmra.mxu3 %v2927_v0  ;;  %3277 = vmatmul.bf16.gmra.mxu0 %v3177_v7 }
 0x1b1   : > { %v1633_v33 = vpop.f32.mrf.mxu2 }
 0x1b2   : > { %v1652_v49 = vadd.f32 %v1633_v33, %v1405_v1 }
 0x1b3   : > { %v1827_v4 = vpop.f32.mrf.mxu3  ;;  %v1406_v15 = vpop.f32.mrf.mxu1 }
 0x1b4   : > { %v1846_v28 = vadd.f32 %v1827_v4, %v1652_v49  ;;  %v1407_v3 = vadd.f32 %v1406_v15, %v5338_v5 }
 0x1b5   : > { %v2207_v36 = vpop.f32.mrf.mxu0 }
 0x1b6   : > { %v5524_v52 = vadd.f32 %v2205_v43, %v1846_v28 }
 0x1b9   : > { %v1635_v61 = vpop.f32.mrf.mxu2 }
 0x1ba   : > { %v1653_v9 = vadd.f32 %v1635_v61, %v1407_v3 }
 0x1bb   : > { %v1829_v21 = vpop.f32.mrf.mxu3  ;;  %v2420_v45 = vpop.f32.mrf.mxu1 }
 0x1bc   : > { %v1847_v26 = vadd.f32 %v1829_v21, %v1653_v9  ;;  %v2460_v18 = vadd.f32 %v2420_v45, %v5363_v30 }
 0x1bd   : > { %v3243_v8 = vpop.f32.mrf.mxu0 }
 0x1be   : > { %v5527_v56 = vadd.f32 %v2207_v36, %v1847_v26 }
 0x1c1   : > { %v2615_v60 = vpop.f32.mrf.mxu2 }
 0x1c2   : > { %v2655_v17 = vadd.f32 %v2615_v60, %v2460_v18 }
 0x1c3   : > { %v2993_v55 = vpop.f32.mrf.mxu3  ;;  %v2422_v2 = vpop.f32.mrf.mxu1 }
 0x1c4   : > { %v3033_v59 = vadd.f32 %v2993_v55, %v2655_v17  ;;  %v2461_v5 = vadd.f32 %v2422_v2, %v5370_v27 }
 0x1c5   : > { %v3245_v13 = vpop.f32.mrf.mxu0 }
 0x1c6   : > { %v3283_v40 = vadd.f32 %v3243_v8, %v3033_v59 }
 0x1c8   : > { %3299 = vst [vmem:[%s4588_s12] sm:$0xff] %v3283_v40  ;;  %v3336_v30 = vmul.f32 %v3283_v40, %v3283_v40 }
 0x1c9   : > { %v2617_v12 = vpop.f32.mrf.mxu2 }
 0x1ca   : > { %v2656_v46 = vadd.f32 %v2617_v12, %v2461_v5 }
 0x1cb   : > { %v2995_v48 = vpop.f32.mrf.mxu3  ;;  %v2425_v38 = vpop.f32.mrf.mxu1 }
 0x1cc   : > { %v3034_v14 = vadd.f32 %v2995_v48, %v2656_v46  ;;  %v2462_v62 = vadd.f32 %v2425_v38, %v5390_v10 }
 0x1cd   : > { %v3248_v11 = vpop.f32.mrf.mxu0 }
 0x1ce   : > { %v3284_v41 = vadd.f32 %v3245_v13, %v3034_v14 }
 0x1d0   : > { %3300 = vst [vmem:[%s4588_s12 + $0x8] sm:$0xff] %v3284_v41  ;;  %v3315_v44 = vadd.f32 %v3284_v41, %v3283_v40  ;;  %v3337_v42 = vmul.f32 %v3284_v41, %v3284_v41 }
 0x1d1   : > { %v2620_v35 = vpop.f32.mrf.mxu2 }
 0x1d2   : > { %v3352_v24 = vadd.f32 %v3337_v42, %v3336_v30  ;;  %v2657_v57 = vadd.f32 %v2620_v35, %v2462_v62 }
 0x1d3   : > { %v2998_v53 = vpop.f32.mrf.mxu3  ;;  %v2427_v34 = vpop.f32.mrf.mxu1 }
 0x1d4   : > { %v3035_v27 = vadd.f32 %v2998_v53, %v2657_v57  ;;  %v2463_v29 = vadd.f32 %v2427_v34, %v5397_v31 }
 0x1d5   : > { %v3250_v51 = vpop.f32.mrf.mxu0 }
 0x1d6   : > { %v3285_v23 = vadd.f32 %v3248_v11, %v3035_v27 }
 0x1d8   : > { %3301 = vst [vmem:[%s4588_s12 + $0x10] sm:$0xff] %v3285_v23  ;;  %v3316_v54 = vadd.f32 %v3315_v44, %v3285_v23  ;;  %v3338_v58 = vmul.f32 %v3285_v23, %v3285_v23 }
 0x1d9   : > { %v2622_v37 = vpop.f32.mrf.mxu2 }
 0x1da   : > { %v3353_v0 = vadd.f32 %v3352_v24, %v3338_v58  ;;  %v2658_v7 = vadd.f32 %v2622_v37, %v2463_v29 }
 0x1db   : > { %v3000_v20 = vpop.f32.mrf.mxu3  ;;  %v2430_v43 = vpop.f32.mrf.mxu1 }
 0x1dc   : > { %v3036_v10 = vadd.f32 %v3000_v20, %v2658_v7  ;;  %v2464_v15 = vadd.f32 %v2430_v43, %v5417_v47 }
 0x1dd   : > { %v3253_v1 = vpop.f32.mrf.mxu0 }
 0x1de   : > { %v3286_v33 = vadd.f32 %v3250_v51, %v3036_v10 }
 0x1e0   : > { %3302 = vst [vmem:[%s4588_s12 + $0x18] sm:$0xff] %v3286_v33  ;;  %v3317_v49 = vadd.f32 %v3316_v54, %v3286_v33  ;;  %v3339_v4 = vmul.f32 %v3286_v33, %v3286_v33 }
 0x1e1   : > { %v2625_v28 = vpop.f32.mrf.mxu2 }
 0x1e2   : > { %v3354_v36 = vadd.f32 %v3353_v0, %v3339_v4  ;;  %v2659_v3 = vadd.f32 %v2625_v28, %v2464_v15 }
 0x1e3   : > { %v3003_v61 = vpop.f32.mrf.mxu3  ;;  %v2432_v9 = vpop.f32.mrf.mxu1 }
 0x1e4   : > { %v3037_v31 = vadd.f32 %v3003_v61, %v2659_v3  ;;  %v2465_v18 = vadd.f32 %v2432_v9, %v5424_v39 }
 0x1e5   : > { %v3255_v21 = vpop.f32.mrf.mxu0 }
 0x1e6   : > { %v3287_v45 = vadd.f32 %v3253_v1, %v3037_v31 }
 0x1e8   : > { %3303 = vst [vmem:[%s4588_s12 + $0x20] sm:$0xff] %v3287_v45  ;;  %v3318_v26 = vadd.f32 %v3317_v49, %v3287_v45  ;;  %v3340_v8 = vmul.f32 %v3287_v45, %v3287_v45 }
 0x1e9   : > { %v2627_v60 = vpop.f32.mrf.mxu2 }
 0x1ea   : > { %v3355_v17 = vadd.f32 %v3354_v36, %v3340_v8  ;;  %v2660_v55 = vadd.f32 %v2627_v60, %v2465_v18 }
 0x1eb   : > { %v3005_v2 = vpop.f32.mrf.mxu3  ;;  %v2435_v59 = vpop.f32.mrf.mxu1 }
 0x1ec   : > { %v3038_v47 = vadd.f32 %v3005_v2, %v2660_v55  ;;  %v2466_v46 = vadd.f32 %v2435_v59, %v5444_v19 }
 0x1ed   : > { %v3258_v13 = vpop.f32.mrf.mxu0 }
 0x1ee   : > { %v3288_v40 = vadd.f32 %v3255_v21, %v3038_v47 }
 0x1f0   : > { %3304 = vst [vmem:[%s4588_s12 + $0x28] sm:$0xff] %v3288_v40  ;;  %v3319_v5 = vadd.f32 %v3318_v26, %v3288_v40  ;;  %v3341_v12 = vmul.f32 %v3288_v40, %v3288_v40 }
 0x1f1   : > { %v2630_v48 = vpop.f32.mrf.mxu2 }
 0x1f2   : > { %v3356_v38 = vadd.f32 %v3355_v17, %v3341_v12  ;;  %v2661_v14 = vadd.f32 %v2630_v48, %v2466_v46 }
 0x1f3   : > { %v3008_v11 = vpop.f32.mrf.mxu3  ;;  %v2437_v41 = vpop.f32.mrf.mxu1 }
 0x1f4   : > { %v3039_v39 = vadd.f32 %v3008_v11, %v2661_v14  ;;  %v2467_v35 = vadd.f32 %v2437_v41, %v5450_v22 }
 0x1f5   : > { %v3260_v30 = vpop.f32.mrf.mxu0 }
 0x1f6   : > { %v3289_v44 = vadd.f32 %v3258_v13, %v3039_v39 }
 0x1f8   : > { %3305 = vst [vmem:[%s4588_s12 + $0x30] sm:$0xff] %v3289_v44  ;;  %v3320_v42 = vadd.f32 %v3319_v5, %v3289_v44  ;;  %v3342_v62 = vmul.f32 %v3289_v44, %v3289_v44 }
 0x1f9   : > { %v2632_v24 = vpop.f32.mrf.mxu2 }
 0x1fa   : > { %v3357_v57 = vadd.f32 %v3356_v38, %v3342_v62  ;;  %v2662_v53 = vadd.f32 %v2632_v24, %v2467_v35 }
 0x1fb   : > { %v3010_v34 = vpop.f32.mrf.mxu3  ;;  %v2440_v27 = vpop.f32.mrf.mxu1 }
 0x1fc   : > { %v3040_v19 = vadd.f32 %v3010_v34, %v2662_v53  ;;  %v2468_v29 = vadd.f32 %v2440_v27, %v5470_v63 }
 0x1fd   : > { %v3263_v51 = vpop.f32.mrf.mxu0 }
 0x1fe   : > { %v3290_v23 = vadd.f32 %v3260_v30, %v3040_v19 }
 0x200   : > { %3306 = vst [vmem:[%s4588_s12 + $0x38] sm:$0xff] %v3290_v23  ;;  %v3321_v54 = vadd.f32 %v3320_v42, %v3290_v23  ;;  %v3343_v58 = vmul.f32 %v3290_v23, %v3290_v23 }
 0x201   : > { %v2635_v37 = vpop.f32.mrf.mxu2 }
 0x202   : > { %v3358_v0 = vadd.f32 %v3357_v57, %v3343_v58  ;;  %v2663_v7 = vadd.f32 %v2635_v37, %v2468_v29 }
 0x203   : > { %v3013_v20 = vpop.f32.mrf.mxu3  ;;  %v2442_v43 = vpop.f32.mrf.mxu1 }
 0x204   : > { %v3041_v22 = vadd.f32 %v3013_v20, %v2663_v7  ;;  %v2469_v4 = vadd.f32 %v2442_v43, %v5477_v6 }
 0x205   : > { %v3265_v10 = vpop.f32.mrf.mxu0 }
 0x206   : > { %v3291_v1 = vadd.f32 %v3263_v51, %v3041_v22 }
 0x208   : > { %3307 = vst [vmem:[%s4588_s12 + $0x40] sm:$0xff] %v3291_v1  ;;  %v3322_v33 = vadd.f32 %v3321_v54, %v3291_v1  ;;  %v3344_v49 = vmul.f32 %v3291_v1, %v3291_v1 }
 0x209   : > { %v2637_v15 = vpop.f32.mrf.mxu2 }
 0x20a   : > { %v3359_v28 = vadd.f32 %v3358_v0, %v3344_v49  ;;  %v2664_v36 = vadd.f32 %v2637_v15, %v2469_v4 }
 0x20b   : > { %v3015_v3 = vpop.f32.mrf.mxu3  ;;  %v2445_v61 = vpop.f32.mrf.mxu1 }
 0x20c   : > { %v3042_v63 = vadd.f32 %v3015_v3, %v2664_v36  ;;  %v2470_v26 = vadd.f32 %v2445_v61, %v5497_v25 }
 0x20d   : > { %v3268_v9 = vpop.f32.mrf.mxu0 }
 0x20e   : > { %v3292_v31 = vadd.f32 %v3265_v10, %v3042_v63 }
 0x210   : > { %3308 = vst [vmem:[%s4588_s12 + $0x48] sm:$0xff] %v3292_v31  ;;  %v3323_v21 = vadd.f32 %v3322_v33, %v3292_v31  ;;  %v3345_v45 = vmul.f32 %v3292_v31, %v3292_v31 }
 0x211   : > { %v2640_v8 = vpop.f32.mrf.mxu2 }
 0x212   : > { %v3360_v18 = vadd.f32 %v3359_v28, %v3345_v45  ;;  %v2665_v60 = vadd.f32 %v2640_v8, %v2470_v26 }
 0x213   : > { %v3018_v17 = vpop.f32.mrf.mxu3  ;;  %v2447_v55 = vpop.f32.mrf.mxu1 }
 0x214   : > { %v3043_v6 = vadd.f32 %v3018_v17, %v2665_v60  ;;  %v2471_v40 = vadd.f32 %v2447_v55, %v5502_v16 }
 0x215   : > { %v3270_v2 = vpop.f32.mrf.mxu0 }
 0x216   : > { %v3293_v59 = vadd.f32 %v3268_v9, %v3043_v6 }
 0x218   : > { %3309 = vst [vmem:[%s4588_s12 + $0x50] sm:$0xff] %v3293_v59  ;;  %v3324_v47 = vadd.f32 %v3323_v21, %v3293_v59  ;;  %v3346_v13 = vmul.f32 %v3293_v59, %v3293_v59 }
 0x219   : > { %v2642_v5 = vpop.f32.mrf.mxu2 }
 0x21a   : > { %v3361_v12 = vadd.f32 %v3360_v18, %v3346_v13  ;;  %v2666_v46 = vadd.f32 %v2642_v5, %v2471_v40 }
 0x21b   : > { %v3020_v48 = vpop.f32.mrf.mxu3  ;;  %v2450_v25 = vpop.f32.mrf.mxu1 }
 0x21c   : > { %v3044_v38 = vadd.f32 %v3020_v48, %v2666_v46  ;;  %v2472_v30 = vadd.f32 %v2450_v25, %v5518_v32 }
 0x21d   : > { %v3273_v11 = vpop.f32.mrf.mxu0 }
 0x21e   : > { %v3294_v14 = vadd.f32 %v3270_v2, %v3044_v38 }
 0x220   : > { %3310 = vst [vmem:[%s4588_s12 + $0x58] sm:$0xff] %v3294_v14  ;;  %v3325_v41 = vadd.f32 %v3324_v47, %v3294_v14  ;;  %v3347_v39 = vmul.f32 %v3294_v14, %v3294_v14 }
 0x221   : > { %v2645_v44 = vpop.f32.mrf.mxu2 }
 0x222   : > { %v3362_v42 = vadd.f32 %v3361_v12, %v3347_v39  ;;  %v2667_v62 = vadd.f32 %v2645_v44, %v2472_v30 }
 0x223   : > { %v3023_v35 = vpop.f32.mrf.mxu3  ;;  %v2452_v16 = vpop.f32.mrf.mxu1 }
 0x224   : > { %v3045_v24 = vadd.f32 %v3023_v35, %v2667_v62  ;;  %v2473_v27 = vadd.f32 %v2452_v16, %v5521_v50 }
 0x225   : > { %v3275_v19 = vpop.f32.mrf.mxu0 }
 0x226   : > { %v3295_v57 = vadd.f32 %v3273_v11, %v3045_v24 }
 0x228   : > { %3311 = vst [vmem:[%s4588_s12 + $0x60] sm:$0xff] %v3295_v57  ;;  %v3326_v53 = vadd.f32 %v3325_v41, %v3295_v57  ;;  %v3348_v34 = vmul.f32 %v3295_v57, %v3295_v57 }
 0x229   : > { %v2647_v51 = vpop.f32.mrf.mxu2 }
 0x22a   : > { %v3363_v23 = vadd.f32 %v3362_v42, %v3348_v34  ;;  %v2668_v54 = vadd.f32 %v2647_v51, %v2473_v27 }
 0x22b   : > { %v3025_v58 = vpop.f32.mrf.mxu3  ;;  %v2455_v32 = vpop.f32.mrf.mxu1 }
 0x22c   : > { %v3046_v29 = vadd.f32 %v3025_v58, %v2668_v54  ;;  %v2474_v20 = vadd.f32 %v2455_v32, %v5524_v52 }
 0x22d   : > { %v3278_v50 = vpop.f32.mrf.mxu0 }
 0x22e   : > { %v3296_v37 = vadd.f32 %v3275_v19, %v3046_v29 }
 0x230   : > { %3312 = vst [vmem:[%s4588_s12 + $0x68] sm:$0xff] %v3296_v37  ;;  %v3327_v0 = vadd.f32 %v3326_v53, %v3296_v37  ;;  %v3349_v7 = vmul.f32 %v3296_v37, %v3296_v37 }
 0x231   : > { %v2650_v43 = vpop.f32.mrf.mxu2 }
 0x232   : > { %v3364_v22 = vadd.f32 %v3363_v23, %v3349_v7  ;;  %v2669_v10 = vadd.f32 %v2650_v43, %v2474_v20 }
 0x233   : > { %v3028_v1 = vpop.f32.mrf.mxu3  ;;  %v2457_v49 = vpop.f32.mrf.mxu1 }
 0x234   : > { %v3047_v33 = vadd.f32 %v3028_v1, %v2669_v10  ;;  %v2475_v36 = vadd.f32 %v2457_v49, %v5527_v56 }
 0x235   : > { %v3280_v31 = vpop.f32.mrf.mxu0 }
 0x236   : > { %v3297_v4 = vadd.f32 %v3278_v50, %v3047_v33 }
 0x238   : > { %3313 = vst [vmem:[%s4588_s12 + $0x70] sm:$0xff] %v3297_v4  ;;  %v3328_v15 = vadd.f32 %v3327_v0, %v3297_v4  ;;  %v3350_v28 = vmul.f32 %v3297_v4, %v3297_v4 }
 0x239   : > { %v2652_v3 = vpop.f32.mrf.mxu2 }
 0x23a   : > { %v3365_v61 = vadd.f32 %v3364_v22, %v3350_v28  ;;  %v2670_v63 = vadd.f32 %v2652_v3, %v2475_v36 }
 0x23b   : > { %v3030_v52 = vpop.f32.mrf.mxu3 }
 0x23c   : > { %v3048_v9 = vadd.f32 %v3030_v52, %v2670_v63 }
 0x23e   : > { %v3298_v21 = vadd.f32 %v3280_v31, %v3048_v9 }
 0x240   : > { %3314 = vst [vmem:[%s4588_s12 + $0x78] sm:$0xff] %v3298_v21  ;;  %v3329_v45 = vadd.f32 %v3328_v15, %v3298_v21  ;;  %v3351_v26 = vmul.f32 %v3298_v21, %v3298_v21  ;;  %s3403_s12 = scalar_lea.hbm %s5618_s7, %s4138_s16 }
 0x241   : > { %s3407_s27 = sshll.u32 %s3403_s12, 4  ;;  %s3408_s27 = int_to_ptr.hbm [resolvable:$true] %s3407_s27 }
 0x242   : > { %v3330_v8 = vrot.slane %v3329_v45, 4  ;;  %v3366_v18 = vadd.f32 %v3365_v61, %v3351_v26  ;;  %s4351_s17 = sshra.s32 %s3408_s27, 4  ;;  %s4352_s17 = int_to_ptr.hbm [resolvable:$true] %s4351_s17 }
 0x243   : > { %s4353_s29 = scalar_lea.hbm %s4352_s17, 2  ;;  %p4358_p11 = scmp.lt.s32.totalorder %s4352_s17, %s5618_s7 }
 0x244   : > { %v3331_v60 = vadd.f32 %v3330_v8, %v3329_v45  ;;  %v3367_v17 = vrot.slane %v3366_v18, 4  ;;  %p4354_p7 = scmp.ne.s32.totalorder %s4352_s17, %s4353_s29  ;;  %p4359_p12 = scmp.lt.s32.totalorder %s4357_s11, %s4353_s29 }
 0x246   : > { %v3332_v55 = vrot.slane %v3331_v60, 2  ;;  %v3368_v56 = vadd.f32 %v3367_v17, %v3366_v18  ;;  %p4355_p9 = pnand %p4354_p7, %p4525_p3  ;;  %p4360_p13 = por %p4359_p12, %p4358_p11 }
 0x248   : > { %v3333_v6 = vadd.f32 %v3332_v55, %v3331_v60  ;;  %v3369_v2 = vrot.slane %v3368_v56, 2  ;;  %p4356_p10 = pneg %p4355_p9 }
 0x24a   : > { %v3334_v59 = vrot.slane %v3333_v6, 1  ;;  %v3370_v47 = vadd.f32 %v3369_v2, %v3368_v56  ;;  %p4361_p0 = pnand %p4360_p13, %p4356_p10 }
 0x24c   : > { %v3371_v13 = vrot.slane %v3370_v47, 1  ;;  %v3335_v40 = vadd.f32 %v3334_v59, %v3333_v6 }
 0x24e   : > { %v3372_v5 = vadd.f32 %v3371_v13, %v3370_v47 }
 0x250   : > { %v3374_v12 = vsel %vm746_vm4, %v3335_v40, %v3372_v5 }
 0x251   : > { %3375 = vst [vmem:[%s399_s13] sm:$0x3] %v3374_v12 }
 0x252   : > { %4364 = shalt.err (!%p4361_p0)
}
 0x253   : > { %4261 = dma.vmem_to_hbm [thread:$0]  (%p4525_p3), %s3406_s28, 32, %s3408_s27, %s3387_s20  }
 0x254 PF: > { %p4267_p1 = scmp.ge.s32.totalorder %s4431_s8, 2  ;;  %s3432_s22 = sand.u32 1, %s4403_s24  }
 0x255   : > { %s3433_s13 = scalar_lea.sflag [#allocation4], %s3432_s22 }
 0x256   : > { %p4264_p2 = pnand %p4267_p1, %p4534_p8 }
 0x258   : > { %p4265_p4 = pneg %p4264_p2 }
 0x25a   : > { %4398 = dma.done.wait (%p4265_p4), %s3433_s13, 32  }
 0x25b   : > { %4400 = vsyncadd (%p4265_p4), %s3433_s13, 4294967264  ;;  %s21_s8 = sadd.s32 1, %s4431_s8   ;;  %s5645_s16 = sld [smem:[#allocation10_spill]] }
 0x25c   : > { %p18_p5 = scmp.ge.s32.totalorder %s21_s8, 6   ;;  %s5646_s27 = sld [smem:[#allocation6_spill]] }
 0x25d   : > { %s5647_s28 = sld [smem:[#allocation7_spill]]  ;;  %s5650_s24 = smov %s4407_s25 }
 0x25e   : > { %s5648_s29 = sld [smem:[#allocation8_spill]]  ;;  %s5651_s25 = smov %s4411_s26 }
 0x25f   : > { %s5649_s30 = sld [smem:[#allocation9_spill]]  ;;  %20 = sbr.rel (!%p18_p5) target bundleno = 5 (0x5), region = 116 }
 0x261   : > { %s5652_s26 = smov %s5645_s16 }
 0x264   :  { %3439 = vsyncpa [#allocation4], 1 }
 0x265   :  { %3441 = vsyncpa [#allocation4 + $0x1], 1 }

</bundles_post_ra>
